<compile_context>
chip_gen: v7x
topology: tpu7x:2x2x1
jax: 0.10.0
libtpu: 0.0.40
codegen_flags: <defaults>
</compile_context>

<pallas_src>
from functools import partial

import jax
import jax.numpy as jnp
from jax.experimental import pallas as pl
from jax.experimental.pallas import tpu as pltpu

BN_EPS = 1e-5


def _vmem_limit_bytes():
    """Generation-aware scoped-VMEM request (~75% of physical, capped at 100MiB)."""
    cap = 64 * 1024 * 1024
    try:
        info = pltpu.get_tpu_info()
        c = getattr(info, "vmem_capacity_bytes", None)
        if c:
            cap = int(c)
    except Exception:
        pass
    return int(min(cap * 3 // 4, 100 * 1024 * 1024))


# --------------------------------------------------------------------------
# Kernel A: conv1 (3x3) + conv3 (1x1) on one image + per-image BN stat partials
# --------------------------------------------------------------------------
def conv13_kernel(H, W, x_ref, w1_ref, w3_ref,
                  a1_ref, a3_ref, st1_ref, st3_ref,
                  xpad_ref, patch_ref):
    HW = H * W
    Cin = x_ref.shape[-1]
    inv_hw = 1.0 / float(HW)

    # Zero only the 1-pixel border of the padded scratch (interior is fully
    # overwritten below).  Done every step so "parallel" megacore sharding is safe.
    xpad_ref[0:1, :, :] = jnp.zeros((1, W + 2, Cin), jnp.bfloat16)
    xpad_ref[H + 1:H + 2, :, :] = jnp.zeros((1, W + 2, Cin), jnp.bfloat16)
    xpad_ref[:, 0:1, :] = jnp.zeros((H + 2, 1, Cin), jnp.bfloat16)
    xpad_ref[:, W + 1:W + 2, :] = jnp.zeros((H + 2, 1, Cin), jnp.bfloat16)
    xpad_ref[1:H + 1, 1:W + 1, :] = x_ref[...]            # bf16 interior write

    # conv3 (1x1): one MXU matmul, f32 accumulation.
    xc = x_ref[...].reshape(HW, Cin)
    a3 = jnp.dot(xc, w3_ref[...], preferred_element_type=jnp.float32)

    # conv1 (3x3): build a (HW, 9*Cin) bf16 im2col patch, then ONE stacked-K matmul.
    for dh in range(3):
        for dw in range(3):
            t = dh * 3 + dw
            patch_ref[:, t * Cin:(t + 1) * Cin] = (
                xpad_ref[dh:dh + H, dw:dw + W, :].reshape(HW, Cin))
    a1 = jnp.dot(patch_ref[...], w1_ref[...], preferred_element_type=jnp.float32)

    a1_ref[...] = a1.astype(a1_ref.dtype)
    a3_ref[...] = a3.astype(a3_ref.dtype)

    # Per-image BN partials from the f32 accumulators: (sum, centered sumsq).
    s1 = jnp.sum(a1, axis=0, keepdims=True)
    d1 = a1 - s1 * inv_hw
    st1_ref[0:1, :] = s1
    st1_ref[1:2, :] = jnp.sum(d1 * d1, axis=0, keepdims=True)

    s3 = jnp.sum(a3, axis=0, keepdims=True)
    d3 = a3 - s3 * inv_hw
    st3_ref[0:1, :] = s3
    st3_ref[1:2, :] = jnp.sum(d3 * d3, axis=0, keepdims=True)


# --------------------------------------------------------------------------
# Kernel B: bn1 + relu -> conv2 (3x3) fused on-chip, + per-image bn2 partials
# --------------------------------------------------------------------------
def conv2_kernel(H, W, a1_ref, sc1_ref, sh1_ref, w2_ref,
                 a2_ref, st2_ref, x1pad_ref, patch_ref):
    HW = H * W
    Cout = a1_ref.shape[-1]
    inv_hw = 1.0 / float(HW)

    # Zero only the 1-pixel border of the padded scratch (see note in kernel A).
    x1pad_ref[0:1, :, :] = jnp.zeros((1, W + 2, Cout), jnp.bfloat16)
    x1pad_ref[H + 1:H + 2, :, :] = jnp.zeros((1, W + 2, Cout), jnp.bfloat16)
    x1pad_ref[:, 0:1, :] = jnp.zeros((H + 2, 1, Cout), jnp.bfloat16)
    x1pad_ref[:, W + 1:W + 2, :] = jnp.zeros((H + 2, 1, Cout), jnp.bfloat16)

    # bn1 + relu kept on-chip (no HBM trip), stored bf16 into the padded scratch.
    x1 = jnp.maximum(a1_ref[...].astype(jnp.float32) * sc1_ref[...] + sh1_ref[...], 0.0)
    x1pad_ref[1:H + 1, 1:W + 1, :] = x1.astype(jnp.bfloat16).reshape(H, W, Cout)

    # conv2 (3x3): (HW, 9*Cout) patch, one stacked-K bf16 matmul, f32 accumulation.
    for dh in range(3):
        for dw in range(3):
            t = dh * 3 + dw
            patch_ref[:, t * Cout:(t + 1) * Cout] = (
                x1pad_ref[dh:dh + H, dw:dw + W, :].reshape(HW, Cout))
    a2 = jnp.dot(patch_ref[...], w2_ref[...], preferred_element_type=jnp.float32)
    a2_ref[...] = a2.astype(a2_ref.dtype)

    s2 = jnp.sum(a2, axis=0, keepdims=True)
    d2 = a2 - s2 * inv_hw
    st2_ref[0:1, :] = s2
    st2_ref[1:2, :] = jnp.sum(d2 * d2, axis=0, keepdims=True)


# --------------------------------------------------------------------------
# Kernel C: bn2 + SE-gated residual add + relu, writes NCHW directly
# --------------------------------------------------------------------------
def bn2_add_relu_kernel(a2_ref, a3_ref, sc2_ref, s3g_ref, shb_ref, out_ref):
    # a2/a3: (TR, Cout) bf16; sc2: (1, Cout); s3g/shb: per-image (1, Cout).
    v = (a2_ref[...].astype(jnp.float32) * sc2_ref[...]
         + a3_ref[...].astype(jnp.float32) * s3g_ref[...]
         + shb_ref[...])
    # Transpose to (Cout, TR): lane-dense NCHW store, no XLA transpose afterwards.
    out_ref[...] = jnp.maximum(v, 0.0).T.astype(out_ref.dtype)


# --------------------------------------------------------------------------
# JAX glue
# --------------------------------------------------------------------------
def _bn_affine(st, gamma, beta, hw):
    """st: (N, 2, C) per-image (sum, centered sumsq).  Training-mode BN affine."""
    n = st.shape[0]
    mean_i = st[:, 0, :] / hw                        # (N, C) per-image means
    m2_i = st[:, 1, :]                               # (N, C) per-image centered SS
    mean = jnp.mean(mean_i, axis=0)                  # (C,)
    var = (jnp.sum(m2_i, axis=0)
           + hw * jnp.sum((mean_i - mean) ** 2, axis=0)) / (n * hw)
    var = jnp.maximum(var, 0.0)
    scale = gamma.reshape(-1) * jax.lax.rsqrt(var + BN_EPS)
    shift = beta.reshape(-1) - mean * scale
    return scale.reshape(1, -1), shift.reshape(1, -1)


def _choose_tr(hw):
    for t in (4096, 2048, 1024, 512, 256, 128):
        if hw % t == 0:
            return t
    return hw


def residual_block_forward(x_nchw, params):
    N, Cin, H, W = x_nchw.shape
    Cout = params["w1"].shape[-1]
    HW = H * W

    # Pre-reshape weights for the stacked-K matmuls; bf16 operands, f32 accum.
    w1r = params["w1"].reshape(9 * Cin, Cout).astype(jnp.bfloat16)
    w2r = params["w2"].reshape(9 * Cout, Cout).astype(jnp.bfloat16)
    w3 = params["w3"].astype(jnp.bfloat16)

    x_nhwc = jnp.transpose(x_nchw, (0, 2, 3, 1)).astype(jnp.bfloat16)

    vmem = _vmem_limit_bytes()
    cp_img = pltpu.CompilerParams(dimension_semantics=("parallel",),
                                  vmem_limit_bytes=vmem)

    # ---- phase 1: conv1 + conv3 + per-image BN stat partials ----------------
    a1, a3, st1, st3 = pl.pallas_call(
        partial(conv13_kernel, H, W),
        out_shape=(
            jax.ShapeDtypeStruct((N, HW, Cout), jnp.bfloat16),
            jax.ShapeDtypeStruct((N, HW, Cout), jnp.bfloat16),
            jax.ShapeDtypeStruct((N, 2, Cout), jnp.float32),
            jax.ShapeDtypeStruct((N, 2, Cout), jnp.float32),
        ),
        grid=(N,),
        in_specs=[
            pl.BlockSpec((None, H, W, Cin), lambda n: (n, 0, 0, 0)),
            pl.BlockSpec((9 * Cin, Cout), lambda n: (0, 0)),     # resident
            pl.BlockSpec((Cin, Cout), lambda n: (0, 0)),         # resident
        ],
        out_specs=(
            pl.BlockSpec((None, HW, Cout), lambda n: (n, 0, 0)),
            pl.BlockSpec((None, HW, Cout), lambda n: (n, 0, 0)),
            pl.BlockSpec((None, 2, Cout), lambda n: (n, 0, 0)),
            pl.BlockSpec((None, 2, Cout), lambda n: (n, 0, 0)),
        ),
        scratch_shapes=[
            pltpu.VMEM((H + 2, W + 2, Cin), jnp.bfloat16),       # padded input
            pltpu.VMEM((HW, 9 * Cin), jnp.bfloat16),             # im2col patch
        ],
        compiler_params=cp_img,
    )(x_nhwc, w1r, w3)

    # Tiny O(N*Cout) BN folding + SE gate in plain JAX (no HBM slab round-trips).
    sc1, sh1 = _bn_affine(st1, params["g1"], params["be1"], float(HW))
    sc3, sh3 = _bn_affine(st3, params["g3"], params["be3"], float(HW))

    pool3 = st3[:, 0, :] / float(HW)                 # per-image mean of conv3(x)
    p = pool3 * sc3 + sh3                            # bn3 commutes with spatial mean
    h = jnp.maximum(jnp.dot(p, params["sew1"]), 0.0)
    gate = jax.nn.sigmoid(jnp.dot(h, params["sew2"]))          # (N, Cout), exact
    s3g = (sc3 * gate)[:, None, :]                   # (N, 1, Cout): bn3-scale * gate
    b3g = (sh3 * gate)[:, None, :]                   # (N, 1, Cout): bn3-shift * gate

    # ---- phase 2: bn1 + relu -> conv2, + per-image bn2 partials --------------
    a2, st2 = pl.pallas_call(
        partial(conv2_kernel, H, W),
        out_shape=(
            jax.ShapeDtypeStruct((N, HW, Cout), jnp.bfloat16),
            jax.ShapeDtypeStruct((N, 2, Cout), jnp.float32),
        ),
        grid=(N,),
        in_specs=[
            pl.BlockSpec((None, HW, Cout), lambda n: (n, 0, 0)),
            pl.BlockSpec((1, Cout), lambda n: (0, 0)),
            pl.BlockSpec((1, Cout), lambda n: (0, 0)),
            pl.BlockSpec((9 * Cout, Cout), lambda n: (0, 0)),    # resident
        ],
        out_specs=(
            pl.BlockSpec((None, HW, Cout), lambda n: (n, 0, 0)),
            pl.BlockSpec((None, 2, Cout), lambda n: (n, 0, 0)),
        ),
        scratch_shapes=[
            pltpu.VMEM((H + 2, W + 2, Cout), jnp.bfloat16),      # padded bn1+relu
            pltpu.VMEM((HW, 9 * Cout), jnp.bfloat16),            # im2col patch
        ],
        compiler_params=cp_img,
    )(a1, sc1, sh1, w2r)

    sc2, sh2 = _bn_affine(st2, params["g2"], params["be2"], float(HW))
    shb = sh2[None, :, :] + b3g                       # (N, 1, Cout) fused shift

    # ---- phase 3: bn2 + SE-gated residual add + relu, NCHW output ------------
    TR = _choose_tr(HW)
    out = pl.pallas_call(
        bn2_add_relu_kernel,
        out_shape=jax.ShapeDtypeStruct((N, Cout, HW), jnp.float32),
        grid=(N, HW // TR),
        in_specs=[
            pl.BlockSpec((None, TR, Cout), lambda n, r: (n, r, 0)),   # a2
            pl.BlockSpec((None, TR, Cout), lambda n, r: (n, r, 0)),   # a3
            pl.BlockSpec((1, Cout), lambda n, r: (0, 0)),             # bn2 scale
            pl.BlockSpec((None, 1, Cout), lambda n, r: (n, 0, 0)),    # bn3*gate scale
            pl.BlockSpec((None, 1, Cout), lambda n, r: (n, 0, 0)),    # fused shift
        ],
        out_specs=pl.BlockSpec((None, Cout, TR), lambda n, r: (n, 0, r)),
        compiler_params=pltpu.CompilerParams(
            dimension_semantics=("parallel", "parallel"),
            vmem_limit_bytes=vmem),
    )(a2, a3, sc2, s3g, shb)

    return out.reshape(N, Cout, H, W)                # free metadata reshape (NCHW)


if __name__ == "__main__":
    key = jax.random.PRNGKey(0)
    N, Cin, Cout, H, W = 2, 4, 32, 16, 16
    hidden = max(1, Cout // 16)                      # SELayer reduction=16
    ks = jax.random.split(key, 12)

    # Conv biases omitted: bias followed by train-mode BatchNorm cancels exactly.
    params = dict(
        w1=0.1 * jax.random.normal(ks[0], (3, 3, Cin, Cout), jnp.float32),
        g1=1.0 + 0.1 * jax.random.normal(ks[1], (1, Cout), jnp.float32),
        be1=0.1 * jax.random.normal(ks[2], (1, Cout), jnp.float32),
        w2=0.1 * jax.random.normal(ks[3], (3, 3, Cout, Cout), jnp.float32),
        g2=1.0 + 0.1 * jax.random.normal(ks[4], (1, Cout), jnp.float32),
        be2=0.1 * jax.random.normal(ks[5], (1, Cout), jnp.float32),
        w3=0.1 * jax.random.normal(ks[6], (Cin, Cout), jnp.float32),
        g3=1.0 + 0.1 * jax.random.normal(ks[7], (1, Cout), jnp.float32),
        be3=0.1 * jax.random.normal(ks[8], (1, Cout), jnp.float32),
        sew1=0.1 * jax.random.normal(ks[9], (Cout, hidden), jnp.float32),
        sew2=0.1 * jax.random.normal(ks[10], (hidden, Cout), jnp.float32),
    )

    x = jax.random.normal(ks[11], (N, Cin, H, W), jnp.float32)

    out = jax.jit(residual_block_forward)(x, params)
    jax.block_until_ready(out)
    assert out.shape == (N, Cout, H, W)
    assert bool(jnp.all(jnp.isfinite(out)))
    print("KERNEL_OK")
</pallas_src>

<mosaic_0001>
module attributes {stable_mosaic.version = 11 : i64} {
  func.func @conv13_kernel(%arg0: i32, %arg1: memref<1x16x16x4xbf16, #tpu.memory_space<vmem>>, %arg2: memref<36x32xbf16, #tpu.memory_space<vmem>>, %arg3: memref<4x32xbf16, #tpu.memory_space<vmem>>, %arg4: memref<1x256x32xbf16, #tpu.memory_space<vmem>>, %arg5: memref<1x256x32xbf16, #tpu.memory_space<vmem>>, %arg6: memref<1x2x32xf32, #tpu.memory_space<vmem>>, %arg7: memref<1x2x32xf32, #tpu.memory_space<vmem>>, %arg8: memref<18x18x4xbf16, #tpu.memory_space<vmem>>, %arg9: memref<256x36xbf16, #tpu.memory_space<vmem>>) attributes {dimension_semantics = [#tpu.dimension_semantics<parallel>], iteration_bounds = array<i64: 2>, scalar_prefetch = 0 : i64, scratch_operands = 2 : i64, tpu.core_type = #tpu.core_type<tc>, window_params = [{transform_indices = @transform_0, window_bounds = array<i64: 1, 16, 16, 4>}, {pipeline_mode = #tpu.pipeline_mode<synchronous>, transform_indices = @transform_1, window_bounds = array<i64: 36, 32>}, {pipeline_mode = #tpu.pipeline_mode<synchronous>, transform_indices = @transform_2, window_bounds = array<i64: 4, 32>}, {transform_indices = @transform_3, window_bounds = array<i64: 1, 256, 32>}, {transform_indices = @transform_4, window_bounds = array<i64: 1, 256, 32>}, {transform_indices = @transform_5, window_bounds = array<i64: 1, 2, 32>}, {transform_indices = @transform_6, window_bounds = array<i64: 1, 2, 32>}]} {
    %cst = arith.constant 0.000000e+00 : bf16
    %0 = vector.broadcast %cst : bf16 to vector<1x18x4xbf16>
    %c0 = arith.constant 0 : index
    %c0_0 = arith.constant 0 : index
    %c0_1 = arith.constant 0 : index
    %1 = vector.load %arg8[%c0, %c0_0, %c0_1] : memref<18x18x4xbf16, #tpu.memory_space<vmem>>, vector<1x18x4xbf16>
    tpu.vector_store %arg8[%c0, %c0_0, %c0_1], %0 {strides = array<i32>} : memref<18x18x4xbf16, #tpu.memory_space<vmem>>, vector<1x18x4xbf16>,
    %cst_2 = arith.constant 0.000000e+00 : bf16
    %2 = vector.broadcast %cst_2 : bf16 to vector<1x18x4xbf16>
    %c17 = arith.constant 17 : index
    %c0_3 = arith.constant 0 : index
    %c0_4 = arith.constant 0 : index
    %3 = vector.load %arg8[%c17, %c0_3, %c0_4] : memref<18x18x4xbf16, #tpu.memory_space<vmem>>, vector<1x18x4xbf16>
    tpu.vector_store %arg8[%c17, %c0_3, %c0_4], %2 {strides = array<i32>} : memref<18x18x4xbf16, #tpu.memory_space<vmem>>, vector<1x18x4xbf16>,
    %cst_5 = arith.constant 0.000000e+00 : bf16
    %4 = vector.broadcast %cst_5 : bf16 to vector<18x1x4xbf16>
    %c0_6 = arith.constant 0 : index
    %c0_7 = arith.constant 0 : index
    %c0_8 = arith.constant 0 : index
    %5 = vector.load %arg8[%c0_6, %c0_7, %c0_8] : memref<18x18x4xbf16, #tpu.memory_space<vmem>>, vector<18x1x4xbf16>
    tpu.vector_store %arg8[%c0_6, %c0_7, %c0_8], %4 {strides = array<i32>} : memref<18x18x4xbf16, #tpu.memory_space<vmem>>, vector<18x1x4xbf16>,
    %cst_9 = arith.constant 0.000000e+00 : bf16
    %6 = vector.broadcast %cst_9 : bf16 to vector<18x1x4xbf16>
    %c0_10 = arith.constant 0 : index
    %c17_11 = arith.constant 17 : index
    %c0_12 = arith.constant 0 : index
    %7 = vector.load %arg8[%c0_10, %c17_11, %c0_12] : memref<18x18x4xbf16, #tpu.memory_space<vmem>>, vector<18x1x4xbf16>
    tpu.vector_store %arg8[%c0_10, %c17_11, %c0_12], %6 {strides = array<i32>} : memref<18x18x4xbf16, #tpu.memory_space<vmem>>, vector<18x1x4xbf16>,
    %c0_13 = arith.constant 0 : index
    %c0_14 = arith.constant 0 : index
    %c0_15 = arith.constant 0 : index
    %c0_16 = arith.constant 0 : index
    %8 = vector.load %arg1[%c0_13, %c0_14, %c0_15, %c0_16] : memref<1x16x16x4xbf16, #tpu.memory_space<vmem>>, vector<1x16x16x4xbf16>
    %9 = vector.shape_cast %8 : vector<1x16x16x4xbf16> to vector<16x16x4xbf16>
    %c1 = arith.constant 1 : index
    %c1_17 = arith.constant 1 : index
    %c0_18 = arith.constant 0 : index
    %10 = vector.load %arg8[%c1, %c1_17, %c0_18] : memref<18x18x4xbf16, #tpu.memory_space<vmem>>, vector<16x16x4xbf16>
    tpu.vector_store %arg8[%c1, %c1_17, %c0_18], %9 {strides = array<i32>} : memref<18x18x4xbf16, #tpu.memory_space<vmem>>, vector<16x16x4xbf16>,
    %c0_19 = arith.constant 0 : index
    %c0_20 = arith.constant 0 : index
    %c0_21 = arith.constant 0 : index
    %c0_22 = arith.constant 0 : index
    %11 = vector.load %arg1[%c0_19, %c0_20, %c0_21, %c0_22] : memref<1x16x16x4xbf16, #tpu.memory_space<vmem>>, vector<1x16x16x4xbf16>
    %12 = vector.shape_cast %11 : vector<1x16x16x4xbf16> to vector<16x16x4xbf16>
    %13 = vector.shape_cast %12 : vector<16x16x4xbf16> to vector<256x4xbf16>
    %c0_23 = arith.constant 0 : index
    %c0_24 = arith.constant 0 : index
    %14 = vector.load %arg3[%c0_23, %c0_24] : memref<4x32xbf16, #tpu.memory_space<vmem>>, vector<4x32xbf16>
    %cst_25 = arith.constant dense<0.000000e+00> : vector<256x32xf32>
    %15 = tpu.matmul %13, %14, %cst_25 {dimension_numbers = #tpu.dot_dimension_numbers<[1], [0], [0], [1], [0, 0, 1, 1], [], []>} : vector<256x4xbf16>, vector<4x32xbf16>, vector<256x32xf32> -> vector<256x32xf32>
    %c0_26 = arith.constant 0 : index
    %c0_27 = arith.constant 0 : index
    %c0_28 = arith.constant 0 : index
    %16 = vector.load %arg8[%c0_26, %c0_27, %c0_28] : memref<18x18x4xbf16, #tpu.memory_space<vmem>>, vector<16x16x4xbf16>
    %17 = vector.shape_cast %16 : vector<16x16x4xbf16> to vector<256x4xbf16>
    %c0_29 = arith.constant 0 : index
    %c0_30 = arith.constant 0 : index
    %18 = vector.load %arg9[%c0_29, %c0_30] : memref<256x36xbf16, #tpu.memory_space<vmem>>, vector<256x4xbf16>
    tpu.vector_store %arg9[%c0_29, %c0_30], %17 {strides = array<i32>} : memref<256x36xbf16, #tpu.memory_space<vmem>>, vector<256x4xbf16>,
    %c0_31 = arith.constant 0 : index
    %c1_32 = arith.constant 1 : index
    %c0_33 = arith.constant 0 : index
    %19 = vector.load %arg8[%c0_31, %c1_32, %c0_33] : memref<18x18x4xbf16, #tpu.memory_space<vmem>>, vector<16x16x4xbf16>
    %20 = vector.shape_cast %19 : vector<16x16x4xbf16> to vector<256x4xbf16>
    %c0_34 = arith.constant 0 : index
    %c4 = arith.constant 4 : index
    %21 = vector.load %arg9[%c0_34, %c4] : memref<256x36xbf16, #tpu.memory_space<vmem>>, vector<256x4xbf16>
    tpu.vector_store %arg9[%c0_34, %c4], %20 {strides = array<i32>} : memref<256x36xbf16, #tpu.memory_space<vmem>>, vector<256x4xbf16>,
    %c0_35 = arith.constant 0 : index
    %c2 = arith.constant 2 : index
    %c0_36 = arith.constant 0 : index
    %22 = vector.load %arg8[%c0_35, %c2, %c0_36] : memref<18x18x4xbf16, #tpu.memory_space<vmem>>, vector<16x16x4xbf16>
    %23 = vector.shape_cast %22 : vector<16x16x4xbf16> to vector<256x4xbf16>
    %c0_37 = arith.constant 0 : index
    %c8 = arith.constant 8 : index
    %24 = vector.load %arg9[%c0_37, %c8] : memref<256x36xbf16, #tpu.memory_space<vmem>>, vector<256x4xbf16>
    tpu.vector_store %arg9[%c0_37, %c8], %23 {strides = array<i32>} : memref<256x36xbf16, #tpu.memory_space<vmem>>, vector<256x4xbf16>,
    %c1_38 = arith.constant 1 : index
    %c0_39 = arith.constant 0 : index
    %c0_40 = arith.constant 0 : index
    %25 = vector.load %arg8[%c1_38, %c0_39, %c0_40] : memref<18x18x4xbf16, #tpu.memory_space<vmem>>, vector<16x16x4xbf16>
    %26 = vector.shape_cast %25 : vector<16x16x4xbf16> to vector<256x4xbf16>
    %c0_41 = arith.constant 0 : index
    %c12 = arith.constant 12 : index
    %27 = vector.load %arg9[%c0_41, %c12] : memref<256x36xbf16, #tpu.memory_space<vmem>>, vector<256x4xbf16>
    tpu.vector_store %arg9[%c0_41, %c12], %26 {strides = array<i32>} : memref<256x36xbf16, #tpu.memory_space<vmem>>, vector<256x4xbf16>,
    %c1_42 = arith.constant 1 : index
    %c1_43 = arith.constant 1 : index
    %c0_44 = arith.constant 0 : index
    %28 = vector.load %arg8[%c1_42, %c1_43, %c0_44] : memref<18x18x4xbf16, #tpu.memory_space<vmem>>, vector<16x16x4xbf16>
    %29 = vector.shape_cast %28 : vector<16x16x4xbf16> to vector<256x4xbf16>
    %c0_45 = arith.constant 0 : index
    %c16 = arith.constant 16 : index
    %30 = vector.load %arg9[%c0_45, %c16] : memref<256x36xbf16, #tpu.memory_space<vmem>>, vector<256x4xbf16>
    tpu.vector_store %arg9[%c0_45, %c16], %29 {strides = array<i32>} : memref<256x36xbf16, #tpu.memory_space<vmem>>, vector<256x4xbf16>,
    %c1_46 = arith.constant 1 : index
    %c2_47 = arith.constant 2 : index
    %c0_48 = arith.constant 0 : index
    %31 = vector.load %arg8[%c1_46, %c2_47, %c0_48] : memref<18x18x4xbf16, #tpu.memory_space<vmem>>, vector<16x16x4xbf16>
    %32 = vector.shape_cast %31 : vector<16x16x4xbf16> to vector<256x4xbf16>
    %c0_49 = arith.constant 0 : index
    %c20 = arith.constant 20 : index
    %33 = vector.load %arg9[%c0_49, %c20] : memref<256x36xbf16, #tpu.memory_space<vmem>>, vector<256x4xbf16>
    tpu.vector_store %arg9[%c0_49, %c20], %32 {strides = array<i32>} : memref<256x36xbf16, #tpu.memory_space<vmem>>, vector<256x4xbf16>,
    %c2_50 = arith.constant 2 : index
    %c0_51 = arith.constant 0 : index
    %c0_52 = arith.constant 0 : index
    %34 = vector.load %arg8[%c2_50, %c0_51, %c0_52] : memref<18x18x4xbf16, #tpu.memory_space<vmem>>, vector<16x16x4xbf16>
    %35 = vector.shape_cast %34 : vector<16x16x4xbf16> to vector<256x4xbf16>
    %c0_53 = arith.constant 0 : index
    %c24 = arith.constant 24 : index
    %36 = vector.load %arg9[%c0_53, %c24] : memref<256x36xbf16, #tpu.memory_space<vmem>>, vector<256x4xbf16>
    tpu.vector_store %arg9[%c0_53, %c24], %35 {strides = array<i32>} : memref<256x36xbf16, #tpu.memory_space<vmem>>, vector<256x4xbf16>,
    %c2_54 = arith.constant 2 : index
    %c1_55 = arith.constant 1 : index
    %c0_56 = arith.constant 0 : index
    %37 = vector.load %arg8[%c2_54, %c1_55, %c0_56] : memref<18x18x4xbf16, #tpu.memory_space<vmem>>, vector<16x16x4xbf16>
    %38 = vector.shape_cast %37 : vector<16x16x4xbf16> to vector<256x4xbf16>
    %c0_57 = arith.constant 0 : index
    %c28 = arith.constant 28 : index
    %39 = vector.load %arg9[%c0_57, %c28] : memref<256x36xbf16, #tpu.memory_space<vmem>>, vector<256x4xbf16>
    tpu.vector_store %arg9[%c0_57, %c28], %38 {strides = array<i32>} : memref<256x36xbf16, #tpu.memory_space<vmem>>, vector<256x4xbf16>,
    %c2_58 = arith.constant 2 : index
    %c2_59 = arith.constant 2 : index
    %c0_60 = arith.constant 0 : index
    %40 = vector.load %arg8[%c2_58, %c2_59, %c0_60] : memref<18x18x4xbf16, #tpu.memory_space<vmem>>, vector<16x16x4xbf16>
    %41 = vector.shape_cast %40 : vector<16x16x4xbf16> to vector<256x4xbf16>
    %c0_61 = arith.constant 0 : index
    %c32 = arith.constant 32 : index
    %42 = vector.load %arg9[%c0_61, %c32] : memref<256x36xbf16, #tpu.memory_space<vmem>>, vector<256x4xbf16>
    tpu.vector_store %arg9[%c0_61, %c32], %41 {strides = array<i32>} : memref<256x36xbf16, #tpu.memory_space<vmem>>, vector<256x4xbf16>,
    %c0_62 = arith.constant 0 : index
    %c0_63 = arith.constant 0 : index
    %43 = vector.load %arg9[%c0_62, %c0_63] : memref<256x36xbf16, #tpu.memory_space<vmem>>, vector<256x36xbf16>
    %c0_64 = arith.constant 0 : index
    %c0_65 = arith.constant 0 : index
    %44 = vector.load %arg2[%c0_64, %c0_65] : memref<36x32xbf16, #tpu.memory_space<vmem>>, vector<36x32xbf16>
    %cst_66 = arith.constant dense<0.000000e+00> : vector<256x32xf32>
    %45 = tpu.matmul %43, %44, %cst_66 {dimension_numbers = #tpu.dot_dimension_numbers<[1], [0], [0], [1], [0, 0, 1, 1], [], []>} : vector<256x36xbf16>, vector<36x32xbf16>, vector<256x32xf32> -> vector<256x32xf32>
    %46 = arith.truncf %45 : vector<256x32xf32> to vector<256x32xbf16>
    %c0_67 = arith.constant 0 : index
    %c0_68 = arith.constant 0 : index
    %c0_69 = arith.constant 0 : index
    %47 = vector.load %arg4[%c0_67, %c0_68, %c0_69] : memref<1x256x32xbf16, #tpu.memory_space<vmem>>, vector<1x256x32xbf16>
    %48 = vector.shape_cast %47 : vector<1x256x32xbf16> to vector<256x32xbf16>
    %49 = vector.shape_cast %46 : vector<256x32xbf16> to vector<1x256x32xbf16>
    tpu.vector_store %arg4[%c0_67, %c0_68, %c0_69], %49 {strides = array<i32>} : memref<1x256x32xbf16, #tpu.memory_space<vmem>>, vector<1x256x32xbf16>,
    %50 = arith.truncf %15 : vector<256x32xf32> to vector<256x32xbf16>
    %c0_70 = arith.constant 0 : index
    %c0_71 = arith.constant 0 : index
    %c0_72 = arith.constant 0 : index
    %51 = vector.load %arg5[%c0_70, %c0_71, %c0_72] : memref<1x256x32xbf16, #tpu.memory_space<vmem>>, vector<1x256x32xbf16>
    %52 = vector.shape_cast %51 : vector<1x256x32xbf16> to vector<256x32xbf16>
    %53 = vector.shape_cast %50 : vector<256x32xbf16> to vector<1x256x32xbf16>
    tpu.vector_store %arg5[%c0_70, %c0_71, %c0_72], %53 {strides = array<i32>} : memref<1x256x32xbf16, #tpu.memory_space<vmem>>, vector<1x256x32xbf16>,
    %cst_73 = arith.constant dense<0.000000e+00> : vector<32xf32>
    %54 = vector.multi_reduction <add>, %45, %cst_73 [0] : vector<256x32xf32> to vector<32xf32>
    %55 = vector.shape_cast %54 : vector<32xf32> to vector<1x32xf32>
    %cst_74 = arith.constant 3.906250e-03 : f32
    %56 = vector.broadcast %cst_74 : f32 to vector<1x32xf32>
    %57 = arith.mulf %55, %56 : vector<1x32xf32>
    %58 = vector.broadcast %57 : vector<1x32xf32> to vector<256x32xf32>
    %59 = arith.subf %45, %58 : vector<256x32xf32>
    %c0_75 = arith.constant 0 : index
    %c0_76 = arith.constant 0 : index
    %c0_77 = arith.constant 0 : index
    %60 = vector.load %arg6[%c0_75, %c0_76, %c0_77] : memref<1x2x32xf32, #tpu.memory_space<vmem>>, vector<1x1x32xf32>
    %61 = vector.shape_cast %60 : vector<1x1x32xf32> to vector<1x32xf32>
    %62 = vector.shape_cast %55 : vector<1x32xf32> to vector<1x1x32xf32>
    tpu.vector_store %arg6[%c0_75, %c0_76, %c0_77], %62 {strides = array<i32>} : memref<1x2x32xf32, #tpu.memory_space<vmem>>, vector<1x1x32xf32>,
    %63 = arith.mulf %59, %59 : vector<256x32xf32>
    %cst_78 = arith.constant dense<0.000000e+00> : vector<32xf32>
    %64 = vector.multi_reduction <add>, %63, %cst_78 [0] : vector<256x32xf32> to vector<32xf32>
    %65 = vector.shape_cast %64 : vector<32xf32> to vector<1x32xf32>
    %c0_79 = arith.constant 0 : index
    %c1_80 = arith.constant 1 : index
    %c0_81 = arith.constant 0 : index
    %66 = vector.load %arg6[%c0_79, %c1_80, %c0_81] : memref<1x2x32xf32, #tpu.memory_space<vmem>>, vector<1x1x32xf32>
    %67 = vector.shape_cast %66 : vector<1x1x32xf32> to vector<1x32xf32>
    %68 = vector.shape_cast %65 : vector<1x32xf32> to vector<1x1x32xf32>
    tpu.vector_store %arg6[%c0_79, %c1_80, %c0_81], %68 {strides = array<i32>} : memref<1x2x32xf32, #tpu.memory_space<vmem>>, vector<1x1x32xf32>,
    %cst_82 = arith.constant dense<0.000000e+00> : vector<32xf32>
    %69 = vector.multi_reduction <add>, %15, %cst_82 [0] : vector<256x32xf32> to vector<32xf32>
    %70 = vector.shape_cast %69 : vector<32xf32> to vector<1x32xf32>
    %cst_83 = arith.constant 3.906250e-03 : f32
    %71 = vector.broadcast %cst_83 : f32 to vector<1x32xf32>
    %72 = arith.mulf %70, %71 : vector<1x32xf32>
    %73 = vector.broadcast %72 : vector<1x32xf32> to vector<256x32xf32>
    %74 = arith.subf %15, %73 : vector<256x32xf32>
    %c0_84 = arith.constant 0 : index
    %c0_85 = arith.constant 0 : index
    %c0_86 = arith.constant 0 : index
    %75 = vector.load %arg7[%c0_84, %c0_85, %c0_86] : memref<1x2x32xf32, #tpu.memory_space<vmem>>, vector<1x1x32xf32>
    %76 = vector.shape_cast %75 : vector<1x1x32xf32> to vector<1x32xf32>
    %77 = vector.shape_cast %70 : vector<1x32xf32> to vector<1x1x32xf32>
    tpu.vector_store %arg7[%c0_84, %c0_85, %c0_86], %77 {strides = array<i32>} : memref<1x2x32xf32, #tpu.memory_space<vmem>>, vector<1x1x32xf32>,
    %78 = arith.mulf %74, %74 : vector<256x32xf32>
    %cst_87 = arith.constant dense<0.000000e+00> : vector<32xf32>
    %79 = vector.multi_reduction <add>, %78, %cst_87 [0] : vector<256x32xf32> to vector<32xf32>
    %80 = vector.shape_cast %79 : vector<32xf32> to vector<1x32xf32>
    %c0_88 = arith.constant 0 : index
    %c1_89 = arith.constant 1 : index
    %c0_90 = arith.constant 0 : index
    %81 = vector.load %arg7[%c0_88, %c1_89, %c0_90] : memref<1x2x32xf32, #tpu.memory_space<vmem>>, vector<1x1x32xf32>
    %82 = vector.shape_cast %81 : vector<1x1x32xf32> to vector<1x32xf32>
    %83 = vector.shape_cast %80 : vector<1x32xf32> to vector<1x1x32xf32>
    tpu.vector_store %arg7[%c0_88, %c1_89, %c0_90], %83 {strides = array<i32>} : memref<1x2x32xf32, #tpu.memory_space<vmem>>, vector<1x1x32xf32>,
    return
  }
  func.func @transform_0(%arg0: i32) -> (i32, i32, i32, i32) {
    %c0_i32 = arith.constant 0 : i32
    %c0_i32_0 = arith.constant 0 : i32
    %c0_i32_1 = arith.constant 0 : i32
    %c0_i32_2 = arith.constant 0 : i32
    return %arg0, %c0_i32, %c0_i32_0, %c0_i32_1 : i32, i32, i32, i32
  }
  func.func @transform_1(%arg0: i32) -> (i32, i32) {
    %c0_i32 = arith.constant 0 : i32
    %c0_i32_0 = arith.constant 0 : i32
    %c0_i32_1 = arith.constant 0 : i32
    return %c0_i32, %c0_i32_0 : i32, i32
  }
  func.func @transform_2(%arg0: i32) -> (i32, i32) {
    %c0_i32 = arith.constant 0 : i32
    %c0_i32_0 = arith.constant 0 : i32
    %c0_i32_1 = arith.constant 0 : i32
    return %c0_i32, %c0_i32_0 : i32, i32
  }
  func.func @transform_3(%arg0: i32) -> (i32, i32, i32) {
    %c0_i32 = arith.constant 0 : i32
    %c0_i32_0 = arith.constant 0 : i32
    %c0_i32_1 = arith.constant 0 : i32
    return %arg0, %c0_i32, %c0_i32_0 : i32, i32, i32
  }
  func.func @transform_4(%arg0: i32) -> (i32, i32, i32) {
    %c0_i32 = arith.constant 0 : i32
    %c0_i32_0 = arith.constant 0 : i32
    %c0_i32_1 = arith.constant 0 : i32
    return %arg0, %c0_i32, %c0_i32_0 : i32, i32, i32
  }
  func.func @transform_5(%arg0: i32) -> (i32, i32, i32) {
    %c0_i32 = arith.constant 0 : i32
    %c0_i32_0 = arith.constant 0 : i32
    %c0_i32_1 = arith.constant 0 : i32
    return %arg0, %c0_i32, %c0_i32_0 : i32, i32, i32
  }
  func.func @transform_6(%arg0: i32) -> (i32, i32, i32) {
    %c0_i32 = arith.constant 0 : i32
    %c0_i32_0 = arith.constant 0 : i32
    %c0_i32_1 = arith.constant 0 : i32
    return %arg0, %c0_i32, %c0_i32_0 : i32, i32, i32
  }
}

module attributes {stable_mosaic.version = 11 : i64} {
  func.func @conv2_kernel(%arg0: i32, %arg1: memref<1x256x32xbf16, #tpu.memory_space<vmem>>, %arg2: memref<1x32xf32, #tpu.memory_space<vmem>>, %arg3: memref<1x32xf32, #tpu.memory_space<vmem>>, %arg4: memref<288x32xbf16, #tpu.memory_space<vmem>>, %arg5: memref<1x256x32xbf16, #tpu.memory_space<vmem>>, %arg6: memref<1x2x32xf32, #tpu.memory_space<vmem>>, %arg7: memref<18x18x32xbf16, #tpu.memory_space<vmem>>, %arg8: memref<256x288xbf16, #tpu.memory_space<vmem>>) attributes {dimension_semantics = [#tpu.dimension_semantics<parallel>], iteration_bounds = array<i64: 2>, scalar_prefetch = 0 : i64, scratch_operands = 2 : i64, tpu.core_type = #tpu.core_type<tc>, window_params = [{transform_indices = @transform_0, window_bounds = array<i64: 1, 256, 32>}, {pipeline_mode = #tpu.pipeline_mode<synchronous>, transform_indices = @transform_1, window_bounds = array<i64: 1, 32>}, {pipeline_mode = #tpu.pipeline_mode<synchronous>, transform_indices = @transform_2, window_bounds = array<i64: 1, 32>}, {pipeline_mode = #tpu.pipeline_mode<synchronous>, transform_indices = @transform_3, window_bounds = array<i64: 288, 32>}, {transform_indices = @transform_4, window_bounds = array<i64: 1, 256, 32>}, {transform_indices = @transform_5, window_bounds = array<i64: 1, 2, 32>}]} {
    %cst = arith.constant 0.000000e+00 : bf16
    %0 = vector.broadcast %cst : bf16 to vector<1x18x32xbf16>
    %c0 = arith.constant 0 : index
    %c0_0 = arith.constant 0 : index
    %c0_1 = arith.constant 0 : index
    %1 = vector.load %arg7[%c0, %c0_0, %c0_1] : memref<18x18x32xbf16, #tpu.memory_space<vmem>>, vector<1x18x32xbf16>
    tpu.vector_store %arg7[%c0, %c0_0, %c0_1], %0 {strides = array<i32>} : memref<18x18x32xbf16, #tpu.memory_space<vmem>>, vector<1x18x32xbf16>,
    %cst_2 = arith.constant 0.000000e+00 : bf16
    %2 = vector.broadcast %cst_2 : bf16 to vector<1x18x32xbf16>
    %c17 = arith.constant 17 : index
    %c0_3 = arith.constant 0 : index
    %c0_4 = arith.constant 0 : index
    %3 = vector.load %arg7[%c17, %c0_3, %c0_4] : memref<18x18x32xbf16, #tpu.memory_space<vmem>>, vector<1x18x32xbf16>
    tpu.vector_store %arg7[%c17, %c0_3, %c0_4], %2 {strides = array<i32>} : memref<18x18x32xbf16, #tpu.memory_space<vmem>>, vector<1x18x32xbf16>,
    %cst_5 = arith.constant 0.000000e+00 : bf16
    %4 = vector.broadcast %cst_5 : bf16 to vector<18x1x32xbf16>
    %c0_6 = arith.constant 0 : index
    %c0_7 = arith.constant 0 : index
    %c0_8 = arith.constant 0 : index
    %5 = vector.load %arg7[%c0_6, %c0_7, %c0_8] : memref<18x18x32xbf16, #tpu.memory_space<vmem>>, vector<18x1x32xbf16>
    tpu.vector_store %arg7[%c0_6, %c0_7, %c0_8], %4 {strides = array<i32>} : memref<18x18x32xbf16, #tpu.memory_space<vmem>>, vector<18x1x32xbf16>,
    %cst_9 = arith.constant 0.000000e+00 : bf16
    %6 = vector.broadcast %cst_9 : bf16 to vector<18x1x32xbf16>
    %c0_10 = arith.constant 0 : index
    %c17_11 = arith.constant 17 : index
    %c0_12 = arith.constant 0 : index
    %7 = vector.load %arg7[%c0_10, %c17_11, %c0_12] : memref<18x18x32xbf16, #tpu.memory_space<vmem>>, vector<18x1x32xbf16>
    tpu.vector_store %arg7[%c0_10, %c17_11, %c0_12], %6 {strides = array<i32>} : memref<18x18x32xbf16, #tpu.memory_space<vmem>>, vector<18x1x32xbf16>,
    %c0_13 = arith.constant 0 : index
    %c0_14 = arith.constant 0 : index
    %c0_15 = arith.constant 0 : index
    %8 = vector.load %arg1[%c0_13, %c0_14, %c0_15] : memref<1x256x32xbf16, #tpu.memory_space<vmem>>, vector<1x256x32xbf16>
    %9 = vector.shape_cast %8 : vector<1x256x32xbf16> to vector<256x32xbf16>
    %10 = arith.extf %9 : vector<256x32xbf16> to vector<256x32xf32>
    %c0_16 = arith.constant 0 : index
    %c0_17 = arith.constant 0 : index
    %11 = vector.load %arg2[%c0_16, %c0_17] : memref<1x32xf32, #tpu.memory_space<vmem>>, vector<1x32xf32>
    %12 = vector.broadcast %11 : vector<1x32xf32> to vector<256x32xf32>
    %13 = arith.mulf %10, %12 : vector<256x32xf32>
    %c0_18 = arith.constant 0 : index
    %c0_19 = arith.constant 0 : index
    %14 = vector.load %arg3[%c0_18, %c0_19] : memref<1x32xf32, #tpu.memory_space<vmem>>, vector<1x32xf32>
    %15 = vector.broadcast %14 : vector<1x32xf32> to vector<256x32xf32>
    %16 = arith.addf %13, %15 : vector<256x32xf32>
    %cst_20 = arith.constant 0.000000e+00 : f32
    %17 = vector.broadcast %cst_20 : f32 to vector<256x32xf32>
    %18 = arith.maximumf %16, %17 : vector<256x32xf32>
    %19 = arith.truncf %18 : vector<256x32xf32> to vector<256x32xbf16>
    %20 = vector.shape_cast %19 : vector<256x32xbf16> to vector<16x16x32xbf16>
    %c1 = arith.constant 1 : index
    %c1_21 = arith.constant 1 : index
    %c0_22 = arith.constant 0 : index
    %21 = vector.load %arg7[%c1, %c1_21, %c0_22] : memref<18x18x32xbf16, #tpu.memory_space<vmem>>, vector<16x16x32xbf16>
    tpu.vector_store %arg7[%c1, %c1_21, %c0_22], %20 {strides = array<i32>} : memref<18x18x32xbf16, #tpu.memory_space<vmem>>, vector<16x16x32xbf16>,
    %c0_23 = arith.constant 0 : index
    %c0_24 = arith.constant 0 : index
    %c0_25 = arith.constant 0 : index
    %22 = vector.load %arg7[%c0_23, %c0_24, %c0_25] : memref<18x18x32xbf16, #tpu.memory_space<vmem>>, vector<16x16x32xbf16>
    %23 = vector.shape_cast %22 : vector<16x16x32xbf16> to vector<256x32xbf16>
    %c0_26 = arith.constant 0 : index
    %c0_27 = arith.constant 0 : index
    %24 = vector.load %arg8[%c0_26, %c0_27] : memref<256x288xbf16, #tpu.memory_space<vmem>>, vector<256x32xbf16>
    tpu.vector_store %arg8[%c0_26, %c0_27], %23 {strides = array<i32>} : memref<256x288xbf16, #tpu.memory_space<vmem>>, vector<256x32xbf16>,
    %c0_28 = arith.constant 0 : index
    %c1_29 = arith.constant 1 : index
    %c0_30 = arith.constant 0 : index
    %25 = vector.load %arg7[%c0_28, %c1_29, %c0_30] : memref<18x18x32xbf16, #tpu.memory_space<vmem>>, vector<16x16x32xbf16>
    %26 = vector.shape_cast %25 : vector<16x16x32xbf16> to vector<256x32xbf16>
    %c0_31 = arith.constant 0 : index
    %c32 = arith.constant 32 : index
    %27 = vector.load %arg8[%c0_31, %c32] : memref<256x288xbf16, #tpu.memory_space<vmem>>, vector<256x32xbf16>
    tpu.vector_store %arg8[%c0_31, %c32], %26 {strides = array<i32>} : memref<256x288xbf16, #tpu.memory_space<vmem>>, vector<256x32xbf16>,
    %c0_32 = arith.constant 0 : index
    %c2 = arith.constant 2 : index
    %c0_33 = arith.constant 0 : index
    %28 = vector.load %arg7[%c0_32, %c2, %c0_33] : memref<18x18x32xbf16, #tpu.memory_space<vmem>>, vector<16x16x32xbf16>
    %29 = vector.shape_cast %28 : vector<16x16x32xbf16> to vector<256x32xbf16>
    %c0_34 = arith.constant 0 : index
    %c64 = arith.constant 64 : index
    %30 = vector.load %arg8[%c0_34, %c64] : memref<256x288xbf16, #tpu.memory_space<vmem>>, vector<256x32xbf16>
    tpu.vector_store %arg8[%c0_34, %c64], %29 {strides = array<i32>} : memref<256x288xbf16, #tpu.memory_space<vmem>>, vector<256x32xbf16>,
    %c1_35 = arith.constant 1 : index
    %c0_36 = arith.constant 0 : index
    %c0_37 = arith.constant 0 : index
    %31 = vector.load %arg7[%c1_35, %c0_36, %c0_37] : memref<18x18x32xbf16, #tpu.memory_space<vmem>>, vector<16x16x32xbf16>
    %32 = vector.shape_cast %31 : vector<16x16x32xbf16> to vector<256x32xbf16>
    %c0_38 = arith.constant 0 : index
    %c96 = arith.constant 96 : index
    %33 = vector.load %arg8[%c0_38, %c96] : memref<256x288xbf16, #tpu.memory_space<vmem>>, vector<256x32xbf16>
    tpu.vector_store %arg8[%c0_38, %c96], %32 {strides = array<i32>} : memref<256x288xbf16, #tpu.memory_space<vmem>>, vector<256x32xbf16>,
    %c1_39 = arith.constant 1 : index
    %c1_40 = arith.constant 1 : index
    %c0_41 = arith.constant 0 : index
    %34 = vector.load %arg7[%c1_39, %c1_40, %c0_41] : memref<18x18x32xbf16, #tpu.memory_space<vmem>>, vector<16x16x32xbf16>
    %35 = vector.shape_cast %34 : vector<16x16x32xbf16> to vector<256x32xbf16>
    %c0_42 = arith.constant 0 : index
    %c128 = arith.constant 128 : index
    %36 = vector.load %arg8[%c0_42, %c128] : memref<256x288xbf16, #tpu.memory_space<vmem>>, vector<256x32xbf16>
    tpu.vector_store %arg8[%c0_42, %c128], %35 {strides = array<i32>} : memref<256x288xbf16, #tpu.memory_space<vmem>>, vector<256x32xbf16>,
    %c1_43 = arith.constant 1 : index
    %c2_44 = arith.constant 2 : index
    %c0_45 = arith.constant 0 : index
    %37 = vector.load %arg7[%c1_43, %c2_44, %c0_45] : memref<18x18x32xbf16, #tpu.memory_space<vmem>>, vector<16x16x32xbf16>
    %38 = vector.shape_cast %37 : vector<16x16x32xbf16> to vector<256x32xbf16>
    %c0_46 = arith.constant 0 : index
    %c160 = arith.constant 160 : index
    %39 = vector.load %arg8[%c0_46, %c160] : memref<256x288xbf16, #tpu.memory_space<vmem>>, vector<256x32xbf16>
    tpu.vector_store %arg8[%c0_46, %c160], %38 {strides = array<i32>} : memref<256x288xbf16, #tpu.memory_space<vmem>>, vector<256x32xbf16>,
    %c2_47 = arith.constant 2 : index
    %c0_48 = arith.constant 0 : index
    %c0_49 = arith.constant 0 : index
    %40 = vector.load %arg7[%c2_47, %c0_48, %c0_49] : memref<18x18x32xbf16, #tpu.memory_space<vmem>>, vector<16x16x32xbf16>
    %41 = vector.shape_cast %40 : vector<16x16x32xbf16> to vector<256x32xbf16>
    %c0_50 = arith.constant 0 : index
    %c192 = arith.constant 192 : index
    %42 = vector.load %arg8[%c0_50, %c192] : memref<256x288xbf16, #tpu.memory_space<vmem>>, vector<256x32xbf16>
    tpu.vector_store %arg8[%c0_50, %c192], %41 {strides = array<i32>} : memref<256x288xbf16, #tpu.memory_space<vmem>>, vector<256x32xbf16>,
    %c2_51 = arith.constant 2 : index
    %c1_52 = arith.constant 1 : index
    %c0_53 = arith.constant 0 : index
    %43 = vector.load %arg7[%c2_51, %c1_52, %c0_53] : memref<18x18x32xbf16, #tpu.memory_space<vmem>>, vector<16x16x32xbf16>
    %44 = vector.shape_cast %43 : vector<16x16x32xbf16> to vector<256x32xbf16>
    %c0_54 = arith.constant 0 : index
    %c224 = arith.constant 224 : index
    %45 = vector.load %arg8[%c0_54, %c224] : memref<256x288xbf16, #tpu.memory_space<vmem>>, vector<256x32xbf16>
    tpu.vector_store %arg8[%c0_54, %c224], %44 {strides = array<i32>} : memref<256x288xbf16, #tpu.memory_space<vmem>>, vector<256x32xbf16>,
    %c2_55 = arith.constant 2 : index
    %c2_56 = arith.constant 2 : index
    %c0_57 = arith.constant 0 : index
    %46 = vector.load %arg7[%c2_55, %c2_56, %c0_57] : memref<18x18x32xbf16, #tpu.memory_space<vmem>>, vector<16x16x32xbf16>
    %47 = vector.shape_cast %46 : vector<16x16x32xbf16> to vector<256x32xbf16>
    %c0_58 = arith.constant 0 : index
    %c256 = arith.constant 256 : index
    %48 = vector.load %arg8[%c0_58, %c256] : memref<256x288xbf16, #tpu.memory_space<vmem>>, vector<256x32xbf16>
    tpu.vector_store %arg8[%c0_58, %c256], %47 {strides = array<i32>} : memref<256x288xbf16, #tpu.memory_space<vmem>>, vector<256x32xbf16>,
    %c0_59 = arith.constant 0 : index
    %c0_60 = arith.constant 0 : index
    %49 = vector.load %arg8[%c0_59, %c0_60] : memref<256x288xbf16, #tpu.memory_space<vmem>>, vector<256x288xbf16>
    %c0_61 = arith.constant 0 : index
    %c0_62 = arith.constant 0 : index
    %50 = vector.load %arg4[%c0_61, %c0_62] : memref<288x32xbf16, #tpu.memory_space<vmem>>, vector<288x32xbf16>
    %cst_63 = arith.constant dense<0.000000e+00> : vector<256x32xf32>
    %51 = tpu.matmul %49, %50, %cst_63 {dimension_numbers = #tpu.dot_dimension_numbers<[1], [0], [0], [1], [0, 0, 1, 1], [], []>} : vector<256x288xbf16>, vector<288x32xbf16>, vector<256x32xf32> -> vector<256x32xf32>
    %52 = arith.truncf %51 : vector<256x32xf32> to vector<256x32xbf16>
    %c0_64 = arith.constant 0 : index
    %c0_65 = arith.constant 0 : index
    %c0_66 = arith.constant 0 : index
    %53 = vector.load %arg5[%c0_64, %c0_65, %c0_66] : memref<1x256x32xbf16, #tpu.memory_space<vmem>>, vector<1x256x32xbf16>
    %54 = vector.shape_cast %53 : vector<1x256x32xbf16> to vector<256x32xbf16>
    %55 = vector.shape_cast %52 : vector<256x32xbf16> to vector<1x256x32xbf16>
    tpu.vector_store %arg5[%c0_64, %c0_65, %c0_66], %55 {strides = array<i32>} : memref<1x256x32xbf16, #tpu.memory_space<vmem>>, vector<1x256x32xbf16>,
    %cst_67 = arith.constant dense<0.000000e+00> : vector<32xf32>
    %56 = vector.multi_reduction <add>, %51, %cst_67 [0] : vector<256x32xf32> to vector<32xf32>
    %57 = vector.shape_cast %56 : vector<32xf32> to vector<1x32xf32>
    %cst_68 = arith.constant 3.906250e-03 : f32
    %58 = vector.broadcast %cst_68 : f32 to vector<1x32xf32>
    %59 = arith.mulf %57, %58 : vector<1x32xf32>
    %60 = vector.broadcast %59 : vector<1x32xf32> to vector<256x32xf32>
    %61 = arith.subf %51, %60 : vector<256x32xf32>
    %c0_69 = arith.constant 0 : index
    %c0_70 = arith.constant 0 : index
    %c0_71 = arith.constant 0 : index
    %62 = vector.load %arg6[%c0_69, %c0_70, %c0_71] : memref<1x2x32xf32, #tpu.memory_space<vmem>>, vector<1x1x32xf32>
    %63 = vector.shape_cast %62 : vector<1x1x32xf32> to vector<1x32xf32>
    %64 = vector.shape_cast %57 : vector<1x32xf32> to vector<1x1x32xf32>
    tpu.vector_store %arg6[%c0_69, %c0_70, %c0_71], %64 {strides = array<i32>} : memref<1x2x32xf32, #tpu.memory_space<vmem>>, vector<1x1x32xf32>,
    %65 = arith.mulf %61, %61 : vector<256x32xf32>
    %cst_72 = arith.constant dense<0.000000e+00> : vector<32xf32>
    %66 = vector.multi_reduction <add>, %65, %cst_72 [0] : vector<256x32xf32> to vector<32xf32>
    %67 = vector.shape_cast %66 : vector<32xf32> to vector<1x32xf32>
    %c0_73 = arith.constant 0 : index
    %c1_74 = arith.constant 1 : index
    %c0_75 = arith.constant 0 : index
    %68 = vector.load %arg6[%c0_73, %c1_74, %c0_75] : memref<1x2x32xf32, #tpu.memory_space<vmem>>, vector<1x1x32xf32>
    %69 = vector.shape_cast %68 : vector<1x1x32xf32> to vector<1x32xf32>
    %70 = vector.shape_cast %67 : vector<1x32xf32> to vector<1x1x32xf32>
    tpu.vector_store %arg6[%c0_73, %c1_74, %c0_75], %70 {strides = array<i32>} : memref<1x2x32xf32, #tpu.memory_space<vmem>>, vector<1x1x32xf32>,
    return
  }
  func.func @transform_0(%arg0: i32) -> (i32, i32, i32) {
    %c0_i32 = arith.constant 0 : i32
    %c0_i32_0 = arith.constant 0 : i32
    %c0_i32_1 = arith.constant 0 : i32
    return %arg0, %c0_i32, %c0_i32_0 : i32, i32, i32
  }
  func.func @transform_1(%arg0: i32) -> (i32, i32) {
    %c0_i32 = arith.constant 0 : i32
    %c0_i32_0 = arith.constant 0 : i32
    %c0_i32_1 = arith.constant 0 : i32
    return %c0_i32, %c0_i32_0 : i32, i32
  }
  func.func @transform_2(%arg0: i32) -> (i32, i32) {
    %c0_i32 = arith.constant 0 : i32
    %c0_i32_0 = arith.constant 0 : i32
    %c0_i32_1 = arith.constant 0 : i32
    return %c0_i32, %c0_i32_0 : i32, i32
  }
  func.func @transform_3(%arg0: i32) -> (i32, i32) {
    %c0_i32 = arith.constant 0 : i32
    %c0_i32_0 = arith.constant 0 : i32
    %c0_i32_1 = arith.constant 0 : i32
    return %c0_i32, %c0_i32_0 : i32, i32
  }
  func.func @transform_4(%arg0: i32) -> (i32, i32, i32) {
    %c0_i32 = arith.constant 0 : i32
    %c0_i32_0 = arith.constant 0 : i32
    %c0_i32_1 = arith.constant 0 : i32
    return %arg0, %c0_i32, %c0_i32_0 : i32, i32, i32
  }
  func.func @transform_5(%arg0: i32) -> (i32, i32, i32) {
    %c0_i32 = arith.constant 0 : i32
    %c0_i32_0 = arith.constant 0 : i32
    %c0_i32_1 = arith.constant 0 : i32
    return %arg0, %c0_i32, %c0_i32_0 : i32, i32, i32
  }
}

module attributes {stable_mosaic.version = 11 : i64} {
  func.func @bn2_add_relu_kernel(%arg0: i32, %arg1: i32, %arg2: memref<1x256x32xbf16, #tpu.memory_space<vmem>>, %arg3: memref<1x256x32xbf16, #tpu.memory_space<vmem>>, %arg4: memref<1x32xf32, #tpu.memory_space<vmem>>, %arg5: memref<1x1x32xf32, #tpu.memory_space<vmem>>, %arg6: memref<1x1x32xf32, #tpu.memory_space<vmem>>, %arg7: memref<1x32x256xf32, #tpu.memory_space<vmem>>) attributes {dimension_semantics = [#tpu.dimension_semantics<parallel>, #tpu.dimension_semantics<parallel>], iteration_bounds = array<i64: 2, 1>, scalar_prefetch = 0 : i64, scratch_operands = 0 : i64, tpu.core_type = #tpu.core_type<tc>, window_params = [{transform_indices = @transform_0, window_bounds = array<i64: 1, 256, 32>}, {transform_indices = @transform_1, window_bounds = array<i64: 1, 256, 32>}, {pipeline_mode = #tpu.pipeline_mode<synchronous>, transform_indices = @transform_2, window_bounds = array<i64: 1, 32>}, {transform_indices = @transform_3, window_bounds = array<i64: 1, 1, 32>}, {transform_indices = @transform_4, window_bounds = array<i64: 1, 1, 32>}, {transform_indices = @transform_5, window_bounds = array<i64: 1, 32, 256>}]} {
    %c0 = arith.constant 0 : index
    %c0_0 = arith.constant 0 : index
    %c0_1 = arith.constant 0 : index
    %0 = vector.load %arg2[%c0, %c0_0, %c0_1] : memref<1x256x32xbf16, #tpu.memory_space<vmem>>, vector<1x256x32xbf16>
    %1 = vector.shape_cast %0 : vector<1x256x32xbf16> to vector<256x32xbf16>
    %2 = arith.extf %1 : vector<256x32xbf16> to vector<256x32xf32>
    %c0_2 = arith.constant 0 : index
    %c0_3 = arith.constant 0 : index
    %3 = vector.load %arg4[%c0_2, %c0_3] : memref<1x32xf32, #tpu.memory_space<vmem>>, vector<1x32xf32>
    %4 = vector.broadcast %3 : vector<1x32xf32> to vector<256x32xf32>
    %5 = arith.mulf %2, %4 : vector<256x32xf32>
    %c0_4 = arith.constant 0 : index
    %c0_5 = arith.constant 0 : index
    %c0_6 = arith.constant 0 : index
    %6 = vector.load %arg3[%c0_4, %c0_5, %c0_6] : memref<1x256x32xbf16, #tpu.memory_space<vmem>>, vector<1x256x32xbf16>
    %7 = vector.shape_cast %6 : vector<1x256x32xbf16> to vector<256x32xbf16>
    %8 = arith.extf %7 : vector<256x32xbf16> to vector<256x32xf32>
    %c0_7 = arith.constant 0 : index
    %c0_8 = arith.constant 0 : index
    %c0_9 = arith.constant 0 : index
    %9 = vector.load %arg5[%c0_7, %c0_8, %c0_9] : memref<1x1x32xf32, #tpu.memory_space<vmem>>, vector<1x1x32xf32>
    %10 = vector.shape_cast %9 : vector<1x1x32xf32> to vector<1x32xf32>
    %11 = vector.broadcast %10 : vector<1x32xf32> to vector<256x32xf32>
    %12 = arith.mulf %8, %11 : vector<256x32xf32>
    %13 = arith.addf %5, %12 : vector<256x32xf32>
    %c0_10 = arith.constant 0 : index
    %c0_11 = arith.constant 0 : index
    %c0_12 = arith.constant 0 : index
    %14 = vector.load %arg6[%c0_10, %c0_11, %c0_12] : memref<1x1x32xf32, #tpu.memory_space<vmem>>, vector<1x1x32xf32>
    %15 = vector.shape_cast %14 : vector<1x1x32xf32> to vector<1x32xf32>
    %16 = vector.broadcast %15 : vector<1x32xf32> to vector<256x32xf32>
    %17 = arith.addf %13, %16 : vector<256x32xf32>
    %cst = arith.constant 0.000000e+00 : f32
    %18 = vector.broadcast %cst : f32 to vector<256x32xf32>
    %19 = arith.maximumf %17, %18 : vector<256x32xf32>
    %20 = tpu.transpose %19, [1, 0] : vector<256x32xf32> -> vector<32x256xf32>
    %c0_13 = arith.constant 0 : index
    %c0_14 = arith.constant 0 : index
    %c0_15 = arith.constant 0 : index
    %21 = vector.load %arg7[%c0_13, %c0_14, %c0_15] : memref<1x32x256xf32, #tpu.memory_space<vmem>>, vector<1x32x256xf32>
    %22 = vector.shape_cast %21 : vector<1x32x256xf32> to vector<32x256xf32>
    %23 = vector.shape_cast %20 : vector<32x256xf32> to vector<1x32x256xf32>
    tpu.vector_store %arg7[%c0_13, %c0_14, %c0_15], %23 {strides = array<i32>} : memref<1x32x256xf32, #tpu.memory_space<vmem>>, vector<1x32x256xf32>,
    return
  }
  func.func @transform_0(%arg0: i32, %arg1: i32) -> (i32, i32, i32) {
    %c0_i32 = arith.constant 0 : i32
    %c0_i32_0 = arith.constant 0 : i32
    return %arg0, %arg1, %c0_i32 : i32, i32, i32
  }
  func.func @transform_1(%arg0: i32, %arg1: i32) -> (i32, i32, i32) {
    %c0_i32 = arith.constant 0 : i32
    %c0_i32_0 = arith.constant 0 : i32
    return %arg0, %arg1, %c0_i32 : i32, i32, i32
  }
  func.func @transform_2(%arg0: i32, %arg1: i32) -> (i32, i32) {
    %c0_i32 = arith.constant 0 : i32
    %c0_i32_0 = arith.constant 0 : i32
    %c0_i32_1 = arith.constant 0 : i32
    return %c0_i32, %c0_i32_0 : i32, i32
  }
  func.func @transform_3(%arg0: i32, %arg1: i32) -> (i32, i32, i32) {
    %c0_i32 = arith.constant 0 : i32
    %c0_i32_0 = arith.constant 0 : i32
    %c0_i32_1 = arith.constant 0 : i32
    return %arg0, %c0_i32, %c0_i32_0 : i32, i32, i32
  }
  func.func @transform_4(%arg0: i32, %arg1: i32) -> (i32, i32, i32) {
    %c0_i32 = arith.constant 0 : i32
    %c0_i32_0 = arith.constant 0 : i32
    %c0_i32_1 = arith.constant 0 : i32
    return %arg0, %c0_i32, %c0_i32_0 : i32, i32, i32
  }
  func.func @transform_5(%arg0: i32, %arg1: i32) -> (i32, i32, i32) {
    %c0_i32 = arith.constant 0 : i32
    %c0_i32_0 = arith.constant 0 : i32
    return %arg0, %c0_i32, %arg1 : i32, i32, i32
  }
}

</mosaic_0001>

<bundles_post_ra>
// kernel: residual_block_forward.5
= control target key start
LH: loop header
LB: loop body
LE: loop exit
PB: predicated region body
PF: predicated region fallthrough
CT: control target
= control target key end

     0   :  { %s1087_s18 = smov 0   ;;  %s1089_s19 = smov 0   ;;  %s1276_s0 = inlined_call_operand.vmem [shape: bf16[2,256,32], index: 0, kind: input, shape index: {}]   ;;  %s1277_s1 = inlined_call_operand.vmem [shape: bf16[2,256,32], index: 1, kind: input, shape index: {}]   ;;  %s1278_s2 = inlined_call_operand.vmem [shape: f32[1,32], index: 2, kind: input, shape index: {}]   ;;  %s1279_s3 = inlined_call_operand.vmem [shape: f32[2,1,32], index: 3, kind: input, shape index: {}]   ;;  %s1280_s4 = inlined_call_operand.vmem [shape: f32[2,1,32], index: 4, kind: input, shape index: {}]   ;;  %s1281_s5 = inlined_call_operand.vmem [shape: f32[2,32,256], index: 5, kind: output, shape index: {}]  }
   0x1   :  { %s1091_s20 = smov 0  }
   0x2 LB: > { %s27_s21 = sadd.s32 1, %s1051_s19  ;;  %p836_p0 = scmp.ge.s32.totalorder %s1055_s20, 1  ;;  %s1055_s20 = sphi %s1091_s20, %s15_s20   ;;  %s1051_s19 = sphi %s1089_s19, %s1283_s19   ;;  %s1047_s18 = sphi %s1087_s18, %s1282_s18  }
   0x3   : > { %p29_p1 = scmp.ge.s32.totalorder %s27_s21, 2  ;;  %p241_p2 = scmp.lt.s32.totalorder %s1055_s20, 3 }
   0x5   : > { %s1285_s21 = smov (%p29_p1, %s27_s21), 0  ;;  %p242_p3 = pnand %p836_p0, %p241_p2 }
   0x6   : > { %p293_p4 = scmp.lt.s32.totalorder (!%p242_p3), %s1047_s18, 1  ;;  %v1125_v0 = vld [vmem:[%s1278_s2] ss:$0 sm:$0xff] (!%p242_p3) }
   0x7   : > { %245 = sbr.rel (%p242_p3) target bundleno = 173 (0xad), region = 40 }
   0xe   : > { %s1287_s18 = smov (!%p293_p4, %s1047_s18), 1 }
   0xf   : > { %s848_s22 = sshll.u32 %s1287_s18, 7  ;;  %s314_s25 = scalar_lea.vmem %s1279_s3, %s1287_s18 }
  0x10   : > { %s1115_s28 = scalar_lea.vmem %s1276_s0, %s848_s22  ;;  %s1120_s6 = scalar_lea.vmem %s1277_s1, %s848_s22  ;;  %v1127_v1 = vld [vmem:[%s314_s25] ss:$0 sm:$0xff] }
  0x11   : > { %v986_v2 = vld [vmem:[%s1115_s28 + $0x40] sm:$0xff]   ;;  %s317_s11 = scalar_lea.vmem %s1280_s4, %s1287_s18  ;;  %v987_v14 = vld [vmem:[%s1115_s28 + $0x48] sm:$0xff]   ;;  %v988_v47 = vld [vmem:[%s1115_s28 + $0x50] sm:$0xff]   ;;  %s850_s12 = sshll.u32 %s1287_s18, 6 }
  0x12   : > { %v1001_v3 = vld [vmem:[%s1120_s6 + $0x40] sm:$0xff]   ;;  %v885_v5 = vunpack.c.l.bf16 %v986_v2  ;;  %v886_v9 = vunpack.c.h.bf16 %v986_v2  ;;  %v1002_v15 = vld [vmem:[%s1120_s6 + $0x48] sm:$0xff]   ;;  %v889_v28 = vunpack.c.l.bf16 %v987_v14  ;;  %v890_v45 = vunpack.c.h.bf16 %v987_v14  ;;  %v1003_v48 = vld [vmem:[%s1120_s6 + $0x50] sm:$0xff]   ;;  %s326_s15 = scalar_lea.vmem %s1281_s5, %s850_s12 }
  0x13   : > { %v852_v4 = vld [vmem:[%s1115_s28] sm:$0xff]   ;;  %v949_v6 = vunpack.c.l.bf16 %v1001_v3  ;;  %v950_v11 = vunpack.c.h.bf16 %v1001_v3  ;;  %v979_v16 = vld [vmem:[%s1115_s28 + $0x8] sm:$0xff]   ;;  %v953_v29 = vunpack.c.l.bf16 %v1002_v15  ;;  %v954_v46 = vunpack.c.h.bf16 %v1002_v15  ;;  %v980_v53 = vld [vmem:[%s1115_s28 + $0x10] sm:$0xff]  }
  0x14   : > { %v853_v7 = vunpack.c.l.bf16 %v852_v4  ;;  %v916_v8 = vld [vmem:[%s1120_s6] sm:$0xff]   ;;  %v854_v12 = vunpack.c.h.bf16 %v852_v4  ;;  %v415_v17 = vmul.f32 %v885_v5, %v1125_v0  ;;  %v416_v20 = vmul.f32 %v886_v9, %v1125_v0  ;;  %v994_v21 = vld [vmem:[%s1120_s6 + $0x8] sm:$0xff]   ;;  %v995_v62 = vld [vmem:[%s1120_s6 + $0x10] sm:$0xff]  }
  0x15   : > { %v917_v10 = vunpack.c.l.bf16 %v916_v8  ;;  %v918_v13 = vunpack.c.h.bf16 %v916_v8  ;;  %v518_v18 = vmul.f32 %v949_v6, %v1127_v1  ;;  %v1145_v22 = vld [vmem:[%s317_s11] ss:$0 sm:$0xff]  ;;  %v519_v24 = vmul.f32 %v950_v11, %v1127_v1 }
  0x16   : > { %v399_v19 = vmul.f32 %v853_v7, %v1125_v0  ;;  %v400_v25 = vmul.f32 %v854_v12, %v1125_v0  ;;  %v857_v30 = vunpack.c.l.bf16 %v979_v16  ;;  %v921_v34 = vunpack.c.l.bf16 %v994_v21 }
  0x17   : > { %v502_v23 = vmul.f32 %v917_v10, %v1127_v1  ;;  %v503_v26 = vmul.f32 %v918_v13, %v1127_v1  ;;  %v550_v27 = vadd.f32 %v518_v18, %v415_v17  ;;  %v551_v32 = vadd.f32 %v519_v24, %v416_v20  ;;  %v989_v17 = vld [vmem:[%s1115_s28 + $0x58] sm:$0xff]  }
  0x18   : > { %v417_v36 = vmul.f32 %v889_v28, %v1125_v0  ;;  %v520_v37 = vmul.f32 %v953_v29, %v1127_v1  ;;  %v401_v38 = vmul.f32 %v857_v30, %v1125_v0  ;;  %v504_v42 = vmul.f32 %v921_v34, %v1127_v1  ;;  %v1004_v18 = vld [vmem:[%s1120_s6 + $0x58] sm:$0xff]  }
  0x19   : > { %v534_v31 = vadd.f32 %v502_v23, %v399_v19  ;;  %v535_v33 = vadd.f32 %v503_v26, %v400_v25  ;;  %v589_v35 = vadd.f32 %v1145_v22, %v550_v27  ;;  %v590_v40 = vadd.f32 %v1145_v22, %v551_v32  ;;  %v981_v24 = vld [vmem:[%s1115_s28 + $0x18] sm:$0xff]  }
  0x1a   : > { %v552_v44 = vadd.f32 %v520_v37, %v417_v36  ;;  %v536_v52 = vadd.f32 %v504_v42, %v401_v38  ;;  %v418_v55 = vmul.f32 %v890_v45, %v1125_v0  ;;  %v521_v56 = vmul.f32 %v954_v46, %v1127_v1 }
  0x1b   : > { %v573_v39 = vadd.f32 %v1145_v22, %v534_v31  ;;  %v574_v41 = vadd.f32 %v1145_v22, %v535_v33  ;;  %v621_v43 = vmax.f32 %v589_v35, 0.0  ;;  %v622_v50 = vmax.f32 %v590_v40, 0.0  ;;  %v996_v33 = vld [vmem:[%s1120_s6 + $0x18] sm:$0xff]  }
  0x1c   : > { %v591_v54 = vadd.f32 %v1145_v22, %v552_v44  ;;  %v858_v57 = vunpack.c.h.bf16 %v979_v16  ;;  %v575_v58 = vadd.f32 %v1145_v22, %v536_v52  ;;  %v922_v59 = vunpack.c.h.bf16 %v994_v21 }
  0x1d   : > { %v605_v49 = vmax.f32 %v573_v39, 0.0  ;;  %v606_v51 = vmax.f32 %v574_v41, 0.0  ;;  %669 = vxpose.xlu1.b32.start [1/16] (narrow) %v621_v43, 32  ;;  %v893_v60 = vunpack.c.l.bf16 %v988_v47  ;;  %v957_v61 = vunpack.c.l.bf16 %v1003_v48 }
  0x1e   : > { %v623_v63 = vmax.f32 %v591_v54, 0.0  ;;  %v553_v2 = vadd.f32 %v521_v56, %v418_v55  ;;  %v402_v3 = vmul.f32 %v858_v57, %v1125_v0  ;;  %v861_v4 = vunpack.c.l.bf16 %v980_v53  ;;  %v982_v55 = vld [vmem:[%s1115_s28 + $0x20] sm:$0xff]  }
  0x1f   : > { %637 = vxpose.xlu0.b32.start [1/16] (narrow) %v605_v49, 32  ;;  %v607_v5 = vmax.f32 %v575_v58, 0.0  ;;  %v505_v6 = vmul.f32 %v922_v59, %v1127_v1  ;;  %v419_v7 = vmul.f32 %v893_v60, %v1125_v0  ;;  %v522_v8 = vmul.f32 %v957_v61, %v1127_v1  ;;  %v990_v49 = vld [vmem:[%s1115_s28 + $0x60] sm:$0xff]  }
  0x20   : > { %v592_v9 = vadd.f32 %v1145_v22, %v553_v2  ;;  %v403_v10 = vmul.f32 %v861_v4, %v1125_v0  ;;  %v925_v11 = vunpack.c.l.bf16 %v995_v62  ;;  %v894_v12 = vunpack.c.h.bf16 %v988_v47  ;;  %v997_v60 = vld [vmem:[%s1120_s6 + $0x20] sm:$0xff]  }
  0x21   : > { %670 = vxpose.xlu1.b32.cont [2/16] (narrow) %v622_v50, 32  ;;  %v537_v13 = vadd.f32 %v505_v6, %v402_v3  ;;  %v554_v14 = vadd.f32 %v522_v8, %v419_v7  ;;  %v958_v15 = vunpack.c.h.bf16 %v1003_v48  ;;  %v862_v16 = vunpack.c.h.bf16 %v980_v53  ;;  %v1005_v50 = vld [vmem:[%s1120_s6 + $0x60] sm:$0xff]  }
  0x22   : > { %v624_v19 = vmax.f32 %v592_v9, 0.0  ;;  %v506_v20 = vmul.f32 %v925_v11, %v1127_v1  ;;  %v420_v21 = vmul.f32 %v894_v12, %v1125_v0  ;;  %v926_v23 = vunpack.c.h.bf16 %v995_v62 }
  0x23   : > { %638 = vxpose.xlu0.b32.cont [2/16] (narrow) %v606_v51, 32  ;;  %v576_v25 = vadd.f32 %v1145_v22, %v537_v13  ;;  %v593_v26 = vadd.f32 %v1145_v22, %v554_v14  ;;  %v523_v27 = vmul.f32 %v958_v15, %v1127_v1  ;;  %v404_v28 = vmul.f32 %v862_v16, %v1125_v0 }
  0x24   : > { %v538_v29 = vadd.f32 %v506_v20, %v403_v10  ;;  %v507_v30 = vmul.f32 %v926_v23, %v1127_v1  ;;  %v897_v31 = vunpack.c.l.bf16 %v989_v17  ;;  %v961_v32 = vunpack.c.l.bf16 %v1004_v18 }
  0x25   : > { %671 = vxpose.xlu1.b32.cont [3/16] (narrow) %v623_v63, 32  ;;  %v608_v34 = vmax.f32 %v576_v25, 0.0  ;;  %v555_v35 = vadd.f32 %v523_v27, %v420_v21  ;;  %v865_v36 = vunpack.c.l.bf16 %v981_v24  ;;  %v929_v43 = vunpack.c.l.bf16 %v996_v33 }
  0x26   : > { %v577_v37 = vadd.f32 %v1145_v22, %v538_v29  ;;  %v539_v38 = vadd.f32 %v507_v30, %v404_v28  ;;  %v421_v39 = vmul.f32 %v897_v31, %v1125_v0  ;;  %v524_v40 = vmul.f32 %v961_v32, %v1127_v1  ;;  %v983_v29 = vld [vmem:[%s1115_s28 + $0x28] sm:$0xff]  }
  0x27   : > { %639 = vxpose.xlu0.b32.cont [3/16] (narrow) %v607_v5, 32  ;;  %v594_v41 = vadd.f32 %v1145_v22, %v555_v35  ;;  %v405_v42 = vmul.f32 %v865_v36, %v1125_v0  ;;  %v898_v44 = vunpack.c.h.bf16 %v989_v17  ;;  %v625_v45 = vmax.f32 %v593_v26, 0.0  ;;  %v998_v30 = vld [vmem:[%s1120_s6 + $0x28] sm:$0xff]  }
  0x28   : > { %v578_v46 = vadd.f32 %v1145_v22, %v539_v38  ;;  %v556_v47 = vadd.f32 %v524_v40, %v421_v39  ;;  %v962_v48 = vunpack.c.h.bf16 %v1004_v18  ;;  %v609_v51 = vmax.f32 %v577_v37, 0.0  ;;  %v991_v18 = vld [vmem:[%s1115_s28 + $0x68] sm:$0xff]  }
  0x29   : > { %672 = vxpose.xlu1.b32.cont [4/16] (narrow) %v624_v19, 32  ;;  %v508_v52 = vmul.f32 %v929_v43, %v1127_v1  ;;  %v422_v53 = vmul.f32 %v898_v44, %v1125_v0  ;;  %v866_v54 = vunpack.c.h.bf16 %v981_v24  ;;  %v626_v56 = vmax.f32 %v594_v41, 0.0  ;;  %v1006_v19 = vld [vmem:[%s1120_s6 + $0x68] sm:$0xff]  }
  0x2a   : > { %v610_v57 = vmax.f32 %v578_v46, 0.0  ;;  %v525_v58 = vmul.f32 %v962_v48, %v1127_v1  ;;  %v930_v59 = vunpack.c.h.bf16 %v996_v33  ;;  %v901_v63 = vunpack.c.l.bf16 %v990_v49 }
  0x2b   : > { %640 = vxpose.xlu0.b32.cont [4/16] (narrow) %v608_v34, 32  ;;  %v540_v61 = vadd.f32 %v508_v52, %v405_v42  ;;  %v406_v62 = vmul.f32 %v866_v54, %v1125_v0  ;;  %v965_v2 = vunpack.c.l.bf16 %v1005_v50  ;;  %v595_v3 = vadd.f32 %v1145_v22, %v556_v47 }
  0x2c   : > { %v557_v4 = vadd.f32 %v525_v58, %v422_v53  ;;  %v509_v5 = vmul.f32 %v930_v59, %v1127_v1  ;;  %v869_v6 = vunpack.c.l.bf16 %v982_v55  ;;  %v423_v8 = vmul.f32 %v901_v63, %v1125_v0 }
  0x2d   : > { %673 = vxpose.xlu1.b32.cont [5/16] (narrow) %v625_v45, 32  ;;  %v579_v7 = vadd.f32 %v1145_v22, %v540_v61  ;;  %v526_v9 = vmul.f32 %v965_v2, %v1127_v1  ;;  %v933_v10 = vunpack.c.l.bf16 %v997_v60  ;;  %v902_v14 = vunpack.c.h.bf16 %v990_v49  ;;  %v999_v61 = vld [vmem:[%s1120_s6 + $0x30] sm:$0xff]  }
  0x2e   : > { %v596_v11 = vadd.f32 %v1145_v22, %v557_v4  ;;  %v541_v12 = vadd.f32 %v509_v5, %v406_v62  ;;  %v407_v13 = vmul.f32 %v869_v6, %v1125_v0  ;;  %v966_v17 = vunpack.c.h.bf16 %v1005_v50  ;;  %v992_v50 = vld [vmem:[%s1115_s28 + $0x70] sm:$0xff]  }
  0x2f   : > { %641 = vxpose.xlu0.b32.cont [5/16] (narrow) %v609_v51, 32  ;;  %v558_v15 = vadd.f32 %v526_v9, %v423_v8  ;;  %v510_v16 = vmul.f32 %v933_v10, %v1127_v1  ;;  %v627_v20 = vmax.f32 %v595_v3, 0.0  ;;  %v611_v21 = vmax.f32 %v579_v7, 0.0  ;;  %v1007_v51 = vld [vmem:[%s1120_s6 + $0x70] sm:$0xff]  }
  0x30   : > { %v424_v23 = vmul.f32 %v902_v14, %v1125_v0  ;;  %v870_v24 = vunpack.c.h.bf16 %v982_v55  ;;  %v580_v25 = vadd.f32 %v1145_v22, %v541_v12  ;;  %v527_v27 = vmul.f32 %v966_v17, %v1127_v1 }
  0x31   : > { %674 = vxpose.xlu1.b32.cont [6/16] (narrow) %v626_v56, 32  ;;  %v542_v26 = vadd.f32 %v510_v16, %v407_v13  ;;  %v934_v28 = vunpack.c.h.bf16 %v997_v60  ;;  %v628_v31 = vmax.f32 %v596_v11, 0.0  ;;  %v905_v33 = vunpack.c.l.bf16 %v991_v18  ;;  %v984_v60 = vld [vmem:[%s1115_s28 + $0x30] sm:$0xff]  }
  0x32   : > { %v408_v32 = vmul.f32 %v870_v24, %v1125_v0  ;;  %v969_v34 = vunpack.c.l.bf16 %v1006_v19  ;;  %v597_v35 = vadd.f32 %v1145_v22, %v558_v15  ;;  %v559_v37 = vadd.f32 %v527_v27, %v424_v23 }
  0x33   : > { %642 = vxpose.xlu0.b32.cont [6/16] (narrow) %v610_v57, 32  ;;  %v581_v36 = vadd.f32 %v1145_v22, %v542_v26  ;;  %v511_v38 = vmul.f32 %v934_v28, %v1127_v1  ;;  %v425_v39 = vmul.f32 %v905_v33, %v1125_v0  ;;  %v873_v41 = vunpack.c.l.bf16 %v983_v29 }
  0x34   : > { %v528_v40 = vmul.f32 %v969_v34, %v1127_v1  ;;  %v937_v42 = vunpack.c.l.bf16 %v998_v30  ;;  %v612_v43 = vmax.f32 %v580_v25, 0.0  ;;  %v906_v45 = vunpack.c.h.bf16 %v991_v18 }
  0x35   : > { %675 = vxpose.xlu1.b32.cont [7/16] (narrow) %v627_v20, 32  ;;  %v543_v44 = vadd.f32 %v511_v38, %v408_v32  ;;  %v598_v46 = vadd.f32 %v1145_v22, %v559_v37  ;;  %v409_v47 = vmul.f32 %v873_v41, %v1125_v0  ;;  %v970_v49 = vunpack.c.h.bf16 %v1006_v19  ;;  %v993_v19 = vld [vmem:[%s1115_s28 + $0x78] sm:$0xff]  }
  0x36   : > { %v512_v48 = vmul.f32 %v937_v42, %v1127_v1  ;;  %v629_v52 = vmax.f32 %v597_v35, 0.0  ;;  %v613_v53 = vmax.f32 %v581_v36, 0.0  ;;  %v426_v54 = vmul.f32 %v906_v45, %v1125_v0  ;;  %v1008_v20 = vld [vmem:[%s1120_s6 + $0x78] sm:$0xff]  }
  0x37   : > { %643 = vxpose.xlu0.b32.cont [7/16] (narrow) %v611_v21, 32  ;;  %v874_v55 = vunpack.c.h.bf16 %v983_v29  ;;  %v582_v56 = vadd.f32 %v1145_v22, %v543_v44  ;;  %v560_v57 = vadd.f32 %v528_v40, %v425_v39  ;;  %v529_v58 = vmul.f32 %v970_v49, %v1127_v1 }
  0x38   : > { %v938_v59 = vunpack.c.h.bf16 %v998_v30  ;;  %v544_v62 = vadd.f32 %v512_v48, %v409_v47  ;;  %v909_v2 = vunpack.c.l.bf16 %v992_v50  ;;  %v973_v3 = vunpack.c.l.bf16 %v1007_v51  ;;  %v985_v30 = vld [vmem:[%s1115_s28 + $0x38] sm:$0xff]  }
  0x39   : > { %676 = vxpose.xlu1.b32.cont [8/16] (narrow) %v628_v31, 32  ;;  %v410_v63 = vmul.f32 %v874_v55, %v1125_v0  ;;  %v630_v4 = vmax.f32 %v598_v46, 0.0  ;;  %v561_v5 = vadd.f32 %v529_v58, %v426_v54  ;;  %v877_v9 = vunpack.c.l.bf16 %v984_v60  ;;  %v1000_v31 = vld [vmem:[%s1120_s6 + $0x38] sm:$0xff]  }
  0x3a   : > { %v513_v6 = vmul.f32 %v938_v59, %v1127_v1  ;;  %v427_v7 = vmul.f32 %v909_v2, %v1125_v0  ;;  %v530_v8 = vmul.f32 %v973_v3, %v1127_v1  ;;  %v941_v10 = vunpack.c.l.bf16 %v999_v61 }
  0x3b   : > { %644 = vxpose.xlu0.b32.cont [8/16] (narrow) %v612_v43, 32  ;;  %v614_v11 = vmax.f32 %v582_v56, 0.0  ;;  %v599_v12 = vadd.f32 %v1145_v22, %v560_v57  ;;  %v910_v14 = vunpack.c.h.bf16 %v992_v50  ;;  %v583_v15 = vadd.f32 %v1145_v22, %v544_v62 }
  0x3c   : > { %v545_v13 = vadd.f32 %v513_v6, %v410_v63  ;;  %v411_v16 = vmul.f32 %v877_v9, %v1125_v0  ;;  %v514_v17 = vmul.f32 %v941_v10, %v1127_v1  ;;  %v974_v18 = vunpack.c.h.bf16 %v1007_v51 }
  0x3d   : > { %677 = vxpose.xlu1.b32.cont [9/16] (narrow) %v629_v52, 32  ;;  %v600_v21 = vadd.f32 %v1145_v22, %v561_v5  ;;  %v562_v24 = vadd.f32 %v530_v8, %v427_v7  ;;  %v878_v25 = vunpack.c.h.bf16 %v984_v60  ;;  %v428_v27 = vmul.f32 %v910_v14, %v1125_v0 }
  0x3e   : > { %v584_v23 = vadd.f32 %v1145_v22, %v545_v13  ;;  %v546_v26 = vadd.f32 %v514_v17, %v411_v16  ;;  %v531_v28 = vmul.f32 %v974_v18, %v1127_v1  ;;  %v942_v29 = vunpack.c.h.bf16 %v999_v61 }
  0x3f   : > { %645 = vxpose.xlu0.b32.cont [9/16] (narrow) %v613_v53, 32  ;;  %v631_v32 = vmax.f32 %v599_v12, 0.0  ;;  %v913_v33 = vunpack.c.l.bf16 %v993_v19  ;;  %v977_v34 = vunpack.c.l.bf16 %v1008_v20  ;;  %v615_v35 = vmax.f32 %v583_v15, 0.0 }
  0x40   : > { %v412_v36 = vmul.f32 %v878_v25, %v1125_v0  ;;  %v515_v37 = vmul.f32 %v942_v29, %v1127_v1  ;;  %v632_v38 = vmax.f32 %v600_v21, 0.0  ;;  %v881_v39 = vunpack.c.l.bf16 %v985_v30 }
  0x41   : > { %678 = vxpose.xlu1.b32.cont [10/16] (narrow) %v630_v4, 32  ;;  %v945_v40 = vunpack.c.l.bf16 %v1000_v31  ;;  %v616_v41 = vmax.f32 %v584_v23, 0.0  ;;  %v601_v42 = vadd.f32 %v1145_v22, %v562_v24  ;;  %v585_v43 = vadd.f32 %v1145_v22, %v546_v26 }
  0x42   : > { %v563_v44 = vadd.f32 %v531_v28, %v428_v27  ;;  %v429_v45 = vmul.f32 %v913_v33, %v1125_v0  ;;  %v532_v46 = vmul.f32 %v977_v34, %v1127_v1  ;;  %v914_v47 = vunpack.c.h.bf16 %v993_v19 }
  0x43   : > { %646 = vxpose.xlu0.b32.cont [10/16] (narrow) %v614_v11, 32  ;;  %v978_v48 = vunpack.c.h.bf16 %v1008_v20  ;;  %v547_v49 = vadd.f32 %v515_v37, %v412_v36  ;;  %v413_v50 = vmul.f32 %v881_v39, %v1125_v0  ;;  %v516_v51 = vmul.f32 %v945_v40, %v1127_v1 }
  0x44   : > { %v882_v52 = vunpack.c.h.bf16 %v985_v30  ;;  %v946_v53 = vunpack.c.h.bf16 %v1000_v31  ;;  %v633_v54 = vmax.f32 %v601_v42, 0.0  ;;  %v617_v55 = vmax.f32 %v585_v43, 0.0 }
  0x45   : > { %679 = vxpose.xlu1.b32.cont [11/16] (narrow) %v631_v32, 32  ;;  %v602_v56 = vadd.f32 %v1145_v22, %v563_v44  ;;  %v564_v57 = vadd.f32 %v532_v46, %v429_v45  ;;  %v430_v58 = vmul.f32 %v914_v47, %v1125_v0  ;;  %v533_v59 = vmul.f32 %v978_v48, %v1127_v1 }
  0x46   : > { %v586_v60 = vadd.f32 %v1145_v22, %v547_v49  ;;  %v548_v61 = vadd.f32 %v516_v51, %v413_v50  ;;  %v414_v62 = vmul.f32 %v882_v52, %v1125_v0  ;;  %v517_v63 = vmul.f32 %v946_v53, %v1127_v1 }
  0x47   : > { %647 = vxpose.xlu0.b32.cont [11/16] (narrow) %v615_v35, 32  ;;  %v634_v2 = vmax.f32 %v602_v56, 0.0  ;;  %v603_v3 = vadd.f32 %v1145_v22, %v564_v57  ;;  %v565_v4 = vadd.f32 %v533_v59, %v430_v58 }
  0x48   : > { %v618_v5 = vmax.f32 %v586_v60, 0.0  ;;  %v587_v6 = vadd.f32 %v1145_v22, %v548_v61  ;;  %v549_v7 = vadd.f32 %v517_v63, %v414_v62 }
  0x49   : > { %680 = vxpose.xlu1.b32.cont [12/16] (narrow) %v632_v38, 32  ;;  %v635_v8 = vmax.f32 %v603_v3, 0.0  ;;  %v604_v9 = vadd.f32 %v1145_v22, %v565_v4 }
  0x4a   : > { %v619_v10 = vmax.f32 %v587_v6, 0.0  ;;  %v588_v0 = vadd.f32 %v1145_v22, %v549_v7 }
  0x4b   : > { %648 = vxpose.xlu0.b32.cont [12/16] (narrow) %v616_v41, 32  ;;  %v636_v1 = vmax.f32 %v604_v9, 0.0 }
  0x4c   : > { %v620_v11 = vmax.f32 %v588_v0, 0.0 }
  0x4d   : > { %681 = vxpose.xlu1.b32.cont [13/16] (narrow) %v633_v54, 32 }
  0x4f   : > { %649 = vxpose.xlu0.b32.cont [13/16] (narrow) %v617_v55, 32 }
  0x51   : > { %682 = vxpose.xlu1.b32.cont [14/16] (narrow) %v634_v2, 32 }
  0x53   : > { %650 = vxpose.xlu0.b32.cont [14/16] (narrow) %v618_v5, 32 }
  0x55   : > { %683 = vxpose.xlu1.b32.cont [15/16] (narrow) %v635_v8, 32 }
  0x57   : > { %651 = vxpose.xlu0.b32.cont [15/16] (narrow) %v619_v10, 32 }
  0x59   : > { %684 = vxpose.xlu1.b32.end [16/16] (narrow) %v636_v1, 32 }
  0x5b   : > { %652 = vxpose.xlu0.b32.end [16/16] (narrow) %v620_v11, 32 }
  0x9d   : > { %v685_v12 = vpop.trf.xlu1 }
  0x9e   : > { %702 = vst [vmem:[%s326_s15 + $0x8] sm:$0xff] %v685_v12 }
  0x9f   : > { %v653_v13 = vpop.trf.xlu0 }
  0xa0   : > { %701 = vst [vmem:[%s326_s15] sm:$0xff] %v653_v13 }
  0xa1   : > { %v686_v14 = vpop.trf.xlu1 }
  0xa2   : > { %704 = vst [vmem:[%s326_s15 + $0x18] sm:$0xff] %v686_v14 }
  0xa3   : > { %v654_v15 = vpop.trf.xlu0 }
  0xa4   : > { %703 = vst [vmem:[%s326_s15 + $0x10] sm:$0xff] %v654_v15 }
  0xa5   : > { %v687_v22 = vpop.trf.xlu1 }
  0xa6   : > { %706 = vst [vmem:[%s326_s15 + $0x28] sm:$0xff] %v687_v22 }
  0xa7   : > { %v655_v16 = vpop.trf.xlu0 }
  0xa8   : > { %705 = vst [vmem:[%s326_s15 + $0x20] sm:$0xff] %v655_v16 }
  0xa9   : > { %v688_v17 = vpop.trf.xlu1 }
  0xaa   : > { %708 = vst [vmem:[%s326_s15 + $0x38] sm:$0xff] %v688_v17 }
  0xab   : > { %v656_v18 = vpop.trf.xlu0 }
  0xac   : > { %707 = vst [vmem:[%s326_s15 + $0x30] sm:$0xff] %v656_v18 }
  0xad PF: > { %s15_s20 = sadd.s32 1, %s1055_s20   ;;  %s1282_s18 = smov %s1051_s19 }
  0xae   : > { %p12_p5 = scmp.ge.s32.totalorder %s15_s20, 4   ;;  %s1283_s19 = smov %s1285_s21 }
  0xb0   :  { %14 = sbr.rel (!%p12_p5) target bundleno = 2 (0x2), region = 79 }

// kernel: residual_block_forward.4
= control target key start
LH: loop header
LB: loop body
LE: loop exit
PB: predicated region body
PF: predicated region fallthrough
CT: control target
= control target key end

     0   :  { %s5869_s18 = smov 0   ;;  %s7872_s0 = inlined_call_operand.vmem [shape: bf16[2,256,32], index: 0, kind: input, shape index: {}]   ;;  %s7873_s1 = inlined_call_operand.vmem [shape: f32[1,32], index: 1, kind: input, shape index: {}]   ;;  %s7874_s2 = inlined_call_operand.vmem [shape: f32[1,32], index: 2, kind: input, shape index: {}]   ;;  %s7875_s3 = inlined_call_operand.vmem [shape: bf16[288,32], index: 3, kind: input, shape index: {}]   ;;  %s7876_s4 = inlined_call_operand.vmem [shape: bf16[2,256,32], index: 4, kind: output, shape index: {0}]   ;;  %s7877_s5 = inlined_call_operand.vmem [shape: f32[2,2,32], index: 5, kind: output, shape index: {1}]  }
   0x1 LB: > { %s5114_s19 = sadd.s32 4294967295, %s5833_s18   ;;  %p5118_p0 = scmp.ge.s32.totalorder %s5833_s18, 1  ;;  %s5833_s18 = sphi %s5869_s18, %s16_s18  }
   0x2   : > { %p190_p1 = scmp.lt.s32.totalorder %s5833_s18, 3 }
   0x4   : > { %p191_p2 = pnand %p5118_p0, %p190_p1 }
   0x5   : > { %vm237_vm0 = vcmask (!%p191_p2), 257024   ;;  %vm240_vm1 = vcmask (!%p191_p2), 253952   ;;  %vm247_vm2 = vsmask.f32 (!%p191_p2), 256  ;;  %v5835_v0 = vmov (!%p191_p2), 0   ;;  %p222_p3 = scmp.lt.s32.totalorder (!%p191_p2), %s5114_s19, 1 }
   0x6   : > { %194 = sbr.rel (%p191_p2) target bundleno = 809 (0x329), region = 36  ;;  %238 = vst.msk [vmem:[#allocation2] sm:$0xf] (!%p191_p2), %vm237_vm0, %v5835_v0  ;;  %239 = vst.msk [vmem:[#allocation2 + $0x4] sm:$0xf] (!%p191_p2), %vm237_vm0, %v5835_v0  ;;  %vm1855_vm5 = vcmask (!%p191_p2), 1042432  }
   0x7   : > { %241 = vst.msk [vmem:[#allocation2 + $0x8] sm:$0x1] (!%p191_p2), %vm240_vm1, %v5835_v0  ;;  %245 = vst.msk [vmem:[#allocation2 + $0xd4] sm:$0x1] (!%p191_p2), %vm240_vm1, %v5835_v0  ;;  %v258_v2 = vld [vmem:[#allocation2 + $0x24] sm:$0x1] (!%p191_p2) }
   0x8   : > { %243 = vst.msk [vmem:[#allocation2 + $0xcc] sm:$0xf] (!%p191_p2), %vm237_vm0, %v5835_v0  ;;  %244 = vst.msk [vmem:[#allocation2 + $0xd0] sm:$0xf] (!%p191_p2), %vm237_vm0, %v5835_v0  ;;  %vm303_vm4 = vsmask.f32 (!%p191_p2), 7938 }
   0x9   : > { %vm5885_vm3 = vmand (!%p191_p2), %vm240_vm1, %vm247_vm2  ;;  %vm1856_vm6 = vcmask (!%p191_p2), 1046532   ;;  %v255_v4 = vld [vmem:[#allocation2 + $0x18] sm:$0x1] (!%p191_p2)  ;;  %v291_v6 = vld [vmem:[#allocation2 + $0xa8] sm:$0x1] (!%p191_p2)  ;;  %s5836_s28 = smov (!%p191_p2), 64  }
   0xa   : > { %v259_v3 = vsel (!%p191_p2), %vm5885_vm3, 0, %v258_v2  ;;  %v256_v5 = vsel (!%p191_p2), %vm5885_vm3, 0, %v255_v4  ;;  %v252_v7 = vld [vmem:[#allocation2 + $0xc] sm:$0x1] (!%p191_p2)  ;;  %vm5897_vm7 = vmand (!%p191_p2), %vm240_vm1, %vm303_vm4  ;;  %v292_v9 = vsel (!%p191_p2), %vm5885_vm3, 0, %v291_v6  ;;  %s5837_s29 = smov (!%p191_p2), 32  }
   0xb   : > { %260 = vst [vmem:[#allocation2 + $0x24] sm:$0x1] (!%p191_p2), %v259_v3  ;;  %257 = vst [vmem:[#allocation2 + $0x18] sm:$0x1] (!%p191_p2), %v256_v5  ;;  %v253_v10 = vsel (!%p191_p2), %vm5885_vm3, 0, %v252_v7  ;;  %s5838_s30 = smov (!%p191_p2), 96  }
   0xc   : > { %v261_v11 = vld [vmem:[#allocation2 + $0x30] sm:$0x1] (!%p191_p2)  ;;  %vm5906_vm8 = vmor (!%p191_p2), %vm1855_vm5, %vm1856_vm6  ;;  %v5920_v13 = vld [vmem:[%s7873_s1] ss:$0 sm:$0xff] (!%p191_p2)  ;;  %293 = vst [vmem:[#allocation2 + $0xa8] sm:$0x1] (!%p191_p2), %v292_v9 }
   0xd   : > { %s7891_s19 = smov (!%p222_p3, %s5114_s19), 1  ;;  %254 = vst [vmem:[#allocation2 + $0xc] sm:$0x1] %v253_v10  ;;  %v262_v14 = vsel %vm5885_vm3, 0, %v261_v11  ;;  %v308_v15 = vld [vmem:[#allocation2 + $0x14] sm:$0x1]  ;;  %vm5972_vm13 = vmand %vm237_vm0, %vm303_vm4 }
   0xe   : > { %s5418_s20 = sshll.u32 %s7891_s19, 7  ;;  %v305_v16 = vld [vmem:[#allocation2 + $0x8] sm:$0x1]  ;;  %v1759_v17 = vld [vmem:[#allocation2] sm:$0xe]  ;;  %v309_v30 = vsel %vm5897_vm7, 0, %v308_v15 }
   0xf   : > { %s5915_s23 = scalar_lea.vmem %s7872_s0, %s5418_s20  ;;  %v1760_v18 = vld [vmem:[#allocation2 + $0x4] sm:$0xf]  ;;  %vm1259_vm9 = vsmask.f32 3328  ;;  %vm1260_vm10 = vsmask.f32 7440 }
  0x10   : > { %263 = vst [vmem:[#allocation2 + $0x30] sm:$0x1] %v262_v14  ;;  %v306_v19 = vsel %vm5897_vm7, 0, %v305_v16  ;;  %v5190_v20 = vrot.slane %v1759_v17, 9  ;;  %v1860_v21 = vrot.slane %v1760_v18, 5  ;;  %v5549_v23 = vld [vmem:[%s5915_s23 + $0x10] sm:$0xff]   ;;  %vm5962_vm12 = vmor %vm1259_vm9, %vm1260_vm10 }
  0x11   : > { %v249_v22 = vld [vmem:[#allocation2] sm:$0x1]  ;;  %307 = vst [vmem:[#allocation2 + $0x8] sm:$0x1] %v306_v19  ;;  %v1212_v25 = vld [vmem:[#allocation2 + $0x4] sm:$0xf]  ;;  %v5494_v26 = vunpack.c.l.bf16 %v5549_v23  ;;  %v5495_v27 = vunpack.c.h.bf16 %v5549_v23 }
  0x12   : > { %v250_v24 = vsel %vm5885_vm3, 0, %v249_v22  ;;  %v5548_v28 = vld [vmem:[%s5915_s23 + $0x8] sm:$0xff]   ;;  %v1861_v31 = vsel %vm5906_vm8, %v5190_v20, %v1860_v21  ;;  %v1862_v32 = vrot.slane %v1860_v21, 4  ;;  %v1272_v33 = vshll.u32 %v1212_v25, 16  ;;  %v5938_v35 = vld [vmem:[%s7874_s2] ss:$0 sm:$0xff] }
  0x13   : > { %v5560_v29 = vld [vmem:[%s5915_s23 + $0x68] sm:$0xff]   ;;  %251 = vst [vmem:[#allocation2] sm:$0x1] %v250_v24  ;;  %v1276_v34 = vshrl.u32 %v1212_v25, 16  ;;  %310 = vst [vmem:[#allocation2 + $0x14] sm:$0x1] %v309_v30  ;;  %v434_v36 = vmul.f32 %v5494_v26, %v5920_v13  ;;  %v435_v37 = vmul.f32 %v5495_v27, %v5920_v13  ;;  %v5490_v38 = vunpack.c.l.bf16 %v5548_v28 }
  0x14   : > { %v5491_v39 = vunpack.c.h.bf16 %v5548_v28  ;;  %v5943_v40 = vld [vmem:[%s5915_s23] sm:$0xff]   ;;  %v5945_v41 = vrot.slane %v1272_v33, 5  ;;  %vm629_vm11 = vsmask.f32 4368  ;;  %v5538_v43 = vunpack.c.l.bf16 %v5560_v29 }
  0x15   : > { %v1278_v42 = vrot.slane %v1276_v34, 4  ;;  %v5539_v44 = vunpack.c.h.bf16 %v5560_v29  ;;  %v473_v45 = vadd.f32 %v5938_v35, %v434_v36  ;;  %v474_v46 = vadd.f32 %v5938_v35, %v435_v37  ;;  %v968_v28 = vld [vmem:[#allocation2 + $0x24] sm:$0xf]  ;;  %vm5981_vm14 = vmor %vm247_vm2, %vm629_vm11 }
  0x16   : > { %v432_v47 = vmul.f32 %v5490_v38, %v5920_v13  ;;  %v433_v48 = vmul.f32 %v5491_v39, %v5920_v13  ;;  %v456_v50 = vmul.f32 %v5538_v43, %v5920_v13  ;;  %v5486_v52 = vunpack.c.l.bf16 %v5943_v40  ;;  %v961_v43 = vld [vmem:[#allocation2 + $0x18] sm:$0xf] }
  0x17   : > { %v1279_v49 = vor.u32 %v1278_v42, %v5945_v41  ;;  %v457_v51 = vmul.f32 %v5539_v44, %v5920_v13  ;;  %v505_v53 = vmax.f32 %v473_v45, 0.0  ;;  %v506_v54 = vmax.f32 %v474_v46, 0.0 }
  0x18   : > { %v471_v55 = vadd.f32 %v5938_v35, %v432_v47  ;;  %v472_v56 = vadd.f32 %v5938_v35, %v433_v48  ;;  %v1761_v57 = vld [vmem:[#allocation2 + $0x8] sm:$0x1]  ;;  %v495_v60 = vadd.f32 %v5938_v35, %v456_v50  ;;  %v5487_v62 = vunpack.c.h.bf16 %v5943_v40 }
  0x19   : > { %v1213_v58 = vld [vmem:[#allocation2 + $0x8] sm:$0x1]  ;;  %v1280_v59 = vrot.slane %v1279_v49, 4  ;;  %v496_v61 = vadd.f32 %v5938_v35, %v457_v51  ;;  %v1863_v63 = vrot.slane %v1761_v57, 5  ;;  %v5424_v3 = vpack.c.bf16 %v505_v53, %v505_v53  ;;  %v5550_v57 = vld [vmem:[%s5915_s23 + $0x18] sm:$0xff]  }
  0x1a   : > { %v1211_v0 = vld [vmem:[#allocation2] sm:$0xf]  ;;  %v1282_v2 = vshll.u32 %v1213_v58, 16  ;;  %v5425_v4 = vpack.c.bf16 %v506_v54, %v506_v54  ;;  %v503_v9 = vmax.f32 %v471_v55, 0.0  ;;  %v504_v10 = vmax.f32 %v472_v56, 0.0 }
  0x1b   : > { %v1263_v6 = vshrl.u32 %v1211_v0, 16  ;;  %v1266_v7 = vshll.u32 %v1211_v0, 16  ;;  %v1864_v11 = vsel %vm5906_vm8, %v1862_v32, %v1863_v63  ;;  %v666_v15 = vshrl.u32 %v5424_v3, 16 }
  0x1c   : > { %v1284_v14 = vrot.slane %v1282_v2, 5  ;;  %v669_v16 = vshll.u32 %v5424_v3, 16  ;;  %v5206_v17 = vcombine.low %v1861_v31, %v1864_v11  ;;  %v674_v20 = vshrl.u32 %v5425_v4, 16  ;;  %v1045_v3 = vld [vmem:[#allocation2 + $0xa8] sm:$0xf]  ;;  %v5559_v11 = vld [vmem:[%s5915_s23 + $0x60] sm:$0xff]  }
  0x1d   : > { %v1265_v18 = vrot.slane %v1263_v6, 4  ;;  %v1268_v19 = vrot.slane %v1266_v7, 5  ;;  %v668_v22 = vrot.slane %v666_v15, 7  ;;  %v677_v23 = vshll.u32 %v5425_v4, 16 }
  0x1e   : > { %v1285_v21 = vsel %vm5962_vm12, %v1280_v59, %v1284_v14  ;;  %v5422_v24 = vpack.c.bf16 %v503_v9, %v503_v9  ;;  %2018 = vrot.lane.b32.xlu1 %v5206_v17, %s5836_s28  ;;  %v5977_v27 = vrot.slane %v674_v20, 7  ;;  %v5423_v29 = vpack.c.bf16 %v504_v10, %v504_v10 }
  0x1f   : > { %v1269_v26 = vor.u32 %v1268_v19, %v1265_v18  ;;  %v527_v30 = vmax.f32 %v495_v60, 0.0  ;;  %v671_v32 = vor.u32 %v669_v16, %v668_v22  ;;  %v672_v33 = vrot.slane %v668_v22, 4 }
  0x20   : > { %v649_v34 = vshrl.u32 %v5422_v24, 16  ;;  %v652_v36 = vshll.u32 %v5422_v24, 16  ;;  %v679_v38 = vor.u32 %v677_v23, %v5977_v27  ;;  %v681_v39 = vrot.slane %v5977_v27, 4  ;;  %v311_v23 = vld [vmem:[#allocation2 + $0x20] sm:$0x1] }
  0x21   : > { %v1270_v37 = vrot.slane %v1269_v26, 4  ;;  %v657_v42 = vshrl.u32 %v5423_v29, 16  ;;  %v969_v44 = vsel %vm5972_vm13, %v671_v32, %v968_v28  ;;  %v660_v46 = vshll.u32 %v5423_v29, 16 }
  0x22   : > { %v651_v45 = vrot.slane %v649_v34, 7  ;;  %v528_v47 = vmax.f32 %v496_v61, 0.0  ;;  %v680_v49 = vsel %vm5981_vm14, %v672_v33, %v679_v38  ;;  %970 = vst [vmem:[#allocation2 + $0x24] sm:$0xf] %v969_v44  ;;  %v5446_v51 = vpack.c.bf16 %v527_v30, %v527_v30  ;;  %v288_v61 = vld [vmem:[#allocation2 + $0x9c] sm:$0x1] }
  0x23   : > { %v1275_v48 = vsel %vm5962_vm12, %v1270_v37, %v5945_v41  ;;  %v5994_v50 = vrot.slane %v657_v42, 7  ;;  %971 = vst.msk [vmem:[#allocation2 + $0x28] sm:$0xf] %vm237_vm0, %v680_v49  ;;  %v430_v4 = vmul.f32 %v5486_v52, %v5920_v13  ;;  %v431_v9 = vmul.f32 %v5487_v62, %v5920_v13  ;;  %v344_v44 = vld [vmem:[#allocation2 + $0xa4] sm:$0x1] }
  0x24   : > { %v5174_v53 = vcombine.low %v1275_v48, %v1285_v21  ;;  %v654_v54 = vor.u32 %v652_v36, %v651_v45  ;;  %v655_v55 = vrot.slane %v651_v45, 4  ;;  %v5447_v56 = vpack.c.bf16 %v528_v47, %v528_v47 }
  0x25   : > { %v662_v58 = vor.u32 %v660_v46, %v5994_v50  ;;  %v664_v59 = vrot.slane %v5994_v50, 4  ;;  %v853_v41 = vshrl.u32 %v5446_v51, 16  ;;  %v856_v60 = vshll.u32 %v5446_v51, 16 }
  0x26   : > { %1694 = vrot.lane.b32.xlu0 %v5174_v53, %s5837_s29  ;;  %v962_v63 = vsel %vm5972_vm13, %v654_v54, %v961_v43  ;;  %v861_v0 = vshrl.u32 %v5447_v56, 16  ;;  %v864_v2 = vshll.u32 %v5447_v56, 16  ;;  %v5498_v10 = vunpack.c.l.bf16 %v5550_v57  ;;  %v954_v54 = vld [vmem:[#allocation2 + $0xc] sm:$0xf] }
  0x27   : > { %v663_v6 = vsel %vm5981_vm14, %v655_v55, %v662_v58  ;;  %963 = vst [vmem:[#allocation2 + $0x18] sm:$0xf] %v962_v63  ;;  %v855_v7 = vrot.slane %v853_v41, 7  ;;  %v469_v15 = vadd.f32 %v5938_v35, %v430_v4  ;;  %v5499_v16 = vunpack.c.h.bf16 %v5550_v57 }
  0x28   : > { %964 = vst.msk [vmem:[#allocation2 + $0x1c] sm:$0xf] %vm237_vm0, %v663_v6  ;;  %v6013_v14 = vrot.slane %v861_v0, 7  ;;  %v289_v52 = vsel %vm5885_vm3, 0, %v288_v61  ;;  %v470_v19 = vadd.f32 %v5938_v35, %v431_v9  ;;  %v436_v20 = vmul.f32 %v5498_v10, %v5920_v13  ;;  %v975_v10 = vld [vmem:[#allocation2 + $0x30] sm:$0xf] }
  0x29   : > { %v858_v17 = vor.u32 %v856_v60, %v855_v7  ;;  %v859_v18 = vrot.slane %v855_v7, 4  ;;  %290 = vst [vmem:[#allocation2 + $0x9c] sm:$0x1] %v289_v52  ;;  %v501_v21 = vmax.f32 %v469_v15, 0.0  ;;  %v437_v22 = vmul.f32 %v5499_v16, %v5920_v13 }
  0x2a   : > { %v866_v40 = vor.u32 %v864_v2, %v6013_v14  ;;  %v868_v62 = vrot.slane %v6013_v14, 4  ;;  %v5757_v24 = vld [vmem:[#allocation2 + $0x24] sm:$0xff]   ;;  %v502_v28 = vmax.f32 %v470_v19, 0.0  ;;  %v475_v29 = vadd.f32 %v5938_v35, %v436_v20 }
  0x2b   : > { %v1046_v26 = vsel %vm5972_vm13, %v858_v17, %v1045_v3  ;;  %v5534_v30 = vunpack.c.l.bf16 %v5559_v11  ;;  %v5420_v33 = vpack.c.bf16 %v501_v21, %v501_v21  ;;  %v476_v34 = vadd.f32 %v5938_v35, %v437_v22  ;;  %3207 = vrot.lane.b32.xlu0 %v5757_v24, %s5836_s28  ;;  %v5558_v3 = vld [vmem:[%s5915_s23 + $0x58] sm:$0xff]   ;;  %v5778_v14 = vld [vmem:[%s7875_s3 + $0x40] sm:$0xff]  }
  0x2c   : > { %v867_v32 = vsel %vm5981_vm14, %v859_v18, %v866_v40  ;;  %1047 = vst [vmem:[#allocation2 + $0xa8] sm:$0xf] %v1046_v26  ;;  %v5535_v36 = vunpack.c.h.bf16 %v5559_v11  ;;  %v5421_v37 = vpack.c.bf16 %v502_v28, %v502_v28  ;;  %v507_v38 = vmax.f32 %v475_v29, 0.0  ;;  %v958_v11 = vld [vmem:[#allocation2 + $0x14] sm:$0x1]  ;;  %5563 = vmatprep.subr.bf16.mxu0 %v5778_v14  ;;  %5729 = vmatprep.subr.bf16.mxu1 %v5778_v14 }
  0x2d   : > { %1048 = vst.msk [vmem:[#allocation2 + $0xac] sm:$0xf] %vm237_vm0, %v867_v32  ;;  %v454_v42 = vmul.f32 %v5534_v30, %v5920_v13  ;;  %v312_v43 = vsel %vm5897_vm7, 0, %v311_v23  ;;  %v632_v45 = vshrl.u32 %v5420_v33, 16  ;;  %v635_v46 = vshll.u32 %v5420_v33, 16 }
  0x2e   : > { %v508_v47 = vmax.f32 %v476_v34, 0.0  ;;  %v455_v48 = vmul.f32 %v5535_v36, %v5920_v13  ;;  %313 = vst [vmem:[#allocation2 + $0x20] sm:$0x1] %v312_v43  ;;  %v640_v51 = vshrl.u32 %v5421_v37, 16  ;;  %v643_v53 = vshll.u32 %v5421_v37, 16 }
  0x2f   : > { %v5758_v49 = vld [vmem:[#allocation2 + $0x18] sm:$0xff]   ;;  %v5426_v55 = vpack.c.bf16 %v507_v38, %v507_v38  ;;  %v493_v56 = vadd.f32 %v5938_v35, %v454_v42  ;;  %v634_v57 = vrot.slane %v632_v45, 7  ;;  %v345_v60 = vsel %vm5897_vm7, 0, %v344_v44  ;;  %v285_v30 = vld [vmem:[#allocation2 + $0x90] sm:$0x1] }
  0x30   : > { %v5427_v58 = vpack.c.bf16 %v508_v47, %v508_v47  ;;  %v494_v41 = vadd.f32 %v5938_v35, %v455_v48  ;;  %3205 = vrot.lane.b32.xlu1 %v5758_v49, %s5836_s28  ;;  %v642_v61 = vrot.slane %v640_v51, 7  ;;  %346 = vst [vmem:[#allocation2 + $0xa4] sm:$0x1] %v345_v60  ;;  %v2775_v21 = vld [vmem:[#allocation2 + $0x18] sm:$0xe]  ;;  %v5530_v22 = vunpack.c.l.bf16 %v5558_v3  ;;  %v5561_v60 = vld [vmem:[%s5915_s23 + $0x70] sm:$0xff]  }
  0x31   : > { %v683_v63 = vshrl.u32 %v5426_v55, 16  ;;  %v686_v0 = vshll.u32 %v5426_v55, 16  ;;  %v525_v2 = vmax.f32 %v493_v56, 0.0  ;;  %v637_v4 = vor.u32 %v635_v46, %v634_v57  ;;  %v2776_v37 = vld [vmem:[#allocation2 + $0x1c] sm:$0xf] }
  0x32   : > { %v638_v6 = vrot.slane %v634_v57, 4  ;;  %v691_v7 = vshrl.u32 %v5427_v58, 16  ;;  %v694_v9 = vshll.u32 %v5427_v58, 16  ;;  %v645_v15 = vor.u32 %v643_v53, %v642_v61  ;;  %v341_v38 = vld [vmem:[#allocation2 + $0x98] sm:$0x1] }
  0x33   : > { %v647_v16 = vrot.slane %v642_v61, 4  ;;  %v685_v52 = vrot.slane %v683_v63, 7  ;;  %v526_v17 = vmax.f32 %v494_v41, 0.0  ;;  %v955_v19 = vsel %vm5972_vm13, %v637_v4, %v954_v54  ;;  %v314_v51 = vld [vmem:[#allocation2 + $0x2c] sm:$0x1] }
  0x34   : > { %v5759_v18 = vld [vmem:[#allocation2 + $0xa8] sm:$0xff]   ;;  %v6043_v20 = vrot.slane %v691_v7, 7  ;;  %v5444_v40 = vpack.c.bf16 %v525_v2, %v525_v2  ;;  %v646_v23 = vsel %vm5981_vm14, %v638_v6, %v645_v15  ;;  %956 = vst [vmem:[#allocation2 + $0xc] sm:$0xf] %v955_v19  ;;  %v5255_v45 = vrot.slane %v2775_v21, 9 }
  0x35   : > { %v688_v24 = vor.u32 %v686_v0, %v685_v52  ;;  %v689_v26 = vrot.slane %v685_v52, 4  ;;  %v959_v28 = vsel %vm5885_vm3, %v647_v16, %v958_v11  ;;  %v965_v29 = vld [vmem:[#allocation2 + $0x20] sm:$0x1]  ;;  %3229 = vrot.lane.b32.xlu0 %v5759_v18, %s5836_s28  ;;  %957 = vst.msk [vmem:[#allocation2 + $0x10] sm:$0xf] %vm237_vm0, %v646_v23  ;;  %v5445_v34 = vpack.c.bf16 %v526_v17, %v526_v17  ;;  %v5762_v16 = vld [vmem:[#allocation2 + $0x18] sm:$0xff]  }
  0x36   : > { %v696_v32 = vor.u32 %v694_v9, %v6043_v20  ;;  %v698_v33 = vrot.slane %v6043_v20, 4  ;;  %960 = vst [vmem:[#allocation2 + $0x14] sm:$0x1] %v959_v28  ;;  %v836_v36 = vshrl.u32 %v5444_v40, 16  ;;  %v839_v43 = vshll.u32 %v5444_v40, 16  ;;  %v6079_v11 = vld [vmem:[%s5915_s23 + $0x20] sm:$0xff]  }
  0x37   : > { %v976_v42 = vsel %vm5972_vm13, %v688_v24, %v975_v10  ;;  %v966_v44 = vsel %vm5885_vm3, %v664_v59, %v965_v29  ;;  %v844_v48 = vshrl.u32 %v5445_v34, 16  ;;  %v847_v49 = vshll.u32 %v5445_v34, 16  ;;  %v1038_v53 = vld [vmem:[#allocation2 + $0x9c] sm:$0xf]  ;;  %v1042_v0 = vld [vmem:[#allocation2 + $0xa4] sm:$0x1] }
  0x38   : > { %v697_v46 = vsel %vm5981_vm14, %v689_v26, %v696_v32  ;;  %977 = vst [vmem:[#allocation2 + $0x30] sm:$0xf] %v976_v42  ;;  %v838_v47 = vrot.slane %v836_v36, 7  ;;  %967 = vst [vmem:[#allocation2 + $0x20] sm:$0x1] %v966_v44  ;;  %v2877_v54 = vrot.slane %v2776_v37, 5  ;;  %v5531_v55 = vunpack.c.h.bf16 %v5558_v3 }
  0x39   : > { %978 = vst.msk [vmem:[#allocation2 + $0x34] sm:$0xf] %vm237_vm0, %v697_v46  ;;  %v286_v50 = vsel %vm5885_vm3, 0, %v285_v30  ;;  %v342_v59 = vsel %vm5897_vm7, 0, %v341_v38  ;;  %v846_v58 = vrot.slane %v844_v48, 7  ;;  %v452_v41 = vmul.f32 %v5530_v22, %v5920_v13  ;;  %v5781_v20 = vld [vmem:[%s7875_s3 + $0x48] sm:$0xff]  }
  0x3a   : > { %v841_v56 = vor.u32 %v839_v43, %v838_v47  ;;  %v842_v57 = vrot.slane %v838_v47, 4  ;;  %287 = vst [vmem:[#allocation2 + $0x90] sm:$0x1] %v286_v50  ;;  %343 = vst [vmem:[#allocation2 + $0x98] sm:$0x1] %v342_v59  ;;  %v6070_v61 = vsel %vm5906_vm8, %v5255_v45, %v2877_v54  ;;  %v2879_v63 = vrot.slane %v2877_v54, 4 }
  0x3b   : > { %v453_v2 = vmul.f32 %v5531_v55, %v5920_v13  ;;  %v315_v3 = vsel %vm5897_vm7, 0, %v314_v51  ;;  %v2772_v4 = vld [vmem:[#allocation2 + $0xc] sm:$0xe]  ;;  %v849_v6 = vor.u32 %v847_v49, %v846_v58  ;;  %v851_v7 = vrot.slane %v846_v58, 4  ;;  %v2778_v55 = vld [vmem:[#allocation2 + $0x24] sm:$0xe] }
  0x3c   : > { %v1039_v9 = vsel %vm5972_vm13, %v841_v56, %v1038_v53  ;;  %v491_v10 = vadd.f32 %v5938_v35, %v452_v41  ;;  %316 = vst [vmem:[#allocation2 + $0x2c] sm:$0x1] %v315_v3  ;;  %v5760_v15 = vld [vmem:[#allocation2 + $0xc] sm:$0xff]   ;;  %v5254_v17 = vrot.slane %v2772_v4, 9  ;;  %v5542_v19 = vunpack.c.l.bf16 %v5561_v60 }
  0x3d   : > { %v2773_v52 = vld [vmem:[#allocation2 + $0x10] sm:$0xf]  ;;  %1040 = vst [vmem:[#allocation2 + $0x9c] sm:$0xf] %v1039_v9  ;;  %v492_v18 = vadd.f32 %v5938_v35, %v453_v2  ;;  %v5543_v40 = vunpack.c.h.bf16 %v5561_v60  ;;  %v2774_v21 = vld [vmem:[#allocation2 + $0x14] sm:$0x1]  ;;  %v850_v23 = vsel %vm5981_vm14, %v842_v57, %v849_v6  ;;  %v1043_v26 = vsel %vm5885_vm3, %v851_v7, %v1042_v0  ;;  %2195 = vrot.lane.b32.xlu1 %v5760_v15, %s5838_s30 }
  0x3e   : > { %v2870_v22 = vrot.slane %v2773_v52, 5  ;;  %v1762_v24 = vld [vmem:[#allocation2 + $0xc] sm:$0xe]  ;;  %v523_v28 = vmax.f32 %v491_v10, 0.0  ;;  %v2873_v29 = vrot.slane %v2774_v21, 5  ;;  %v458_v34 = vmul.f32 %v5542_v19, %v5920_v13 }
  0x3f   : > { %1041 = vst.msk [vmem:[#allocation2 + $0xa0] sm:$0xf] %vm237_vm0, %v850_v23  ;;  %v2777_v30 = vld [vmem:[#allocation2 + $0x20] sm:$0x1]  ;;  %v5191_v32 = vrot.slane %v1762_v24, 9  ;;  %v459_v36 = vmul.f32 %v5543_v40, %v5920_v13  ;;  %v524_v44 = vmax.f32 %v492_v18, 0.0  ;;  %v5502_v51 = vunpack.c.l.bf16 %v6079_v11 }
  0x40   : > { %1044 = vst [vmem:[#allocation2 + $0xa4] sm:$0x1] %v1043_v26  ;;  %v5761_v37 = vld [vmem:[#allocation2 + $0x30] sm:$0xff]   ;;  %v2871_v38 = vsel %vm5906_vm8, %v5254_v17, %v2870_v22  ;;  %v2872_v42 = vrot.slane %v2870_v22, 4  ;;  %v2880_v43 = vrot.slane %v2777_v30, 5  ;;  %v5442_v47 = vpack.c.bf16 %v523_v28, %v523_v28 }
  0x41   : > { %v1763_v45 = vld [vmem:[#allocation2 + $0x10] sm:$0xf]  ;;  %v1764_v46 = vld [vmem:[#allocation2 + $0x14] sm:$0x1]  ;;  %v6093_v48 = vadd.f32 %v5938_v35, %v458_v34  ;;  %v6096_v49 = vadd.f32 %v5938_v35, %v459_v36  ;;  %3209 = vrot.lane.b32.xlu0 %v5761_v37, %s5836_s28  ;;  %2197 = vrot.lane.b32.xlu1 %v5762_v16, %s5838_s30  ;;  %v5443_v35 = vpack.c.bf16 %v524_v44, %v524_v44  ;;  %v2779_v60 = vld [vmem:[#allocation2 + $0x28] sm:$0xf]  ;;  %v5503_v27 = vunpack.c.h.bf16 %v6079_v11 }
  0x42   : > { %v2874_v53 = vsel %vm5906_vm8, %v2872_v42, %v2873_v29  ;;  %v2881_v54 = vsel %vm5906_vm8, %v2879_v63, %v2880_v43  ;;  %v1867_v50 = vrot.slane %v1763_v45, 5  ;;  %v1870_v59 = vrot.slane %v1764_v46, 5  ;;  %v1765_v0 = vld [vmem:[#allocation2 + $0x18] sm:$0xe]  ;;  %v1766_v7 = vld [vmem:[#allocation2 + $0x1c] sm:$0xf] }
  0x43   : > { %v5270_v56 = vcombine.low %v2871_v38, %v2874_v53  ;;  %v5271_v57 = vcombine.low %v6070_v61, %v2881_v54  ;;  %v819_v58 = vshrl.u32 %v5442_v47, 16  ;;  %v972_v41 = vld [vmem:[#allocation2 + $0x2c] sm:$0x1]  ;;  %v822_v6 = vshll.u32 %v5442_v47, 16  ;;  %v1031_v16 = vld [vmem:[#allocation2 + $0x90] sm:$0xf] }
  0x44   : > { %v1868_v2 = vsel %vm5906_vm8, %v5191_v32, %v1867_v50  ;;  %v1869_v3 = vrot.slane %v1867_v50, 4  ;;  %v2808_v4 = vld [vmem:[#allocation2 + $0x9c] sm:$0xe]  ;;  %v973_v63 = vsel %vm5885_vm3, %v681_v39, %v972_v41  ;;  %v827_v61 = vshrl.u32 %v5443_v35, 16  ;;  %v1767_v30 = vld [vmem:[#allocation2 + $0x20] sm:$0x1] }
  0x45   : > { %v5266_v9 = vrot.slane %v2808_v4, 9  ;;  %v821_v10 = vrot.slane %v819_v58, 7  ;;  %v830_v15 = vshll.u32 %v5443_v35, 16  ;;  %974 = vst [vmem:[#allocation2 + $0x2c] sm:$0x1] %v973_v63  ;;  %3028 = vrot.lane.b32.xlu0 %v5270_v56, %s5837_s29  ;;  %v5256_v19 = vrot.slane %v2778_v55, 9 }
  0x46   : > { %v5763_v52 = vld [vmem:[#allocation2 + $0x9c] sm:$0xff]   ;;  %v1871_v17 = vsel %vm5906_vm8, %v1869_v3, %v1870_v59  ;;  %v6117_v40 = vmul.f32 %v5502_v51, %v5920_v13  ;;  %v829_v28 = vrot.slane %v827_v61, 7  ;;  %v2884_v29 = vrot.slane %v2779_v60, 5  ;;  %v1035_v38 = vld [vmem:[#allocation2 + $0x98] sm:$0x1] }
  0x47   : > { %v2809_v18 = vld [vmem:[#allocation2 + $0xa0] sm:$0xf]  ;;  %v5207_v39 = vcombine.low %v1868_v2, %v1871_v17  ;;  %v2810_v21 = vld [vmem:[#allocation2 + $0xa4] sm:$0x1]  ;;  %v824_v23 = vor.u32 %v822_v6, %v821_v10  ;;  %v825_v24 = vrot.slane %v821_v10, 4  ;;  %2219 = vrot.lane.b32.xlu1 %v5763_v52, %s5838_s30  ;;  %v5192_v32 = vrot.slane %v1765_v0, 9 }
  0x48   : > { %v2954_v22 = vrot.slane %v2809_v18, 5  ;;  %v2957_v26 = vrot.slane %v2810_v21, 5  ;;  %v1874_v42 = vrot.slane %v1766_v7, 5  ;;  %v3269_v43 = vld [vmem:[#allocation2 + $0x18] sm:$0xf]  ;;  %v832_v44 = vor.u32 %v830_v15, %v829_v28 }
  0x49   : > { %v1032_v37 = vsel %vm5972_vm13, %v824_v23, %v1031_v16  ;;  %3030 = vrot.lane.b32.xlu0 %v5271_v57, %s5837_s29  ;;  %v834_v45 = vrot.slane %v829_v28, 4  ;;  %v2885_v46 = vsel %vm5906_vm8, %v5256_v19, %v2884_v29  ;;  %v2886_v47 = vrot.slane %v2884_v29, 4  ;;  %v3270_v51 = vld [vmem:[#allocation2 + $0x1c] sm:$0xf]  ;;  %v3271_v55 = vld [vmem:[#allocation2 + $0x20] sm:$0x1] }
  0x4a   : > { %v2955_v34 = vsel %vm5906_vm8, %v5266_v9, %v2954_v22  ;;  %v2956_v36 = vrot.slane %v2954_v22, 4  ;;  %1033 = vst [vmem:[#allocation2 + $0x90] sm:$0xf] %v1032_v37  ;;  %v6131_v54 = vsel %vm5906_vm8, %v5192_v32, %v1874_v42  ;;  %v1876_v50 = vrot.slane %v1874_v42, 4  ;;  %v1214_v60 = vld [vmem:[#allocation2 + $0xc] sm:$0xf] }
  0x4b   : > { %v1877_v59 = vrot.slane %v1767_v30, 5  ;;  %2020 = vrot.lane.b32.xlu1 %v5207_v39, %s5836_s28  ;;  %v833_v57 = vsel %vm5981_vm14, %v825_v24, %v832_v44  ;;  %v1036_v35 = vsel %vm5885_vm3, %v834_v45, %v1035_v38  ;;  %v3318_v41 = vshrl.u32 %v3269_v43, 16  ;;  %v1215_v10 = vld [vmem:[#allocation2 + $0x10] sm:$0xf]  ;;  %v1216_v52 = vld [vmem:[#allocation2 + $0x14] sm:$0x1] }
  0x4c   : > { %v2958_v53 = vsel %vm5906_vm8, %v2956_v36, %v2957_v26  ;;  %v2780_v58 = vld [vmem:[#allocation2 + $0x2c] sm:$0x1]  ;;  %1034 = vst.msk [vmem:[#allocation2 + $0x94] sm:$0xf] %vm237_vm0, %v833_v57  ;;  %1037 = vst [vmem:[#allocation2 + $0x98] sm:$0x1] %v1036_v35 }
  0x4d   : > { %v5282_v56 = vcombine.low %v2955_v34, %v2958_v53  ;;  %v2887_v0 = vrot.slane %v2780_v58, 5  ;;  %v6141_v2 = vsel %vm5906_vm8, %v1876_v50, %v1877_v59  ;;  %v3321_v3 = vshll.u32 %v3269_v43, 16  ;;  %v3272_v22 = vld [vmem:[#allocation2 + $0x24] sm:$0xf]  ;;  %v3273_v57 = vld [vmem:[#allocation2 + $0x28] sm:$0xf] }
  0x4e   : > { %v3327_v4 = vshll.u32 %v3270_v51, 16  ;;  %v5208_v6 = vcombine.low %v6131_v54, %v6141_v2  ;;  %v3320_v63 = vrot.slane %v3318_v41, 4  ;;  %v3331_v7 = vshrl.u32 %v3270_v51, 16  ;;  %v3274_v35 = vld [vmem:[#allocation2 + $0x2c] sm:$0x1] }
  0x4f   : > { %3052 = vrot.lane.b32.xlu0 %v5282_v56, %s5837_s29  ;;  %v3337_v9 = vshll.u32 %v3271_v55, 16  ;;  %v2888_v61 = vsel %vm5906_vm8, %v2886_v47, %v2887_v0  ;;  %v3323_v15 = vrot.slane %v3321_v3, 5  ;;  %v1287_v17 = vshrl.u32 %v1214_v60, 16 }
  0x50   : > { %v3329_v16 = vrot.slane %v3327_v4, 5  ;;  %v5272_v18 = vcombine.low %v2885_v46, %v2888_v61  ;;  %v3333_v19 = vrot.slane %v3331_v7, 4  ;;  %v1290_v21 = vshll.u32 %v1214_v60, 16 }
  0x51   : > { %v3339_v39 = vrot.slane %v3337_v9, 5  ;;  %v1795_v23 = vld [vmem:[#allocation2 + $0x90] sm:$0xe]  ;;  %v3324_v24 = vor.u32 %v3323_v15, %v3320_v63  ;;  %v1289_v26 = vrot.slane %v1287_v17, 4  ;;  %v1296_v28 = vshll.u32 %v1215_v10, 16 }
  0x52   : > { %v1300_v29 = vshrl.u32 %v1215_v10, 16  ;;  %v5202_v30 = vrot.slane %v1795_v23, 9  ;;  %v3334_v32 = vor.u32 %v3333_v19, %v3329_v16  ;;  %v1292_v34 = vrot.slane %v1290_v21, 5  ;;  %v1247_v3 = vld [vmem:[#allocation2 + $0x90] sm:$0xf] }
  0x53   : > { %3032 = vrot.lane.b32.xlu0 %v5272_v18, %s5837_s29  ;;  %v1306_v36 = vshll.u32 %v1216_v52, 16  ;;  %v3325_v37 = vrot.slane %v3324_v24, 4  ;;  %v1298_v38 = vrot.slane %v1296_v28, 5  ;;  %v3342_v43 = vshrl.u32 %v3272_v22, 16  ;;  %v1796_v44 = vld [vmem:[#allocation2 + $0x94] sm:$0xf] }
  0x54   : > { %v1302_v42 = vrot.slane %v1300_v29, 4  ;;  %v1797_v45 = vld [vmem:[#allocation2 + $0x98] sm:$0x1]  ;;  %v3335_v46 = vrot.slane %v3334_v32, 4  ;;  %v1293_v47 = vor.u32 %v1292_v34, %v1289_v26  ;;  %v6152_v53 = vmul.f32 %v5503_v27, %v5920_v13  ;;  %v1248_v63 = vld [vmem:[#allocation2 + $0x94] sm:$0xf] }
  0x55   : > { %v1308_v51 = vrot.slane %v1306_v36, 5  ;;  %v1944_v50 = vrot.slane %v1796_v44, 5  ;;  %v1947_v59 = vrot.slane %v1797_v45, 5  ;;  %v3330_v55 = vsel %vm5962_vm12, %v3325_v37, %v3329_v16  ;;  %v1249_v17 = vld [vmem:[#allocation2 + $0x98] sm:$0x1] }
  0x56   : > { %v1303_v56 = vor.u32 %v1302_v42, %v1298_v38  ;;  %v3340_v58 = vsel %vm5962_vm12, %v3335_v46, %v3339_v39  ;;  %v1294_v41 = vrot.slane %v1293_v47, 4  ;;  %v3344_v60 = vrot.slane %v3342_v43, 4  ;;  %v1217_v23 = vld [vmem:[#allocation2 + $0x18] sm:$0xf]  ;;  %v1219_v43 = vld [vmem:[#allocation2 + $0x20] sm:$0x1] }
  0x57   : > { %v3345_v0 = vshll.u32 %v3272_v22, 16  ;;  %v1945_v11 = vsel %vm5906_vm8, %v5202_v30, %v1944_v50  ;;  %v1946_v13 = vrot.slane %v1944_v50, 4  ;;  %v5302_v27 = vcombine.low %v3330_v55, %v3340_v58  ;;  %v1218_v30 = vld [vmem:[#allocation2 + $0x1c] sm:$0xf] }
  0x58   : > { %v1304_v4 = vrot.slane %v1303_v56, 4  ;;  %v1299_v7 = vsel %vm5962_vm12, %v1294_v41, %v1298_v38  ;;  %v3351_v10 = vshll.u32 %v3273_v57, 16  ;;  %v3355_v61 = vshrl.u32 %v3273_v57, 16 }
  0x59   : > { %v3347_v9 = vrot.slane %v3345_v0, 5  ;;  %v1948_v15 = vsel %vm5906_vm8, %v1946_v13, %v1947_v59  ;;  %3749 = vrot.lane.b32.xlu0 %v5302_v27, %s5838_s30  ;;  %v3361_v52 = vshll.u32 %v3274_v35, 16  ;;  %v1551_v18 = vshrl.u32 %v1247_v3, 16  ;;  %v347_v59 = vld [vmem:[#allocation2 + $0xb0] sm:$0x1] }
  0x5a   : > { %v1309_v16 = vsel %vm5962_vm12, %v1304_v4, %v1308_v51  ;;  %v5218_v19 = vcombine.low %v1945_v11, %v1948_v15  ;;  %v3353_v22 = vrot.slane %v3351_v10, 5  ;;  %v3357_v24 = vrot.slane %v3355_v61, 4 }
  0x5b   : > { %v5175_v39 = vcombine.low %v1299_v7, %v1309_v16  ;;  %v3348_v21 = vor.u32 %v3347_v9, %v3344_v60  ;;  %v3363_v26 = vrot.slane %v3361_v52, 5  ;;  %v1553_v28 = vrot.slane %v1551_v18, 4  ;;  %v317_v16 = vld [vmem:[#allocation2 + $0x38] sm:$0x1] }
  0x5c   : > { %v1554_v29 = vshll.u32 %v1247_v3, 16  ;;  %2042 = vrot.lane.b32.xlu1 %v5218_v19, %s5836_s28  ;;  %v1560_v34 = vshll.u32 %v1248_v63, 16  ;;  %v1564_v36 = vshrl.u32 %v1248_v63, 16  ;;  %v1570_v37 = vshll.u32 %v1249_v17, 16  ;;  %v3305_v3 = vld [vmem:[#allocation2 + $0xa8] sm:$0xf] }
  0x5d   : > { %v3349_v32 = vrot.slane %v3348_v21, 4  ;;  %v3358_v38 = vor.u32 %v3357_v24, %v3353_v22  ;;  %v1311_v44 = vshrl.u32 %v1217_v23, 16  ;;  %v1314_v45 = vshll.u32 %v1217_v23, 16  ;;  %v3306_v63 = vld [vmem:[#allocation2 + $0xac] sm:$0xf] }
  0x5e   : > { %v1556_v42 = vrot.slane %v1554_v29, 5  ;;  %v1562_v47 = vrot.slane %v1560_v34, 5  ;;  %v1566_v51 = vrot.slane %v1564_v36, 4  ;;  %v1572_v50 = vrot.slane %v1570_v37, 5  ;;  %v3275_v21 = vld [vmem:[#allocation2 + $0x30] sm:$0xf] }
  0x5f   : > { %v3354_v46 = vsel %vm5962_vm12, %v3349_v32, %v3353_v22  ;;  %v3359_v55 = vrot.slane %v3358_v38, 4  ;;  %v1313_v57 = vrot.slane %v1311_v44, 4  ;;  %v1316_v35 = vrot.slane %v1314_v45, 5  ;;  %v3276_v22 = vld [vmem:[#allocation2 + $0x34] sm:$0xf] }
  0x60   : > { %v1557_v56 = vor.u32 %v1556_v42, %v1553_v28  ;;  %2022 = vrot.lane.b32.xlu1 %v5208_v6, %s5836_s28  ;;  %v1567_v58 = vor.u32 %v1566_v51, %v1562_v47  ;;  %v1320_v41 = vshll.u32 %v1218_v30, 16  ;;  %v1324_v60 = vshrl.u32 %v1218_v30, 16  ;;  %v2811_v29 = vld [vmem:[#allocation2 + $0xa8] sm:$0xe]  ;;  %v1250_v51 = vld [vmem:[#allocation2 + $0x9c] sm:$0xf] }
  0x61   : > { %v1330_v0 = vshll.u32 %v1219_v43, 16  ;;  %v3364_v11 = vsel %vm5962_vm12, %v3359_v55, %v3363_v26  ;;  %v1317_v27 = vor.u32 %v1316_v35, %v1313_v57  ;;  %v348_v4 = vsel %vm5897_vm7, 0, %v347_v59  ;;  %v2812_v43 = vld [vmem:[#allocation2 + $0xac] sm:$0xf] }
  0x62   : > { %v1558_v13 = vrot.slane %v1557_v56, 4  ;;  %v5303_v7 = vcombine.low %v3354_v46, %v3364_v11  ;;  %v1568_v9 = vrot.slane %v1567_v58, 4  ;;  %v1322_v10 = vrot.slane %v1320_v41, 5  ;;  %349 = vst [vmem:[#allocation2 + $0xb0] sm:$0x1] %v348_v4 }
  0x63   : > { %v1326_v61 = vrot.slane %v1324_v60, 4  ;;  %v1318_v2 = vrot.slane %v1317_v27, 4  ;;  %v1332_v6 = vrot.slane %v1330_v0, 5  ;;  %v3606_v15 = vshrl.u32 %v3305_v3, 16  ;;  %v1252_v4 = vld [vmem:[#allocation2 + $0xa4] sm:$0x1] }
  0x64   : > { %v1563_v54 = vsel %vm5962_vm12, %v1558_v13, %v1562_v47  ;;  %1696 = vrot.lane.b32.xlu1 %v5175_v39, %s5837_s29  ;;  %3751 = vrot.lane.b32.xlu0 %v5303_v7, %s5838_s30  ;;  %v1573_v52 = vsel %vm5962_vm12, %v1568_v9, %v1572_v50  ;;  %v3609_v18 = vshll.u32 %v3305_v3, 16  ;;  %v3615_v19 = vshll.u32 %v3306_v63, 16  ;;  %v1251_v50 = vld [vmem:[#allocation2 + $0xa0] sm:$0xf]  ;;  %v294_v3 = vld [vmem:[#allocation2 + $0xb4] sm:$0x1] }
  0x65   : > { %v1327_v17 = vor.u32 %v1326_v61, %v1322_v10  ;;  %v5186_v23 = vcombine.low %v1563_v54, %v1573_v52  ;;  %v1323_v24 = vsel %vm5962_vm12, %v1318_v2, %v1322_v10  ;;  %v3608_v26 = vrot.slane %v3606_v15, 4  ;;  %v1798_v61 = vld [vmem:[#allocation2 + $0x9c] sm:$0xe]  ;;  %v1799_v54 = vld [vmem:[#allocation2 + $0xa0] sm:$0xf] }
  0x66   : > { %v3619_v28 = vshrl.u32 %v3306_v63, 16  ;;  %v3611_v32 = vrot.slane %v3609_v18, 5  ;;  %v6186_v39 = vrot.slane %v3615_v19, 5  ;;  %v318_v34 = vsel %vm5897_vm7, 0, %v317_v16  ;;  %v1800_v2 = vld [vmem:[#allocation2 + $0xa4] sm:$0x1] }
  0x67   : > { %v1328_v30 = vrot.slane %v1327_v17, 4  ;;  %319 = vst [vmem:[#allocation2 + $0x38] sm:$0x1] %v318_v34  ;;  %v3366_v37 = vshrl.u32 %v3275_v21, 16  ;;  %v3369_v38 = vshll.u32 %v3275_v21, 16  ;;  %v3375_v42 = vshll.u32 %v3276_v22, 16 }
  0x68   : > { %v3621_v36 = vrot.slane %v3619_v28, 4  ;;  %1718 = vrot.lane.b32.xlu1 %v5186_v23, %s5837_s29  ;;  %v3612_v45 = vor.u32 %v3611_v32, %v3608_v26  ;;  %v3379_v46 = vshrl.u32 %v3276_v22, 16  ;;  %v5267_v47 = vrot.slane %v2811_v29, 9  ;;  %v5780_v29 = vld [vmem:[%s7875_s3] sm:$0xff]  }
  0x69   : > { %v1333_v44 = vsel %vm5962_vm12, %v1328_v30, %v1332_v6  ;;  %v1049_v55 = vld [vmem:[#allocation2 + $0xb0] sm:$0x1]  ;;  %v3368_v57 = vrot.slane %v3366_v37, 4  ;;  %v3371_v35 = vrot.slane %v3369_v38, 5  ;;  %v6200_v60 = vrot.slane %v3375_v42, 5  ;;  %5564 = vmatpush3.bf16.msra.mxu0 %v5780_v29  ;;  %5737 = vmatpush3.bf16.msra.mxu1 %v5780_v29 }
  0x6a   : > { %v5176_v59 = vcombine.low %v1323_v24, %v1333_v44  ;;  %v3622_v56 = vor.u32 %v3621_v36, %v6186_v39  ;;  %v1050_v58 = vsel %vm5885_vm3, %v868_v62, %v1049_v55  ;;  %v6198_v41 = vrot.slane %v3612_v45, 4  ;;  %5565 = vmatprep.subr.bf16.mxu0 %v5781_v20  ;;  %5730 = vmatprep.subr.bf16.mxu1 %v5781_v20 }
  0x6b   : > { %v3381_v0 = vrot.slane %v3379_v46, 4  ;;  %1051 = vst [vmem:[#allocation2 + $0xb0] sm:$0x1] %v1050_v58  ;;  %v3372_v13 = vor.u32 %v3371_v35, %v3368_v57  ;;  %v2961_v27 = vrot.slane %v2812_v43, 5  ;;  %v1575_v63 = vshrl.u32 %v1250_v51, 16 }
  0x6c   : > { %1698 = vrot.lane.b32.xlu0 %v5176_v59, %s5837_s29  ;;  %v6203_v11 = vrot.slane %v3622_v56, 4  ;;  %v3618_v62 = vsel %vm5962_vm12, %v6198_v41, %v6186_v39  ;;  %v1578_v9 = vshll.u32 %v1250_v51, 16  ;;  %v1584_v10 = vshll.u32 %v1251_v50, 16 }
  0x6d   : > { %v3382_v7 = vor.u32 %v3381_v0, %v6200_v60  ;;  %v6213_v6 = vrot.slane %v3372_v13, 4  ;;  %v6217_v15 = vsel %vm5906_vm8, %v5267_v47, %v2961_v27  ;;  %v2963_v16 = vrot.slane %v2961_v27, 4  ;;  %v350_v27 = vld [vmem:[#allocation2 + $0xbc] sm:$0x1] }
  0x6e   : > { %v1577_v52 = vrot.slane %v1575_v63, 4  ;;  %v979_v17 = vld [vmem:[#allocation2 + $0x38] sm:$0x1]  ;;  %v1580_v19 = vrot.slane %v1578_v9, 5  ;;  %v1586_v21 = vrot.slane %v1584_v10, 5  ;;  %v1588_v22 = vshrl.u32 %v1251_v50, 16 }
  0x6f   : > { %v6219_v18 = vrot.slane %v3382_v7, 4  ;;  %v980_v23 = vsel %vm5885_vm3, %v698_v33, %v979_v17  ;;  %v3378_v24 = vsel %vm5962_vm12, %v6213_v6, %v6200_v60  ;;  %v1594_v26 = vshll.u32 %v1252_v4, 16  ;;  %v2781_v9 = vld [vmem:[#allocation2 + $0x30] sm:$0xe]  ;;  %v2782_v10 = vld [vmem:[#allocation2 + $0x34] sm:$0xf] }
  0x70   : > { %v295_v28 = vsel %vm5885_vm3, 0, %v294_v3  ;;  %981 = vst [vmem:[#allocation2 + $0x38] sm:$0x1] %v980_v23  ;;  %v1581_v30 = vor.u32 %v1580_v19, %v1577_v52  ;;  %v1590_v33 = vrot.slane %v1588_v22, 4  ;;  %v529_v32 = vmax.f32 %v6093_v48, 0.0  ;;  %v5764_v22 = vld [vmem:[#allocation2 + $0x24] sm:$0xff]  }
  0x71   : > { %296 = vst [vmem:[#allocation2 + $0xb4] sm:$0x1] %v295_v28  ;;  %v530_v34 = vmax.f32 %v6096_v49, 0.0  ;;  %v1596_v36 = vrot.slane %v1594_v26, 5  ;;  %v5203_v37 = vrot.slane %v1798_v61, 9  ;;  %v1951_v38 = vrot.slane %v1799_v54, 5 }
  0x72   : > { %v1954_v42 = vrot.slane %v1800_v2, 5  ;;  %v3307_v43 = vld [vmem:[#allocation2 + $0xb0] sm:$0x1]  ;;  %v1582_v45 = vrot.slane %v1581_v30, 4  ;;  %v1591_v46 = vor.u32 %v1590_v33, %v1586_v21  ;;  %v5448_v47 = vpack.c.bf16 %v529_v32, %v529_v32  ;;  %v1220_v28 = vld [vmem:[#allocation2 + $0x24] sm:$0xf] }
  0x73   : > { %v2813_v44 = vld [vmem:[#allocation2 + $0xb0] sm:$0x1]  ;;  %v5449_v51 = vpack.c.bf16 %v530_v34, %v530_v34  ;;  %v3625_v50 = vshll.u32 %v3307_v43, 16  ;;  %v6241_v48 = vsel %vm5906_vm8, %v5203_v37, %v1951_v38  ;;  %v1953_v49 = vrot.slane %v1951_v38, 4  ;;  %v1221_v32 = vld [vmem:[#allocation2 + $0x28] sm:$0xf] }
  0x74   : > { %v2964_v59 = vrot.slane %v2813_v44, 5  ;;  %v1587_v55 = vsel %vm5962_vm12, %v1582_v45, %v1586_v21  ;;  %v1592_v56 = vrot.slane %v1591_v46, 4  ;;  %v870_v57 = vshrl.u32 %v5448_v47, 16  ;;  %v5782_v34 = vld [vmem:[%s7875_s3 + $0x8] sm:$0xff]   ;;  %v264_v38 = vld [vmem:[#allocation2 + $0x3c] sm:$0x1] }
  0x75   : > { %v873_v35 = vshll.u32 %v5448_v47, 16  ;;  %v3627_v58 = vrot.slane %v3625_v50, 5  ;;  %v878_v3 = vshrl.u32 %v5449_v51, 16  ;;  %v881_v13 = vshll.u32 %v5449_v51, 16  ;;  %v1222_v37 = vld [vmem:[#allocation2 + $0x2c] sm:$0x1]  ;;  %5566 = vmatpush3.bf16.msra.mxu0 %v5782_v34  ;;  %5738 = vmatpush3.bf16.msra.mxu1 %v5782_v34 }
  0x76   : > { %v6247_v0 = vsel %vm5906_vm8, %v2963_v16, %v2964_v59  ;;  %v1597_v63 = vsel %vm5962_vm12, %v1592_v56, %v1596_v36  ;;  %v872_v14 = vrot.slane %v870_v57, 7  ;;  %v6255_v7 = vsel %vm5906_vm8, %v1953_v49, %v1954_v42  ;;  %v5784_v42 = vld [vmem:[%s7875_s3 + $0x50] sm:$0xff]   ;;  %v1768_v47 = vld [vmem:[#allocation2 + $0x24] sm:$0xe]  ;;  %v6290_v51 = vld [vmem:[#allocation2 + $0x28] sm:$0xf] }
  0x77   : > { %v5283_v4 = vcombine.low %v6217_v15, %v6247_v0  ;;  %v3628_v61 = vsel %vm5962_vm12, %v6203_v11, %v3627_v58  ;;  %v3277_v54 = vld [vmem:[#allocation2 + $0x38] sm:$0x1]  ;;  %v6260_v2 = vcombine.low %v1587_v55, %v1597_v63  ;;  %v6262_v16 = vrot.slane %v878_v3, 7  ;;  %v6296_v56 = vld [vmem:[#allocation2 + $0x2c] sm:$0x1]  ;;  %5567 = vmatprep.subr.bf16.mxu0 %v5784_v42  ;;  %5731 = vmatprep.subr.bf16.mxu1 %v5784_v42 }
  0x78   : > { %v1052_v52 = vld [vmem:[#allocation2 + $0xb4] sm:$0xf]  ;;  %v5219_v17 = vcombine.low %v6241_v48, %v6255_v7  ;;  %v5314_v19 = vcombine.low %v3618_v62, %v3628_v61  ;;  %v3385_v21 = vshll.u32 %v3277_v54, 16  ;;  %v875_v23 = vor.u32 %v873_v35, %v872_v14  ;;  %v2783_v11 = vld [vmem:[#allocation2 + $0x38] sm:$0x1] }
  0x79   : > { %v876_v26 = vrot.slane %v872_v14, 4  ;;  %v883_v29 = vor.u32 %v881_v13, %v6262_v16  ;;  %v885_v20 = vrot.slane %v6262_v16, 4  ;;  %v5257_v30 = vrot.slane %v2781_v9, 9  ;;  %v320_v57 = vld [vmem:[#allocation2 + $0x44] sm:$0x1]  ;;  %v5785_v35 = vld [vmem:[%s7875_s3 + $0x10] sm:$0xff]  }
  0x7a   : > { %v2891_v33 = vrot.slane %v2782_v10, 5  ;;  %3773 = vrot.lane.b32.xlu1 %v5314_v19, %s5838_s30  ;;  %v3387_v39 = vrot.slane %v3385_v21, 5  ;;  %v1053_v41 = vsel %vm5972_vm13, %v875_v23, %v1052_v52  ;;  %v2894_v62 = vrot.slane %v2783_v11, 5  ;;  %v6316_v10 = vld [vmem:[%s5915_s23 + $0x78] sm:$0xff]   ;;  %v6331_v52 = vld [vmem:[%s5915_s23 + $0x28] sm:$0xff]   ;;  %5568 = vmatpush3.bf16.msra.mxu0 %v5785_v35 }
  0x7b   : > { %v351_v36 = vsel %vm5897_vm7, 0, %v350_v27  ;;  %v884_v43 = vsel %vm5981_vm14, %v876_v26, %v883_v29  ;;  %1054 = vst [vmem:[#allocation2 + $0xb4] sm:$0xf] %v1053_v41  ;;  %v1335_v46 = vshrl.u32 %v1220_v28, 16  ;;  %v1338_v59 = vshll.u32 %v1220_v28, 16  ;;  %v5786_v19 = vld [vmem:[%s7875_s3 + $0x58] sm:$0xff]   ;;  %5739 = vmatpush3.bf16.msra.mxu1 %v5785_v35 }
  0x7c   : > { %v6288_v44 = vsel %vm5906_vm8, %v5257_v30, %v2891_v33  ;;  %v2893_v45 = vrot.slane %v2891_v33, 4  ;;  %352 = vst [vmem:[#allocation2 + $0xbc] sm:$0x1] %v351_v36  ;;  %v3388_v50 = vsel %vm5962_vm12, %v6219_v18, %v3387_v39  ;;  %1055 = vst.msk [vmem:[#allocation2 + $0xb8] sm:$0xf] %vm237_vm0, %v884_v43  ;;  %v1344_v49 = vshll.u32 %v1221_v32, 16  ;;  %5569 = vmatprep.subr.bf16.mxu0 %v5786_v19 }
  0x7d   : > { %v1348_v55 = vshrl.u32 %v1221_v32, 16  ;;  %v5304_v18 = vcombine.low %v3378_v24, %v3388_v50  ;;  %v1337_v3 = vrot.slane %v1335_v46, 4  ;;  %v1354_v13 = vshll.u32 %v1222_v37, 16  ;;  %v6324_v24 = vld [vmem:[%s7874_s2] ss:$0 sm:$0xff]  ;;  %5732 = vmatprep.subr.bf16.mxu1 %v5786_v19 }
  0x7e   : > { %v6308_v58 = vsel %vm5906_vm8, %v2893_v45, %v2894_v62  ;;  %2199 = vrot.lane.b32.xlu1 %v5764_v22, %s5838_s30  ;;  %v1340_v63 = vrot.slane %v1338_v59, 5  ;;  %v6313_v14 = vrot.slane %v1344_v49, 5  ;;  %v265_v6 = vsel %vm5885_vm3, 0, %v264_v38 }
  0x7f   : > { %v5273_v27 = vcombine.low %v6288_v44, %v6308_v58  ;;  %v1350_v9 = vrot.slane %v1348_v55, 4  ;;  %3753 = vrot.lane.b32.xlu0 %v5304_v18, %s5838_s30  ;;  %v1356_v60 = vrot.slane %v1354_v13, 5  ;;  %v477_v61 = vadd.f32 %v6324_v24, %v6117_v40  ;;  %266 = vst [vmem:[#allocation2 + $0x3c] sm:$0x1] %v265_v6  ;;  %v1253_v13 = vld [vmem:[#allocation2 + $0xa8] sm:$0xf] }
  0x80   : > { %v478_v54 = vadd.f32 %v6324_v24, %v6152_v53  ;;  %v1341_v21 = vor.u32 %v1340_v63, %v1337_v3  ;;  %v5193_v23 = vrot.slane %v1768_v47, 9  ;;  %v1881_v26 = vrot.slane %v6290_v51, 5 }
  0x81   : > { %v1351_v22 = vor.u32 %v1350_v9, %v6313_v14  ;;  %v509_v11 = vmax.f32 %v477_v61, 0.0  ;;  %v1884_v28 = vrot.slane %v6296_v56, 5  ;;  %v321_v53 = vsel %vm5897_vm7, 0, %v320_v57  ;;  %v1254_v61 = vld [vmem:[#allocation2 + $0xac] sm:$0xf] }
  0x82   : > { %v510_v40 = vmax.f32 %v478_v54, 0.0  ;;  %1720 = vrot.lane.b32.xlu1 %v6260_v2, %s5837_s29  ;;  %v3308_v30 = vld [vmem:[#allocation2 + $0xb4] sm:$0xf]  ;;  %v6345_v33 = vsel %vm5906_vm8, %v5193_v23, %v1881_v26  ;;  %322 = vst [vmem:[#allocation2 + $0x44] sm:$0x1] %v321_v53  ;;  %v5546_v32 = vunpack.c.l.bf16 %v6316_v10  ;;  %v5547_v34 = vunpack.c.h.bf16 %v6316_v10  ;;  %v5788_v23 = vld [vmem:[%s7875_s3 + $0x18] sm:$0xff]  }
  0x83   : > { %v1056_v29 = vld [vmem:[#allocation2 + $0xbc] sm:$0x1]  ;;  %v5506_v39 = vunpack.c.l.bf16 %v6331_v52  ;;  %3054 = vrot.lane.b32.xlu0 %v5283_v4, %s5837_s29  ;;  %v5765_v41 = vld [vmem:[#allocation2 + $0xb4] sm:$0xff]   ;;  %v3630_v36 = vshrl.u32 %v3308_v30, 16  ;;  %v5428_v37 = vpack.c.bf16 %v509_v11, %v509_v11  ;;  %v3633_v42 = vshll.u32 %v3308_v30, 16  ;;  %v5789_v30 = vld [vmem:[%s7875_s3 + $0x60] sm:$0xff]   ;;  %5570 = vmatpush3.bf16.msra.mxu0 %v5788_v23 }
  0x84   : > { %v1057_v2 = vsel %vm5885_vm3, %v885_v20, %v1056_v29  ;;  %v3309_v62 = vld [vmem:[#allocation2 + $0xb8] sm:$0xf]  ;;  %v5429_v38 = vpack.c.bf16 %v510_v40, %v510_v40  ;;  %v1342_v46 = vrot.slane %v1341_v21, 4  ;;  %v1352_v51 = vrot.slane %v1351_v22, 4  ;;  %v2814_v0 = vld [vmem:[#allocation2 + $0xb4] sm:$0xe]  ;;  %5740 = vmatpush3.bf16.msra.mxu1 %v5788_v23  ;;  %5571 = vmatprep.subr.bf16.mxu0 %v5789_v30 }
  0x85   : > { %1058 = vst [vmem:[#allocation2 + $0xbc] sm:$0x1] %v1057_v2  ;;  %v3639_v43 = vshll.u32 %v3309_v62, 16  ;;  %v3643_v45 = vshrl.u32 %v3309_v62, 16  ;;  %v3632_v47 = vrot.slane %v3630_v36, 4  ;;  %v700_v50 = vshrl.u32 %v5428_v37, 16  ;;  %5733 = vmatprep.subr.bf16.mxu1 %v5789_v30 }
  0x86   : > { %v703_v15 = vshll.u32 %v5428_v37, 16  ;;  %2044 = vrot.lane.b32.xlu1 %v5219_v17, %s5836_s28  ;;  %v3635_v4 = vrot.slane %v3633_v42, 5  ;;  %v1347_v59 = vsel %vm5962_vm12, %v1342_v46, %v6313_v14  ;;  %v1357_v49 = vsel %vm5962_vm12, %v1352_v51, %v1356_v60  ;;  %v2815_v35 = vld [vmem:[#allocation2 + $0xb8] sm:$0xf]  ;;  %v982_v17 = vld [vmem:[#allocation2 + $0x3c] sm:$0xf] }
  0x87   : > { %v6362_v16 = vrot.slane %v3639_v43, 5  ;;  %v3645_v20 = vrot.slane %v3643_v45, 4  ;;  %3231 = vrot.lane.b32.xlu0 %v5765_v41, %s5836_s28  ;;  %v702_v55 = vrot.slane %v700_v50, 7  ;;  %v708_v56 = vshrl.u32 %v5429_v38, 16  ;;  %v1255_v2 = vld [vmem:[#allocation2 + $0xb0] sm:$0x1] }
  0x88   : > { %v711_v57 = vshll.u32 %v5429_v38, 16  ;;  %v3636_v18 = vor.u32 %v3635_v4, %v3632_v47  ;;  %v5177_v7 = vcombine.low %v1347_v59, %v1357_v49  ;;  %v1883_v3 = vrot.slane %v1881_v26, 4  ;;  %v297_v62 = vld [vmem:[#allocation2 + $0xc0] sm:$0x1]  ;;  %v1801_v51 = vld [vmem:[#allocation2 + $0xa8] sm:$0xe] }
  0x89   : > { %v3646_v48 = vor.u32 %v3645_v20, %v6362_v16  ;;  %v705_v63 = vor.u32 %v703_v15, %v702_v55  ;;  %v706_v9 = vrot.slane %v702_v55, 4  ;;  %v710_v6 = vrot.slane %v708_v56, 7  ;;  %v986_v21 = vld [vmem:[#allocation2 + $0x44] sm:$0x1]  ;;  %v1803_v56 = vld [vmem:[#allocation2 + $0xb0] sm:$0x1] }
  0x8a   : > { %v5268_v14 = vrot.slane %v2814_v0, 9  ;;  %v3637_v54 = vrot.slane %v3636_v18, 4  ;;  %v6373_v60 = vsel %vm5906_vm8, %v1883_v3, %v1884_v28  ;;  %v2968_v22 = vrot.slane %v2815_v35, 5  ;;  %v5766_v3 = vld [vmem:[#allocation2 + $0xa8] sm:$0xff]  }
  0x8b   : > { %v3647_v19 = vrot.slane %v3646_v48, 4  ;;  %3034 = vrot.lane.b32.xlu0 %v5273_v27, %s5837_s29  ;;  %v713_v11 = vor.u32 %v711_v57, %v710_v6  ;;  %v715_v40 = vrot.slane %v710_v6, 4  ;;  %v983_v53 = vsel %vm5972_vm13, %v705_v63, %v982_v17  ;;  %v353_v57 = vld [vmem:[#allocation2 + $0xc8] sm:$0x1] }
  0x8c   : > { %v3310_v26 = vld [vmem:[#allocation2 + $0xbc] sm:$0x1]  ;;  %v5209_v28 = vcombine.low %v6345_v33, %v6373_v60  ;;  %v3642_v41 = vsel %vm5962_vm12, %v3637_v54, %v6362_v16  ;;  %984 = vst [vmem:[#allocation2 + $0x3c] sm:$0xf] %v983_v53  ;;  %v6394_v58 = vsel %vm5906_vm8, %v5268_v14, %v2968_v22  ;;  %v2970_v27 = vrot.slane %v2968_v22, 4 }
  0x8d   : > { %v2816_v29 = vld [vmem:[#allocation2 + $0xbc] sm:$0x1]  ;;  %v3649_v44 = vshll.u32 %v3310_v26, 16  ;;  %v714_v36 = vsel %vm5981_vm14, %v706_v9, %v713_v11  ;;  %v987_v37 = vsel %vm5885_vm3, %v715_v40, %v986_v21  ;;  %v1599_v42 = vshrl.u32 %v1253_v13, 16  ;;  %v1802_v16 = vld [vmem:[#allocation2 + $0xac] sm:$0xf] }
  0x8e   : > { %v2971_v38 = vrot.slane %v2816_v29, 5  ;;  %985 = vst.msk [vmem:[#allocation2 + $0x40] sm:$0xf] %vm237_vm0, %v714_v36  ;;  %988 = vst [vmem:[#allocation2 + $0x44] sm:$0x1] %v987_v37  ;;  %v1602_v45 = vshll.u32 %v1253_v13, 16  ;;  %v5507_v53 = vunpack.c.h.bf16 %v6331_v52 }
  0x8f   : > { %v3651_v43 = vrot.slane %v3649_v44, 5  ;;  %v1608_v46 = vshll.u32 %v1254_v61, 16  ;;  %v1612_v47 = vshrl.u32 %v1254_v61, 16  ;;  %1700 = vrot.lane.b32.xlu0 %v5177_v7, %s5837_s29  ;;  %v1601_v15 = vrot.slane %v1599_v42, 4  ;;  %v6415_v7 = vld [vmem:[%s7873_s1] ss:$0 sm:$0xff] }
  0x90   : > { %v6404_v50 = vsel %vm5906_vm8, %v2970_v27, %v2971_v38  ;;  %v1618_v0 = vshll.u32 %v1255_v2, 16  ;;  %v298_v4 = vsel %vm5885_vm3, 0, %v297_v62  ;;  %v1604_v49 = vrot.slane %v1602_v45, 5  ;;  %v1224_v60 = vld [vmem:[#allocation2 + $0x34] sm:$0xf] }
  0x91   : > { %v3652_v20 = vsel %vm5962_vm12, %v3647_v19, %v3651_v43  ;;  %v5284_v59 = vcombine.low %v6394_v58, %v6404_v50  ;;  %v1610_v55 = vrot.slane %v1608_v46, 5  ;;  %299 = vst [vmem:[#allocation2 + $0xc0] sm:$0x1] %v298_v4  ;;  %v1614_v18 = vrot.slane %v1612_v47, 4 }
  0x92   : > { %v5315_v35 = vcombine.low %v3642_v41, %v3652_v20  ;;  %v1620_v48 = vrot.slane %v1618_v0, 5  ;;  %v460_v17 = vmul.f32 %v6415_v7, %v5546_v32  ;;  %v1605_v13 = vor.u32 %v1604_v49, %v1601_v15  ;;  %v5768_v49 = vld [vmem:[#allocation2 + $0x30] sm:$0xff]  }
  0x93   : > { %v461_v63 = vmul.f32 %v6415_v7, %v5547_v34  ;;  %v5204_v9 = vrot.slane %v1801_v51, 9  ;;  %v1958_v6 = vrot.slane %v1802_v16, 5  ;;  %v3278_v14 = vld [vmem:[#allocation2 + $0x3c] sm:$0xf]  ;;  %v1615_v61 = vor.u32 %v1614_v18, %v1610_v55 }
  0x94   : > { %3775 = vrot.lane.b32.xlu1 %v5315_v35, %s5838_s30  ;;  %v499_v54 = vadd.f32 %v6324_v24, %v460_v17  ;;  %v1961_v19 = vrot.slane %v1803_v56, 5  ;;  %v354_v21 = vsel %vm5897_vm7, 0, %v353_v57  ;;  %v3390_v22 = vshrl.u32 %v3278_v14, 16  ;;  %v2784_v42 = vld [vmem:[#allocation2 + $0x3c] sm:$0xe]  ;;  %v5790_v57 = vld [vmem:[%s7875_s3 + $0x20] sm:$0xff]  }
  0x95   : > { %v3393_v32 = vshll.u32 %v3278_v14, 16  ;;  %v1606_v23 = vrot.slane %v1605_v13, 4  ;;  %v500_v26 = vadd.f32 %v6324_v24, %v461_v63  ;;  %355 = vst [vmem:[#allocation2 + $0xc8] sm:$0x1] %v354_v21  ;;  %v5767_v10 = vld [vmem:[#allocation2 + $0x3c] sm:$0xff]   ;;  %v1616_v11 = vrot.slane %v1615_v61, 4  ;;  %5572 = vmatpush3.bf16.msra.mxu0 %v5790_v57  ;;  %5741 = vmatpush3.bf16.msra.mxu1 %v5790_v57 }
  0x96   : > { %v3279_v34 = vld [vmem:[#allocation2 + $0x40] sm:$0xf]  ;;  %v6430_v40 = vsel %vm5906_vm8, %v5204_v9, %v1958_v6  ;;  %v6436_v29 = vmul.f32 %v6415_v7, %v5506_v39  ;;  %v3280_v30 = vld [vmem:[#allocation2 + $0x44] sm:$0x1]  ;;  %v3392_v41 = vrot.slane %v3390_v22, 4  ;;  %3211 = vrot.lane.b32.xlu0 %v5767_v10, %s5836_s28  ;;  %v531_v38 = vmax.f32 %v499_v54, 0.0 }
  0x97   : > { %v3395_v44 = vrot.slane %v3393_v32, 5  ;;  %v3399_v27 = vshll.u32 %v3279_v34, 16  ;;  %v3403_v2 = vshrl.u32 %v3279_v34, 16  ;;  %v3409_v62 = vshll.u32 %v3280_v30, 16  ;;  %v2785_v39 = vld [vmem:[#allocation2 + $0x40] sm:$0xf] }
  0x98   : > { %2221 = vrot.lane.b32.xlu1 %v5766_v3, %s5838_s30  ;;  %v1611_v36 = vsel %vm5962_vm12, %v1606_v23, %v1610_v55  ;;  %v1621_v37 = vsel %vm5962_vm12, %v1616_v11, %v1620_v48  ;;  %v532_v15 = vmax.f32 %v500_v26, 0.0  ;;  %v5450_v0 = vpack.c.bf16 %v531_v38, %v531_v38  ;;  %v2786_v3 = vld [vmem:[#allocation2 + $0x44] sm:$0x1]  ;;  %v1223_v13 = vld [vmem:[#allocation2 + $0x30] sm:$0xf]  ;;  %v5793_v30 = vld [vmem:[%s7875_s3 + $0x28] sm:$0xff]   ;;  %v6488_v57 = vpop.permute.xlu0 %1694 }
  0x99   : > { %v3396_v43 = vor.u32 %v3395_v44, %v3392_v41  ;;  %v3401_v45 = vrot.slane %v3399_v27, 5  ;;  %v3405_v46 = vrot.slane %v3403_v2, 4  ;;  %v6444_v47 = vcombine.low %v1611_v36, %v1621_v37  ;;  %v1225_v22 = vld [vmem:[#allocation2 + $0x38] sm:$0x1]  ;;  %v267_v11 = vld [vmem:[#allocation2 + $0x48] sm:$0x1] }
  0x9a   : > { %v3411_v51 = vrot.slane %v3409_v62, 5  ;;  %v1960_v4 = vrot.slane %v1958_v6, 4  ;;  %v5258_v56 = vrot.slane %v2784_v42, 9  ;;  %v2898_v55 = vrot.slane %v2785_v39, 5  ;;  %v5795_v62 = vld [vmem:[%s7875_s3 + $0x70] sm:$0xff]  }
  0x9b   : > { %v3397_v16 = vrot.slane %v3396_v43, 4  ;;  %v3406_v20 = vor.u32 %v3405_v46, %v3401_v45  ;;  %v5451_v35 = vpack.c.bf16 %v532_v15, %v532_v15  ;;  %v887_v18 = vshrl.u32 %v5450_v0, 16  ;;  %v1771_v39 = vld [vmem:[#allocation2 + $0x30] sm:$0xe]  ;;  %v1772_v43 = vld [vmem:[#allocation2 + $0x34] sm:$0xf] }
  0x9c   : > { %2024 = vrot.lane.b32.xlu1 %v5209_v28, %s5836_s28  ;;  %v890_v48 = vshll.u32 %v5450_v0, 16  ;;  %v6455_v17 = vsel %vm5906_vm8, %v1960_v4, %v1961_v19  ;;  %v6463_v33 = vsel %vm5906_vm8, %v5258_v56, %v2898_v55  ;;  %v5792_v28 = vld [vmem:[%s7875_s3 + $0x68] sm:$0xff]   ;;  %v1059_v19 = vld [vmem:[#allocation2 + $0xc0] sm:$0xf]  ;;  %v2900_v21 = vrot.slane %v2898_v55, 4 }
  0x9d   : > { %v3402_v63 = vsel %vm5962_vm12, %v3397_v16, %v3401_v45  ;;  %v3407_v9 = vrot.slane %v3406_v20, 4  ;;  %v5220_v6 = vcombine.low %v6430_v40, %v6455_v17  ;;  %v889_v14 = vrot.slane %v887_v18, 7  ;;  %v1063_v26 = vld [vmem:[#allocation2 + $0xc8] sm:$0x1]  ;;  %5573 = vmatprep.subr.bf16.mxu0 %v5792_v28  ;;  %5734 = vmatprep.subr.bf16.mxu1 %v5792_v28  ;;  %v1773_v45 = vld [vmem:[#allocation2 + $0x38] sm:$0x1] }
  0x9e   : > { %v895_v61 = vshrl.u32 %v5451_v35, 16  ;;  %v898_v54 = vshll.u32 %v5451_v35, 16  ;;  %v2901_v23 = vrot.slane %v2786_v3, 5  ;;  %v1359_v10 = vshrl.u32 %v1223_v13, 16  ;;  %5574 = vmatpush3.bf16.msra.mxu0 %v5793_v30  ;;  %5742 = vmatpush3.bf16.msra.mxu1 %v5793_v30  ;;  %v323_v4 = vld [vmem:[#allocation2 + $0x50] sm:$0x1]  ;;  %v6533_v30 = vpop.permute.xlu0 %3207 }
  0x9f   : > { %v3412_v32 = vsel %vm5962_vm12, %v3407_v9, %v3411_v51  ;;  %v1362_v34 = vshll.u32 %v1223_v13, 16  ;;  %v892_v44 = vor.u32 %v890_v48, %v889_v14  ;;  %v893_v27 = vrot.slane %v889_v14, 4  ;;  %5575 = vmatprep.subr.bf16.mxu0 %v5795_v62  ;;  %v6486_v55 = vld [vmem:[#allocation2 + $0xb4] sm:$0xf]  ;;  %5735 = vmatprep.subr.bf16.mxu1 %v5795_v62  ;;  %v6501_v13 = vld [vmem:[#allocation2 + $0xb8] sm:$0xf] }
  0xa0   : > { %v5305_v41 = vcombine.low %v3402_v63, %v3412_v32  ;;  %2201 = vrot.lane.b32.xlu1 %v5768_v49, %s5838_s30  ;;  %v897_v2 = vrot.slane %v895_v61, 7  ;;  %v6479_v36 = vsel %vm5906_vm8, %v2900_v21, %v2901_v23  ;;  %v1361_v37 = vrot.slane %v1359_v10, 4  ;;  %v5553_v61 = vld [vmem:[%s5915_s23 + $0x30] sm:$0xff]  }
  0xa1   : > { %v1364_v38 = vrot.slane %v1362_v34, 5  ;;  %v1368_v42 = vshll.u32 %v1224_v60, 16  ;;  %v1060_v15 = vsel %vm5972_vm13, %v892_v44, %v1059_v19  ;;  %v5274_v0 = vcombine.low %v6463_v33, %v6479_v36  ;;  %v5799_v19 = vld [vmem:[%s7875_s3 + $0x78] sm:$0xff]   ;;  %v1804_v33 = vld [vmem:[#allocation2 + $0xb4] sm:$0xe] }
  0xa2   : > { %3755 = vrot.lane.b32.xlu0 %v5305_v41, %s5838_s30  ;;  %v900_v46 = vor.u32 %v898_v54, %v897_v2  ;;  %v902_v51 = vrot.slane %v897_v2, 4  ;;  %1061 = vst [vmem:[#allocation2 + $0xc0] sm:$0xf] %v1060_v15  ;;  %v1372_v49 = vshrl.u32 %v1224_v60, 16  ;;  %v1378_v56 = vshll.u32 %v1225_v22, 16  ;;  %v5797_v54 = vld [vmem:[%s7875_s3 + $0x30] sm:$0xff]  }
  0xa3   : > { %v1365_v16 = vor.u32 %v1364_v38, %v1361_v37  ;;  %v1370_v20 = vrot.slane %v1368_v42, 5  ;;  %v268_v48 = vsel %vm5885_vm3, 0, %v267_v11  ;;  %v441_v3 = vmul.f32 %v6415_v7, %v5507_v53  ;;  %5576 = vmatpush3.bf16.msra.mxu0 %v5797_v54  ;;  %5743 = vmatpush3.bf16.msra.mxu1 %v5797_v54  ;;  %v6541_v38 = vpop.permute.xlu1 %2018  ;;  %v356_v36 = vld [vmem:[#allocation2 + $0xd4] sm:$0x1] }
  0xa4   : > { %1722 = vrot.lane.b32.xlu1 %v6444_v47, %s5837_s29  ;;  %v901_v35 = vsel %vm5981_vm14, %v893_v27, %v900_v46  ;;  %v1064_v18 = vsel %vm5885_vm3, %v902_v51, %v1063_v26  ;;  %v1374_v63 = vrot.slane %v1372_v49, 4  ;;  %v1380_v9 = vrot.slane %v1378_v56, 5  ;;  %269 = vst [vmem:[#allocation2 + $0x48] sm:$0x1] %v268_v48  ;;  %5577 = vmatprep.subr.bf16.mxu0 %v5799_v19 }
  0xa5   : > { %1062 = vst.msk [vmem:[#allocation2 + $0xc4] sm:$0xf] %vm237_vm0, %v901_v35  ;;  %1065 = vst [vmem:[#allocation2 + $0xc8] sm:$0x1] %v1064_v18  ;;  %v1366_v47 = vrot.slane %v1365_v16, 4  ;;  %v479_v60 = vadd.f32 %v6324_v24, %v6436_v29  ;;  %v480_v52 = vadd.f32 %v6324_v24, %v441_v3  ;;  %v5194_v53 = vrot.slane %v1771_v39, 9  ;;  %5736 = vmatprep.subr.bf16.mxu1 %v5799_v19 }
  0xa6   : > { %3056 = vrot.lane.b32.xlu0 %v5284_v59, %s5837_s29  ;;  %v1888_v28 = vrot.slane %v1772_v43, 5  ;;  %v1891_v14 = vrot.slane %v1773_v45, 5  ;;  %v1375_v21 = vor.u32 %v1374_v63, %v1370_v20  ;;  %v324_v50 = vsel %vm5897_vm7, 0, %v323_v4 }
  0xa7   : > { %v1371_v29 = vsel %vm5962_vm12, %v1366_v47, %v1370_v20  ;;  %v511_v58 = vmax.f32 %v479_v60, 0.0  ;;  %v512_v59 = vmax.f32 %v480_v52, 0.0  ;;  %325 = vst [vmem:[#allocation2 + $0x50] sm:$0x1] %v324_v50  ;;  %v1623_v23 = vshrl.u32 %v6486_v55, 16 }
  0xa8   : > { %2046 = vrot.lane.b32.xlu1 %v5220_v6, %s5836_s28  ;;  %v6528_v22 = vsel %vm5906_vm8, %v5194_v53, %v1888_v28  ;;  %v1890_v32 = vrot.slane %v1888_v28, 4  ;;  %v1376_v26 = vrot.slane %v1375_v21, 4  ;;  %v1626_v34 = vshll.u32 %v6486_v55, 16 }
  0xa9   : > { %v5430_v10 = vpack.c.bf16 %v511_v58, %v511_v58  ;;  %v1632_v11 = vshll.u32 %v6501_v13, 16  ;;  %v3311_v40 = vld [vmem:[#allocation2 + $0xc0] sm:$0xf]  ;;  %v5431_v17 = vpack.c.bf16 %v512_v59, %v512_v59  ;;  %v5510_v41 = vunpack.c.l.bf16 %v5553_v61 }
  0xaa   : > { %v6537_v6 = vsel %vm5906_vm8, %v1890_v32, %v1891_v14  ;;  %v5511_v44 = vunpack.c.h.bf16 %v5553_v61  ;;  %v3654_v27 = vshrl.u32 %v3311_v40, 16  ;;  %v3657_v2 = vshll.u32 %v3311_v40, 16  ;;  %v2817_v51 = vld [vmem:[#allocation2 + $0xc0] sm:$0xe]  ;;  %v6554_v14 = vpop.permute.xlu0 %3229 }
  0xab   : > { %v1381_v62 = vsel %vm5962_vm12, %v1376_v26, %v1380_v9  ;;  %v717_v37 = vshrl.u32 %v5430_v10, 16  ;;  %v720_v45 = vshll.u32 %v5430_v10, 16  ;;  %v5210_v46 = vcombine.low %v6528_v22, %v6537_v6  ;;  %v989_v47 = vld [vmem:[#allocation2 + $0x48] sm:$0xf]  ;;  %v6556_v26 = vpop.permute.xlu1 %3205  ;;  %v5800_v10 = vld [vmem:[%s7875_s3 + $0x38] sm:$0xff]  }
  0xac   : > { %v5769_v42 = vld [vmem:[#allocation2 + $0xc0] sm:$0xff]   ;;  %v6543_v43 = vcombine.low %v1371_v29, %v1381_v62  ;;  %v6548_v15 = vmul.f32 %v6415_v7, %v5510_v41  ;;  %v3313_v4 = vld [vmem:[#allocation2 + $0xc8] sm:$0x1]  ;;  %v3656_v16 = vrot.slane %v3654_v27, 4  ;;  %v3659_v20 = vrot.slane %v3657_v2, 5  ;;  %5578 = vmatpush3.bf16.msra.mxu0 %v5800_v10  ;;  %5744 = vmatpush3.bf16.msra.mxu1 %v5800_v10 }
  0xad   : > { %v3312_v39 = vld [vmem:[#allocation2 + $0xc4] sm:$0xf]  ;;  %3233 = vrot.lane.b32.xlu0 %v5769_v42, %s5836_s28  ;;  %v3673_v35 = vshll.u32 %v3313_v4, 16  ;;  %v719_v18 = vrot.slane %v717_v37, 7  ;;  %v725_v48 = vshrl.u32 %v5431_v17, 16  ;;  %v728_v3 = vshll.u32 %v5431_v17, 16 }
  0xae   : > { %v3663_v49 = vshll.u32 %v3312_v39, 16  ;;  %v3667_v56 = vshrl.u32 %v3312_v39, 16  ;;  %v3660_v63 = vor.u32 %v3659_v20, %v3656_v16  ;;  %v993_v52 = vld [vmem:[#allocation2 + $0x50] sm:$0x1]  ;;  %v2818_v53 = vld [vmem:[#allocation2 + $0xc4] sm:$0xf]  ;;  %v6552_v28 = vmul.f32 %v6415_v7, %v5511_v44 }
  0xaf   : > { %v3675_v61 = vrot.slane %v3673_v35, 5  ;;  %v722_v54 = vor.u32 %v720_v45, %v719_v18  ;;  %v723_v19 = vrot.slane %v719_v18, 4  ;;  %v727_v29 = vrot.slane %v725_v48, 7  ;;  %v2819_v21 = vld [vmem:[#allocation2 + $0xc8] sm:$0x1] }
  0xb0   : > { %v3665_v9 = vrot.slane %v3663_v49, 5  ;;  %v3669_v60 = vrot.slane %v3667_v56, 4  ;;  %v3661_v58 = vrot.slane %v3660_v63, 4  ;;  %v5269_v59 = vrot.slane %v2817_v51, 9  ;;  %v1258_v27 = vld [vmem:[#allocation2 + $0xbc] sm:$0x1] }
  0xb1   : > { %v2975_v32 = vrot.slane %v2818_v53, 5  ;;  %3036 = vrot.lane.b32.xlu0 %v5274_v0, %s5837_s29  ;;  %v730_v40 = vor.u32 %v728_v3, %v727_v29  ;;  %v732_v17 = vrot.slane %v727_v29, 4  ;;  %v990_v41 = vsel %vm5972_vm13, %v722_v54, %v989_v47  ;;  %v300_v2 = vld [vmem:[#allocation2 + $0xcc] sm:$0x1]  ;;  %v1805_v16 = vld [vmem:[#allocation2 + $0xb8] sm:$0xf]  ;;  %v6602_v53 = vpop.permute.xlu1 %2195 }
  0xb2   : > { %v3670_v50 = vor.u32 %v3669_v60, %v3665_v9  ;;  %v2978_v44 = vrot.slane %v2819_v21, 5  ;;  %v3666_v62 = vsel %vm5962_vm12, %v3661_v58, %v3665_v9  ;;  %991 = vst [vmem:[#allocation2 + $0x48] sm:$0xf] %v990_v41  ;;  %v1625_v51 = vrot.slane %v1623_v23, 4  ;;  %v1806_v20 = vld [vmem:[#allocation2 + $0xbc] sm:$0x1] }
  0xb3   : > { %v6571_v42 = vsel %vm5906_vm8, %v5269_v59, %v2975_v32  ;;  %v2977_v39 = vrot.slane %v2975_v32, 4  ;;  %v731_v0 = vsel %vm5981_vm14, %v723_v19, %v730_v40  ;;  %v994_v45 = vsel %vm5885_vm3, %v732_v17, %v993_v52  ;;  %v6581_v49 = vld [vmem:[#allocation2 + $0xd0] sm:$0xf]  ;;  %v5554_v63 = vld [vmem:[%s5915_s23 + $0x38] sm:$0xff]  }
  0xb4   : > { %v3671_v37 = vrot.slane %v3670_v50, 4  ;;  %v1628_v4 = vrot.slane %v1626_v34, 5  ;;  %992 = vst.msk [vmem:[#allocation2 + $0x4c] sm:$0xf] %vm237_vm0, %v731_v0  ;;  %995 = vst [vmem:[#allocation2 + $0x50] sm:$0x1] %v994_v45  ;;  %v6593_v34 = vpop.permute.xlu0 %3209  ;;  %v6616_v40 = vadd.f32 %v6324_v24, %v6548_v15  ;;  %v6620_v17 = vadd.f32 %v6324_v24, %v6552_v28 }
  0xb5   : > { %v6588_v35 = vsel %vm5906_vm8, %v2977_v39, %v2978_v44  ;;  %v1634_v23 = vrot.slane %v1632_v11, 5  ;;  %v1636_v55 = vshrl.u32 %v6501_v13, 16  ;;  %1702 = vrot.lane.b32.xlu0 %v6543_v43, %s5837_s29  ;;  %v1642_v47 = vshll.u32 %v1258_v27, 16  ;;  %v5770_v13 = vld [vmem:[#allocation2 + $0xb4] sm:$0xff]  }
  0xb6   : > { %v3676_v56 = vsel %vm5962_vm12, %v3671_v37, %v3675_v61  ;;  %v5285_v48 = vcombine.low %v6571_v42, %v6588_v35  ;;  %v1629_v3 = vor.u32 %v1628_v4, %v1625_v51  ;;  %v301_v60 = vsel %vm5885_vm3, 0, %v300_v2 }
  0xb7   : > { %v5316_v18 = vcombine.low %v3666_v62, %v3676_v56  ;;  %v1638_v9 = vrot.slane %v1636_v55, 4  ;;  %v5205_v52 = vrot.slane %v1804_v33, 9  ;;  %v1965_v11 = vrot.slane %v1805_v16, 5  ;;  %302 = vst [vmem:[#allocation2 + $0xcc] sm:$0x1] %v301_v60 }
  0xb8   : > { %v1630_v61 = vrot.slane %v1629_v3, 4  ;;  %v1644_v54 = vrot.slane %v1642_v47, 5  ;;  %v1968_v43 = vrot.slane %v1806_v20, 5  ;;  %v357_v19 = vsel %vm5897_vm7, 0, %v356_v36  ;;  %v6622_v44 = vpop.permute.xlu0 %3028  ;;  %v6634_v20 = vpop.permute.xlu1 %2197 }
  0xb9   : > { %3777 = vrot.lane.b32.xlu1 %v5316_v18, %s5838_s30  ;;  %v1639_v29 = vor.u32 %v1638_v9, %v1634_v23  ;;  %v6609_v21 = vsel %vm5906_vm8, %v5205_v52, %v1965_v11  ;;  %v1967_v58 = vrot.slane %v1965_v11, 4  ;;  %358 = vst [vmem:[#allocation2 + $0xd4] sm:$0x1] %v357_v19  ;;  %v3687_v50 = vshll.u32 %v6581_v49, 16  ;;  %v3281_v59 = vld [vmem:[#allocation2 + $0x48] sm:$0xf] }
  0xba   : > { %v1635_v32 = vsel %vm5962_vm12, %v1630_v61, %v1634_v23  ;;  %v2787_v10 = vld [vmem:[#allocation2 + $0x48] sm:$0xe]  ;;  %v5514_v41 = vunpack.c.l.bf16 %v5554_v63  ;;  %v3414_v27 = vshrl.u32 %v3281_v59, 16  ;;  %v3417_v2 = vshll.u32 %v3281_v59, 16  ;;  %v5772_v23 = vld [vmem:[#allocation2 + $0x3c] sm:$0xff]  }
  0xbb   : > { %v1640_v62 = vrot.slane %v1639_v29, 4  ;;  %v6626_v37 = vsel %vm5906_vm8, %v1967_v58, %v1968_v43  ;;  %v5771_v39 = vld [vmem:[#allocation2 + $0x48] sm:$0xff]   ;;  %v5259_v36 = vrot.slane %v2787_v10, 9  ;;  %v5515_v24 = vunpack.c.h.bf16 %v5554_v63  ;;  %v3283_v0 = vld [vmem:[#allocation2 + $0x50] sm:$0x1] }
  0xbc   : > { %v3282_v33 = vld [vmem:[#allocation2 + $0x4c] sm:$0xf]  ;;  %v5221_v15 = vcombine.low %v6609_v21, %v6626_v37  ;;  %v6632_v28 = vmul.f32 %v6415_v7, %v5514_v41  ;;  %v3416_v45 = vrot.slane %v3414_v27, 4  ;;  %v3419_v51 = vrot.slane %v3417_v2, 5  ;;  %3213 = vrot.lane.b32.xlu0 %v5771_v39, %s5836_s28  ;;  %v2789_v3 = vld [vmem:[#allocation2 + $0x50] sm:$0x1]  ;;  %v6649_v58 = vpop.permute.xlu0 %3030 }
  0xbd   : > { %2223 = vrot.lane.b32.xlu1 %v5770_v13, %s5838_s30  ;;  %v3423_v4 = vshll.u32 %v3282_v33, 16  ;;  %v3427_v16 = vshrl.u32 %v3282_v33, 16  ;;  %v3433_v56 = vshll.u32 %v3283_v0, 16  ;;  %v1645_v55 = vsel %vm5962_vm12, %v1640_v62, %v1644_v54  ;;  %v2788_v18 = vld [vmem:[#allocation2 + $0x4c] sm:$0xf]  ;;  %v6657_v33 = vpop.permute.xlu1 %2219 }
  0xbe   : > { %v6639_v47 = vrot.slane %v3687_v50, 5  ;;  %v6642_v63 = vmul.f32 %v6415_v7, %v5515_v24  ;;  %v3420_v9 = vor.u32 %v3419_v51, %v3416_v45  ;;  %v5189_v11 = vcombine.low %v1635_v32, %v1645_v55  ;;  %v1226_v13 = vld [vmem:[#allocation2 + $0x3c] sm:$0xf]  ;;  %v3314_v19 = vld [vmem:[#allocation2 + $0xcc] sm:$0xf] }
  0xbf   : > { %v3425_v60 = vrot.slane %v3423_v4, 5  ;;  %v3429_v52 = vrot.slane %v3427_v16, 4  ;;  %v3435_v61 = vrot.slane %v3433_v56, 5  ;;  %v2905_v43 = vrot.slane %v2788_v18, 5  ;;  %v1227_v39 = vld [vmem:[#allocation2 + $0x40] sm:$0xf] }
  0xc0   : > { %v2908_v54 = vrot.slane %v2789_v3, 5  ;;  %v3691_v29 = vshrl.u32 %v6581_v49, 16  ;;  %v3421_v7 = vrot.slane %v3420_v9, 4  ;;  %v3316_v59 = vld [vmem:[#allocation2 + $0xd4] sm:$0x1]  ;;  %v3678_v10 = vshrl.u32 %v3314_v19, 16 }
  0xc1   : > { %2026 = vrot.lane.b32.xlu1 %v5210_v46, %s5836_s28  ;;  %v3430_v50 = vor.u32 %v3429_v52, %v3425_v60  ;;  %v3681_v41 = vshll.u32 %v3314_v19, 16  ;;  %v6653_v32 = vsel %vm5906_vm8, %v5259_v36, %v2905_v43  ;;  %v2907_v27 = vrot.slane %v2905_v43, 4  ;;  %v1228_v45 = vld [vmem:[#allocation2 + $0x44] sm:$0x1]  ;;  %v270_v18 = vld [vmem:[#allocation2 + $0x54] sm:$0x1]  ;;  %v6669_v43 = vpop.permute.xlu0 %3052 }
  0xc2   : > { %v3693_v22 = vrot.slane %v3691_v29, 4  ;;  %v3697_v6 = vshll.u32 %v3316_v59, 16  ;;  %v3426_v46 = vsel %vm5962_vm12, %v3421_v7, %v3425_v60  ;;  %v3680_v62 = vrot.slane %v3678_v10, 4  ;;  %v1774_v52 = vld [vmem:[#allocation2 + $0x3c] sm:$0xe]  ;;  %v5776_v59 = vld [vmem:[#allocation2] sm:$0xff]  }
  0xc3   : > { %v3431_v2 = vrot.slane %v3430_v50, 4  ;;  %v3683_v49 = vrot.slane %v3681_v41, 5  ;;  %v6662_v24 = vsel %vm5906_vm8, %v2907_v27, %v2908_v54  ;;  %v1383_v51 = vshrl.u32 %v1226_v13, 16  ;;  %v1775_v50 = vld [vmem:[#allocation2 + $0x40] sm:$0xf] }
  0xc4   : > { %v3694_v36 = vor.u32 %v3693_v22, %v6639_v47  ;;  %v3699_v0 = vrot.slane %v3697_v6, 5  ;;  %v5275_v16 = vcombine.low %v6653_v32, %v6662_v24  ;;  %v1386_v55 = vshll.u32 %v1226_v13, 16  ;;  %v1776_v27 = vld [vmem:[#allocation2 + $0x44] sm:$0x1]  ;;  %v5794_v22 = vld [vmem:[#allocation2 + $0xc] sm:$0xff]  }
  0xc5   : > { %2203 = vrot.lane.b32.xlu1 %v5772_v23, %s5838_s30  ;;  %v3436_v4 = vsel %vm5962_vm12, %v3431_v2, %v3435_v61  ;;  %v3684_v56 = vor.u32 %v3683_v49, %v3680_v62  ;;  %v1385_v9 = vrot.slane %v1383_v51, 4  ;;  %v1392_v60 = vshll.u32 %v1227_v39, 16  ;;  %v5798_v49 = vld [vmem:[#allocation2 + $0x90] sm:$0xff]   ;;  %v6745_v24 = vld [vmem:[%s7874_s2] ss:$0 sm:$0xff] }
  0xc6   : > { %v5306_v3 = vcombine.low %v3426_v46, %v3436_v4  ;;  %v3695_v23 = vrot.slane %v3694_v36, 4  ;;  %v1388_v19 = vrot.slane %v1386_v55, 5  ;;  %v1396_v29 = vshrl.u32 %v1227_v39, 16  ;;  %v5802_v39 = vld [vmem:[#allocation2 + $0x18] sm:$0xff]  }
  0xc7   : > { %v3685_v54 = vrot.slane %v3684_v56, 4  ;;  %v1402_v7 = vshll.u32 %v1228_v45, 16  ;;  %v1394_v61 = vrot.slane %v1392_v60, 5  ;;  %v271_v10 = vsel %vm5885_vm3, 0, %v270_v18  ;;  %v5804_v36 = vld [vmem:[#allocation2 + $0x9c] sm:$0xff]  }
  0xc8   : > { %3757 = vrot.lane.b32.xlu0 %v5306_v3, %s5838_s30  ;;  %v3700_v13 = vsel %vm5962_vm12, %v3695_v23, %v3699_v0  ;;  %v513_v41 = vmax.f32 %v6616_v40, 0.0  ;;  %v1389_v46 = vor.u32 %v1388_v19, %v1385_v9  ;;  %v1398_v2 = vrot.slane %v1396_v29, 4  ;;  %272 = vst [vmem:[#allocation2 + $0x54] sm:$0x1] %v271_v10  ;;  %v326_v4 = vld [vmem:[#allocation2 + $0x5c] sm:$0x1] }
  0xc9   : > { %1724 = vrot.lane.b32.xlu1 %v5189_v11, %s5837_s29  ;;  %v3690_v6 = vsel %vm5962_vm12, %v3685_v54, %v6639_v47  ;;  %v1404_v62 = vrot.slane %v1402_v7, 5  ;;  %v6681_v11 = vpop.permute.xlu1 %2020  ;;  %v514_v45 = vmax.f32 %v6620_v17, 0.0  ;;  %v5195_v40 = vrot.slane %v1774_v52, 9  ;;  %v1229_v56 = vld [vmem:[#allocation2 + $0x48] sm:$0xf]  ;;  %v5773_v23 = vld [vmem:[#allocation2 + $0xcc] sm:$0xff]   ;;  %v6692_v54 = vpop.permute.xlu0 %3032 }
  0xca   : > { %v5317_v0 = vcombine.low %v3690_v6, %v3700_v13  ;;  %v5432_v51 = vpack.c.bf16 %v513_v41, %v513_v41  ;;  %v1390_v55 = vrot.slane %v1389_v46, 4  ;;  %v1399_v18 = vor.u32 %v1398_v2, %v1394_v61  ;;  %v1230_v52 = vld [vmem:[#allocation2 + $0x4c] sm:$0xf]  ;;  %v5774_v41 = vld [vmem:[#allocation2 + $0xc0] sm:$0xff]  }
  0xcb   : > { %v1895_v3 = vrot.slane %v1775_v50, 5  ;;  %v1898_v47 = vrot.slane %v1776_v27, 5  ;;  %v5433_v17 = vpack.c.bf16 %v514_v45, %v514_v45  ;;  %vm1194_vm15 = vcmask 261120   ;;  %v5807_v2 = vld [vmem:[#allocation2 + $0x24] sm:$0xff]  }
  0xcc   : > { %3058 = vrot.lane.b32.xlu0 %v5285_v48, %s5837_s29  ;;  %v734_v9 = vshrl.u32 %v5432_v51, 16  ;;  %v737_v60 = vshll.u32 %v5432_v51, 16  ;;  %v1395_v19 = vsel %vm5962_vm12, %v1390_v55, %v1394_v61  ;;  %v1400_v29 = vrot.slane %v1399_v18, 4  ;;  %1195 = vst.msk [vmem:[#allocation3] sm:$0xff] %vm1194_vm15, %v5776_v59  ;;  %1196 = vst.msk [vmem:[#allocation3 + $0x18] sm:$0xff] %vm1194_vm15, %v5794_v22 }
  0xcd   : > { %2048 = vrot.lane.b32.xlu1 %v5221_v15, %s5836_s28  ;;  %v6698_v42 = vsel %vm5906_vm8, %v5195_v40, %v1895_v3  ;;  %v1897_v35 = vrot.slane %v1895_v3, 4  ;;  %1207 = vst.msk [vmem:[#allocation3 + $0x120] sm:$0xff] %vm1194_vm15, %v5798_v49  ;;  %1197 = vst.msk [vmem:[#allocation3 + $0x30] sm:$0xff] %vm1194_vm15, %v5802_v39  ;;  %v742_v21 = vshrl.u32 %v5433_v17, 16  ;;  %v745_v37 = vshll.u32 %v5433_v17, 16  ;;  %v6723_v18 = vpop.permute.xlu0 %3749 }
  0xce   : > { %1208 = vst.msk [vmem:[#allocation3 + $0x138] sm:$0xff] %vm1194_vm15, %v5804_v36  ;;  %v736_v48 = vrot.slane %v734_v9, 7  ;;  %vm1742_vm2 = vcmask 523520   ;;  %v1231_v15 = vld [vmem:[#allocation2 + $0x50] sm:$0x1]  ;;  %v1405_v7 = vsel %vm5962_vm12, %v1400_v29, %v1404_v62  ;;  %v327_v59 = vsel %vm5897_vm7, 0, %v326_v4  ;;  %v6715_v61 = vpop.permute.xlu1 %2042 }
  0xcf   : > { %v6709_v50 = vsel %vm5906_vm8, %v1897_v35, %v1898_v47  ;;  %1743 = vst.msk [vmem:[#allocation3] sm:$0xff] %vm1742_vm2, %v6488_v57  ;;  %v1407_v13 = vshrl.u32 %v1229_v56, 16  ;;  %v5179_v10 = vcombine.low %v1395_v19, %v1405_v7  ;;  %v744_v6 = vrot.slane %v742_v21, 7  ;;  %v996_v46 = vld [vmem:[#allocation2 + $0x54] sm:$0xf] }
  0xd0   : > { %3235 = vrot.lane.b32.xlu0 %v5773_v23, %s5836_s28  ;;  %v739_v27 = vor.u32 %v737_v60, %v736_v48  ;;  %v740_v22 = vrot.slane %v736_v48, 4  ;;  %328 = vst [vmem:[#allocation2 + $0x5c] sm:$0x1] %v327_v59  ;;  %v5211_v57 = vcombine.low %v6698_v42, %v6709_v50  ;;  %v1410_v49 = vshll.u32 %v1229_v56, 16  ;;  %v273_v36 = vld [vmem:[#allocation2 + $0x60] sm:$0x1] }
  0xd1   : > { %3779 = vrot.lane.b32.xlu1 %v5317_v0, %s5838_s30  ;;  %v1409_v62 = vrot.slane %v1407_v13, 4  ;;  %v1416_v39 = vshll.u32 %v1230_v52, 16  ;;  %v747_v45 = vor.u32 %v745_v37, %v744_v6  ;;  %v749_v51 = vrot.slane %v744_v6, 4  ;;  %v1777_v4 = vld [vmem:[#allocation2 + $0x48] sm:$0xe]  ;;  %1198 = vst.msk [vmem:[#allocation3 + $0x48] sm:$0xff] %vm1194_vm15, %v5807_v2 }
  0xd2   : > { %v997_v0 = vsel %vm5972_vm13, %v739_v27, %v996_v46  ;;  %v1420_v40 = vshrl.u32 %v1230_v52, 16  ;;  %v1778_v55 = vld [vmem:[#allocation2 + $0x4c] sm:$0xf]  ;;  %v1412_v3 = vrot.slane %v1410_v49, 5  ;;  %v1426_v23 = vshll.u32 %v1231_v15, 16  ;;  %v6726_v17 = vpop.permute.xlu1 %2022  ;;  %v5555_v15 = vld [vmem:[%s5915_s23 + $0x40] sm:$0xff]  }
  0xd3   : > { %998 = vst [vmem:[#allocation2 + $0x54] sm:$0xf] %v997_v0  ;;  %v1418_v47 = vrot.slane %v1416_v39, 5  ;;  %vm2066_vm4 = vcmask 785920   ;;  %v1779_v56 = vld [vmem:[#allocation2 + $0x50] sm:$0x1]  ;;  %v748_v9 = vsel %vm5981_vm14, %v740_v22, %v747_v45  ;;  %v5519_v0 = vunpack.c.h.bf16 %v5555_v15 }
  0xd4   : > { %3038 = vrot.lane.b32.xlu0 %v5275_v16, %s5837_s29  ;;  %v1422_v60 = vrot.slane %v1420_v40, 4  ;;  %2067 = vst.msk [vmem:[#allocation3] sm:$0xff] %vm2066_vm4, %v6541_v38  ;;  %vm2243_vm5 = vcmask 1048320   ;;  %v274_v52 = vsel %vm5885_vm3, 0, %v273_v36  ;;  %v329_v19 = vld [vmem:[#allocation2 + $0x68] sm:$0x1]  ;;  %v1413_v29 = vor.u32 %v1412_v3, %v1409_v62 }
  0xd5   : > { %2225 = vrot.lane.b32.xlu1 %v5774_v41, %s5838_s30  ;;  %999 = vst.msk [vmem:[#allocation2 + $0x58] sm:$0xf] %vm237_vm0, %v748_v9  ;;  %v1428_v32 = vrot.slane %v1426_v23, 5  ;;  %275 = vst [vmem:[#allocation2 + $0x60] sm:$0x1] %v274_v52  ;;  %v483_v38 = vadd.f32 %v6745_v24, %v6632_v28  ;;  %v484_v16 = vadd.f32 %v6745_v24, %v6642_v63  ;;  %v5196_v35 = vrot.slane %v1777_v4, 9 }
  0xd6   : > { %2244 = vst.msk [vmem:[#allocation3] sm:$0xff] %vm2243_vm5, %v6602_v53  ;;  %v1423_v42 = vor.u32 %v1422_v60, %v1418_v47  ;;  %v1902_v48 = vrot.slane %v1778_v55, 5  ;;  %v1905_v21 = vrot.slane %v1779_v56, 5  ;;  %v6751_v37 = vld [vmem:[#allocation2 + $0x10] sm:$0xf]  ;;  %v1414_v7 = vrot.slane %v1413_v29, 4  ;;  %v1697_v41 = vpop.permute.xlu1 %1696  ;;  %v6765_v46 = vpop.permute.xlu0 %3751 }
  0xd7   : > { %v1000_v53 = vld [vmem:[#allocation2 + $0x5c] sm:$0x1]  ;;  %v515_v50 = vmax.f32 %v483_v38, 0.0  ;;  %v516_v59 = vmax.f32 %v484_v16, 0.0  ;;  %v330_v13 = vsel %vm5897_vm7, 0, %v329_v19  ;;  %v5777_v63 = vld [vmem:[#allocation2 + $0x48] sm:$0xff]  }
  0xd8   : > { %1704 = vrot.lane.b32.xlu0 %v5179_v10, %s5837_s29  ;;  %v1001_v28 = vsel %vm5885_vm3, %v749_v51, %v1000_v53  ;;  %v1424_v27 = vrot.slane %v1423_v42, 4  ;;  %v6762_v22 = vsel %vm5906_vm8, %v5196_v35, %v1902_v48  ;;  %v1904_v6 = vrot.slane %v1902_v48, 4  ;;  %331 = vst [vmem:[#allocation2 + $0x68] sm:$0x1] %v330_v13  ;;  %1744 = vst.msk [vmem:[#allocation3 + $0x18] sm:$0xff] %vm1742_vm2, %v1697_v41 }
  0xd9   : > { %2028 = vrot.lane.b32.xlu1 %v5211_v57, %s5836_s28  ;;  %1002 = vst [vmem:[#allocation2 + $0x5c] sm:$0x1] %v1001_v28  ;;  %v1419_v10 = vsel %vm5962_vm12, %v1414_v7, %v1418_v47  ;;  %v5434_v2 = vpack.c.bf16 %v515_v50, %v515_v50  ;;  %v6769_v57 = vpack.c.bf16 %v516_v59, %v516_v59  ;;  %v2318_v62 = vshll.u32 %v6751_v37, 16  ;;  %v6788_v60 = vld [vmem:[%s7873_s1] ss:$0 sm:$0xff] }
  0xda   : > { %2068 = vst.msk [vmem:[#allocation3 + $0x18] sm:$0xff] %vm2066_vm4, %v6681_v11  ;;  %v3284_v49 = vld [vmem:[#allocation2 + $0x54] sm:$0xf]  ;;  %v1429_v36 = vsel %vm5962_vm12, %v1424_v27, %v1428_v32  ;;  %v6778_v45 = vsel %vm5906_vm8, %v1904_v6, %v1905_v21  ;;  %v5518_v51 = vunpack.c.l.bf16 %v5555_v15  ;;  %v1719_v47 = vpop.permute.xlu1 %1718  ;;  %v6794_v52 = vmul.f32 %v6788_v60, %v5519_v0 }
  0xdb   : > { %v2790_v39 = vld [vmem:[#allocation2 + $0x54] sm:$0xe]  ;;  %2245 = vst.msk [vmem:[#allocation3 + $0x18] sm:$0xff] %vm2243_vm5, %v6634_v20  ;;  %v3438_v40 = vshrl.u32 %v3284_v49, 16  ;;  %v3441_v4 = vshll.u32 %v3284_v49, 16  ;;  %v5180_v3 = vcombine.low %v1419_v10, %v1429_v36  ;;  %v751_v56 = vshrl.u32 %v5434_v2, 16 }
  0xdc   : > { %v5260_v55 = vrot.slane %v2790_v39, 9  ;;  %v5775_v11 = vld [vmem:[#allocation2 + $0x54] sm:$0xff]   ;;  %v5212_v9 = vcombine.low %v6762_v22, %v6778_v45  ;;  %v6791_v20 = vmul.f32 %v6788_v60, %v5518_v51  ;;  %1755 = vst.msk [vmem:[#allocation3 + $0x120] sm:$0xff] %vm1742_vm2, %v1719_v47  ;;  %v754_v48 = vshll.u32 %v5434_v2, 16  ;;  %v1003_v13 = vld [vmem:[#allocation2 + $0x60] sm:$0xf] }
  0xdd   : > { %v3285_v23 = vld [vmem:[#allocation2 + $0x58] sm:$0xf]  ;;  %2205 = vrot.lane.b32.xlu1 %v5777_v63, %s5838_s30  ;;  %v3440_v19 = vrot.slane %v3438_v40, 4  ;;  %v3443_v29 = vrot.slane %v3441_v4, 5  ;;  %2079 = vst.msk [vmem:[#allocation3 + $0x120] sm:$0xff] %vm2066_vm4, %v6715_v61  ;;  %3215 = vrot.lane.b32.xlu0 %v5775_v11, %s5836_s28  ;;  %v753_v35 = vrot.slane %v751_v56, 7 }
  0xde   : > { %v3447_v32 = vshll.u32 %v3285_v23, 16  ;;  %v3451_v38 = vshrl.u32 %v3285_v23, 16  ;;  %v2791_v16 = vld [vmem:[#allocation2 + $0x58] sm:$0xf]  ;;  %v759_v21 = vshrl.u32 %v6769_v57, 16  ;;  %2256 = vst.msk [vmem:[#allocation3 + $0x120] sm:$0xff] %vm2243_vm5, %v6657_v33  ;;  %v1699_v15 = vpop.permute.xlu0 %1698 }
  0xdf   : > { %v2912_v42 = vrot.slane %v2791_v16, 5  ;;  %v3444_v53 = vor.u32 %v3443_v29, %v3440_v19  ;;  %v762_v59 = vshll.u32 %v6769_v57, 16  ;;  %1745 = vst.msk [vmem:[#allocation3 + $0x30] sm:$0xff] %vm1742_vm2, %v1699_v15  ;;  %v756_v27 = vor.u32 %v754_v48, %v753_v35  ;;  %v2260_v22 = vld [vmem:[#allocation2 + $0xc] sm:$0xf] }
  0xe0   : > { %v3449_v7 = vrot.slane %v3447_v32, 5  ;;  %v3453_v50 = vrot.slane %v3451_v38, 4  ;;  %v3286_v61 = vld [vmem:[#allocation2 + $0x5c] sm:$0x1]  ;;  %v757_v33 = vrot.slane %v753_v35, 4  ;;  %2069 = vst.msk [vmem:[#allocation3 + $0x30] sm:$0xff] %vm2066_vm4, %v6726_v17 }
  0xe1   : > { %v2792_v41 = vld [vmem:[#allocation2 + $0x5c] sm:$0x1]  ;;  %v6807_v28 = vsel %vm5906_vm8, %v5260_v55, %v2912_v42  ;;  %v2914_v63 = vrot.slane %v2912_v42, 4  ;;  %1706 = vrot.lane.b32.xlu1 %v5180_v3, %s5837_s29  ;;  %v3445_v6 = vrot.slane %v3444_v53, 4  ;;  %v3457_v2 = vshll.u32 %v3286_v61, 16  ;;  %v5810_v15 = vld [vmem:[#allocation2 + $0xa8] sm:$0xff]  }
  0xe2   : > { %v3454_v10 = vor.u32 %v3453_v50, %v3449_v7  ;;  %v2915_v57 = vrot.slane %v2792_v41, 5  ;;  %v761_v49 = vrot.slane %v759_v21, 7  ;;  %v1004_v39 = vsel %vm5972_vm13, %v756_v27, %v1003_v13  ;;  %v2262_v36 = vld [vmem:[#allocation2 + $0x14] sm:$0x1]  ;;  %v1007_v55 = vld [vmem:[#allocation2 + $0x68] sm:$0x1] }
  0xe3   : > { %v6814_v45 = vrot.slane %v2318_v62, 5  ;;  %v2322_v51 = vshrl.u32 %v6751_v37, 16  ;;  %v3450_v0 = vsel %vm5962_vm12, %v3445_v6, %v3449_v7  ;;  %v3459_v4 = vrot.slane %v3457_v2, 5  ;;  %1005 = vst [vmem:[#allocation2 + $0x60] sm:$0xf] %v1004_v39  ;;  %v5783_v62 = vld [vmem:[#allocation2 + $0x54] sm:$0xff]  }
  0xe4   : > { %v3455_v40 = vrot.slane %v3454_v10, 4  ;;  %v2916_v17 = vsel %vm5906_vm8, %v2914_v63, %v2915_v57  ;;  %v764_v47 = vor.u32 %v762_v59, %v761_v49  ;;  %v766_v11 = vrot.slane %v761_v49, 4  ;;  %v1232_v56 = vld [vmem:[#allocation2 + $0x54] sm:$0xf]  ;;  %v1233_v38 = vld [vmem:[#allocation2 + $0x58] sm:$0xf] }
  0xe5   : > { %v5276_v3 = vcombine.low %v6807_v28, %v2916_v17  ;;  %2030 = vrot.lane.b32.xlu1 %v5212_v9, %s5836_s28  ;;  %v2324_v23 = vrot.slane %v2322_v51, 4  ;;  %v2328_v19 = vshll.u32 %v2262_v36, 16  ;;  %v2309_v29 = vshrl.u32 %v2260_v22, 16  ;;  %v1234_v48 = vld [vmem:[#allocation2 + $0x5c] sm:$0x1]  ;;  %v6834_v13 = vld [vmem:[%s5915_s23 + $0x48] sm:$0xff]  }
  0xe6   : > { %v3460_v37 = vsel %vm5962_vm12, %v3455_v40, %v3459_v4  ;;  %v2312_v32 = vshll.u32 %v2260_v22, 16  ;;  %v765_v42 = vsel %vm5981_vm14, %v757_v33, %v764_v47  ;;  %v1008_v35 = vsel %vm5885_vm3, %v766_v11, %v1007_v55  ;;  %v6830_v21 = vld [vmem:[#allocation2 + $0x18] sm:$0xf]  ;;  %1209 = vst.msk [vmem:[#allocation3 + $0x150] sm:$0xff] %vm1194_vm15, %v5810_v15  ;;  %v5812_v10 = vld [vmem:[#allocation2 + $0x30] sm:$0xff]  }
  0xe7   : > { %v5307_v16 = vcombine.low %v3450_v0, %v3460_v37  ;;  %v2325_v9 = vor.u32 %v2324_v23, %v6814_v45  ;;  %1006 = vst.msk [vmem:[#allocation2 + $0x64] sm:$0xf] %vm237_vm0, %v765_v42  ;;  %1009 = vst [vmem:[#allocation2 + $0x68] sm:$0x1] %v1008_v35  ;;  %v2330_v53 = vrot.slane %v2328_v19, 5  ;;  %v2311_v7 = vrot.slane %v2309_v29, 4 }
  0xe8   : > { %v2314_v50 = vrot.slane %v2312_v32, 5  ;;  %v1431_v59 = vshrl.u32 %v1232_v56, 16  ;;  %v1434_v41 = vshll.u32 %v1232_v56, 16  ;;  %v1440_v28 = vshll.u32 %v1233_v38, 16  ;;  %1199 = vst.msk [vmem:[#allocation3 + $0x60] sm:$0xff] %vm1194_vm15, %v5812_v10  ;;  %v5813_v19 = vld [vmem:[#allocation2 + $0xb4] sm:$0xff]  }
  0xe9   : > { %3759 = vrot.lane.b32.xlu0 %v5307_v16, %s5838_s30  ;;  %2207 = vrot.lane.b32.xlu1 %v5783_v62, %s5838_s30  ;;  %v2326_v61 = vrot.slane %v2325_v9, 4  ;;  %v1444_v63 = vshrl.u32 %v1233_v38, 16  ;;  %v1450_v22 = vshll.u32 %v1234_v48, 16  ;;  %v2333_v6 = vshrl.u32 %v6830_v21, 16  ;;  %1210 = vst.msk [vmem:[#allocation3 + $0x168] sm:$0xff] %vm1194_vm15, %v5813_v19 }
  0xea   : > { %v2315_v27 = vor.u32 %v2314_v50, %v2311_v7  ;;  %v1433_v33 = vrot.slane %v1431_v59, 4  ;;  %v3287_v2 = vld [vmem:[#allocation2 + $0x60] sm:$0xf]  ;;  %v6844_v39 = vadd.f32 %v6745_v24, %v6791_v20  ;;  %v6848_v36 = vadd.f32 %v6745_v24, %v6794_v52  ;;  %v2264_v7 = vld [vmem:[#allocation2 + $0x1c] sm:$0xf] }
  0xeb   : > { %v2331_v57 = vsel %vm5962_vm12, %v2326_v61, %v2330_v53  ;;  %v2793_v49 = vld [vmem:[#allocation2 + $0x60] sm:$0xe]  ;;  %v5522_v51 = vunpack.c.l.bf16 %v6834_v13  ;;  %v3462_v0 = vshrl.u32 %v3287_v2, 16  ;;  %v3465_v40 = vshll.u32 %v3287_v2, 16 }
  0xec   : > { %v2316_v4 = vrot.slane %v2315_v27, 4  ;;  %v5261_v17 = vrot.slane %v2793_v49, 9  ;;  %v1436_v55 = vrot.slane %v1434_v41, 5  ;;  %v1442_v47 = vrot.slane %v1440_v28, 5  ;;  %v6858_v37 = vpop.permute.xlu1 %3773  ;;  %v2265_v49 = vld [vmem:[#allocation2 + $0x20] sm:$0x1] }
  0xed   : > { %3040 = vrot.lane.b32.xlu0 %v5276_v3, %s5837_s29  ;;  %v1446_v11 = vrot.slane %v1444_v63, 4  ;;  %v1452_v62 = vrot.slane %v1450_v22, 5  ;;  %v3464_v20 = vrot.slane %v3462_v0, 4  ;;  %v3467_v23 = vrot.slane %v3465_v40, 5 }
  0xee   : > { %v2321_v52 = vsel %vm5962_vm12, %v2316_v4, %v6814_v45  ;;  %v6856_v56 = vrot.slane %v2333_v6, 4  ;;  %v5779_v29 = vld [vmem:[#allocation2 + $0x60] sm:$0xff]   ;;  %v1437_v16 = vor.u32 %v1436_v55, %v1433_v33  ;;  %v2336_v42 = vshll.u32 %v6830_v21, 16  ;;  %v3289_v35 = vld [vmem:[#allocation2 + $0x68] sm:$0x1] }
  0xef   : > { %v3288_v32 = vld [vmem:[#allocation2 + $0x64] sm:$0xf]  ;;  %v5238_v38 = vcombine.low %v2321_v52, %v2331_v57  ;;  %v1447_v3 = vor.u32 %v1446_v11, %v1442_v47  ;;  %v3468_v9 = vor.u32 %v3467_v23, %v3464_v20  ;;  %v5523_v45 = vunpack.c.h.bf16 %v6834_v13  ;;  %v2795_v59 = vld [vmem:[#allocation2 + $0x68] sm:$0x1] }
  0xf0   : > { %v3471_v48 = vshll.u32 %v3288_v32, 16  ;;  %v3475_v15 = vshrl.u32 %v3288_v32, 16  ;;  %v2794_v53 = vld [vmem:[#allocation2 + $0x64] sm:$0xf]  ;;  %v3481_v50 = vshll.u32 %v3289_v35, 16  ;;  %v1438_v41 = vrot.slane %v1437_v16, 4  ;;  %v2200_v22 = vpop.permute.xlu1 %2199 }
  0xf1   : > { %3217 = vrot.lane.b32.xlu0 %v5779_v29, %s5836_s28  ;;  %2756 = vst.msk [vmem:[#allocation3 + $0x8] sm:$0xff] %vm1194_vm15, %v5238_v38  ;;  %v2919_v61 = vrot.slane %v2794_v53, 5  ;;  %v1448_v28 = vrot.slane %v1447_v3, 4  ;;  %v3469_v21 = vrot.slane %v3468_v9, 4  ;;  %v2922_v33 = vrot.slane %v2795_v59, 5  ;;  %v6875_v0 = vpop.permute.xlu0 %3753 }
  0xf2   : > { %v3473_v63 = vrot.slane %v3471_v48, 5  ;;  %v3477_v27 = vrot.slane %v3475_v15, 4  ;;  %3076 = vst.msk [vmem:[#allocation3 + $0x8] sm:$0xff] %vm1742_vm2, %v6622_v44  ;;  %v3483_v6 = vrot.slane %v3481_v50, 5  ;;  %v1443_v57 = vsel %vm5962_vm12, %v1438_v41, %v1442_v47  ;;  %v5814_v44 = vld [vmem:[#allocation2 + $0x3c] sm:$0xff]  }
  0xf3   : > { %3253 = vst.msk [vmem:[#allocation3 + $0x8] sm:$0xff] %vm2066_vm4, %v6556_v26  ;;  %v6871_v10 = vsel %vm5906_vm8, %v5261_v17, %v2919_v61  ;;  %v2921_v2 = vrot.slane %v2919_v61, 4  ;;  %v1453_v26 = vsel %vm5962_vm12, %v1448_v28, %v1452_v62  ;;  %v2338_v55 = vrot.slane %v2336_v42, 5  ;;  %v276_v17 = vld [vmem:[#allocation2 + $0x6c] sm:$0x1]  ;;  %v6887_v47 = vld [vmem:[%s7875_s3 + $0x80] sm:$0xff]  }
  0xf4   : > { %2246 = vst.msk [vmem:[#allocation3 + $0x30] sm:$0xff] %vm2243_vm5, %v2200_v22  ;;  %v3474_v40 = vsel %vm5962_vm12, %v3469_v21, %v3473_v63  ;;  %v3478_v4 = vor.u32 %v3477_v27, %v3473_v63  ;;  %3797 = vst.msk [vmem:[#allocation3 + $0x8] sm:$0xff] %vm2243_vm5, %v6723_v18  ;;  %v5181_v20 = vcombine.low %v1443_v57, %v1453_v26  ;;  %v2342_v23 = vshll.u32 %v2264_v7, 16  ;;  %v1780_v32 = vld [vmem:[#allocation2 + $0x54] sm:$0xe]  ;;  %v1721_v16 = vpop.permute.xlu1 %1720  ;;  %v5817_v63 = vld [vmem:[#allocation2 + $0x48] sm:$0xff]  }
  0xf5   : > { %v6891_v11 = vsel %vm5906_vm8, %v2921_v2, %v2922_v33  ;;  %v2346_v52 = vshrl.u32 %v2264_v7, 16  ;;  %1200 = vst.msk [vmem:[#allocation3 + $0x78] sm:$0xff] %vm1194_vm15, %v5814_v44  ;;  %v2339_v18 = vor.u32 %v2338_v55, %v6856_v56  ;;  %v2352_v29 = vshll.u32 %v2265_v49, 16  ;;  %v1781_v38 = vld [vmem:[#allocation2 + $0x58] sm:$0xf]  ;;  %5693 = vmatprep.subr.bf16.mxu1 %v6887_v47  ;;  %v6902_v15 = vpop.permute.xlu0 %3054  ;;  %1201 = vst.msk [vmem:[#allocation3 + $0x90] sm:$0xff] %vm1194_vm15, %v5817_v63 }
  0xf6   : > { %v3479_v62 = vrot.slane %v3478_v4, 4  ;;  %v5277_v19 = vcombine.low %v6871_v10, %v6891_v11  ;;  %1708 = vrot.lane.b32.xlu1 %v5181_v20, %s5837_s29  ;;  %v2344_v3 = vrot.slane %v2342_v23, 5  ;;  %v277_v35 = vsel %vm5885_vm3, 0, %v276_v17  ;;  %v1782_v48 = vld [vmem:[#allocation2 + $0x5c] sm:$0x1]  ;;  %1756 = vst.msk [vmem:[#allocation3 + $0x138] sm:$0xff] %vm1742_vm2, %v1721_v16 }
  0xf7   : > { %v2348_v42 = vrot.slane %v2346_v52, 4  ;;  %v517_v9 = vmax.f32 %v6844_v39, 0.0  ;;  %v2340_v53 = vrot.slane %v2339_v18, 4  ;;  %v2354_v7 = vrot.slane %v2352_v29, 5  ;;  %278 = vst [vmem:[#allocation2 + $0x6c] sm:$0x1] %v277_v35 }
  0xf8   : > { %v3484_v56 = vsel %vm5962_vm12, %v3479_v62, %v3483_v6  ;;  %v518_v50 = vmax.f32 %v6848_v36, 0.0  ;;  %v2296_v59 = vld [vmem:[#allocation2 + $0x9c] sm:$0xf]  ;;  %v5197_v21 = vrot.slane %v1780_v32, 9  ;;  %v1909_v33 = vrot.slane %v1781_v38, 5  ;;  %v2045_v2 = vpop.permute.xlu1 %2044 }
  0xf9   : > { %v5308_v61 = vcombine.low %v3474_v40, %v3484_v56  ;;  %v2349_v41 = vor.u32 %v2348_v42, %v2344_v3  ;;  %v5436_v28 = vpack.c.bf16 %v517_v9, %v517_v9  ;;  %v2345_v39 = vsel %vm5962_vm12, %v2340_v53, %v2344_v3  ;;  %v2297_v10 = vld [vmem:[#allocation2 + $0xa0] sm:$0xf]  ;;  %v6911_v40 = vpop.permute.xlu0 %3231  ;;  %2080 = vst.msk [vmem:[#allocation3 + $0x138] sm:$0xff] %vm2066_vm4, %v2045_v2  ;;  %v2298_v11 = vld [vmem:[#allocation2 + $0xa4] sm:$0x1]  ;;  %v4101_v23 = vld [vmem:[#allocation3] sm:$0xff] }
  0xfa   : > { %v5437_v27 = vpack.c.bf16 %v518_v50, %v518_v50  ;;  %v1912_v22 = vrot.slane %v1782_v48, 5  ;;  %v2597_v36 = vshrl.u32 %v2296_v59, 16  ;;  %v1910_v55 = vsel %vm5906_vm8, %v5197_v21, %v1909_v33  ;;  %v332_v20 = vld [vmem:[#allocation2 + $0x74] sm:$0x1]  ;;  %v2266_v32 = vld [vmem:[#allocation2 + $0x24] sm:$0xf] }
  0xfb   : > { %3761 = vrot.lane.b32.xlu0 %v5308_v61, %s5838_s30  ;;  %v2350_v6 = vrot.slane %v2349_v41, 4  ;;  %v768_v57 = vshrl.u32 %v5436_v28, 16  ;;  %v771_v49 = vshll.u32 %v5436_v28, 16  ;;  %v4102_v44 = vld [vmem:[#allocation3 + $0x8] sm:$0xff]  ;;  %v1911_v17 = vrot.slane %v1909_v33, 4 }
  0xfc   : > { %v776_v4 = vshrl.u32 %v5437_v27, 16  ;;  %v779_v26 = vshll.u32 %v5437_v27, 16  ;;  %4373 = vmatprep.mubr.bf16.mxu0 %v4102_v44  ;;  %v2599_v18 = vrot.slane %v2597_v36, 4  ;;  %v2600_v29 = vshll.u32 %v2296_v59, 16  ;;  %v2267_v35 = vld [vmem:[#allocation2 + $0x28] sm:$0xf] }
  0xfd   : > { %v2355_v52 = vsel %vm5962_vm12, %v2350_v6, %v2354_v7  ;;  %v770_v62 = vrot.slane %v768_v57, 7  ;;  %4374 = vmatmul.mubr.bf16.vlgmr.msra.gmra.mrb[0].mxu0 %v4101_v23  ;;  %v1913_v3 = vsel %vm5906_vm8, %v1911_v17, %v1912_v22  ;;  %v2606_v42 = vshll.u32 %v2297_v10, 16  ;;  %v2268_v50 = vld [vmem:[#allocation2 + $0x2c] sm:$0x1]  ;;  %v6924_v61 = vpop.permute.xlu0 %3034  ;;  %v5791_v33 = vld [vmem:[#allocation2 + $0x60] sm:$0xff]  }
  0xfe   : > { %v5239_v38 = vcombine.low %v2345_v39, %v2355_v52  ;;  %v6919_v16 = vrot.slane %v776_v4, 7  ;;  %v1010_v56 = vld [vmem:[#allocation2 + $0x6c] sm:$0xf]  ;;  %v5213_v53 = vcombine.low %v1910_v55, %v1913_v3  ;;  %v2602_v7 = vrot.slane %v2600_v29, 5  ;;  %v1235_v6 = vld [vmem:[#allocation2 + $0x60] sm:$0xf] }
  0xff   : > { %3042 = vrot.lane.b32.xlu0 %v5277_v19, %s5837_s29  ;;  %v773_v9 = vor.u32 %v771_v49, %v770_v62  ;;  %v774_v48 = vrot.slane %v770_v62, 4  ;;  %v2608_v28 = vrot.slane %v2606_v42, 5  ;;  %v2610_v21 = vshrl.u32 %v2297_v10, 16  ;;  %v6948_v3 = vld [vmem:[%s5915_s23 + $0x50] sm:$0xff]  }
 0x100   : > { %2757 = vst.msk [vmem:[#allocation3 + $0x20] sm:$0xff] %vm1194_vm15, %v5239_v38  ;;  %v781_v59 = vor.u32 %v779_v26, %v6919_v16  ;;  %v783_v41 = vrot.slane %v6919_v16, 4  ;;  %2032 = vrot.lane.b32.xlu1 %v5213_v53, %s5836_s28  ;;  %v2603_v63 = vor.u32 %v2602_v7, %v2599_v18  ;;  %v2616_v39 = vshll.u32 %v2298_v11, 16  ;;  %v1236_v11 = vld [vmem:[#allocation2 + $0x64] sm:$0xf] }
 0x101   : > { %3077 = vst.msk [vmem:[#allocation3 + $0x20] sm:$0xff] %vm1742_vm2, %v6649_v58  ;;  %v1011_v19 = vsel %vm5972_vm13, %v773_v9, %v1010_v56  ;;  %v333_v27 = vsel %vm5897_vm7, 0, %v332_v20  ;;  %v2612_v10 = vrot.slane %v2610_v21, 4  ;;  %v2357_v58 = vshrl.u32 %v2266_v32, 16  ;;  %v1701_v4 = vpop.permute.xlu0 %1700  ;;  %v5818_v20 = vld [vmem:[#allocation2 + $0x54] sm:$0xff]  }
 0x102   : > { %3254 = vst.msk [vmem:[#allocation3 + $0x20] sm:$0xff] %vm2066_vm4, %v6533_v30  ;;  %v782_v22 = vsel %vm5981_vm14, %v774_v48, %v781_v59  ;;  %1012 = vst [vmem:[#allocation2 + $0x6c] sm:$0xf] %v1011_v19  ;;  %v2360_v2 = vshll.u32 %v2266_v32, 16  ;;  %v2604_v57 = vrot.slane %v2603_v63, 4  ;;  %v2618_v49 = vrot.slane %v2616_v39, 5 }
 0x103   : > { %334 = vst [vmem:[#allocation2 + $0x74] sm:$0x1] %v333_v27  ;;  %1013 = vst.msk [vmem:[#allocation2 + $0x70] sm:$0xf] %vm237_vm0, %v782_v22  ;;  %v2366_v36 = vshll.u32 %v2267_v35, 16  ;;  %v2370_v44 = vshrl.u32 %v2267_v35, 16  ;;  %v2613_v30 = vor.u32 %v2612_v10, %v2608_v28  ;;  %v448_v63 = vmul.f32 %v6788_v60, %v5522_v51 }
 0x104   : > { %3798 = vst.msk [vmem:[#allocation3 + $0x20] sm:$0xff] %vm2243_vm5, %v6765_v46  ;;  %v2359_v26 = vrot.slane %v2357_v58, 4  ;;  %v2362_v55 = vrot.slane %v2360_v2, 5  ;;  %v2376_v17 = vshll.u32 %v2268_v50, 16  ;;  %v2609_v23 = vsel %vm5962_vm12, %v2604_v57, %v2608_v28  ;;  %2209 = vrot.lane.b32.xlu1 %v5791_v33, %s5838_s30  ;;  %v1237_v18 = vld [vmem:[#allocation2 + $0x68] sm:$0x1] }
 0x105   : > { %1746 = vst.msk [vmem:[#allocation3 + $0x48] sm:$0xff] %vm1742_vm2, %v1701_v4  ;;  %v2368_v52 = vrot.slane %v2366_v36, 5  ;;  %v2372_v62 = vrot.slane %v2370_v44, 4  ;;  %v1455_v29 = vshrl.u32 %v1235_v6, 16  ;;  %v2614_v46 = vrot.slane %v2613_v30, 4 }
 0x106   : > { %v2363_v32 = vor.u32 %v2362_v55, %v2359_v26  ;;  %v2378_v38 = vrot.slane %v2376_v17, 5  ;;  %v1458_v16 = vshll.u32 %v1235_v6, 16  ;;  %1202 = vst.msk [vmem:[#allocation3 + $0xa8] sm:$0xff] %vm1194_vm15, %v5818_v20  ;;  %v1464_v9 = vshll.u32 %v1236_v11, 16  ;;  %v6951_v56 = vpop.permute.xlu1 %3775  ;;  %v279_v57 = vld [vmem:[#allocation2 + $0x78] sm:$0x1] }
 0x107   : > { %v2373_v42 = vor.u32 %v2372_v62, %v2368_v52  ;;  %v1457_v35 = vrot.slane %v1455_v29, 4  ;;  %v1468_v48 = vshrl.u32 %v1236_v11, 16  ;;  %v2619_v53 = vsel %vm5962_vm12, %v2614_v46, %v2618_v49  ;;  %v1783_v29 = vld [vmem:[#allocation2 + $0x60] sm:$0xe] }
 0x108   : > { %v2364_v7 = vrot.slane %v2363_v32, 4  ;;  %v1460_v50 = vrot.slane %v1458_v16, 5  ;;  %v1474_v59 = vshll.u32 %v1237_v18, 16  ;;  %v5250_v28 = vcombine.low %v2609_v23, %v2619_v53 }
 0x109   : > { %v3290_v19 = vld [vmem:[#allocation2 + $0x6c] sm:$0xf]  ;;  %v449_v39 = vmul.f32 %v6788_v60, %v5523_v45  ;;  %v5526_v27 = vunpack.c.l.bf16 %v6948_v3  ;;  %v2374_v45 = vrot.slane %v2373_v42, 4  ;;  %v1466_v55 = vrot.slane %v1464_v9, 5 }
 0x10a   : > { %v1014_v21 = vld [vmem:[#allocation2 + $0x74] sm:$0x1]  ;;  %v5787_v33 = vld [vmem:[#allocation2 + $0x6c] sm:$0xff]   ;;  %v3486_v58 = vshrl.u32 %v3290_v19, 16  ;;  %v2369_v2 = vsel %vm5962_vm12, %v2364_v7, %v2368_v52  ;;  %v1461_v6 = vor.u32 %v1460_v50, %v1457_v35  ;;  %2768 = vst.msk [vmem:[#allocation3 + $0x128] sm:$0xff] %vm1194_vm15, %v5250_v28  ;;  %v3489_v51 = vshll.u32 %v3290_v19, 16  ;;  %v2222_v44 = vpop.permute.xlu1 %2221  ;;  %v6984_v35 = vpop.permute.xlu0 %3211 }
 0x10b   : > { %v1015_v22 = vsel %vm5885_vm3, %v783_v41, %v1014_v21  ;;  %v3291_v10 = vld [vmem:[#allocation2 + $0x70] sm:$0xf]  ;;  %v2796_v36 = vld [vmem:[#allocation2 + $0x6c] sm:$0xe]  ;;  %3219 = vrot.lane.b32.xlu0 %v5787_v33, %s5836_s28  ;;  %3088 = vst.msk [vmem:[#allocation3 + $0x128] sm:$0xff] %vm1742_vm2, %v6669_v43  ;;  %v2379_v23 = vsel %vm5962_vm12, %v2374_v45, %v2378_v38  ;;  %v1470_v18 = vrot.slane %v1468_v48, 4  ;;  %v488_v21 = vadd.f32 %v6745_v24, %v449_v39 }
 0x10c   : > { %1016 = vst [vmem:[#allocation2 + $0x74] sm:$0x1] %v1015_v22  ;;  %v3495_v13 = vshll.u32 %v3291_v10, 16  ;;  %v3499_v49 = vshrl.u32 %v3291_v10, 16  ;;  %v3488_v41 = vrot.slane %v3486_v58, 4  ;;  %v5262_v30 = vrot.slane %v2796_v36, 9 }
 0x10d   : > { %v2797_v4 = vld [vmem:[#allocation2 + $0x70] sm:$0xf]  ;;  %v1462_v26 = vrot.slane %v1461_v6, 4  ;;  %2257 = vst.msk [vmem:[#allocation3 + $0x138] sm:$0xff] %vm2243_vm5, %v2222_v44  ;;  %v3491_v17 = vrot.slane %v3489_v51, 5  ;;  %v5240_v52 = vcombine.low %v2369_v2, %v2379_v23  ;;  %v1476_v32 = vrot.slane %v1474_v59, 5 }
 0x10e   : > { %3265 = vst.msk [vmem:[#allocation3 + $0x128] sm:$0xff] %vm2066_vm4, %v6554_v14  ;;  %v6973_v11 = vrot.slane %v3495_v13, 5  ;;  %v3501_v20 = vrot.slane %v3499_v49, 4  ;;  %v2926_v62 = vrot.slane %v2797_v4, 5  ;;  %v280_v16 = vsel %vm5885_vm3, 0, %v279_v57  ;;  %v4105_v42 = vld [vmem:[#allocation3 + $0x20] sm:$0xff]  ;;  %v2025_v38 = vpop.permute.xlu1 %2024 }
 0x10f   : > { %v1467_v43 = vsel %vm5962_vm12, %v1462_v26, %v1466_v55  ;;  %3809 = vst.msk [vmem:[#allocation3 + $0x128] sm:$0xff] %vm2243_vm5, %v6858_v37  ;;  %v3492_v46 = vor.u32 %v3491_v17, %v3488_v41  ;;  %v1471_v53 = vor.u32 %v1470_v18, %v1466_v55  ;;  %281 = vst [vmem:[#allocation2 + $0x78] sm:$0x1] %v280_v16  ;;  %v1784_v7 = vld [vmem:[#allocation2 + $0x64] sm:$0xf]  ;;  %4381 = vmatprep.mubr.bf16.mxu0 %v4105_v42  ;;  %v4104_v50 = vld [vmem:[#allocation3 + $0x18] sm:$0xff] }
 0x110   : > { %v3502_v14 = vor.u32 %v3501_v20, %v6973_v11  ;;  %2758 = vst.msk [vmem:[#allocation3 + $0x38] sm:$0xff] %vm1194_vm15, %v5240_v52  ;;  %v6989_v9 = vsel %vm5906_vm8, %v5262_v30, %v2926_v62  ;;  %v2928_v48 = vrot.slane %v2926_v62, 4  ;;  %v487_v37 = vadd.f32 %v6745_v24, %v448_v63  ;;  %v1785_v19 = vld [vmem:[#allocation2 + $0x68] sm:$0x1]  ;;  %4382 = vmatmul.mubr.bf16.gmra.mrb[4].mxu0 %v4104_v50  ;;  %v5819_v22 = vld [vmem:[#allocation2 + $0x60] sm:$0xff]  }
 0x111   : > { %2070 = vst.msk [vmem:[#allocation3 + $0x48] sm:$0xff] %vm2066_vm4, %v2025_v38  ;;  %v3493_v59 = vrot.slane %v3492_v46, 4  ;;  %v5198_v33 = vrot.slane %v1783_v29, 9  ;;  %v1472_v58 = vrot.slane %v1471_v53, 4  ;;  %v5527_v6 = vunpack.c.h.bf16 %v6948_v3  ;;  %v335_v44 = vld [vmem:[#allocation2 + $0x80] sm:$0x1] }
 0x112   : > { %v3503_v28 = vrot.slane %v3502_v14, 4  ;;  %3078 = vst.msk [vmem:[#allocation3 + $0x38] sm:$0xff] %vm1742_vm2, %v6692_v54  ;;  %v519_v2 = vmax.f32 %v487_v37, 0.0  ;;  %v7002_v57 = vmul.f32 %v6788_v60, %v5526_v27  ;;  %v520_v13 = vmax.f32 %v488_v21, 0.0  ;;  %v1239_v18 = vld [vmem:[#allocation2 + $0x70] sm:$0xf] }
 0x113   : > { %v3292_v10 = vld [vmem:[#allocation2 + $0x74] sm:$0x1]  ;;  %3255 = vst.msk [vmem:[#allocation3 + $0x38] sm:$0xff] %vm2066_vm4, %v6593_v34  ;;  %v3498_v54 = vsel %vm5962_vm12, %v3493_v59, %v6973_v11  ;;  %v2202_v34 = vpop.permute.xlu1 %2201  ;;  %v1477_v49 = vsel %vm5962_vm12, %v1472_v58, %v1476_v32  ;;  %v1916_v36 = vrot.slane %v1784_v7, 5  ;;  %v1919_v27 = vrot.slane %v1785_v19, 5  ;;  %v5816_v11 = vld [vmem:[%s7875_s3 + $0x88] sm:$0xff]  }
 0x114   : > { %v2798_v63 = vld [vmem:[#allocation2 + $0x74] sm:$0x1]  ;;  %v3505_v39 = vshll.u32 %v3292_v10, 16  ;;  %3799 = vst.msk [vmem:[#allocation3 + $0x38] sm:$0xff] %vm2243_vm5, %v6875_v0  ;;  %v5438_v45 = vpack.c.bf16 %v519_v2, %v519_v2  ;;  %2247 = vst.msk [vmem:[#allocation3 + $0x48] sm:$0xff] %vm2243_vm5, %v2202_v34  ;;  %v5182_v30 = vcombine.low %v1467_v43, %v1477_v49  ;;  %v5439_v26 = vpack.c.bf16 %v520_v13, %v520_v13  ;;  %v7017_v17 = vpop.permute.xlu0 %3755  ;;  %v4137_v43 = vld [vmem:[#allocation3 + $0x120] sm:$0xff] }
 0x115   : > { %v2929_v51 = vrot.slane %v2798_v63, 5  ;;  %1203 = vst.msk [vmem:[#allocation3 + $0xc0] sm:$0xff] %vm1194_vm15, %v5819_v22  ;;  %v1238_v0 = vld [vmem:[#allocation2 + $0x6c] sm:$0xf]  ;;  %v1917_v62 = vsel %vm5906_vm8, %v5198_v33, %v1916_v36  ;;  %v1918_v32 = vrot.slane %v1916_v36, 4  ;;  %v336_v37 = vsel %vm5897_vm7, 0, %v335_v44 }
 0x116   : > { %v3507_v41 = vrot.slane %v3505_v39, 5  ;;  %v4138_v55 = vld [vmem:[#allocation3 + $0x128] sm:$0xff]  ;;  %v785_v23 = vshrl.u32 %v5438_v45, 16  ;;  %v788_v52 = vshll.u32 %v5438_v45, 16  ;;  %1710 = vrot.lane.b32.xlu1 %v5182_v30, %s5837_s29  ;;  %v793_v46 = vshrl.u32 %v5439_v26, 16  ;;  %v4107_v13 = vld [vmem:[#allocation3 + $0x30] sm:$0xff] }
 0x117   : > { %v7015_v4 = vsel %vm5906_vm8, %v2928_v48, %v2929_v51  ;;  %4469 = vmatprep.mubr.bf16.mxu1 %v4138_v55  ;;  %v796_v14 = vshll.u32 %v5439_v26, 16  ;;  %v1240_v16 = vld [vmem:[#allocation2 + $0x74] sm:$0x1]  ;;  %v282_v42 = vld [vmem:[#allocation2 + $0x84] sm:$0x1]  ;;  %v1723_v38 = vpop.permute.xlu1 %1722  ;;  %v1479_v7 = vshrl.u32 %v1238_v0, 16  ;;  %v1920_v59 = vsel %vm5906_vm8, %v1918_v32, %v1919_v27 }
 0x118   : > { %v5278_v20 = vcombine.low %v6989_v9, %v7015_v4  ;;  %v3508_v29 = vsel %vm5962_vm12, %v3503_v28, %v3507_v41  ;;  %4470 = vmatmul.mubr.bf16.vlgmr.msra.gmra.mrb[0].mxu1 %v4137_v43  ;;  %v787_v48 = vrot.slane %v785_v23, 7  ;;  %v1017_v53 = vld [vmem:[#allocation2 + $0x78] sm:$0xf]  ;;  %1757 = vst.msk [vmem:[#allocation3 + $0x150] sm:$0xff] %vm1742_vm2, %v1723_v38  ;;  %v795_v50 = vrot.slane %v793_v46, 7  ;;  %v7036_v34 = vpop.permute.xlu0 %3056  ;;  %v5801_v36 = vld [vmem:[#allocation2 + $0x6c] sm:$0xff]  }
 0x119   : > { %v5309_v9 = vcombine.low %v3498_v54, %v3508_v29  ;;  %5694 = vmatpush3.bf16.msra.mxu1 %v6887_v47  ;;  %337 = vst [vmem:[#allocation2 + $0x80] sm:$0x1] %v336_v37  ;;  %v1482_v28 = vshll.u32 %v1238_v0, 16  ;;  %v1488_v21 = vshll.u32 %v1239_v18, 16  ;;  %v1786_v19 = vld [vmem:[#allocation2 + $0x6c] sm:$0xe]  ;;  %v5214_v10 = vcombine.low %v1917_v62, %v1920_v59 }
 0x11a   : > { %5695 = vmatprep.subr.bf16.mxu1 %v5816_v11  ;;  %v790_v33 = vor.u32 %v788_v52, %v787_v48  ;;  %v791_v22 = vrot.slane %v787_v48, 4  ;;  %v1481_v63 = vrot.slane %v1479_v7, 4  ;;  %v798_v2 = vor.u32 %v796_v14, %v795_v50  ;;  %v1787_v51 = vld [vmem:[#allocation2 + $0x70] sm:$0xf]  ;;  %v1788_v4 = vld [vmem:[#allocation2 + $0x74] sm:$0x1] }
 0x11b   : > { %3763 = vrot.lane.b32.xlu0 %v5309_v9, %s5838_s30  ;;  %v4108_v58 = vld [vmem:[#allocation3 + $0x38] sm:$0xff]  ;;  %v800_v54 = vrot.slane %v795_v50, 4  ;;  %v1484_v39 = vrot.slane %v1482_v28, 5  ;;  %v1490_v47 = vrot.slane %v1488_v21, 5  ;;  %v2047_v49 = vpop.permute.xlu1 %2046  ;;  %2034 = vrot.lane.b32.xlu1 %v5214_v10, %s5836_s28  ;;  %v1492_v27 = vshrl.u32 %v1239_v18, 16 }
 0x11c   : > { %4389 = vmatprep.mubr.bf16.mxu0 %v4108_v58  ;;  %v1018_v45 = vsel %vm5972_vm13, %v790_v33, %v1017_v53  ;;  %v1498_v44 = vshll.u32 %v1240_v16, 16  ;;  %v283_v41 = vsel %vm5885_vm3, 0, %v282_v42  ;;  %2081 = vst.msk [vmem:[#allocation3 + $0x150] sm:$0xff] %vm2066_vm4, %v2047_v49  ;;  %v799_v30 = vsel %vm5981_vm14, %v791_v22, %v798_v2  ;;  %v7051_v23 = vld [vmem:[#allocation2 + $0xa8] sm:$0xf] }
 0x11d   : > { %4390 = vmatmul.mubr.bf16.gmra.mrb[8].mxu0 %v4107_v13  ;;  %1019 = vst [vmem:[#allocation2 + $0x78] sm:$0xf] %v1018_v45  ;;  %v1485_v26 = vor.u32 %v1484_v39, %v1481_v63  ;;  %284 = vst [vmem:[#allocation2 + $0x84] sm:$0x1] %v283_v41  ;;  %v451_v0 = vmul.f32 %v6788_v60, %v5527_v6  ;;  %v489_v55 = vadd.f32 %v6745_v24, %v7002_v57  ;;  %v2300_v49 = vld [vmem:[#allocation2 + $0xac] sm:$0xf] }
 0x11e   : > { %5696 = vmatpush3.bf16.msra.mxu1 %v5816_v11  ;;  %1020 = vst.msk [vmem:[#allocation2 + $0x7c] sm:$0xf] %vm237_vm0, %v799_v30  ;;  %v1494_v52 = vrot.slane %v1492_v27, 4  ;;  %v5199_v62 = vrot.slane %v1786_v19, 9  ;;  %v1923_v18 = vrot.slane %v1787_v51, 5  ;;  %v1926_v3 = vrot.slane %v1788_v4, 5 }
 0x11f   : > { %3044 = vrot.lane.b32.xlu0 %v5278_v20, %s5837_s29  ;;  %v1486_v43 = vrot.slane %v1485_v26, 4  ;;  %v490_v29 = vadd.f32 %v6745_v24, %v451_v0  ;;  %v521_v46 = vmax.f32 %v489_v55, 0.0  ;;  %2211 = vrot.lane.b32.xlu1 %v5801_v36, %s5838_s30  ;;  %v1500_v6 = vrot.slane %v1498_v44, 5  ;;  %v7062_v38 = vpop.permute.xlu0 %3233 }
 0x120   : > { %v1021_v14 = vld [vmem:[#allocation2 + $0x80] sm:$0x1]  ;;  %v1495_v60 = vor.u32 %v1494_v52, %v1490_v47  ;;  %v1925_v57 = vrot.slane %v1923_v18, 4  ;;  %v2621_v11 = vshrl.u32 %v7051_v23, 16  ;;  %v1924_v42 = vsel %vm5906_vm8, %v5199_v62, %v1923_v18 }
 0x121   : > { %v1022_v20 = vsel %vm5885_vm3, %v800_v54, %v1021_v14  ;;  %v522_v32 = vmax.f32 %v490_v29, 0.0  ;;  %v5440_v16 = vpack.c.bf16 %v521_v46, %v521_v46  ;;  %v1491_v24 = vsel %vm5962_vm12, %v1486_v43, %v1490_v47 }
 0x122   : > { %1023 = vst [vmem:[#allocation2 + $0x80] sm:$0x1] %v1022_v20  ;;  %v1496_v9 = vrot.slane %v1495_v60, 4  ;;  %v1927_v48 = vsel %vm5906_vm8, %v1925_v57, %v1926_v3  ;;  %v7068_v53 = vrot.slane %v2621_v11, 4  ;;  %v2624_v59 = vshll.u32 %v7051_v23, 16 }
 0x123   : > { %v5441_v37 = vpack.c.bf16 %v522_v32, %v522_v32  ;;  %v802_v7 = vshrl.u32 %v5440_v16, 16  ;;  %v805_v50 = vshll.u32 %v5440_v16, 16  ;;  %v5215_v58 = vcombine.low %v1924_v42, %v1927_v48  ;;  %v7073_v2 = vpop.permute.xlu0 %3036 }
 0x124   : > { %v3293_v28 = vld [vmem:[#allocation2 + $0x78] sm:$0xf]  ;;  %v1501_v19 = vsel %vm5962_vm12, %v1496_v9, %v1500_v6  ;;  %v1024_v41 = vld [vmem:[#allocation2 + $0x84] sm:$0xf]  ;;  %v5820_v6 = vld [vmem:[#allocation2 + $0x6c] sm:$0xff]   ;;  %v2626_v20 = vrot.slane %v2624_v59, 5 }
 0x125   : > { %v2799_v21 = vld [vmem:[#allocation2 + $0x78] sm:$0xe]  ;;  %v3294_v22 = vld [vmem:[#allocation2 + $0x7c] sm:$0xf]  ;;  %v3510_v10 = vshrl.u32 %v3293_v28, 16  ;;  %v5183_v63 = vcombine.low %v1491_v24, %v1501_v19  ;;  %v3513_v54 = vshll.u32 %v3293_v28, 16 }
 0x126   : > { %v5796_v33 = vld [vmem:[#allocation2 + $0x78] sm:$0xff]   ;;  %v3519_v39 = vshll.u32 %v3294_v22, 16  ;;  %v3523_v47 = vshrl.u32 %v3294_v22, 16  ;;  %v5263_v13 = vrot.slane %v2799_v21, 9  ;;  %v804_v27 = vrot.slane %v802_v7, 7  ;;  %1204 = vst.msk [vmem:[#allocation3 + $0xd8] sm:$0xff] %vm1194_vm15, %v5820_v6 }
 0x127   : > { %v2800_v51 = vld [vmem:[#allocation2 + $0x7c] sm:$0xf]  ;;  %3221 = vrot.lane.b32.xlu0 %v5796_v33, %s5836_s28  ;;  %v3512_v45 = vrot.slane %v3510_v10, 4  ;;  %1712 = vrot.lane.b32.xlu1 %v5183_v63, %s5837_s29  ;;  %v810_v44 = vshrl.u32 %v5441_v37, 16  ;;  %v3515_v4 = vrot.slane %v3513_v54, 5  ;;  %v813_v0 = vshll.u32 %v5441_v37, 16  ;;  %v1703_v29 = vpop.permute.xlu0 %1702 }
 0x128   : > { %v2933_v36 = vrot.slane %v2800_v51, 5  ;;  %v3521_v30 = vrot.slane %v3519_v39, 5  ;;  %v3525_v26 = vrot.slane %v3523_v47, 4  ;;  %v807_v18 = vor.u32 %v805_v50, %v804_v27  ;;  %1747 = vst.msk [vmem:[#allocation3 + $0x60] sm:$0xff] %vm1742_vm2, %v1703_v29  ;;  %v5805_v16 = vld [vmem:[#allocation2 + $0x78] sm:$0xff]  }
 0x129   : > { %v3295_v55 = vld [vmem:[#allocation2 + $0x80] sm:$0x1]  ;;  %v808_v43 = vrot.slane %v804_v27, 4  ;;  %v3516_v46 = vor.u32 %v3515_v4, %v3512_v45  ;;  %v7082_v57 = vrot.slane %v810_v44, 7  ;;  %v2630_v32 = vshll.u32 %v2300_v49, 16 }
 0x12a   : > { %v2801_v23 = vld [vmem:[#allocation2 + $0x80] sm:$0x1]  ;;  %v7079_v52 = vsel %vm5906_vm8, %v5263_v13, %v2933_v36  ;;  %v2935_v62 = vrot.slane %v2933_v36, 4  ;;  %v3526_v3 = vor.u32 %v3525_v26, %v3521_v30  ;;  %v3529_v14 = vshll.u32 %v3295_v55, 16  ;;  %v2301_v7 = vld [vmem:[#allocation2 + $0xb0] sm:$0x1] }
 0x12b   : > { %v2936_v60 = vrot.slane %v2801_v23, 5  ;;  %v1025_v11 = vsel %vm5972_vm13, %v807_v18, %v1024_v41  ;;  %2036 = vrot.lane.b32.xlu1 %v5215_v58, %s5836_s28  ;;  %v7087_v42 = vpop.permute.xlu1 %3777  ;;  %v3517_v24 = vrot.slane %v3516_v46, 4  ;;  %v815_v50 = vor.u32 %v813_v0, %v7082_v57  ;;  %v338_v28 = vld [vmem:[#allocation2 + $0x8c] sm:$0x1]  ;;  %v1241_v21 = vld [vmem:[#allocation2 + $0x78] sm:$0xf] }
 0x12c   : > { %v3527_v9 = vrot.slane %v3526_v3, 4  ;;  %v3531_v48 = vrot.slane %v3529_v14, 5  ;;  %1026 = vst [vmem:[#allocation2 + $0x84] sm:$0xf] %v1025_v11  ;;  %v2627_v59 = vor.u32 %v2626_v20, %v7068_v53  ;;  %v2632_v22 = vrot.slane %v2630_v32, 5 }
 0x12d   : > { %v2937_v37 = vsel %vm5906_vm8, %v2935_v62, %v2936_v60  ;;  %v3522_v19 = vsel %vm5962_vm12, %v3517_v24, %v3521_v30  ;;  %v2634_v10 = vshrl.u32 %v2300_v49, 16  ;;  %v1242_v63 = vld [vmem:[#allocation2 + $0x7c] sm:$0xf]  ;;  %v816_v54 = vsel %vm5981_vm14, %v808_v43, %v815_v50  ;;  %v1243_v53 = vld [vmem:[#allocation2 + $0x80] sm:$0x1] }
 0x12e   : > { %v5279_v25 = vcombine.low %v7079_v52, %v2937_v37  ;;  %v3532_v33 = vsel %vm5962_vm12, %v3527_v9, %v3531_v48  ;;  %v2628_v39 = vrot.slane %v2627_v59, 4  ;;  %v2640_v47 = vshll.u32 %v2301_v7, 16  ;;  %1027 = vst.msk [vmem:[#allocation2 + $0x88] sm:$0xf] %vm237_vm0, %v816_v54  ;;  %v2269_v55 = vld [vmem:[#allocation2 + $0x30] sm:$0xf] }
 0x12f   : > { %v5310_v58 = vcombine.low %v3522_v19, %v3532_v33  ;;  %2213 = vrot.lane.b32.xlu1 %v5805_v16, %s5838_s30  ;;  %v2224_v51 = vpop.permute.xlu1 %2223  ;;  %v2636_v13 = vrot.slane %v2634_v10, 4  ;;  %v339_v45 = vsel %vm5897_vm7, 0, %v338_v28  ;;  %v1503_v36 = vshrl.u32 %v1241_v21, 16  ;;  %v2270_v50 = vld [vmem:[#allocation2 + $0x34] sm:$0xf] }
 0x130   : > { %v1506_v27 = vshll.u32 %v1241_v21, 16  ;;  %2258 = vst.msk [vmem:[#allocation3 + $0x150] sm:$0xff] %vm2243_vm5, %v2224_v51  ;;  %v817_v31 = vrot.slane %v7082_v57, 4  ;;  %v2642_v49 = vrot.slane %v2640_v47, 5  ;;  %340 = vst [vmem:[#allocation2 + $0x8c] sm:$0x1] %v339_v45  ;;  %v2633_v8 = vsel %vm5962_vm12, %v2628_v39, %v2632_v22  ;;  %v7112_v57 = vpop.permute.xlu0 %3213 }
 0x131   : > { %3765 = vrot.lane.b32.xlu0 %v5310_v58, %s5838_s30  ;;  %v1512_v44 = vshll.u32 %v1242_v63, 16  ;;  %v1516_v41 = vshrl.u32 %v1242_v63, 16  ;;  %v2637_v4 = vor.u32 %v2636_v13, %v2632_v22  ;;  %v1505_v30 = vrot.slane %v1503_v36, 4  ;;  %v2271_v54 = vld [vmem:[#allocation2 + $0x38] sm:$0x1] }
 0x132   : > { %v1508_v26 = vrot.slane %v1506_v27, 5  ;;  %v1522_v0 = vshll.u32 %v1243_v53, 16  ;;  %v2381_v16 = vshrl.u32 %v2269_v55, 16  ;;  %v1789_v51 = vld [vmem:[#allocation2 + $0x78] sm:$0xe]  ;;  %v2384_v36 = vshll.u32 %v2269_v55, 16 }
 0x133   : > { %v3296_v23 = vld [vmem:[#allocation2 + $0x84] sm:$0xf]  ;;  %v2027_v62 = vpop.permute.xlu1 %2026  ;;  %v2638_v18 = vrot.slane %v2637_v4, 4  ;;  %v1514_v14 = vrot.slane %v1512_v44, 5  ;;  %v1518_v60 = vrot.slane %v1516_v41, 4  ;;  %v5200_v55 = vrot.slane %v1789_v51, 9 }
 0x134   : > { %v2802_v52 = vld [vmem:[#allocation2 + $0x84] sm:$0xe]  ;;  %v3534_v43 = vshrl.u32 %v3296_v23, 16  ;;  %v3537_v29 = vshll.u32 %v3296_v23, 16  ;;  %2071 = vst.msk [vmem:[#allocation3 + $0x60] sm:$0xff] %vm2066_vm4, %v2027_v62  ;;  %v1509_v3 = vor.u32 %v1508_v26, %v1505_v30  ;;  %v1524_v6 = vrot.slane %v1522_v0, 5 }
 0x135   : > { %v5264_v46 = vrot.slane %v2802_v52, 9  ;;  %3046 = vrot.lane.b32.xlu0 %v5279_v25, %s5837_s29  ;;  %v2643_v11 = vsel %vm5962_vm12, %v2638_v18, %v2642_v49  ;;  %v5803_v24 = vld [vmem:[#allocation2 + $0x84] sm:$0xff]   ;;  %v1519_v7 = vor.u32 %v1518_v60, %v1514_v14  ;;  %v2383_v45 = vrot.slane %v2381_v16, 4  ;;  %v1791_v27 = vld [vmem:[#allocation2 + $0x80] sm:$0x1] }
 0x136   : > { %v3536_v20 = vrot.slane %v3534_v43, 4  ;;  %v3539_v32 = vrot.slane %v3537_v29, 5  ;;  %v5251_v9 = vcombine.low %v2633_v8, %v2643_v11  ;;  %v3297_v48 = vld [vmem:[#allocation2 + $0x88] sm:$0xf]  ;;  %v1510_v37 = vrot.slane %v1509_v3, 4 }
 0x137   : > { %v2204_v59 = vpop.permute.xlu1 %2203  ;;  %v1028_v25 = vld [vmem:[#allocation2 + $0x8c] sm:$0x1]  ;;  %v3543_v21 = vshll.u32 %v3297_v48, 16  ;;  %v3547_v19 = vshrl.u32 %v3297_v48, 16  ;;  %v2803_v33 = vld [vmem:[#allocation2 + $0x88] sm:$0xf] }
 0x138   : > { %v3540_v28 = vor.u32 %v3539_v32, %v3536_v20  ;;  %2248 = vst.msk [vmem:[#allocation3 + $0x60] sm:$0xff] %vm2243_vm5, %v2204_v59  ;;  %v1029_v22 = vsel %vm5885_vm3, %v817_v31, %v1028_v25  ;;  %v2940_v10 = vrot.slane %v2803_v33, 5  ;;  %v1515_v63 = vsel %vm5962_vm12, %v1510_v37, %v1514_v14  ;;  %v3300_v23 = vld [vmem:[#allocation2 + $0x94] sm:$0xf]  ;;  %v3301_v20 = vld [vmem:[#allocation2 + $0x98] sm:$0x1] }
 0x139   : > { %3223 = vrot.lane.b32.xlu0 %v5803_v24, %s5836_s28  ;;  %2769 = vst.msk [vmem:[#allocation3 + $0x140] sm:$0xff] %vm1194_vm15, %v5251_v9  ;;  %v1520_v58 = vrot.slane %v1519_v7, 4  ;;  %1030 = vst [vmem:[#allocation2 + $0x8c] sm:$0x1] %v1029_v22  ;;  %v7127_v47 = vrot.slane %v3543_v21, 5  ;;  %v3549_v53 = vrot.slane %v3547_v19, 4 }
 0x13a   : > { %3089 = vst.msk [vmem:[#allocation3 + $0x140] sm:$0xff] %vm1742_vm2, %v6902_v15  ;;  %v7125_v39 = vrot.slane %v3540_v28, 4  ;;  %v7133_v1 = vsel %vm5906_vm8, %v5264_v46, %v2940_v10  ;;  %v1790_v15 = vld [vmem:[#allocation2 + $0x7c] sm:$0xf]  ;;  %v7137_v31 = vpop.permute.xlu0 %3757  ;;  %v2942_v41 = vrot.slane %v2940_v10, 4  ;;  %v2390_v30 = vshll.u32 %v2270_v50, 16 }
 0x13b   : > { %3266 = vst.msk [vmem:[#allocation3 + $0x140] sm:$0xff] %vm2066_vm4, %v6911_v40  ;;  %v1525_v13 = vsel %vm5962_vm12, %v1520_v58, %v1524_v6  ;;  %v1725_v49 = vpop.permute.xlu1 %1724  ;;  %v3550_v44 = vor.u32 %v3549_v53, %v7127_v47  ;;  %v3299_v40 = vld [vmem:[#allocation2 + $0x90] sm:$0xf]  ;;  %v2386_v26 = vrot.slane %v2384_v36, 5  ;;  %v2394_v0 = vshrl.u32 %v2270_v50, 16  ;;  %v5821_v24 = vld [vmem:[#allocation2 + $0x78] sm:$0xff]  }
 0x13c   : > { %v5184_v4 = vcombine.low %v1515_v63, %v1525_v13  ;;  %3810 = vst.msk [vmem:[#allocation3 + $0x140] sm:$0xff] %vm2243_vm5, %v6951_v56  ;;  %v2400_v8 = vshll.u32 %v2271_v54, 16  ;;  %v2392_v62 = vrot.slane %v2390_v30, 5  ;;  %v1930_v18 = vrot.slane %v1790_v15, 5  ;;  %v2805_v33 = vld [vmem:[#allocation2 + $0x90] sm:$0xe] }
 0x13d   : > { %1758 = vst.msk [vmem:[#allocation3 + $0x168] sm:$0xff] %vm1742_vm2, %v1725_v49  ;;  %v3551_v52 = vrot.slane %v3550_v44, 4  ;;  %v1933_v43 = vrot.slane %v1791_v27, 5  ;;  %v2387_v29 = vor.u32 %v2386_v26, %v2383_v45  ;;  %v2396_v46 = vrot.slane %v2394_v0, 4  ;;  %v2806_v22 = vld [vmem:[#allocation2 + $0x94] sm:$0xf] }
 0x13e   : > { %1714 = vrot.lane.b32.xlu1 %v5184_v4, %s5837_s29  ;;  %v2402_v3 = vrot.slane %v2400_v8, 5  ;;  %v3558_v14 = vshrl.u32 %v3299_v40, 16  ;;  %v7144_v60 = vpop.permute.xlu0 %3058  ;;  %v1931_v6 = vsel %vm5906_vm8, %v5200_v55, %v1930_v18  ;;  %v1932_v11 = vrot.slane %v1930_v18, 4  ;;  %v4140_v10 = vld [vmem:[#allocation3 + $0x138] sm:$0xff]  ;;  %1205 = vst.msk [vmem:[#allocation3 + $0xf0] sm:$0xff] %vm1194_vm15, %v5821_v24 }
 0x13f   : > { %v2049_v56 = vpop.permute.xlu1 %2048  ;;  %v3561_v32 = vshll.u32 %v3299_v40, 16  ;;  %v3567_v16 = vshll.u32 %v3300_v23, 16  ;;  %v3546_v48 = vsel %vm5962_vm12, %v7125_v39, %v7127_v47  ;;  %v2388_v7 = vrot.slane %v2387_v29, 4  ;;  %v2807_v47 = vld [vmem:[#allocation2 + $0x98] sm:$0x1]  ;;  %v5808_v40 = vld [vmem:[#allocation2 + $0x84] sm:$0xff]  }
 0x140   : > { %2082 = vst.msk [vmem:[#allocation3 + $0x168] sm:$0xff] %vm2066_vm4, %v2049_v56  ;;  %v3298_v9 = vld [vmem:[#allocation2 + $0x8c] sm:$0x1]  ;;  %v2397_v50 = vor.u32 %v2396_v46, %v2392_v62  ;;  %v3560_v59 = vrot.slane %v3558_v14, 4  ;;  %v1934_v21 = vsel %vm5906_vm8, %v1932_v11, %v1933_v43  ;;  %v3571_v27 = vshrl.u32 %v3300_v23, 16 }
 0x141   : > { %v2804_v37 = vld [vmem:[#allocation2 + $0x8c] sm:$0x1]  ;;  %v3553_v25 = vshll.u32 %v3298_v9, 16  ;;  %v3563_v19 = vrot.slane %v3561_v32, 5  ;;  %v2393_v63 = vsel %vm5962_vm12, %v2388_v7, %v2392_v62  ;;  %v5216_v54 = vcombine.low %v1931_v6, %v1934_v21  ;;  %v1244_v49 = vld [vmem:[#allocation2 + $0x84] sm:$0xf] }
 0x142   : > { %v2943_v28 = vrot.slane %v2804_v37, 5  ;;  %v2398_v58 = vrot.slane %v2397_v50, 4  ;;  %v7158_v39 = vrot.slane %v3567_v16, 5  ;;  %v7160_v51 = vpop.permute.xlu0 %3235  ;;  %v3577_v30 = vshll.u32 %v3301_v20, 16  ;;  %v1245_v23 = vld [vmem:[#allocation2 + $0x88] sm:$0xf] }
 0x143   : > { %v4141_v53 = vld [vmem:[#allocation3 + $0x140] sm:$0xff]  ;;  %v7162_v13 = vpop.permute.xlu1 %3779  ;;  %v3555_v45 = vrot.slane %v3553_v25, 5  ;;  %v3564_v15 = vor.u32 %v3563_v19, %v3560_v59  ;;  %2038 = vrot.lane.b32.xlu1 %v5216_v54, %s5836_s28  ;;  %v5265_v26 = vrot.slane %v2805_v33, 9  ;;  %v3573_v55 = vrot.slane %v3571_v27, 4  ;;  %v1246_v29 = vld [vmem:[#allocation2 + $0x8c] sm:$0x1] }
 0x144   : > { %v2944_v36 = vsel %vm5906_vm8, %v2942_v41, %v2943_v28  ;;  %4477 = vmatprep.mubr.bf16.mxu1 %v4141_v53  ;;  %v2403_v4 = vsel %vm5962_vm12, %v2398_v58, %v2402_v3  ;;  %v3579_v18 = vrot.slane %v3577_v30, 5  ;;  %v2947_v43 = vrot.slane %v2806_v22, 5  ;;  %v1792_v11 = vld [vmem:[#allocation2 + $0x84] sm:$0xe]  ;;  %v1793_v9 = vld [vmem:[#allocation2 + $0x88] sm:$0xf] }
 0x145   : > { %v5280_v44 = vcombine.low %v7133_v1, %v2944_v36  ;;  %4478 = vmatmul.mubr.bf16.gmra.mrb[4].mxu1 %v4140_v10  ;;  %v3556_v0 = vsel %vm5962_vm12, %v3551_v52, %v3555_v45  ;;  %v5241_v8 = vcombine.low %v2393_v63, %v2403_v4  ;;  %v3565_v41 = vrot.slane %v3564_v15, 4  ;;  %v1794_v25 = vld [vmem:[#allocation2 + $0x8c] sm:$0x1]  ;;  %v2303_v33 = vld [vmem:[#allocation2 + $0xb8] sm:$0xf]  ;;  %v5822_v63 = vld [vmem:[#allocation2 + $0x84] sm:$0xff]  }
 0x146   : > { %v5311_v62 = vcombine.low %v3546_v48, %v3556_v0  ;;  %v2950_v1 = vrot.slane %v2807_v47, 5  ;;  %v7172_v46 = vpop.permute.xlu0 %3038  ;;  %v3574_v52 = vor.u32 %v3573_v55, %v7158_v39  ;;  %v1527_v56 = vshrl.u32 %v1244_v49, 16  ;;  %v2302_v48 = vld [vmem:[#allocation2 + $0xb4] sm:$0xf]  ;;  %1206 = vst.msk [vmem:[#allocation3 + $0x108] sm:$0xff] %vm1194_vm15, %v5822_v63 }
 0x147   : > { %v2226_v3 = vpop.permute.xlu1 %2225  ;;  %2759 = vst.msk [vmem:[#allocation3 + $0x50] sm:$0xff] %vm1194_vm15, %v5241_v8  ;;  %v3570_v14 = vsel %vm5962_vm12, %v3565_v41, %v7158_v39  ;;  %v1530_v6 = vshll.u32 %v1244_v49, 16  ;;  %2215 = vrot.lane.b32.xlu1 %v5808_v40, %s5838_s30  ;;  %v7186_v20 = vsel %vm5906_vm8, %v5265_v26, %v2947_v43  ;;  %v2949_v32 = vrot.slane %v2947_v43, 4  ;;  %v5806_v47 = vld [vmem:[#allocation2 + $0x90] sm:$0xff]   ;;  %v2304_v27 = vld [vmem:[#allocation2 + $0xbc] sm:$0x1] }
 0x148   : > { %2259 = vst.msk [vmem:[#allocation3 + $0x168] sm:$0xff] %vm2243_vm5, %v2226_v3  ;;  %3767 = vrot.lane.b32.xlu0 %v5311_v62, %s5838_s30  ;;  %v1536_v16 = vshll.u32 %v1245_v23, 16  ;;  %v1540_v24 = vshrl.u32 %v1245_v23, 16  ;;  %v3575_v37 = vrot.slane %v3574_v52, 4  ;;  %v1529_v7 = vrot.slane %v1527_v56, 4  ;;  %v4110_v56 = vld [vmem:[#allocation3 + $0x48] sm:$0xff] }
 0x149   : > { %3079 = vst.msk [vmem:[#allocation3 + $0x50] sm:$0xff] %vm1742_vm2, %v6924_v61  ;;  %v1532_v50 = vrot.slane %v1530_v6, 5  ;;  %v1546_v59 = vshll.u32 %v1246_v29, 16  ;;  %v7192_v61 = vsel %vm5906_vm8, %v2949_v32, %v2950_v1  ;;  %v5201_v19 = vrot.slane %v1792_v11, 9  ;;  %v3302_v8 = vld [vmem:[#allocation2 + $0x9c] sm:$0xf] }
 0x14a   : > { %3256 = vst.msk [vmem:[#allocation3 + $0x50] sm:$0xff] %vm2066_vm4, %v6984_v35  ;;  %v1538_v28 = vrot.slane %v1536_v16, 5  ;;  %v1542_v21 = vrot.slane %v1540_v24, 4  ;;  %v1705_v22 = vpop.permute.xlu0 %1704  ;;  %v3580_v35 = vsel %vm5962_vm12, %v3575_v37, %v3579_v18  ;;  %v5281_v58 = vcombine.low %v7186_v20, %v7192_v61  ;;  %v3303_v43 = vld [vmem:[#allocation2 + $0xa0] sm:$0xf] }
 0x14b   : > { %3800 = vst.msk [vmem:[#allocation3 + $0x50] sm:$0xff] %vm2243_vm5, %v7017_v17  ;;  %v2029_v10 = vpop.permute.xlu1 %2028  ;;  %v1533_v54 = vor.u32 %v1532_v50, %v1529_v7  ;;  %v1548_v39 = vrot.slane %v1546_v59, 5  ;;  %v5312_v53 = vcombine.low %v3570_v14, %v3580_v35  ;;  %v1937_v45 = vrot.slane %v1793_v9, 5  ;;  %v3304_v52 = vld [vmem:[#allocation2 + $0xa4] sm:$0x1] }
 0x14c   : > { %1748 = vst.msk [vmem:[#allocation3 + $0x78] sm:$0xff] %vm1742_vm2, %v1705_v22  ;;  %3048 = vrot.lane.b32.xlu0 %v5280_v44, %s5837_s29  ;;  %v1543_v17 = vor.u32 %v1542_v21, %v1538_v28  ;;  %v1940_v36 = vrot.slane %v1794_v25, 5  ;;  %v2645_v49 = vshrl.u32 %v2302_v48, 16  ;;  %v2648_v4 = vshll.u32 %v2302_v48, 16  ;;  %v2272_v9 = vld [vmem:[#allocation2 + $0x3c] sm:$0xf] }
 0x14d   : > { %2072 = vst.msk [vmem:[#allocation3 + $0x78] sm:$0xff] %vm2066_vm4, %v2029_v10  ;;  %v1534_v15 = vrot.slane %v1533_v54, 4  ;;  %v2654_v30 = vshll.u32 %v2303_v33, 16  ;;  %v1938_v26 = vsel %vm5906_vm8, %v5201_v19, %v1937_v45  ;;  %v1939_v0 = vrot.slane %v1937_v45, 4  ;;  %v2274_v35 = vld [vmem:[#allocation2 + $0x44] sm:$0x1] }
 0x14e   : > { %v1544_v40 = vrot.slane %v1543_v17, 4  ;;  %v2658_v44 = vshrl.u32 %v2303_v33, 16  ;;  %v2647_v23 = vrot.slane %v2645_v49, 4  ;;  %v2650_v62 = vrot.slane %v2648_v4, 5  ;;  %v2273_v33 = vld [vmem:[#allocation2 + $0x40] sm:$0xf] }
 0x14f   : > { %v2206_v41 = vpop.permute.xlu1 %2205  ;;  %v1539_v55 = vsel %vm5962_vm12, %v1534_v15, %v1538_v28  ;;  %v2656_v18 = vrot.slane %v2654_v30, 5  ;;  %v1941_v29 = vsel %vm5906_vm8, %v1939_v0, %v1940_v36  ;;  %v2664_v14 = vshll.u32 %v2304_v27, 16  ;;  %v2305_v36 = vld [vmem:[#allocation2 + $0xc0] sm:$0xf]  ;;  %v5811_v4 = vld [vmem:[#allocation2 + $0x90] sm:$0xff]  }
 0x150   : > { %2249 = vst.msk [vmem:[#allocation3 + $0x78] sm:$0xff] %vm2243_vm5, %v2206_v41  ;;  %3225 = vrot.lane.b32.xlu0 %v5806_v47, %s5836_s28  ;;  %v1549_v1 = vsel %vm5962_vm12, %v1544_v40, %v1548_v39  ;;  %v2660_v3 = vrot.slane %v2658_v44, 4  ;;  %v5217_v11 = vcombine.low %v1938_v26, %v1941_v29  ;;  %v2651_v32 = vor.u32 %v2650_v62, %v2647_v23  ;;  %v5809_v15 = vld [vmem:[#allocation2 + $0x9c] sm:$0xff]   ;;  %v7221_v40 = vpop.permute.xlu0 %3215 }
 0x151   : > { %v5185_v6 = vcombine.low %v1539_v55, %v1549_v1  ;;  %v3582_v16 = vshrl.u32 %v3302_v8, 16  ;;  %v2666_v37 = vrot.slane %v2664_v14, 5  ;;  %v3585_v7 = vshll.u32 %v3302_v8, 16  ;;  %v2306_v55 = vld [vmem:[#allocation2 + $0xc4] sm:$0xf] }
 0x152   : > { %v4111_v24 = vld [vmem:[#allocation3 + $0x50] sm:$0xff]  ;;  %v2661_v48 = vor.u32 %v2660_v3, %v2656_v18  ;;  %v3591_v50 = vshll.u32 %v3303_v43, 16  ;;  %v2652_v25 = vrot.slane %v2651_v32, 4  ;;  %v3595_v21 = vshrl.u32 %v3303_v43, 16 }
 0x153   : > { %4397 = vmatprep.mubr.bf16.mxu0 %v4111_v24  ;;  %v1707_v59 = vpop.permute.xlu1 %1706  ;;  %1716 = vrot.lane.b32.xlu1 %v5185_v6, %s5837_s29  ;;  %v3584_v28 = vrot.slane %v3582_v16, 4  ;;  %v3601_v19 = vshll.u32 %v3304_v52, 16  ;;  %v3587_v10 = vrot.slane %v3585_v7, 5  ;;  %v2405_v54 = vshrl.u32 %v2272_v9, 16  ;;  %v2307_v14 = vld [vmem:[#allocation2 + $0xc8] sm:$0x1] }
 0x154   : > { %4398 = vmatmul.mubr.bf16.gmra.mrb[12].mxu0 %v4110_v56  ;;  %1749 = vst.msk [vmem:[#allocation3 + $0x90] sm:$0xff] %vm1742_vm2, %v1707_v59  ;;  %3769 = vrot.lane.b32.xlu0 %v5312_v53, %s5838_s30  ;;  %v2662_v22 = vrot.slane %v2661_v48, 4  ;;  %v3593_v63 = vrot.slane %v3591_v50, 5  ;;  %v2657_v39 = vsel %vm5962_vm12, %v2652_v25, %v2656_v18  ;;  %v3597_v47 = vrot.slane %v3595_v21, 4  ;;  %v2277_v21 = vld [vmem:[#allocation2 + $0x50] sm:$0x1] }
 0x155   : > { %v3603_v17 = vrot.slane %v3601_v19, 5  ;;  %v2408_v45 = vshll.u32 %v2272_v9, 16  ;;  %v3588_v49 = vor.u32 %v3587_v10, %v3584_v28  ;;  %v2407_v30 = vrot.slane %v2405_v54, 4 }
 0x156   : > { %v2667_v27 = vsel %vm5962_vm12, %v2662_v22, %v2666_v37  ;;  %v2414_v53 = vshll.u32 %v2273_v33, 16  ;;  %v3598_v44 = vor.u32 %v3597_v47, %v3593_v63  ;;  %v2418_v41 = vshrl.u32 %v2273_v33, 16 }
 0x157   : > { %v2031_v26 = vpop.permute.xlu1 %2030  ;;  %2040 = vrot.lane.b32.xlu1 %v5217_v11, %s5836_s28  ;;  %v5252_v0 = vcombine.low %v2657_v39, %v2667_v27  ;;  %v2410_v8 = vrot.slane %v2408_v45, 5  ;;  %v3589_v23 = vrot.slane %v3588_v49, 4  ;;  %v2424_v18 = vshll.u32 %v2274_v35, 16  ;;  %v2278_v35 = vld [vmem:[#allocation2 + $0x54] sm:$0xf] }
 0x158   : > { %2073 = vst.msk [vmem:[#allocation3 + $0x90] sm:$0xff] %vm2066_vm4, %v2031_v26  ;;  %3050 = vrot.lane.b32.xlu0 %v5281_v58, %s5837_s29  ;;  %v2416_v62 = vrot.slane %v2414_v53, 5  ;;  %v2669_v43 = vshrl.u32 %v2305_v36, 16  ;;  %v3599_v1 = vrot.slane %v3598_v44, 4  ;;  %v2420_v3 = vrot.slane %v2418_v41, 4 }
 0x159   : > { %2770 = vst.msk [vmem:[#allocation3 + $0x158] sm:$0xff] %vm1194_vm15, %v5252_v0  ;;  %v2411_v29 = vor.u32 %v2410_v8, %v2407_v30  ;;  %v2672_v52 = vshll.u32 %v2305_v36, 16  ;;  %v3594_v56 = vsel %vm5962_vm12, %v3589_v23, %v3593_v63  ;;  %v2426_v6 = vrot.slane %v2424_v18, 5  ;;  %v2275_v58 = vld [vmem:[#allocation2 + $0x48] sm:$0xf] }
 0x15a   : > { %3090 = vst.msk [vmem:[#allocation3 + $0x158] sm:$0xff] %vm1742_vm2, %v7036_v34  ;;  %v2671_v20 = vrot.slane %v2669_v43, 4  ;;  %v2678_v61 = vshll.u32 %v2306_v55, 16  ;;  %v3604_v32 = vsel %vm5962_vm12, %v3599_v1, %v3603_v17  ;;  %v2421_v24 = vor.u32 %v2420_v3, %v2416_v62  ;;  %v2276_v34 = vld [vmem:[#allocation2 + $0x4c] sm:$0xf] }
 0x15b   : > { %v2208_v11 = vpop.permute.xlu1 %2207  ;;  %2217 = vrot.lane.b32.xlu1 %v5811_v4, %s5838_s30  ;;  %3267 = vst.msk [vmem:[#allocation3 + $0x158] sm:$0xff] %vm2066_vm4, %v7062_v38  ;;  %v2412_v16 = vrot.slane %v2411_v29, 4  ;;  %v2674_v9 = vrot.slane %v2672_v52, 5  ;;  %v5313_v48 = vcombine.low %v3594_v56, %v3604_v32  ;;  %v2682_v7 = vshrl.u32 %v2306_v55, 16  ;;  %v7243_v59 = vpop.permute.xlu0 %3759  ;;  %v2279_v17 = vld [vmem:[#allocation2 + $0x58] sm:$0xf] }
 0x15c   : > { %2250 = vst.msk [vmem:[#allocation3 + $0x90] sm:$0xff] %vm2243_vm5, %v2208_v11  ;;  %3227 = vrot.lane.b32.xlu0 %v5809_v15, %s5836_s28  ;;  %3811 = vst.msk [vmem:[#allocation3 + $0x158] sm:$0xff] %vm2243_vm5, %v7087_v42  ;;  %v2680_v37 = vrot.slane %v2678_v61, 5  ;;  %v2688_v50 = vshll.u32 %v2307_v14, 16  ;;  %v2422_v25 = vrot.slane %v2421_v24, 4  ;;  %v2429_v19 = vshrl.u32 %v2275_v58, 16 }
 0x15d   : > { %v2417_v38 = vsel %vm5962_vm12, %v2412_v16, %v2416_v62  ;;  %v2675_v28 = vor.u32 %v2674_v9, %v2671_v20  ;;  %v2684_v33 = vrot.slane %v2682_v7, 4  ;;  %v2432_v10 = vshll.u32 %v2275_v58, 16  ;;  %v2280_v53 = vld [vmem:[#allocation2 + $0x5c] sm:$0x1]  ;;  %v4143_v0 = vld [vmem:[#allocation3 + $0x150] sm:$0xff] }
 0x15e   : > { %v2690_v22 = vrot.slane %v2688_v50, 5  ;;  %v2438_v63 = vshll.u32 %v2276_v34, 16  ;;  %v2427_v42 = vsel %vm5962_vm12, %v2422_v25, %v2426_v6  ;;  %v2431_v39 = vrot.slane %v2429_v19, 4  ;;  %v3813_v62 = vld [vmem:[#allocation2 + $0x18] sm:$0xe] }
 0x15f   : > { %v2676_v54 = vrot.slane %v2675_v28, 4  ;;  %v2442_v47 = vshrl.u32 %v2276_v34, 16  ;;  %v5242_v45 = vcombine.low %v2417_v38, %v2427_v42  ;;  %v2685_v36 = vor.u32 %v2684_v33, %v2680_v37  ;;  %v7253_v23 = vpop.permute.xlu0 %3040  ;;  %v3814_v14 = vld [vmem:[#allocation2 + $0x1c] sm:$0xf]  ;;  %v3815_v61 = vld [vmem:[#allocation2 + $0x20] sm:$0x1] }
 0x160   : > { %3771 = vrot.lane.b32.xlu0 %v5313_v48, %s5838_s30  ;;  %v2434_v15 = vrot.slane %v2432_v10, 5  ;;  %v2440_v27 = vrot.slane %v2438_v63, 5  ;;  %v2448_v30 = vshll.u32 %v2277_v21, 16  ;;  %v2453_v26 = vshrl.u32 %v2278_v35, 16  ;;  %v3816_v16 = vld [vmem:[#allocation2 + $0x24] sm:$0xe]  ;;  %s7474_s30 = scalar_lea.vmem %s7876_s4, %s5418_s20 }
 0x161   : > { %v2681_v49 = vsel %vm5962_vm12, %v2676_v54, %v2680_v37  ;;  %v2444_v4 = vrot.slane %v2442_v47, 4  ;;  %2760 = vst.msk [vmem:[#allocation3 + $0x68] sm:$0xff] %vm1194_vm15, %v5242_v45  ;;  %v2686_v44 = vrot.slane %v2685_v36, 4  ;;  %v2456_v41 = vshll.u32 %v2278_v35, 16  ;;  %v3817_v48 = vld [vmem:[#allocation2 + $0x28] sm:$0xf] }
 0x162   : > { %v2435_v8 = vor.u32 %v2434_v15, %v2431_v39  ;;  %v2462_v55 = vshll.u32 %v2279_v17, 16  ;;  %3080 = vst.msk [vmem:[#allocation3 + $0x68] sm:$0xff] %vm1742_vm2, %v7073_v2  ;;  %v2450_v1 = vrot.slane %v2448_v30, 5  ;;  %v2455_v29 = vrot.slane %v2453_v26, 4  ;;  %v3818_v37 = vld [vmem:[#allocation2 + $0x2c] sm:$0x1] }
 0x163   : > { %v4144_v18 = vld [vmem:[#allocation3 + $0x158] sm:$0xff]  ;;  %v2445_v43 = vor.u32 %v2444_v4, %v2440_v27  ;;  %v2466_v3 = vshrl.u32 %v2279_v17, 16  ;;  %3257 = vst.msk [vmem:[#allocation3 + $0x68] sm:$0xff] %vm2066_vm4, %v7112_v57  ;;  %v2691_v52 = vsel %vm5962_vm12, %v2686_v44, %v2690_v22  ;;  %v2458_v6 = vrot.slane %v2456_v41, 5  ;;  %v2281_v25 = vld [vmem:[#allocation2 + $0x60] sm:$0xf]  ;;  %v3218_v19 = vpop.permute.xlu0 %3217 }
 0x164   : > { %4485 = vmatprep.mubr.bf16.mxu1 %v4144_v18  ;;  %v2436_v56 = vrot.slane %v2435_v8, 4  ;;  %v2464_v20 = vrot.slane %v2462_v55, 5  ;;  %3801 = vst.msk [vmem:[#allocation3 + $0x68] sm:$0xff] %vm2243_vm5, %v7137_v31  ;;  %v5253_v2 = vcombine.low %v2681_v49, %v2691_v52  ;;  %v2472_v32 = vshll.u32 %v2280_v53, 16  ;;  %v2282_v10 = vld [vmem:[#allocation2 + $0x64] sm:$0xf] }
 0x165   : > { %4486 = vmatmul.mubr.bf16.gmra.mrb[8].mxu1 %v4143_v0  ;;  %v2446_v58 = vrot.slane %v2445_v43, 4  ;;  %v2468_v11 = vrot.slane %v2466_v3, 4  ;;  %v2459_v24 = vor.u32 %v2458_v6, %v2455_v29  ;;  %v5318_v9 = vrot.slane %v3813_v62, 9  ;;  %v2283_v47 = vld [vmem:[#allocation2 + $0x68] sm:$0x1]  ;;  %s5123_s20 = sshll.u32 %s7891_s19, 1 }
 0x166   : > { %v2441_v57 = vsel %vm5962_vm12, %v2436_v56, %v2440_v27  ;;  %v3911_v34 = vrot.slane %v3814_v14, 5  ;;  %2771 = vst.msk [vmem:[#allocation3 + $0x170] sm:$0xff] %vm1194_vm15, %v5253_v2  ;;  %v2474_v50 = vrot.slane %v2472_v32, 5  ;;  %v3914_v38 = vrot.slane %v3815_v61, 5  ;;  %v3819_v36 = vld [vmem:[#allocation2 + $0x30] sm:$0xe]  ;;  %s7745_s15 = scalar_lea.vmem %s7877_s5, %s5123_s20 }
 0x167   : > { %v2451_v7 = vsel %vm5962_vm12, %v2446_v58, %v2450_v1  ;;  %v2469_v31 = vor.u32 %v2468_v11, %v2464_v20  ;;  %3091 = vst.msk [vmem:[#allocation3 + $0x170] sm:$0xff] %vm1742_vm2, %v7144_v60  ;;  %v2460_v21 = vrot.slane %v2459_v24, 4  ;;  %v5319_v42 = vrot.slane %v3816_v16, 9  ;;  %v3820_v15 = vld [vmem:[#allocation2 + $0x34] sm:$0xf]  ;;  %v4113_v27 = vld [vmem:[#allocation3 + $0x60] sm:$0xff] }
 0x168   : > { %v5243_v28 = vcombine.low %v2441_v57, %v2451_v7  ;;  %v3912_v33 = vsel %vm5906_vm8, %v5318_v9, %v3911_v34  ;;  %v3913_v22 = vrot.slane %v3911_v34, 4  ;;  %v1709_v63 = vpop.permute.xlu1 %1708  ;;  %3268 = vst.msk [vmem:[#allocation3 + $0x170] sm:$0xff] %vm2066_vm4, %v7160_v51  ;;  %v3918_v54 = vrot.slane %v3817_v48, 5  ;;  %v3821_v53 = vld [vmem:[#allocation2 + $0x38] sm:$0x1]  ;;  %v4146_v16 = vld [vmem:[#allocation3 + $0x168] sm:$0xff] }
 0x169   : > { %v2470_v35 = vrot.slane %v2469_v31, 4  ;;  %v3921_v39 = vrot.slane %v3818_v37, 5  ;;  %1750 = vst.msk [vmem:[#allocation3 + $0xa8] sm:$0xff] %vm1742_vm2, %v1709_v63  ;;  %v2465_v60 = vsel %vm5962_vm12, %v2460_v21, %v2464_v20  ;;  %v2477_v45 = vshrl.u32 %v2281_v25, 16  ;;  %v3822_v26 = vld [vmem:[#allocation2 + $0x3c] sm:$0xe] }
 0x16a   : > { %2761 = vst.msk [vmem:[#allocation3 + $0x80] sm:$0xff] %vm1194_vm15, %v5243_v28  ;;  %v3915_v17 = vsel %vm5906_vm8, %v3913_v22, %v3914_v38  ;;  %v2480_v51 = vshll.u32 %v2281_v25, 16  ;;  %v3920_v30 = vrot.slane %v3918_v54, 4  ;;  %v2486_v55 = vshll.u32 %v2282_v10, 16  ;;  %v3823_v62 = vld [vmem:[#allocation2 + $0x40] sm:$0xf] }
 0x16b   : > { %3812 = vst.msk [vmem:[#allocation3 + $0x170] sm:$0xff] %vm2243_vm5, %v7162_v13  ;;  %v2475_v49 = vsel %vm5962_vm12, %v2470_v35, %v2474_v50  ;;  %v5334_v4 = vcombine.low %v3912_v33, %v3915_v17  ;;  %v3919_v13 = vsel %vm5906_vm8, %v5319_v42, %v3918_v54  ;;  %v4114_v0 = vld [vmem:[#allocation3 + $0x68] sm:$0xff]  ;;  %v2479_v8 = vrot.slane %v2477_v45, 4  ;;  %v3825_v6 = vld [vmem:[#allocation2 + $0x48] sm:$0xe]  ;;  %v4116_v63 = vld [vmem:[#allocation3 + $0x78] sm:$0xff] }
 0x16c   : > { %3081 = vst.msk [vmem:[#allocation3 + $0x80] sm:$0xff] %vm1742_vm2, %v7172_v46  ;;  %v5244_v44 = vcombine.low %v2465_v60, %v2475_v49  ;;  %v2482_v41 = vrot.slane %v2480_v51, 5  ;;  %4405 = vmatprep.mubr.bf16.mxu0 %v4114_v0  ;;  %v3922_v46 = vsel %vm5906_vm8, %v3920_v30, %v3921_v39  ;;  %v2490_v18 = vshrl.u32 %v2282_v10, 16  ;;  %v3824_v29 = vld [vmem:[#allocation2 + $0x44] sm:$0x1] }
 0x16d   : > { %3258 = vst.msk [vmem:[#allocation3 + $0x80] sm:$0xff] %vm2066_vm4, %v7221_v40  ;;  %v2496_v43 = vshll.u32 %v2283_v47, 16  ;;  %v5320_v1 = vrot.slane %v3819_v36, 9  ;;  %4406 = vmatmul.mubr.bf16.gmra.mrb[16].mxu0 %v4113_v27  ;;  %v5335_v40 = vcombine.low %v3919_v13, %v3922_v46  ;;  %v3762_v3 = vpop.permute.xlu0 %3761  ;;  %v2488_v52 = vrot.slane %v2486_v55, 5  ;;  %v3826_v20 = vld [vmem:[#allocation2 + $0x4c] sm:$0xf] }
 0x16e   : > { %3802 = vst.msk [vmem:[#allocation3 + $0x80] sm:$0xff] %vm2243_vm5, %v7243_v59  ;;  %v2483_v14 = vor.u32 %v2482_v41, %v2479_v8  ;;  %v3925_v56 = vrot.slane %v3820_v15, 5  ;;  %v2492_v59 = vrot.slane %v2490_v18, 4  ;;  %v3928_v2 = vrot.slane %v3821_v53, 5  ;;  %v3827_v11 = vld [vmem:[#allocation2 + $0x50] sm:$0x1] }
 0x16f   : > { %4085 = vst.msk [vmem:[#allocation3 + $0x10] sm:$0xff] %vm1194_vm15, %v5334_v4  ;;  %2762 = vst.msk [vmem:[#allocation3 + $0x98] sm:$0xff] %vm1194_vm15, %v5244_v44  ;;  %v2498_v61 = vrot.slane %v2496_v43, 5  ;;  %v5321_v58 = vrot.slane %v3822_v26, 9  ;;  %v3828_v32 = vld [vmem:[#allocation2 + $0x54] sm:$0xe] }
 0x170   : > { %3082 = vst.msk [vmem:[#allocation3 + $0x98] sm:$0xff] %vm1742_vm2, %v7253_v23  ;;  %v2484_v57 = vrot.slane %v2483_v14, 4  ;;  %v3926_v24 = vsel %vm5906_vm8, %v5320_v1, %v3925_v56  ;;  %v3927_v9 = vrot.slane %v3925_v56, 4  ;;  %v3932_v34 = vrot.slane %v3823_v62, 5  ;;  %v3829_v48 = vld [vmem:[#allocation2 + $0x58] sm:$0xf] }
 0x171   : > { %3259 = vst.msk [vmem:[#allocation3 + $0x98] sm:$0xff] %vm2066_vm4, %v3218_v19  ;;  %v2493_v23 = vor.u32 %v2492_v59, %v2488_v52  ;;  %v3935_v7 = vrot.slane %v3824_v29, 5  ;;  %v5322_v31 = vrot.slane %v3825_v6, 9  ;;  %v3939_v50 = vrot.slane %v3826_v20, 5  ;;  %v3830_v38 = vld [vmem:[#allocation2 + $0x5c] sm:$0x1]  ;;  %v3043_v44 = vpop.permute.xlu0 %3042 }
 0x172   : > { %4086 = vst.msk [vmem:[#allocation3 + $0x28] sm:$0xff] %vm1194_vm15, %v5335_v40  ;;  %v4147_v37 = vld [vmem:[#allocation3 + $0x170] sm:$0xff]  ;;  %v2489_v25 = vsel %vm5962_vm12, %v2484_v57, %v2488_v52  ;;  %v3929_v28 = vsel %vm5906_vm8, %v3927_v9, %v3928_v2  ;;  %v3933_v21 = vsel %vm5906_vm8, %v5321_v58, %v3932_v34  ;;  %v3934_v19 = vrot.slane %v3932_v34, 4  ;;  %v2033_v33 = vpop.permute.xlu1 %2032  ;;  %v2285_v10 = vld [vmem:[#allocation2 + $0x70] sm:$0xf] }
 0x173   : > { %3803 = vst.msk [vmem:[#allocation3 + $0x98] sm:$0xff] %vm2243_vm5, %v3762_v3  ;;  %4493 = vmatprep.mubr.bf16.mxu1 %v4147_v37  ;;  %v2284_v22 = vld [vmem:[#allocation2 + $0x6c] sm:$0xf]  ;;  %v2494_v35 = vrot.slane %v2493_v23, 4  ;;  %v5336_v42 = vcombine.low %v3926_v24, %v3929_v28  ;;  %v3940_v54 = vsel %vm5906_vm8, %v5322_v31, %v3939_v50  ;;  %v3941_v39 = vrot.slane %v3939_v50, 4 }
 0x174   : > { %4494 = vmatmul.mubr.bf16.gmra.mrb[12].mxu1 %v4146_v16  ;;  %2074 = vst.msk [vmem:[#allocation3 + $0xa8] sm:$0xff] %vm2066_vm4, %v2033_v33  ;;  %v2286_v47 = vld [vmem:[#allocation2 + $0x74] sm:$0x1]  ;;  %v3831_v60 = vld [vmem:[#allocation2 + $0x60] sm:$0xe]  ;;  %v3936_v51 = vsel %vm5906_vm8, %v3934_v19, %v3935_v7  ;;  %v3942_v36 = vrot.slane %v3827_v11, 5 }
 0x175   : > { %v4117_v45 = vld [vmem:[#allocation3 + $0x80] sm:$0xff]  ;;  %v5323_v15 = vrot.slane %v3828_v32, 9  ;;  %v3946_v27 = vrot.slane %v3829_v48, 5  ;;  %v2499_v49 = vsel %vm5962_vm12, %v2494_v35, %v2498_v61  ;;  %4087 = vst.msk [vmem:[#allocation3 + $0x40] sm:$0xff] %vm1194_vm15, %v5336_v42  ;;  %v5337_v4 = vcombine.low %v3933_v21, %v3936_v51  ;;  %v3832_v53 = vld [vmem:[#allocation2 + $0x64] sm:$0xf] }
 0x176   : > { %v4103_v17 = vld [vmem:[#allocation3 + $0x10] sm:$0xff]  ;;  %4413 = vmatprep.mubr.bf16.mxu0 %v4117_v45  ;;  %v3949_v13 = vrot.slane %v3830_v38, 5  ;;  %v2501_v30 = vshrl.u32 %v2284_v22, 16  ;;  %v5245_v0 = vcombine.low %v2489_v25, %v2499_v49  ;;  %v3943_v8 = vsel %vm5906_vm8, %v3941_v39, %v3942_v36  ;;  %v2210_v62 = vpop.permute.xlu1 %2209  ;;  %v3835_v18 = vld [vmem:[#allocation2 + $0x70] sm:$0xf] }
 0x177   : > { %5697 = vmatprep.mubr.msk.bf16.mxu1 %vm1194_vm15, %v4103_v17  ;;  %v3833_v26 = vld [vmem:[#allocation2 + $0x68] sm:$0x1]  ;;  %4414 = vmatmul.mubr.bf16.gmra.mrb[20].mxu0 %v4116_v63  ;;  %v3947_v41 = vsel %vm5906_vm8, %v5323_v15, %v3946_v27  ;;  %v3948_v55 = vrot.slane %v3946_v27, 4  ;;  %v3834_v46 = vld [vmem:[#allocation2 + $0x6c] sm:$0xe]  ;;  %4088 = vst.msk [vmem:[#allocation3 + $0x58] sm:$0xff] %vm1194_vm15, %v5337_v4  ;;  %v5338_v43 = vcombine.low %v3940_v54, %v3943_v8 }
 0x178   : > { %2251 = vst.msk [vmem:[#allocation3 + $0xa8] sm:$0xff] %vm2243_vm5, %v2210_v62  ;;  %v2503_v1 = vrot.slane %v2501_v30, 4  ;;  %v2504_v29 = vshll.u32 %v2284_v22, 16  ;;  %v2510_v40 = vshll.u32 %v2285_v10, 16  ;;  %v3836_v3 = vld [vmem:[#allocation2 + $0x74] sm:$0x1] }
 0x179   : > { %v4106_v14 = vld [vmem:[#allocation3 + $0x28] sm:$0xff]  ;;  %2763 = vst.msk [vmem:[#allocation3 + $0xb0] sm:$0xff] %vm1194_vm15, %v5245_v0  ;;  %v3950_v56 = vsel %vm5906_vm8, %v3948_v55, %v3949_v13  ;;  %v2514_v6 = vshrl.u32 %v2285_v10, 16  ;;  %v2520_v20 = vshll.u32 %v2286_v47, 16  ;;  %v5324_v59 = vrot.slane %v3831_v60, 9  ;;  %4089 = vst.msk [vmem:[#allocation3 + $0x70] sm:$0xff] %vm1194_vm15, %v5338_v43 }
 0x17a   : > { %v4120_v52 = vld [vmem:[#allocation3 + $0x98] sm:$0xff]  ;;  %3083 = vst.msk [vmem:[#allocation3 + $0xb0] sm:$0xff] %vm1742_vm2, %v3043_v44  ;;  %v5339_v61 = vcombine.low %v3947_v41, %v3950_v56  ;;  %v2506_v2 = vrot.slane %v2504_v29, 5  ;;  %v2512_v58 = vrot.slane %v2510_v40, 5  ;;  %v3953_v11 = vrot.slane %v3832_v53, 5  ;;  %v4119_v48 = vld [vmem:[#allocation3 + $0x90] sm:$0xff] }
 0x17b   : > { %4421 = vmatprep.mubr.bf16.mxu0 %v4120_v52  ;;  %v2287_v32 = vld [vmem:[#allocation2 + $0x78] sm:$0xf]  ;;  %v2516_v16 = vrot.slane %v2514_v6, 4  ;;  %v2522_v57 = vrot.slane %v2520_v20, 5  ;;  %v3956_v24 = vrot.slane %v3833_v26, 5  ;;  %v5325_v9 = vrot.slane %v3834_v46, 9 }
 0x17c   : > { %v2288_v34 = vld [vmem:[#allocation2 + $0x7c] sm:$0xf]  ;;  %5698 = vmatmul.mubr.msk.bf16.vlgmr.msra.gmra.mrb[16].mxu1 %vm1194_vm15, %v4106_v14  ;;  %4090 = vst.msk [vmem:[#allocation3 + $0x88] sm:$0xff] %vm1194_vm15, %v5339_v61  ;;  %v2507_v37 = vor.u32 %v2506_v2, %v2503_v1  ;;  %v3954_v23 = vsel %vm5906_vm8, %v5324_v59, %v3953_v11  ;;  %v3955_v7 = vrot.slane %v3953_v11, 4  ;;  %v3960_v31 = vrot.slane %v3835_v18, 5 }
 0x17d   : > { %v2289_v50 = vld [vmem:[#allocation2 + $0x80] sm:$0x1]  ;;  %v4109_v38 = vld [vmem:[#allocation3 + $0x40] sm:$0xff]  ;;  %v2517_v25 = vor.u32 %v2516_v16, %v2512_v58  ;;  %v3963_v28 = vrot.slane %v3836_v3, 5  ;;  %v2525_v21 = vshrl.u32 %v2287_v32, 16  ;;  %v2528_v19 = vshll.u32 %v2287_v32, 16  ;;  %v3220_v22 = vpop.permute.xlu0 %3219 }
 0x17e   : > { %v3837_v33 = vld [vmem:[#allocation2 + $0x78] sm:$0xe]  ;;  %5701 = vmatprep.mubr.msk.bf16.mxu1 %vm1194_vm15, %v4109_v38  ;;  %v2508_v10 = vrot.slane %v2507_v37, 4  ;;  %v3957_v63 = vsel %vm5906_vm8, %v3955_v7, %v3956_v24  ;;  %v3961_v35 = vsel %vm5906_vm8, %v5325_v9, %v3960_v31  ;;  %v3962_v42 = vrot.slane %v3960_v31, 4  ;;  %v3838_v54 = vld [vmem:[#allocation2 + $0x7c] sm:$0xf] }
 0x17f   : > { %v3839_v39 = vld [vmem:[#allocation2 + $0x80] sm:$0x1]  ;;  %3260 = vst.msk [vmem:[#allocation3 + $0xb0] sm:$0xff] %vm2066_vm4, %v3220_v22  ;;  %4422 = vmatmul.mubr.bf16.gmra.mrb[24].mxu0 %v4119_v48  ;;  %v2518_v47 = vrot.slane %v2517_v25, 4  ;;  %v5340_v60 = vcombine.low %v3954_v23, %v3957_v63  ;;  %v2527_v17 = vrot.slane %v2525_v21, 4  ;;  %v2530_v45 = vrot.slane %v2528_v19, 5 }
 0x180   : > { %v3840_v51 = vld [vmem:[#allocation2 + $0x84] sm:$0xe]  ;;  %v2513_v36 = vsel %vm5962_vm12, %v2508_v10, %v2512_v58  ;;  %v3964_v15 = vsel %vm5906_vm8, %v3962_v42, %v3963_v28  ;;  %v2534_v27 = vshll.u32 %v2288_v34, 16  ;;  %v2538_v49 = vshrl.u32 %v2288_v34, 16  ;;  %v3841_v4 = vld [vmem:[#allocation2 + $0x88] sm:$0xf] }
 0x181   : > { %v3842_v13 = vld [vmem:[#allocation2 + $0x8c] sm:$0x1]  ;;  %v4112_v30 = vld [vmem:[#allocation3 + $0x58] sm:$0xff]  ;;  %v2523_v53 = vsel %vm5962_vm12, %v2518_v47, %v2522_v57  ;;  %4091 = vst.msk [vmem:[#allocation3 + $0xa0] sm:$0xff] %vm1194_vm15, %v5340_v60  ;;  %v5341_v26 = vcombine.low %v3961_v35, %v3964_v15  ;;  %v2531_v0 = vor.u32 %v2530_v45, %v2527_v17  ;;  %v2544_v44 = vshll.u32 %v2289_v50, 16 }
 0x182   : > { %v3843_v8 = vld [vmem:[#allocation2 + $0x90] sm:$0xe]  ;;  %v3844_v41 = vld [vmem:[#allocation2 + $0x94] sm:$0xf]  ;;  %v4115_v55 = vld [vmem:[#allocation3 + $0x70] sm:$0xff]  ;;  %v5246_v62 = vcombine.low %v2513_v36, %v2523_v53  ;;  %v2536_v46 = vrot.slane %v2534_v27, 5 }
 0x183   : > { %v2540_v18 = vrot.slane %v2538_v49, 4  ;;  %v5326_v43 = vrot.slane %v3837_v33, 9  ;;  %v3845_v1 = vld [vmem:[#allocation2 + $0x98] sm:$0x1]  ;;  %4092 = vst.msk [vmem:[#allocation3 + $0xb8] sm:$0xff] %vm1194_vm15, %v5341_v26  ;;  %v2532_v29 = vrot.slane %v2531_v0, 4 }
 0x184   : > { %v2546_v40 = vrot.slane %v2544_v44, 5  ;;  %v3967_v3 = vrot.slane %v3838_v54, 5  ;;  %v3970_v14 = vrot.slane %v3839_v39, 5  ;;  %v3846_v52 = vld [vmem:[#allocation2 + $0x9c] sm:$0xe]  ;;  %5702 = vmatmul.mubr.msk.bf16.gmra.mrb[20].mxu1 %vm1194_vm15, %v4112_v30  ;;  %2764 = vst.msk [vmem:[#allocation3 + $0xc8] sm:$0xff] %vm1194_vm15, %v5246_v62 }
 0x185   : > { %v2541_v56 = vor.u32 %v2540_v18, %v2536_v46  ;;  %v5327_v6 = vrot.slane %v3840_v51, 9  ;;  %v3974_v20 = vrot.slane %v3841_v4, 5  ;;  %v3977_v59 = vrot.slane %v3842_v13, 5  ;;  %v3847_v61 = vld [vmem:[#allocation2 + $0xa0] sm:$0xf]  ;;  %5705 = vmatprep.mubr.msk.bf16.mxu1 %vm1194_vm15, %v4115_v55 }
 0x186   : > { %v2537_v2 = vsel %vm5962_vm12, %v2532_v29, %v2536_v46  ;;  %v3968_v58 = vsel %vm5906_vm8, %v5326_v43, %v3967_v3  ;;  %v3969_v11 = vrot.slane %v3967_v3, 4  ;;  %v5328_v32 = vrot.slane %v3843_v8, 9  ;;  %v3848_v34 = vld [vmem:[#allocation2 + $0xa4] sm:$0x1]  ;;  %v2291_v21 = vld [vmem:[#allocation2 + $0x88] sm:$0xf] }
 0x187   : > { %v2542_v16 = vrot.slane %v2541_v56, 4  ;;  %v3975_v57 = vsel %vm5906_vm8, %v5327_v6, %v3974_v20  ;;  %v3976_v24 = vrot.slane %v3974_v20, 4  ;;  %v3981_v9 = vrot.slane %v3844_v41, 5  ;;  %v2290_v31 = vld [vmem:[#allocation2 + $0x84] sm:$0xf] }
 0x188   : > { %v3971_v48 = vsel %vm5906_vm8, %v3969_v11, %v3970_v14  ;;  %v3984_v37 = vrot.slane %v3845_v1, 5  ;;  %v5329_v23 = vrot.slane %v3846_v52, 9  ;;  %v3988_v7 = vrot.slane %v3847_v61, 5  ;;  %v2292_v19 = vld [vmem:[#allocation2 + $0x8c] sm:$0x1]  ;;  %v4118_v33 = vld [vmem:[#allocation3 + $0x88] sm:$0xff]  ;;  %v1711_v22 = vpop.permute.xlu1 %1710 }
 0x189   : > { %v2547_v50 = vsel %vm5962_vm12, %v2542_v16, %v2546_v40  ;;  %v5342_v38 = vcombine.low %v3968_v58, %v3971_v48  ;;  %v3978_v25 = vsel %vm5906_vm8, %v3976_v24, %v3977_v59  ;;  %v3982_v28 = vsel %vm5906_vm8, %v5328_v32, %v3981_v9  ;;  %v3849_v54 = vld [vmem:[#allocation2 + $0xa8] sm:$0xe]  ;;  %v3850_v39 = vld [vmem:[#allocation2 + $0xac] sm:$0xf]  ;;  %v3851_v47 = vld [vmem:[#allocation2 + $0xb0] sm:$0x1] }
 0x18a   : > { %v5247_v10 = vcombine.low %v2537_v2, %v2547_v50  ;;  %v5343_v63 = vcombine.low %v3975_v57, %v3978_v25  ;;  %v3983_v35 = vrot.slane %v3981_v9, 4  ;;  %v3989_v42 = vsel %vm5906_vm8, %v5329_v23, %v3988_v7  ;;  %1751 = vst.msk [vmem:[#allocation3 + $0xc0] sm:$0xff] %vm1742_vm2, %v1711_v22  ;;  %v4121_v60 = vld [vmem:[#allocation3 + $0xa0] sm:$0xff]  ;;  %v3852_v13 = vld [vmem:[#allocation2 + $0xb4] sm:$0xe] }
 0x18b   : > { %4093 = vst.msk [vmem:[#allocation3 + $0xd0] sm:$0xff] %vm1194_vm15, %v5342_v38  ;;  %v3990_v17 = vrot.slane %v3988_v7, 4  ;;  %v3991_v45 = vrot.slane %v3848_v34, 5  ;;  %v2549_v51 = vshrl.u32 %v2290_v31, 16  ;;  %v2552_v36 = vshll.u32 %v2290_v31, 16  ;;  %v4124_v24 = vld [vmem:[#allocation3 + $0xb8] sm:$0xff] }
 0x18c   : > { %2765 = vst.msk [vmem:[#allocation3 + $0xe0] sm:$0xff] %vm1194_vm15, %v5247_v10  ;;  %4094 = vst.msk [vmem:[#allocation3 + $0xe8] sm:$0xff] %vm1194_vm15, %v5343_v63  ;;  %v3985_v15 = vsel %vm5906_vm8, %v3983_v35, %v3984_v37  ;;  %v2558_v27 = vshll.u32 %v2291_v21, 16  ;;  %v2562_v49 = vshrl.u32 %v2291_v21, 16  ;;  %v2568_v4 = vshll.u32 %v2292_v19, 16  ;;  %5706 = vmatmul.mubr.msk.bf16.gmra.mrb[24].mxu1 %vm1194_vm15, %v4118_v33  ;;  %v4122_v19 = vld [vmem:[#allocation3 + $0xa8] sm:$0xff] }
 0x18d   : > { %v3764_v30 = vpop.permute.xlu0 %3763  ;;  %v5344_v53 = vcombine.low %v3982_v28, %v3985_v15  ;;  %v3992_v26 = vsel %vm5906_vm8, %v3990_v17, %v3991_v45  ;;  %v2551_v0 = vrot.slane %v2549_v51, 4  ;;  %v2554_v44 = vrot.slane %v2552_v36, 5  ;;  %v3853_v8 = vld [vmem:[#allocation2 + $0xb8] sm:$0xf]  ;;  %v3854_v41 = vld [vmem:[#allocation2 + $0xbc] sm:$0x1]  ;;  %5709 = vmatprep.mubr.msk.bf16.mxu1 %vm1194_vm15, %v4121_v60  ;;  %v2035_v1 = vpop.permute.xlu1 %2034 }
 0x18e   : > { %3804 = vst.msk [vmem:[#allocation3 + $0xb0] sm:$0xff] %vm2243_vm5, %v3764_v30  ;;  %v5345_v55 = vcombine.low %v3989_v42, %v3992_v26  ;;  %v2560_v62 = vrot.slane %v2558_v27, 5  ;;  %v2564_v46 = vrot.slane %v2562_v49, 4  ;;  %v2570_v18 = vrot.slane %v2568_v4, 5  ;;  %v2293_v43 = vld [vmem:[#allocation2 + $0x90] sm:$0xf] }
 0x18f   : > { %4095 = vst.msk [vmem:[#allocation3 + $0x100] sm:$0xff] %vm1194_vm15, %v5344_v53  ;;  %v2555_v29 = vor.u32 %v2554_v44, %v2551_v0  ;;  %v5330_v40 = vrot.slane %v3849_v54, 9  ;;  %v3995_v3 = vrot.slane %v3850_v39, 5  ;;  %v3998_v14 = vrot.slane %v3851_v47, 5  ;;  %v2294_v59 = vld [vmem:[#allocation2 + $0x94] sm:$0xf] }
 0x190   : > { %2075 = vst.msk [vmem:[#allocation3 + $0xc0] sm:$0xff] %vm2066_vm4, %v2035_v1  ;;  %v2565_v52 = vor.u32 %v2564_v46, %v2560_v62  ;;  %v5331_v56 = vrot.slane %v3852_v13, 9  ;;  %v4002_v6 = vrot.slane %v3853_v8, 5  ;;  %v4005_v20 = vrot.slane %v3854_v41, 5  ;;  %v2295_v32 = vld [vmem:[#allocation2 + $0x98] sm:$0x1] }
 0x191   : > { %4096 = vst.msk [vmem:[#allocation3 + $0x118] sm:$0xff] %vm1194_vm15, %v5345_v55  ;;  %v3045_v61 = vpop.permute.xlu0 %3044  ;;  %v2556_v2 = vrot.slane %v2555_v29, 4  ;;  %v3996_v58 = vsel %vm5906_vm8, %v5330_v40, %v3995_v3  ;;  %v3997_v11 = vrot.slane %v3995_v3, 4  ;;  %v2573_v16 = vshrl.u32 %v2293_v43, 16  ;;  %v3855_v57 = vld [vmem:[#allocation2 + $0xc0] sm:$0xe]  ;;  %v2212_v7 = vpop.permute.xlu1 %2211 }
 0x192   : > { %3084 = vst.msk [vmem:[#allocation3 + $0xc8] sm:$0xff] %vm1742_vm2, %v3045_v61  ;;  %v2566_v9 = vrot.slane %v2565_v52, 4  ;;  %v4003_v34 = vsel %vm5906_vm8, %v5331_v56, %v4002_v6  ;;  %v4004_v48 = vrot.slane %v4002_v6, 4  ;;  %v2576_v37 = vshll.u32 %v2293_v43, 16  ;;  %v3856_v23 = vld [vmem:[#allocation2 + $0xc4] sm:$0xf] }
 0x193   : > { %v4127_v31 = vld [vmem:[#allocation3 + $0xd0] sm:$0xff]  ;;  %v2561_v50 = vsel %vm5962_vm12, %v2556_v2, %v2560_v62  ;;  %v3999_v38 = vsel %vm5906_vm8, %v3997_v11, %v3998_v14  ;;  %v2575_v25 = vrot.slane %v2573_v16, 4  ;;  %v2582_v28 = vshll.u32 %v2294_v59, 16  ;;  %2252 = vst.msk [vmem:[#allocation3 + $0xc0] sm:$0xff] %vm2243_vm5, %v2212_v7  ;;  %v3859_v42 = vld [vmem:[#allocation2 + $0xd0] sm:$0xf] }
 0x194   : > { %v3857_v21 = vld [vmem:[#allocation2 + $0xc8] sm:$0x1]  ;;  %v2571_v33 = vsel %vm5962_vm12, %v2566_v9, %v2570_v18  ;;  %v5346_v22 = vcombine.low %v3996_v58, %v3999_v38  ;;  %v4006_v10 = vsel %vm5906_vm8, %v4004_v48, %v4005_v20  ;;  %v2578_v63 = vrot.slane %v2576_v37, 5  ;;  %v3858_v35 = vld [vmem:[#allocation2 + $0xcc] sm:$0xe]  ;;  %5710 = vmatmul.mubr.msk.bf16.gmra.mrb[28].mxu1 %vm1194_vm15, %v4124_v24  ;;  %v4130_v18 = vld [vmem:[#allocation3 + $0xe8] sm:$0xff] }
 0x195   : > { %v4123_v54 = vld [vmem:[#allocation3 + $0xb0] sm:$0xff]  ;;  %v5248_v39 = vcombine.low %v2561_v50, %v2571_v33  ;;  %v5347_v47 = vcombine.low %v4003_v34, %v4006_v10  ;;  %v2584_v60 = vrot.slane %v2582_v28, 5  ;;  %v2586_v17 = vshrl.u32 %v2294_v59, 16  ;;  %5713 = vmatprep.mubr.msk.bf16.mxu1 %vm1194_vm15, %v4127_v31  ;;  %v3860_v27 = vld [vmem:[#allocation2 + $0xd4] sm:$0x1] }
 0x196   : > { %4429 = vmatprep.mubr.bf16.mxu0 %v4123_v54  ;;  %4097 = vst.msk [vmem:[#allocation3 + $0x130] sm:$0xff] %vm1194_vm15, %v5346_v22  ;;  %v2579_v45 = vor.u32 %v2578_v63, %v2575_v25  ;;  %v2592_v51 = vshll.u32 %v2295_v32, 16  ;;  %v5332_v36 = vrot.slane %v3855_v57, 9  ;;  %v4009_v15 = vrot.slane %v3856_v23, 5  ;;  %v4133_v29 = vld [vmem:[#allocation3 + $0x100] sm:$0xff] }
 0x197   : > { %4430 = vmatmul.mubr.bf16.gmra.mrb[28].mxu0 %v4122_v19  ;;  %2766 = vst.msk [vmem:[#allocation3 + $0xf8] sm:$0xff] %vm1194_vm15, %v5248_v39  ;;  %4098 = vst.msk [vmem:[#allocation3 + $0x148] sm:$0xff] %vm1194_vm15, %v5347_v47  ;;  %v2588_v49 = vrot.slane %v2586_v17, 4  ;;  %v4012_v4 = vrot.slane %v3857_v21, 5  ;;  %v5333_v13 = vrot.slane %v3858_v35, 9  ;;  %v4016_v30 = vrot.slane %v3859_v42, 5 }
 0x198   : > { %v2580_v53 = vrot.slane %v2579_v45, 4  ;;  %v2594_v26 = vrot.slane %v2592_v51, 5  ;;  %v4010_v0 = vsel %vm5906_vm8, %v5332_v36, %v4009_v15  ;;  %v4011_v44 = vrot.slane %v4009_v15, 4  ;;  %v4136_v12 = vld [vmem:[#allocation3 + $0x118] sm:$0xff] }
 0x199   : > { %v2589_v8 = vor.u32 %v2588_v49, %v2584_v60  ;;  %v4017_v41 = vsel %vm5906_vm8, %v5333_v13, %v4016_v30  ;;  %v4018_v55 = vrot.slane %v4016_v30, 4  ;;  %v4019_v62 = vrot.slane %v3860_v27, 5  ;;  %v3222_v46 = vpop.permute.xlu0 %3221  ;;  %v1713_v43 = vpop.permute.xlu1 %1712 }
 0x19a   : > { %v4013_v1 = vsel %vm5906_vm8, %v4011_v44, %v4012_v4  ;;  %3261 = vst.msk [vmem:[#allocation3 + $0xc8] sm:$0xff] %vm2066_vm4, %v3222_v46  ;;  %v2585_v40 = vsel %vm5962_vm12, %v2580_v53, %v2584_v60  ;;  %v4125_v32 = vld [vmem:[#allocation3 + $0xc0] sm:$0xff] }
 0x19b   : > { %1752 = vst.msk [vmem:[#allocation3 + $0xd8] sm:$0xff] %vm1742_vm2, %v1713_v43  ;;  %v2590_v3 = vrot.slane %v2589_v8, 4  ;;  %v5348_v14 = vcombine.low %v4010_v0, %v4013_v1  ;;  %v4020_v52 = vsel %vm5906_vm8, %v4018_v55, %v4019_v62 }
 0x19c   : > { %v5349_v56 = vcombine.low %v4017_v41, %v4020_v52  ;;  %5714 = vmatmul.mubr.msk.bf16.gmra.mrb[32].mxu1 %vm1194_vm15, %v4130_v18 }
 0x19d   : > { %v2595_v6 = vsel %vm5962_vm12, %v2590_v3, %v2594_v26  ;;  %4099 = vst.msk [vmem:[#allocation3 + $0x160] sm:$0xff] %vm1194_vm15, %v5348_v14  ;;  %v2037_v20 = vpop.permute.xlu1 %2036  ;;  %5717 = vmatprep.mubr.msk.bf16.mxu1 %vm1194_vm15, %v4133_v29  ;;  %v4139_v2 = vld [vmem:[#allocation3 + $0x130] sm:$0xff] }
 0x19e   : > { %v5249_v59 = vcombine.low %v2585_v40, %v2595_v6  ;;  %4100 = vst.msk [vmem:[#allocation3 + $0x178] sm:$0xff] %vm1194_vm15, %v5349_v56  ;;  %v4142_v11 = vld [vmem:[#allocation3 + $0x148] sm:$0xff] }
 0x19f   : > { %2076 = vst.msk [vmem:[#allocation3 + $0xd8] sm:$0xff] %vm2066_vm4, %v2037_v20 }
 0x1a0   : > { %2767 = vst.msk [vmem:[#allocation3 + $0x110] sm:$0xff] %vm1194_vm15, %v5249_v59 }
 0x1a1   : > { %v2214_v61 = vpop.permute.xlu1 %2213 }
 0x1a2   : > { %2253 = vst.msk [vmem:[#allocation3 + $0xd8] sm:$0xff] %vm2243_vm5, %v2214_v61 }
 0x1a3   : > { %v3766_v58 = vpop.permute.xlu0 %3765 }
 0x1a4   : > { %3805 = vst.msk [vmem:[#allocation3 + $0xc8] sm:$0xff] %vm2243_vm5, %v3766_v58  ;;  %5718 = vmatmul.mubr.msk.bf16.gmra.mrb[36].mxu1 %vm1194_vm15, %v4136_v12  ;;  %v4145_v16 = vld [vmem:[#allocation3 + $0x160] sm:$0xff] }
 0x1a5   : > { %5721 = vmatprep.mubr.msk.bf16.mxu1 %vm1194_vm15, %v4139_v2  ;;  %v4148_v34 = vld [vmem:[#allocation3 + $0x178] sm:$0xff] }
 0x1a7   : > { %v3047_v5 = vpop.permute.xlu0 %3046 }
 0x1a8   : > { %3085 = vst.msk [vmem:[#allocation3 + $0xe0] sm:$0xff] %vm1742_vm2, %v3047_v5 }
 0x1a9   : > { %v4128_v31 = vld [vmem:[#allocation3 + $0xd8] sm:$0xff] }
 0x1ab   : > { %v3224_v57 = vpop.permute.xlu0 %3223  ;;  %v4126_v24 = vld [vmem:[#allocation3 + $0xc8] sm:$0xff] }
 0x1ac   : > { %3262 = vst.msk [vmem:[#allocation3 + $0xe0] sm:$0xff] %vm2066_vm4, %v3224_v57  ;;  %4437 = vmatprep.mubr.bf16.mxu0 %v4126_v24  ;;  %5722 = vmatmul.mubr.msk.bf16.gmra.mrb[40].mxu1 %vm1194_vm15, %v4142_v11 }
 0x1ad   : > { %4438 = vmatmul.mubr.bf16.gmra.mrb[32].mxu0 %v4125_v32  ;;  %5725 = vmatprep.mubr.msk.bf16.mxu1 %vm1194_vm15, %v4145_v16 }
 0x1b0   : > { %v1715_v9 = vpop.permute.xlu1 %1714 }
 0x1b1   : > { %1753 = vst.msk [vmem:[#allocation3 + $0xf0] sm:$0xff] %vm1742_vm2, %v1715_v9 }
 0x1b4   : > { %5726 = vmatmul.mubr.msk.bf16.gmra.mrb[44].mxu1 %vm1194_vm15, %v4148_v34 }
 0x1b5   : > { %v2039_v48 = vpop.permute.xlu1 %2038 }
 0x1b6   : > { %2077 = vst.msk [vmem:[#allocation3 + $0xf0] sm:$0xff] %vm2066_vm4, %v2039_v48 }
 0x1b9   : > { %v2216_v23 = vpop.permute.xlu1 %2215 }
 0x1ba   : > { %v3768_v37 = vpop.permute.xlu0 %3767  ;;  %2254 = vst.msk [vmem:[#allocation3 + $0xf0] sm:$0xff] %vm2243_vm5, %v2216_v23 }
 0x1bb   : > { %3806 = vst.msk [vmem:[#allocation3 + $0xe0] sm:$0xff] %vm2243_vm5, %v3768_v37 }
 0x1be   : > { %v3049_v7 = vpop.permute.xlu0 %3048 }
 0x1bf   : > { %3086 = vst.msk [vmem:[#allocation3 + $0xf8] sm:$0xff] %vm1742_vm2, %v3049_v7 }
 0x1c1   : > { %v4131_v33 = vld [vmem:[#allocation3 + $0xf0] sm:$0xff] }
 0x1c2   : > { %v3226_v50 = vpop.permute.xlu0 %3225  ;;  %v4129_v38 = vld [vmem:[#allocation3 + $0xe0] sm:$0xff] }
 0x1c3   : > { %3263 = vst.msk [vmem:[#allocation3 + $0xf8] sm:$0xff] %vm2066_vm4, %v3226_v50  ;;  %4445 = vmatprep.mubr.bf16.mxu0 %v4129_v38 }
 0x1c4   : > { %4446 = vmatmul.mubr.bf16.gmra.mrb[36].mxu0 %v4128_v31 }
 0x1c5   : > { %v1717_v25 = vpop.permute.xlu1 %1716 }
 0x1c6   : > { %v3770_v28 = vpop.permute.xlu0 %3769  ;;  %1754 = vst.msk [vmem:[#allocation3 + $0x108] sm:$0xff] %vm1742_vm2, %v1717_v25 }
 0x1c7   : > { %3807 = vst.msk [vmem:[#allocation3 + $0xf8] sm:$0xff] %vm2243_vm5, %v3770_v28 }
 0x1c9   : > { %v2041_v21 = vpop.permute.xlu1 %2040 }
 0x1ca   : > { %v3051_v19 = vpop.permute.xlu0 %3050  ;;  %2078 = vst.msk [vmem:[#allocation3 + $0x108] sm:$0xff] %vm2066_vm4, %v2041_v21 }
 0x1cb   : > { %3087 = vst.msk [vmem:[#allocation3 + $0x110] sm:$0xff] %vm1742_vm2, %v3051_v19 }
 0x1cd   : > { %v2218_v22 = vpop.permute.xlu1 %2217 }
 0x1ce   : > { %v3228_v10 = vpop.permute.xlu0 %3227  ;;  %v4132_v63 = vld [vmem:[#allocation3 + $0xf8] sm:$0xff]  ;;  %2255 = vst.msk [vmem:[#allocation3 + $0x108] sm:$0xff] %vm2243_vm5, %v2218_v22 }
 0x1cf   : > { %3264 = vst.msk [vmem:[#allocation3 + $0x110] sm:$0xff] %vm2066_vm4, %v3228_v10  ;;  %4453 = vmatprep.mubr.bf16.mxu0 %v4132_v63 }
 0x1d0   : > { %v5579_v35 = vpop.f32.mrb[0].mxu0  ;;  %4454 = vmatmul.mubr.bf16.gmra.mrb[40].mxu0 %v4131_v33 }
 0x1d1   : > { %v5580_v42 = vpop.f32.mrb[1].mxu0 }
 0x1d2   : > { %v7440_v54 = vadd.f32 %v5580_v42, %v5579_v35  ;;  %v5582_v39 = vpop.f32.mrb[2].mxu0  ;;  %v3772_v47 = vpop.permute.xlu0 %3771 }
 0x1d3   : > { %v5583_v60 = vpop.f32.mrb[3].mxu0  ;;  %3808 = vst.msk [vmem:[#allocation3 + $0x110] sm:$0xff] %vm2243_vm5, %v3772_v47 }
 0x1d4   : > { %v7443_v17 = vadd.f32 %v5583_v60, %v5582_v39 }
 0x1d5   : > { %v4134_v45 = vld [vmem:[#allocation3 + $0x108] sm:$0xff] }
 0x1da   : > { %v4135_v51 = vld [vmem:[#allocation3 + $0x110] sm:$0xff] }
 0x1db   : > { %4461 = vmatprep.mubr.bf16.mxu0 %v4135_v51 }
 0x1dc   : > { %4462 = vmatmul.mubr.bf16.gmra.mrb[44].mxu0 %v4134_v45 }
 0x1e3   : > { %v5585_v36 = vpop.f32.mrb[4].mxu0 }
 0x1e4   : > { %v5586_v15 = vpop.f32.mrb[5].mxu0 }
 0x1e5   : > { %v5587_v27 = vadd.f32 %v5586_v15, %v5585_v36  ;;  %v5588_v49 = vpop.f32.mrb[6].mxu0 }
 0x1e6   : > { %v5589_v4 = vpop.f32.mrb[7].mxu0 }
 0x1e7   : > { %v5590_v13 = vadd.f32 %v5589_v4, %v5588_v49 }
 0x1eb   : > { %v5651_v30 = vpop.f32.mrb[0].mxu1 }
 0x1ec   : > { %v5652_v53 = vpop.f32.mrb[1].mxu1 }
 0x1ed   : > { %v7445_v26 = vadd.f32 %v5652_v53, %v5651_v30  ;;  %v5654_v0 = vpop.f32.mrb[2].mxu1 }
 0x1ee   : > { %v5655_v44 = vpop.f32.mrb[3].mxu1 }
 0x1ef   : > { %v7447_v8 = vadd.f32 %v5655_v44, %v5654_v0 }
 0x1f0   : > { %v5591_v41 = vpop.f32.mrb[8].mxu0 }
 0x1f1   : > { %v5592_v55 = vpop.f32.mrb[9].mxu0 }
 0x1f2   : > { %v7449_v62 = vadd.f32 %v5592_v55, %v5591_v41  ;;  %v5594_v46 = vpop.f32.mrb[10].mxu0 }
 0x1f3   : > { %v5595_v18 = vpop.f32.mrb[11].mxu0 }
 0x1f4   : > { %v7451_v43 = vadd.f32 %v5595_v18, %v5594_v46 }
 0x218   : > { %v5657_v1 = vpop.f32.mrb[4].mxu1 }
 0x219   : > { %v5658_v29 = vpop.f32.mrb[5].mxu1 }
 0x21a   : > { %v7453_v40 = vadd.f32 %v5658_v29, %v5657_v1  ;;  %v5660_v3 = vpop.f32.mrb[6].mxu1 }
 0x21b   : > { %v5661_v14 = vpop.f32.mrb[7].mxu1 }
 0x21c   : > { %v7455_v52 = vadd.f32 %v5661_v14, %v5660_v3 }
 0x227   : > { %v5597_v56 = vpop.f32.mrb[12].mxu0 }
 0x228   : > { %v5598_v6 = vpop.f32.mrb[13].mxu0 }
 0x229   : > { %v5599_v20 = vadd.f32 %v5598_v6, %v5597_v56  ;;  %v5600_v59 = vpop.f32.mrb[14].mxu0 }
 0x22a   : > { %v5601_v12 = vpop.f32.mrb[15].mxu0 }
 0x22b   : > { %v5602_v61 = vadd.f32 %v5601_v12, %v5600_v59 }
 0x238   : > { %v5663_v2 = vpop.f32.mrb[8].mxu1 }
 0x239   : > { %v5664_v58 = vpop.f32.mrb[9].mxu1 }
 0x23a   : > { %v7457_v5 = vadd.f32 %v5664_v58, %v5663_v2  ;;  %v5666_v11 = vpop.f32.mrb[10].mxu1 }
 0x23b   : > { %v5667_v32 = vpop.f32.mrb[11].mxu1 }
 0x23c   : > { %v7459_v16 = vadd.f32 %v5667_v32, %v5666_v11 }
 0x240   : > { %v5603_v57 = vpop.f32.mrb[16].mxu0 }
 0x241   : > { %v5604_v24 = vpop.f32.mrb[17].mxu0 }
 0x242   : > { %v5605_v9 = vadd.f32 %v5604_v24, %v5603_v57  ;;  %v5606_v34 = vpop.f32.mrb[18].mxu0 }
 0x243   : > { %v5607_v48 = vpop.f32.mrb[19].mxu0 }
 0x244   : > { %v7461_v37 = vadd.f32 %v5607_v48, %v5606_v34 }
 0x247   : > { %v5669_v23 = vpop.f32.mrb[12].mxu1 }
 0x248   : > { %v5670_v7 = vpop.f32.mrb[13].mxu1 }
 0x249   : > { %v7463_v31 = vadd.f32 %v5670_v7, %v5669_v23  ;;  %v5672_v50 = vpop.f32.mrb[14].mxu1 }
 0x24a   : > { %v5673_v38 = vpop.f32.mrb[15].mxu1  ;;  %v5609_v25 = vpop.f32.mrb[20].mxu0 }
 0x24b   : > { %v7465_v28 = vadd.f32 %v5673_v38, %v5672_v50  ;;  %v5610_v21 = vpop.f32.mrb[21].mxu0 }
 0x24c   : > { %v5611_v19 = vadd.f32 %v5610_v21, %v5609_v25  ;;  %v5612_v33 = vpop.f32.mrb[22].mxu0 }
 0x24d   : > { %v5613_v22 = vpop.f32.mrb[23].mxu0 }
 0x24e   : > { %v5614_v10 = vadd.f32 %v5613_v22, %v5612_v33 }
 0x24f   : > { %v5699_v63 = vpop.f32.mrb[16].mxu1 }
 0x250   : > { %v7467_v35 = vadd.f32 %v5699_v63, %v5587_v27  ;;  %v4536_v42 = vpop.f32.mrb[17].mxu1 }
 0x251   : > { %v7477_v39 = vadd.f32 %v7440_v54, %v4536_v42  ;;  %v5700_v47 = vpop.f32.mrb[18].mxu1 }
 0x252   : > { %v5454_v60 = vpack.c.bf16 %v7467_v35, %v7467_v35  ;;  %v7481_v45 = vadd.f32 %v5700_v47, %v5590_v13  ;;  %v4539_v51 = vpop.f32.mrb[19].mxu1  ;;  %v5615_v36 = vpop.f32.mrb[24].mxu0  ;;  %v4826_v11 = vsel %vm1194_vm15, %v7467_v35, 0.0 }
 0x253   : > { %v5452_v15 = vpack.c.bf16 %v7477_v39, %v7477_v39  ;;  %v7486_v27 = vadd.f32 %v7443_v17, %v4539_v51  ;;  %v5616_v49 = vpop.f32.mrb[25].mxu0 }
 0x254   : > { %4793 = vst.msk [vmem:[%s7474_s30 + $0x8] sm:$0xf] %vm237_vm0, %v5454_v60  ;;  %v5455_v54 = vpack.c.bf16 %v7481_v45, %v7481_v45  ;;  %v5617_v4 = vadd.f32 %v5616_v49, %v5615_v36  ;;  %v5618_v30 = vpop.f32.mrb[26].mxu0  ;;  %v4828_v50 = vsel %vm1194_vm15, %v7481_v45, 0.0 }
 0x255   : > { %4791 = vst.msk [vmem:[%s7474_s30] sm:$0xf] %vm237_vm0, %v5452_v15  ;;  %v5453_v13 = vpack.c.bf16 %v7486_v27, %v7486_v27  ;;  %v5619_v53 = vpop.f32.mrb[27].mxu0  ;;  %v4824_v56 = vsel %vm1194_vm15, %v7486_v27, 0.0 }
 0x256   : > { %4794 = vst.msk [vmem:[%s7474_s30 + $0xc] sm:$0xf] %vm237_vm0, %v5455_v54  ;;  %v5620_v17 = vadd.f32 %v5619_v53, %v5618_v30 }
 0x257   : > { %4792 = vst.msk [vmem:[%s7474_s30 + $0x4] sm:$0xf] %vm237_vm0, %v5453_v13  ;;  %v5703_v0 = vpop.f32.mrb[20].mxu1 }
 0x258   : > { %v7500_v44 = vadd.f32 %v5703_v0, %v5599_v20  ;;  %v4552_v41 = vpop.f32.mrb[21].mxu1  ;;  %v4823_v20 = vsel %vm1194_vm15, %v7477_v39, 0.0 }
 0x259   : > { %v7503_v55 = vadd.f32 %v7449_v62, %v4552_v41  ;;  %v5704_v46 = vpop.f32.mrb[22].mxu1 }
 0x25a   : > { %v5458_v18 = vpack.c.bf16 %v7500_v44, %v7500_v44  ;;  %v7507_v1 = vadd.f32 %v5704_v46, %v5602_v61  ;;  %v4555_v29 = vpop.f32.mrb[23].mxu1 }
 0x25b   : > { %v5456_v3 = vpack.c.bf16 %v7503_v55, %v7503_v55  ;;  %v7512_v14 = vadd.f32 %v7451_v43, %v4555_v29  ;;  %v4825_v43 = vadd.f32 %v4824_v56, %v4823_v20  ;;  %v4830_v25 = vsel %vm1194_vm15, %v7503_v55, 0.0 }
 0x25c   : > { %4797 = vst.msk [vmem:[%s7474_s30 + $0x18] sm:$0xf] %vm237_vm0, %v5458_v18  ;;  %v5459_v62 = vpack.c.bf16 %v7507_v1, %v7507_v1  ;;  %v4834_v29 = vsel %vm1194_vm15, %v7500_v44, 0.0 }
 0x25d   : > { %4795 = vst.msk [vmem:[%s7474_s30 + $0x10] sm:$0xf] %vm237_vm0, %v5456_v3  ;;  %v5457_v6 = vpack.c.bf16 %v7512_v14, %v7512_v14  ;;  %v4827_v34 = vadd.f32 %v4826_v11, %v4825_v43  ;;  %v4832_v15 = vsel %vm1194_vm15, %v7512_v14, 0.0 }
 0x25e   : > { %4798 = vst.msk [vmem:[%s7474_s30 + $0x1c] sm:$0xf] %vm237_vm0, %v5459_v62  ;;  %v4836_v62 = vsel %vm1194_vm15, %v7507_v1, 0.0 }
 0x25f   : > { %4796 = vst.msk [vmem:[%s7474_s30 + $0x14] sm:$0xf] %vm237_vm0, %v5457_v6  ;;  %v5707_v59 = vpop.f32.mrb[24].mxu1  ;;  %v4829_v38 = vadd.f32 %v4828_v50, %v4827_v34 }
 0x260   : > { %v7530_v12 = vadd.f32 %v5707_v59, %v5611_v19  ;;  %v4568_v61 = vpop.f32.mrb[25].mxu1 }
 0x261   : > { %v7532_v2 = vadd.f32 %v5605_v9, %v4568_v61  ;;  %v5708_v58 = vpop.f32.mrb[26].mxu1  ;;  %v4831_v42 = vadd.f32 %v4830_v25, %v4829_v38 }
 0x262   : > { %v5462_v32 = vpack.c.bf16 %v7530_v12, %v7530_v12  ;;  %v7538_v57 = vadd.f32 %v5708_v58, %v5614_v10  ;;  %v4571_v24 = vpop.f32.mrb[27].mxu1  ;;  %v4842_v25 = vsel %vm1194_vm15, %v7530_v12, 0.0 }
 0x263   : > { %v5460_v48 = vpack.c.bf16 %v7532_v2, %v7532_v2  ;;  %v7543_v23 = vadd.f32 %v7461_v37, %v4571_v24  ;;  %v4833_v13 = vadd.f32 %v4832_v15, %v4831_v42  ;;  %v4838_v43 = vsel %vm1194_vm15, %v7532_v2, 0.0 }
 0x264   : > { %4801 = vst.msk [vmem:[%s7474_s30 + $0x28] sm:$0xf] %vm237_vm0, %v5462_v32  ;;  %v5463_v9 = vpack.c.bf16 %v7538_v57, %v7538_v57 }
 0x265   : > { %4799 = vst.msk [vmem:[%s7474_s30 + $0x20] sm:$0xf] %vm237_vm0, %v5460_v48  ;;  %v5461_v7 = vpack.c.bf16 %v7543_v23, %v7543_v23  ;;  %v4835_v56 = vadd.f32 %v4834_v29, %v4833_v13  ;;  %v4840_v32 = vsel %vm1194_vm15, %v7543_v23, 0.0 }
 0x266   : > { %4802 = vst.msk [vmem:[%s7474_s30 + $0x2c] sm:$0xf] %vm237_vm0, %v5463_v9 }
 0x267   : > { %4800 = vst.msk [vmem:[%s7474_s30 + $0x24] sm:$0xf] %vm237_vm0, %v5461_v7  ;;  %v5711_v37 = vpop.f32.mrb[28].mxu1  ;;  %v4837_v6 = vadd.f32 %v4836_v62, %v4835_v56 }
 0x268   : > { %v4584_v21 = vpop.f32.mrb[29].mxu1 }
 0x269   : > { %v7561_v33 = vadd.f32 %v5617_v4, %v4584_v21  ;;  %v5712_v22 = vpop.f32.mrb[30].mxu1  ;;  %v4839_v11 = vadd.f32 %v4838_v43, %v4837_v6 }
 0x26a   : > { %v5621_v19 = vpop.f32.mrb[28].mxu0  ;;  %v4587_v63 = vpop.f32.mrb[31].mxu1 }
 0x26b   : > { %v5622_v10 = vpop.f32.mrb[29].mxu0  ;;  %v5464_v47 = vpack.c.bf16 %v7561_v33, %v7561_v33  ;;  %v7565_v36 = vadd.f32 %v5620_v17, %v4587_v63  ;;  %v4841_v24 = vadd.f32 %v4840_v32, %v4839_v11 }
 0x26c   : > { %v5623_v60 = vadd.f32 %v5622_v10, %v5621_v19  ;;  %v5624_v51 = vpop.f32.mrb[30].mxu0 }
 0x26d   : > { %v5625_v49 = vpop.f32.mrb[31].mxu0  ;;  %4803 = vst.msk [vmem:[%s7474_s30 + $0x30] sm:$0xf] %vm237_vm0, %v5464_v47  ;;  %v5465_v4 = vpack.c.bf16 %v7565_v36, %v7565_v36  ;;  %v4843_v63 = vadd.f32 %v4842_v25, %v4841_v24 }
 0x26e   : > { %v7571_v54 = vadd.f32 %v5711_v37, %v5623_v60  ;;  %v5626_v30 = vadd.f32 %v5625_v49, %v5624_v51  ;;  %v4844_v49 = vsel %vm1194_vm15, %v7538_v57, 0.0 }
 0x26f   : > { %4804 = vst.msk [vmem:[%s7474_s30 + $0x34] sm:$0xf] %vm237_vm0, %v5465_v4  ;;  %v7581_v0 = vpop.f32.mrb[32].mxu1 }
 0x270   : > { %v5466_v53 = vpack.c.bf16 %v7571_v54, %v7571_v54  ;;  %v7579_v17 = vadd.f32 %v5712_v22, %v5626_v30  ;;  %v4600_v41 = vpop.f32.mrb[33].mxu1  ;;  %v4845_v30 = vadd.f32 %v4844_v49, %v4843_v63 }
 0x271   : > { %v7587_v18 = vpop.f32.mrb[34].mxu1 }
 0x272   : > { %4805 = vst.msk [vmem:[%s7474_s30 + $0x38] sm:$0xf] %vm237_vm0, %v5466_v53  ;;  %v5467_v46 = vpack.c.bf16 %v7579_v17, %v7579_v17  ;;  %v4603_v3 = vpop.f32.mrb[35].mxu1  ;;  %v4846_v53 = vsel %vm1194_vm15, %v7561_v33, 0.0 }
 0x273   : > { %v4847_v11 = vadd.f32 %v4846_v53, %v4845_v30 }
 0x274   : > { %4806 = vst.msk [vmem:[%s7474_s30 + $0x3c] sm:$0xf] %vm237_vm0, %v5467_v46 }
 0x277   : > { %v7595_v20 = vpop.f32.mrb[36].mxu1 }
 0x278   : > { %v7599_v59 = vpop.f32.mrb[37].mxu1 }
 0x279   : > { %v7601_v61 = vpop.f32.mrb[38].mxu1 }
 0x27a   : > { %v7603_v58 = vpop.f32.mrb[39].mxu1 }
 0x27f   : > { %v5723_v34 = vpop.f32.mrb[40].mxu1 }
 0x280   : > { %v5627_v48 = vpop.f32.mrb[32].mxu0  ;;  %v7608_v9 = vadd.f32 %v5723_v34, %v7453_v40  ;;  %v4632_v7 = vpop.f32.mrb[41].mxu1 }
 0x281   : > { %v5628_v50 = vpop.f32.mrb[33].mxu0  ;;  %v7611_v38 = vadd.f32 %v7445_v26, %v4632_v7  ;;  %v5724_v37 = vpop.f32.mrb[42].mxu1  ;;  %v4852_v7 = vsel %vm1194_vm15, %v7579_v17, 0.0 }
 0x282   : > { %v5629_v21 = vadd.f32 %v5628_v50, %v5627_v48  ;;  %v5630_v19 = vpop.f32.mrb[34].mxu0  ;;  %v5478_v22 = vpack.c.bf16 %v7608_v9, %v7608_v9  ;;  %v7618_v40 = vadd.f32 %v5724_v37, %v7455_v52  ;;  %v4635_v10 = vpop.f32.mrb[43].mxu1 }
 0x283   : > { %v5631_v42 = vpop.f32.mrb[35].mxu0  ;;  %v5476_v26 = vpack.c.bf16 %v7611_v38, %v7611_v38  ;;  %v7623_v47 = vadd.f32 %v7447_v8, %v4635_v10 }
 0x284   : > { %v5632_v60 = vadd.f32 %v5631_v42, %v5630_v19  ;;  %v7625_v51 = vadd.f32 %v5629_v21, %v4600_v41  ;;  %4817 = vst.msk [vmem:[%s7474_s30 + $0x68] sm:$0xf] %vm237_vm0, %v5478_v22  ;;  %v5479_v52 = vpack.c.bf16 %v7618_v40, %v7618_v40 }
 0x285   : > { %4815 = vst.msk [vmem:[%s7474_s30 + $0x60] sm:$0xf] %vm237_vm0, %v5476_v26  ;;  %v5477_v15 = vpack.c.bf16 %v7623_v47, %v7623_v47 }
 0x286   : > { %v5468_v8 = vpack.c.bf16 %v7625_v51, %v7625_v51  ;;  %v7639_v4 = vadd.f32 %v5632_v60, %v4603_v3  ;;  %4818 = vst.msk [vmem:[%s7474_s30 + $0x6c] sm:$0xf] %vm237_vm0, %v5479_v52  ;;  %v4854_v50 = vsel %vm1194_vm15, %v7625_v51, 0.0 }
 0x287   : > { %4816 = vst.msk [vmem:[%s7474_s30 + $0x64] sm:$0xf] %vm237_vm0, %v5477_v15  ;;  %v5727_v13 = vpop.f32.mrb[44].mxu1 }
 0x288   : > { %4807 = vst.msk [vmem:[%s7474_s30 + $0x40] sm:$0xf] %vm237_vm0, %v5468_v8  ;;  %v5469_v41 = vpack.c.bf16 %v7639_v4, %v7639_v4  ;;  %v7652_v46 = vadd.f32 %v5727_v13, %v7463_v31  ;;  %v4648_v29 = vpop.f32.mrb[45].mxu1  ;;  %v4856_v22 = vsel %vm1194_vm15, %v7639_v4, 0.0 }
 0x289   : > { %v7655_v3 = vadd.f32 %v7457_v5, %v4648_v29  ;;  %v5728_v56 = vpop.f32.mrb[46].mxu1  ;;  %v4848_v5 = vsel %vm1194_vm15, %v7565_v36, 0.0 }
 0x28a   : > { %4808 = vst.msk [vmem:[%s7474_s30 + $0x44] sm:$0xf] %vm237_vm0, %v5469_v41  ;;  %v5482_v62 = vpack.c.bf16 %v7652_v46, %v7652_v46  ;;  %v7662_v6 = vadd.f32 %v5728_v56, %v7465_v28  ;;  %v4651_v43 = vpop.f32.mrb[47].mxu1  ;;  %v4849_v34 = vadd.f32 %v4848_v5, %v4847_v11 }
 0x28b   : > { %v5480_v31 = vpack.c.bf16 %v7655_v3, %v7655_v3  ;;  %v7667_v32 = vadd.f32 %v7459_v16, %v4651_v43  ;;  %v4850_v16 = vsel %vm1194_vm15, %v7571_v54, 0.0 }
 0x28c   : > { %4821 = vst.msk [vmem:[%s7474_s30 + $0x78] sm:$0xf] %vm237_vm0, %v5482_v62  ;;  %v5483_v24 = vpack.c.bf16 %v7662_v6, %v7662_v6  ;;  %v4851_v48 = vadd.f32 %v4850_v16, %v4849_v34 }
 0x28d   : > { %4819 = vst.msk [vmem:[%s7474_s30 + $0x70] sm:$0xf] %vm237_vm0, %v5480_v31  ;;  %v5481_v28 = vpack.c.bf16 %v7667_v32, %v7667_v32 }
 0x28e   : > { %4822 = vst.msk [vmem:[%s7474_s30 + $0x7c] sm:$0xf] %vm237_vm0, %v5483_v24  ;;  %v4853_v37 = vadd.f32 %v4852_v7, %v4851_v48 }
 0x28f   : > { %4820 = vst.msk [vmem:[%s7474_s30 + $0x74] sm:$0xf] %vm237_vm0, %v5481_v28 }
 0x290   : > { %v4855_v21 = vadd.f32 %v4854_v50, %v4853_v37 }
 0x292   : > { %v4857_v52 = vadd.f32 %v4856_v22, %v4855_v21 }
 0x297   : > { %v5633_v25 = vpop.f32.mrb[36].mxu0 }
 0x298   : > { %v5634_v19 = vpop.f32.mrb[37].mxu0 }
 0x299   : > { %v5635_v10 = vadd.f32 %v5634_v19, %v5633_v25  ;;  %v5636_v63 = vpop.f32.mrb[38].mxu0 }
 0x29a   : > { %v5637_v42 = vpop.f32.mrb[39].mxu0 }
 0x29b   : > { %v7692_v26 = vadd.f32 %v7581_v0, %v5635_v10  ;;  %v5638_v60 = vadd.f32 %v5637_v42, %v5636_v63 }
 0x29d   : > { %v5470_v15 = vpack.c.bf16 %v7692_v26, %v7692_v26  ;;  %v4858_v49 = vsel %vm1194_vm15, %v7692_v26, 0.0  ;;  %v7699_v8 = vadd.f32 %v7587_v18, %v5638_v60 }
 0x29e   : > { %v4859_v30 = vadd.f32 %v4858_v49, %v4857_v52 }
 0x29f   : > { %4809 = vst.msk [vmem:[%s7474_s30 + $0x48] sm:$0xf] %vm237_vm0, %v5470_v15  ;;  %v5471_v13 = vpack.c.bf16 %v7699_v8, %v7699_v8  ;;  %v4860_v0 = vsel %vm1194_vm15, %v7699_v8, 0.0  ;;  %v4870_v15 = vsel %vm1194_vm15, %v7611_v38, 0.0 }
 0x2a0   : > { %v4861_v53 = vadd.f32 %v4860_v0, %v4859_v30  ;;  %v4876_v0 = vsel %vm1194_vm15, %v7618_v40, 0.0 }
 0x2a1   : > { %4810 = vst.msk [vmem:[%s7474_s30 + $0x4c] sm:$0xf] %vm237_vm0, %v5471_v13 }
 0x2a3   : > { %v5639_v41 = vpop.f32.mrb[40].mxu0 }
 0x2a4   : > { %v5640_v29 = vpop.f32.mrb[41].mxu0 }
 0x2a5   : > { %v5641_v56 = vadd.f32 %v5640_v29, %v5639_v41  ;;  %v5642_v62 = vpop.f32.mrb[42].mxu0  ;;  %v4878_v41 = vsel %vm1194_vm15, %v7655_v3, 0.0 }
 0x2a6   : > { %v5643_v18 = vpop.f32.mrb[43].mxu0 }
 0x2a7   : > { %v4617_v43 = vadd.f32 %v5641_v56, %v7599_v59  ;;  %v5644_v11 = vadd.f32 %v5643_v18, %v5642_v62  ;;  %v4880_v56 = vsel %vm1194_vm15, %v7667_v32, 0.0  ;;  %v4882_v18 = vsel %vm1194_vm15, %v7652_v46, 0.0 }
 0x2a9   : > { %v5472_v31 = vpack.c.bf16 %v4617_v43, %v4617_v43  ;;  %v4862_v5 = vsel %vm1194_vm15, %v4617_v43, 0.0  ;;  %v4620_v24 = vadd.f32 %v5644_v11, %v7603_v58 }
 0x2aa   : > { %v4863_v28 = vadd.f32 %v4862_v5, %v4861_v53 }
 0x2ab   : > { %4811 = vst.msk [vmem:[%s7474_s30 + $0x50] sm:$0xf] %vm237_vm0, %v5472_v31  ;;  %v5473_v34 = vpack.c.bf16 %v4620_v24, %v4620_v24  ;;  %v4864_v16 = vsel %vm1194_vm15, %v4620_v24, 0.0  ;;  %v4884_v31 = vsel %vm1194_vm15, %v7662_v6, 0.0 }
 0x2ac   : > { %v4865_v48 = vadd.f32 %v4864_v16, %v4863_v28 }
 0x2ad   : > { %4812 = vst.msk [vmem:[%s7474_s30 + $0x54] sm:$0xf] %vm237_vm0, %v5473_v34 }
 0x2af   : > { %v5645_v7 = vpop.f32.mrb[44].mxu0 }
 0x2b0   : > { %v5646_v50 = vpop.f32.mrb[45].mxu0 }
 0x2b1   : > { %v5647_v59 = vadd.f32 %v5646_v50, %v5645_v7  ;;  %v5648_v37 = vpop.f32.mrb[46].mxu0 }
 0x2b2   : > { %v5649_v25 = vpop.f32.mrb[47].mxu0 }
 0x2b3   : > { %v4625_v21 = vadd.f32 %v7595_v20, %v5647_v59  ;;  %v5650_v19 = vadd.f32 %v5649_v25, %v5648_v37  ;;  %v4872_v20 = vsel %vm1194_vm15, %v7623_v47, 0.0 }
 0x2b5   : > { %v5474_v58 = vpack.c.bf16 %v4625_v21, %v4625_v21  ;;  %v4866_v22 = vsel %vm1194_vm15, %v4625_v21, 0.0  ;;  %v4628_v10 = vadd.f32 %v7601_v61, %v5650_v19  ;;  %v4874_v61 = vsel %vm1194_vm15, %v7608_v9, 0.0 }
 0x2b6   : > { %v4867_v63 = vadd.f32 %v4866_v22, %v4865_v48 }
 0x2b7   : > { %4813 = vst.msk [vmem:[%s7474_s30 + $0x58] sm:$0xf] %vm237_vm0, %v5474_v58  ;;  %v5475_v42 = vpack.c.bf16 %v4628_v10, %v4628_v10  ;;  %v4868_v60 = vsel %vm1194_vm15, %v4628_v10, 0.0 }
 0x2b8   : > { %v4869_v52 = vadd.f32 %v4868_v60, %v4867_v63 }
 0x2b9   : > { %4814 = vst.msk [vmem:[%s7474_s30 + $0x5c] sm:$0xf] %vm237_vm0, %v5475_v42 }
 0x2ba   : > { %v4871_v49 = vadd.f32 %v4870_v15, %v4869_v52 }
 0x2bc   : > { %v4873_v30 = vadd.f32 %v4872_v20, %v4871_v49 }
 0x2be   : > { %v4875_v13 = vadd.f32 %v4874_v61, %v4873_v30 }
 0x2c0   : > { %v4877_v53 = vadd.f32 %v4876_v0, %v4875_v13 }
 0x2c2   : > { %v4879_v29 = vadd.f32 %v4878_v41, %v4877_v53 }
 0x2c4   : > { %v4881_v62 = vadd.f32 %v4880_v56, %v4879_v29 }
 0x2c6   : > { %v4883_v11 = vadd.f32 %v4882_v18, %v4881_v62 }
 0x2c8   : > { %v4885_v5 = vadd.f32 %v4884_v31, %v4883_v11 }
 0x2ca   : > { %v4886_v28 = vrot.slane %v4885_v5, 4 }
 0x2cc   : > { %v4887_v34 = vadd.f32 %v4886_v28, %v4885_v5 }
 0x2ce   : > { %v4888_v16 = vrot.slane %v4887_v34, 2 }
 0x2d0   : > { %v4889_v48 = vadd.f32 %v4888_v16, %v4887_v34 }
 0x2d2   : > { %v4890_v7 = vrot.slane %v4889_v48, 1 }
 0x2d4   : > { %v4891_v50 = vadd.f32 %v4890_v7, %v4889_v48 }
 0x2d6   : > { %4925 = vst.msk [vmem:[%s7745_s15] sm:$0x1] %vm240_vm1, %v4891_v50  ;;  %v7749_v59 = vmul.f32 0.00390625, %v4891_v50 }
 0x2d8   : > { %v7753_v37 = vsub.f32 %v7692_v26, %v7749_v59  ;;  %v7757_v25 = vsub.f32 %v7699_v8, %v7749_v59  ;;  %v7760_v19 = vsub.f32 %v4617_v43, %v7749_v59  ;;  %v7763_v58 = vsub.f32 %v4620_v24, %v7749_v59 }
 0x2d9   : > { %v7766_v22 = vsub.f32 %v4625_v21, %v7749_v59  ;;  %v7769_v63 = vsub.f32 %v4628_v10, %v7749_v59  ;;  %v4893_v26 = vsub.f32 %v7477_v39, %v7749_v59  ;;  %v4894_v42 = vsub.f32 %v7486_v27, %v7749_v59 }
 0x2da   : > { %v4895_v8 = vsub.f32 %v7467_v35, %v7749_v59  ;;  %v4896_v43 = vsub.f32 %v7481_v45, %v7749_v59  ;;  %v4897_v21 = vsub.f32 %v7503_v55, %v7749_v59  ;;  %v4898_v10 = vsub.f32 %v7512_v14, %v7749_v59 }
 0x2db   : > { %v4926_v24 = vmul.f32 %v4893_v26, %v4893_v26  ;;  %v4927_v60 = vmul.f32 %v4894_v42, %v4894_v42  ;;  %v4899_v35 = vsub.f32 %v7500_v44, %v7749_v59  ;;  %v4900_v55 = vsub.f32 %v7507_v1, %v7749_v59 }
 0x2dc   : > { %v4928_v52 = vmul.f32 %v4895_v8, %v4895_v8  ;;  %v4929_v15 = vmul.f32 %v4896_v43, %v4896_v43  ;;  %v4930_v20 = vmul.f32 %v4897_v21, %v4897_v21  ;;  %v4931_v61 = vmul.f32 %v4898_v10, %v4898_v10 }
 0x2dd   : > { %v4958_v39 = vsel %vm1194_vm15, %v4926_v24, 0.0  ;;  %v4959_v27 = vsel %vm1194_vm15, %v4927_v60, 0.0  ;;  %v4901_v0 = vsub.f32 %v7532_v2, %v7749_v59  ;;  %v4932_v53 = vmul.f32 %v4899_v35, %v4899_v35 }
 0x2de   : > { %v4960_v49 = vadd.f32 %v4959_v27, %v4958_v39  ;;  %v4961_v45 = vsel %vm1194_vm15, %v4928_v52, 0.0  ;;  %v4963_v13 = vsel %vm1194_vm15, %v4929_v15, 0.0  ;;  %v4965_v41 = vsel %vm1194_vm15, %v4930_v20, 0.0 }
 0x2df   : > { %v4902_v44 = vsub.f32 %v7543_v23, %v7749_v59  ;;  %v4933_v56 = vmul.f32 %v4900_v55, %v4900_v55  ;;  %v4967_v62 = vsel %vm1194_vm15, %v4931_v61, 0.0  ;;  %v4903_v1 = vsub.f32 %v7530_v12, %v7749_v59 }
 0x2e0   : > { %v4962_v30 = vadd.f32 %v4961_v45, %v4960_v49  ;;  %v4934_v11 = vmul.f32 %v4901_v0, %v4901_v0  ;;  %v4969_v31 = vsel %vm1194_vm15, %v4932_v53, 0.0  ;;  %v4904_v2 = vsub.f32 %v7538_v57, %v7749_v59 }
 0x2e1   : > { %v4935_v28 = vmul.f32 %v4902_v44, %v4902_v44  ;;  %v4971_v34 = vsel %vm1194_vm15, %v4933_v56, 0.0  ;;  %v4905_v23 = vsub.f32 %v7561_v33, %v7749_v59  ;;  %v4936_v48 = vmul.f32 %v4903_v1, %v4903_v1 }
 0x2e2   : > { %v4964_v14 = vadd.f32 %v4963_v13, %v4962_v30  ;;  %v4973_v7 = vsel %vm1194_vm15, %v4934_v11, 0.0  ;;  %v4906_v12 = vsub.f32 %v7565_v36, %v7749_v59  ;;  %v4937_v26 = vmul.f32 %v4904_v2, %v4904_v2 }
 0x2e3   : > { %v4975_v42 = vsel %vm1194_vm15, %v4935_v28, 0.0  ;;  %v4907_v57 = vsub.f32 %v7571_v54, %v7749_v59  ;;  %v4938_v43 = vmul.f32 %v4905_v23, %v4905_v23  ;;  %v4977_v24 = vsel %vm1194_vm15, %v4936_v48, 0.0 }
 0x2e4   : > { %v4966_v29 = vadd.f32 %v4965_v41, %v4964_v14  ;;  %v4908_v33 = vsub.f32 %v7579_v17, %v7749_v59  ;;  %v4939_v21 = vmul.f32 %v4906_v12, %v4906_v12  ;;  %v4979_v52 = vsel %vm1194_vm15, %v4937_v26, 0.0 }
 0x2e5   : > { %v4909_v36 = vsub.f32 %v7625_v51, %v7749_v59  ;;  %v4940_v15 = vmul.f32 %v4907_v57, %v4907_v57  ;;  %v4981_v39 = vsel %vm1194_vm15, %v4938_v43, 0.0  ;;  %v4910_v54 = vsub.f32 %v7639_v4, %v7749_v59 }
 0x2e6   : > { %v4968_v18 = vadd.f32 %v4967_v62, %v4966_v29  ;;  %v4941_v49 = vmul.f32 %v4908_v33, %v4908_v33  ;;  %v4983_v35 = vsel %vm1194_vm15, %v4939_v21, 0.0  ;;  %v4944_v51 = vmul.f32 %v7753_v37, %v7753_v37 }
 0x2e7   : > { %v4942_v45 = vmul.f32 %v4909_v36, %v4909_v36  ;;  %v4985_v17 = vsel %vm1194_vm15, %v4940_v15, 0.0  ;;  %v4943_v55 = vmul.f32 %v4910_v54, %v4910_v54  ;;  %v4945_v4 = vmul.f32 %v7757_v25, %v7757_v25 }
 0x2e8   : > { %v4970_v5 = vadd.f32 %v4969_v31, %v4968_v18  ;;  %v4987_v61 = vsel %vm1194_vm15, %v4941_v49, 0.0  ;;  %v4946_v29 = vmul.f32 %v7760_v19, %v7760_v19  ;;  %v4993_v44 = vsel %vm1194_vm15, %v4944_v51, 0.0 }
 0x2e9   : > { %v4989_v14 = vsel %vm1194_vm15, %v4942_v45, 0.0  ;;  %v4991_v53 = vsel %vm1194_vm15, %v4943_v55, 0.0  ;;  %v4947_v62 = vmul.f32 %v7763_v58, %v7763_v58  ;;  %v4995_v37 = vsel %vm1194_vm15, %v4945_v4, 0.0 }
 0x2ea   : > { %v4972_v16 = vadd.f32 %v4971_v34, %v4970_v5  ;;  %v4917_v1 = vsub.f32 %v7611_v38, %v7749_v59  ;;  %v4948_v25 = vmul.f32 %v7766_v22, %v7766_v22  ;;  %v4997_v11 = vsel %vm1194_vm15, %v4946_v29, 0.0 }
 0x2eb   : > { %v4918_v19 = vsub.f32 %v7623_v47, %v7749_v59  ;;  %v4949_v5 = vmul.f32 %v7769_v63, %v7769_v63  ;;  %v4999_v58 = vsel %vm1194_vm15, %v4947_v62, 0.0  ;;  %v4919_v28 = vsub.f32 %v7608_v9, %v7749_v59 }
 0x2ec   : > { %v4974_v50 = vadd.f32 %v4973_v7, %v4972_v16  ;;  %v4950_v34 = vmul.f32 %v4917_v1, %v4917_v1  ;;  %v5001_v38 = vsel %vm1194_vm15, %v4948_v25, 0.0  ;;  %v4920_v22 = vsub.f32 %v7618_v40, %v7749_v59 }
 0x2ed   : > { %v4951_v23 = vmul.f32 %v4918_v19, %v4918_v19  ;;  %v5003_v48 = vsel %vm1194_vm15, %v4949_v5, 0.0  ;;  %v4921_v63 = vsub.f32 %v7655_v3, %v7749_v59  ;;  %v4952_v7 = vmul.f32 %v4919_v28, %v4919_v28 }
 0x2ee   : > { %v4976_v8 = vadd.f32 %v4975_v42, %v4974_v50  ;;  %v5005_v50 = vsel %vm1194_vm15, %v4950_v34, 0.0  ;;  %v4922_v9 = vsub.f32 %v7667_v32, %v7749_v59  ;;  %v4953_v26 = vmul.f32 %v4920_v22, %v4920_v22 }
 0x2ef   : > { %v5007_v42 = vsel %vm1194_vm15, %v4951_v23, 0.0  ;;  %v4923_v40 = vsub.f32 %v7652_v46, %v7749_v59  ;;  %v4954_v57 = vmul.f32 %v4921_v63, %v4921_v63  ;;  %v5009_v43 = vsel %vm1194_vm15, %v4952_v7, 0.0 }
 0x2f0   : > { %v4978_v60 = vadd.f32 %v4977_v24, %v4976_v8  ;;  %v4924_v3 = vsub.f32 %v7662_v6, %v7749_v59  ;;  %v5011_v33 = vsel %vm1194_vm15, %v4953_v26, 0.0 }
 0x2f1   : > { %v5013_v32 = vsel %vm1194_vm15, %v4954_v57, 0.0 }
 0x2f2   : > { %v4980_v10 = vadd.f32 %v4979_v52, %v4978_v60  ;;  %v4955_v60 = vmul.f32 %v4922_v9, %v4922_v9  ;;  %v4956_v52 = vmul.f32 %v4923_v40, %v4923_v40  ;;  %v4957_v36 = vmul.f32 %v4924_v3, %v4924_v3 }
 0x2f4   : > { %v4982_v27 = vadd.f32 %v4981_v39, %v4980_v10  ;;  %v5015_v15 = vsel %vm1194_vm15, %v4955_v60, 0.0  ;;  %v5017_v39 = vsel %vm1194_vm15, %v4956_v52, 0.0  ;;  %v5019_v54 = vsel %vm1194_vm15, %v4957_v36, 0.0 }
 0x2f6   : > { %v4984_v20 = vadd.f32 %v4983_v35, %v4982_v27 }
 0x2f8   : > { %v4986_v30 = vadd.f32 %v4985_v17, %v4984_v20 }
 0x2fa   : > { %v4988_v13 = vadd.f32 %v4987_v61, %v4986_v30 }
 0x2fc   : > { %v4990_v0 = vadd.f32 %v4989_v14, %v4988_v13 }
 0x2fe   : > { %v4992_v41 = vadd.f32 %v4991_v53, %v4990_v0 }
 0x300   : > { %v4994_v56 = vadd.f32 %v4993_v44, %v4992_v41 }
 0x302   : > { %v4996_v18 = vadd.f32 %v4995_v37, %v4994_v56 }
 0x304   : > { %v4998_v31 = vadd.f32 %v4997_v11, %v4996_v18 }
 0x306   : > { %v5000_v2 = vadd.f32 %v4999_v58, %v4998_v31 }
 0x308   : > { %v5002_v16 = vadd.f32 %v5001_v38, %v5000_v2 }
 0x30a   : > { %v5004_v47 = vadd.f32 %v5003_v48, %v5002_v16 }
 0x30c   : > { %v5006_v12 = vadd.f32 %v5005_v50, %v5004_v47 }
 0x30e   : > { %v5008_v8 = vadd.f32 %v5007_v42, %v5006_v12 }
 0x310   : > { %v5010_v24 = vadd.f32 %v5009_v43, %v5008_v8 }
 0x312   : > { %v5012_v21 = vadd.f32 %v5011_v33, %v5010_v24 }
 0x314   : > { %v5014_v10 = vadd.f32 %v5013_v32, %v5012_v21 }
 0x316   : > { %v5016_v46 = vadd.f32 %v5015_v15, %v5014_v10 }
 0x318   : > { %v5018_v27 = vadd.f32 %v5017_v39, %v5016_v46 }
 0x31a   : > { %v5020_v49 = vadd.f32 %v5019_v54, %v5018_v27 }
 0x31c   : > { %v5021_v6 = vrot.slane %v5020_v49, 4 }
 0x31e   : > { %v5022_v59 = vadd.f32 %v5021_v6, %v5020_v49 }
 0x320   : > { %v5023_v35 = vrot.slane %v5022_v59, 2 }
 0x322   : > { %v5024_v20 = vadd.f32 %v5023_v35, %v5022_v59 }
 0x324   : > { %v5025_v45 = vrot.slane %v5024_v20, 1 }
 0x326   : > { %v5026_v17 = vadd.f32 %v5025_v45, %v5024_v20 }
 0x328   : > { %5027 = vst.msk [vmem:[%s7745_s15 + $0x1] sm:$0x1] %vm240_vm1, %v5026_v17 }
 0x329 PF: > { %s16_s18 = sadd.s32 1, %s5833_s18  }
 0x32a   : > { %p13_p4 = scmp.ge.s32.totalorder %s16_s18, 4  }
 0x32c   :  { %15 = sbr.rel (!%p13_p4) target bundleno = 1 (0x1), region = 81 }

// kernel: residual_block_forward.3
= control target key start
LH: loop header
LB: loop body
LE: loop exit
PB: predicated region body
PF: predicated region fallthrough
CT: control target
= control target key end

     0   :  { %s6075_s21 = smov 0   ;;  %s8159_s0 = inlined_call_operand.vmem [shape: bf16[2,16,16,4], index: 0, kind: input, shape index: {}]   ;;  %s8160_s1 = inlined_call_operand.vmem [shape: bf16[36,32], index: 1, kind: input, shape index: {}]   ;;  %s8161_s2 = inlined_call_operand.vmem [shape: bf16[4,32], index: 2, kind: input, shape index: {}]   ;;  %s8162_s3 = inlined_call_operand.vmem [shape: bf16[2,256,32], index: 3, kind: output, shape index: {0}]   ;;  %s8163_s4 = inlined_call_operand.vmem [shape: bf16[2,256,32], index: 4, kind: output, shape index: {1}]   ;;  %s8164_s5 = inlined_call_operand.vmem [shape: f32[2,2,32], index: 5, kind: output, shape index: {2}]   ;;  %s8165_s6 = inlined_call_operand.vmem [shape: f32[2,2,32], index: 6, kind: output, shape index: {3}]  }
   0x1 LB: > { %s5439_s22 = sadd.s32 4294967295, %s6029_s21   ;;  %p5443_p0 = scmp.ge.s32.totalorder %s6029_s21, 1  ;;  %s6029_s21 = sphi %s6075_s21, %s17_s21  }
   0x2   : > { %p219_p1 = scmp.lt.s32.totalorder %s6029_s21, 3 }
   0x4   : > { %p220_p2 = pnand %p5443_p0, %p219_p1 }
   0x6   : > { %223 = sbr.rel (%p220_p2) target bundleno = 861 (0x35d), region = 32 }
   0xd   : > { %p262_p3 = scmp.lt.s32.totalorder %s5439_s22, 1  ;;  %vm286_vm0 = vcmask 27648   ;;  %vm289_vm1 = vcmask 24576   ;;  %vm296_vm2 = vsmask.f32 256  ;;  %v6031_v3 = vmov 0  }
   0xe   : > { %vm6085_vm3 = vmand %vm289_vm1, %vm296_vm2  ;;  %v301_v1 = vld [vmem:[#allocation2 + $0xc] sm:$0x1]  ;;  %287 = vst.msk [vmem:[#allocation2] sm:$0xf] %vm286_vm0, %v6031_v3  ;;  %v304_v4 = vld [vmem:[#allocation2 + $0x18] sm:$0x1] }
   0xf   : > { %s8224_s22 = smov (!%p262_p3, %s5439_s22), 1  ;;  %v302_v2 = vsel %vm6085_vm3, 0, %v301_v1  ;;  %288 = vst.msk [vmem:[#allocation2 + $0x4] sm:$0xf] %vm286_vm0, %v6031_v3  ;;  %292 = vst.msk [vmem:[#allocation2 + $0xcc] sm:$0xf] %vm286_vm0, %v6031_v3 }
  0x10   : > { %303 = vst [vmem:[#allocation2 + $0xc] sm:$0x1] %v302_v2  ;;  %290 = vst.msk [vmem:[#allocation2 + $0x8] sm:$0x1] %vm289_vm1, %v6031_v3  ;;  %s6100_s23 = sshll.u32 %s8224_s22, 7  ;;  %v305_v5 = vsel %vm6085_vm3, 0, %v304_v4 }
  0x11   : > { %293 = vst.msk [vmem:[#allocation2 + $0xd0] sm:$0xf] %vm286_vm0, %v6031_v3  ;;  %vm352_vm4 = vsmask.f32 7938  ;;  %s6108_s26 = scalar_lea.vmem %s8159_s0, %s6100_s23  ;;  %vm440_vm5 = vsmask.f32 4368 }
  0x12   : > { %294 = vst.msk [vmem:[#allocation2 + $0xd4] sm:$0x1] %vm289_vm1, %v6031_v3  ;;  %306 = vst [vmem:[#allocation2 + $0x18] sm:$0x1] %v305_v5  ;;  %v307_v6 = vld [vmem:[#allocation2 + $0x24] sm:$0x1] }
  0x13   : > { %v408_v7 = vld [vmem:[%s6108_s26] sm:$0xf]  ;;  %v409_v8 = vld [vmem:[%s6108_s26 + $0x4] sm:$0xf]  ;;  %v410_v9 = vld [vmem:[%s6108_s26 + $0x8] sm:$0xf] }
  0x14   : > { %vm6115_vm6 = vmand %vm289_vm1, %vm352_vm4  ;;  %v443_v11 = vshrl.u32 %v408_v7, 16  ;;  %v446_v12 = vshll.u32 %v408_v7, 16  ;;  %v451_v13 = vshrl.u32 %v409_v8, 16  ;;  %v454_v14 = vshll.u32 %v409_v8, 16  ;;  %v411_v15 = vld [vmem:[%s6108_s26 + $0xc] sm:$0xf] }
  0x15   : > { %vm6121_vm7 = vmor %vm296_vm2, %vm440_vm5  ;;  %vm1992_vm8 = vcmask 1042432   ;;  %vm1993_vm9 = vcmask 1046532   ;;  %v460_v17 = vshrl.u32 %v410_v9, 16  ;;  %v463_v18 = vshll.u32 %v410_v9, 16  ;;  %v412_v24 = vld [vmem:[%s6108_s26 + $0x10] sm:$0xf] }
  0x16   : > { %v445_v19 = vrot.slane %v443_v11, 7  ;;  %v6125_v20 = vrot.slane %v451_v13, 7  ;;  %vm6129_vm10 = vmand %vm286_vm0, %vm352_vm4  ;;  %v468_v22 = vshrl.u32 %v411_v15, 16  ;;  %v308_v23 = vsel %vm6085_vm3, 0, %v307_v6  ;;  %v6136_v27 = vld [vmem:[#allocation2] sm:$0xe] }
  0x17   : > { %v765_v25 = vld [vmem:[#allocation2 + $0xc] sm:$0xf]  ;;  %v354_v26 = vld [vmem:[#allocation2 + $0x8] sm:$0x1]  ;;  %309 = vst [vmem:[#allocation2 + $0x24] sm:$0x1] %v308_v23  ;;  %vm6165_vm13 = vmor %vm1992_vm8, %vm1993_vm9 }
  0x18   : > { %v448_v28 = vor.u32 %v446_v12, %v445_v19  ;;  %v449_v29 = vrot.slane %v445_v19, 4  ;;  %v456_v30 = vor.u32 %v454_v14, %v6125_v20  ;;  %v6139_v31 = vld [vmem:[#allocation2 + $0x4] sm:$0xf]  ;;  %v471_v32 = vshll.u32 %v411_v15, 16  ;;  %v298_v33 = vld [vmem:[#allocation2] sm:$0x1] }
  0x19   : > { %v355_v34 = vsel %vm6115_vm6, 0, %v354_v26  ;;  %v1997_v35 = vrot.slane %v6139_v31, 5  ;;  %v462_v36 = vrot.slane %v460_v17, 7  ;;  %v413_v37 = vld [vmem:[%s6108_s26 + $0x14] sm:$0xf]  ;;  %v477_v38 = vshrl.u32 %v412_v24, 16 }
  0x1a   : > { %v457_v39 = vsel %vm6121_vm7, %v449_v29, %v456_v30  ;;  %v766_v40 = vsel %vm6129_vm10, %v448_v28, %v765_v25  ;;  %356 = vst [vmem:[#allocation2 + $0x8] sm:$0x1] %v355_v34  ;;  %v6149_v41 = vrot.slane %v468_v22, 7  ;;  %v772_v42 = vld [vmem:[#allocation2 + $0x18] sm:$0xf]  ;;  %v299_v43 = vsel %vm6085_vm3, 0, %v298_v33 }
  0x1b   : > { %v1349_v44 = vld [vmem:[#allocation2 + $0x4] sm:$0xf]  ;;  %v357_v45 = vld [vmem:[#allocation2 + $0x14] sm:$0x1]  ;;  %v458_v46 = vrot.slane %v6125_v20, 4  ;;  %v5516_v47 = vrot.slane %v6136_v27, 9  ;;  %v465_v48 = vor.u32 %v463_v18, %v462_v36 }
  0x1c   : > { %767 = vst [vmem:[#allocation2 + $0xc] sm:$0xf] %v766_v40  ;;  %768 = vst.msk [vmem:[#allocation2 + $0x10] sm:$0xf] %vm286_vm0, %v457_v39  ;;  %v466_v49 = vrot.slane %v462_v36, 4  ;;  %v1999_v51 = vrot.slane %v1997_v35, 4  ;;  %v473_v52 = vor.u32 %v471_v32, %v6149_v41 }
  0x1d   : > { %300 = vst [vmem:[#allocation2] sm:$0x1] %v299_v43  ;;  %v360_v50 = vld [vmem:[#allocation2 + $0x20] sm:$0x1]  ;;  %vm1396_vm11 = vsmask.f32 3328  ;;  %v773_v56 = vsel %vm6129_vm10, %v465_v48, %v772_v42  ;;  %v1998_v22 = vsel %vm6165_vm13, %v5516_v47, %v1997_v35 }
  0x1e   : > { %vm1397_vm12 = vsmask.f32 7440  ;;  %v1409_v53 = vshll.u32 %v1349_v44, 16  ;;  %v1413_v54 = vshrl.u32 %v1349_v44, 16  ;;  %v363_v55 = vld [vmem:[#allocation2 + $0x2c] sm:$0x1]  ;;  %v474_v61 = vsel %vm6121_vm7, %v466_v49, %v473_v52 }
  0x1f   : > { %v479_v57 = vrot.slane %v477_v38, 7  ;;  %v480_v58 = vshll.u32 %v412_v24, 16  ;;  %v485_v59 = vshrl.u32 %v413_v37, 16  ;;  %v310_v60 = vld [vmem:[#allocation2 + $0x30] sm:$0x1]  ;;  %v488_v1 = vshll.u32 %v413_v37, 16  ;;  %vm6201_vm14 = vmor %vm1396_vm11, %vm1397_vm12 }
  0x20   : > { %774 = vst [vmem:[#allocation2 + $0x18] sm:$0xf] %v773_v56  ;;  %v6161_v62 = vrot.slane %v1409_v53, 5  ;;  %v1415_v63 = vrot.slane %v1413_v54, 4  ;;  %v779_v2 = vld [vmem:[#allocation2 + $0x24] sm:$0xf] }
  0x21   : > { %775 = vst.msk [vmem:[#allocation2 + $0x1c] sm:$0xf] %vm286_vm0, %v474_v61  ;;  %v482_v4 = vor.u32 %v480_v58, %v479_v57  ;;  %v483_v5 = vrot.slane %v479_v57, 4  ;;  %v6170_v6 = vrot.slane %v485_v59, 7  ;;  %v358_v7 = vsel %vm6115_vm6, 0, %v357_v45  ;;  %s6032_s27 = smov 12  }
  0x22   : > { %v475_v8 = vrot.slane %v6149_v41, 4  ;;  %359 = vst [vmem:[#allocation2 + $0x14] sm:$0x1] %v358_v7  ;;  %v361_v9 = vsel %vm6115_vm6, 0, %v360_v50  ;;  %v364_v11 = vsel %vm6115_vm6, 0, %v363_v55  ;;  %v311_v12 = vsel %vm6085_vm3, 0, %v310_v60 }
  0x23   : > { %v1898_v13 = vld [vmem:[#allocation2 + $0x8] sm:$0x1]  ;;  %v490_v15 = vor.u32 %v488_v1, %v6170_v6  ;;  %v780_v17 = vsel %vm6129_vm10, %v482_v4, %v779_v2  ;;  %362 = vst [vmem:[#allocation2 + $0x20] sm:$0x1] %v361_v9  ;;  %365 = vst [vmem:[#allocation2 + $0x2c] sm:$0x1] %v364_v11  ;;  %v1416_v25 = vor.u32 %v1415_v63, %v6161_v62 }
  0x24   : > { %v1350_v14 = vld [vmem:[#allocation2 + $0x8] sm:$0x1]  ;;  %312 = vst [vmem:[#allocation2 + $0x30] sm:$0x1] %v311_v12  ;;  %v6185_v18 = vld [vmem:[%s6108_s26 + $0x18] sm:$0xf] }
  0x25   : > { %v5955_v19 = vld [vmem:[#allocation2 + $0xc] sm:$0xff]   ;;  %v2000_v23 = vrot.slane %v1898_v13, 5  ;;  %781 = vst [vmem:[#allocation2 + $0x24] sm:$0xf] %v780_v17  ;;  %v1348_v24 = vld [vmem:[#allocation2] sm:$0xf]  ;;  %v491_v27 = vsel %vm6121_vm7, %v483_v5, %v490_v15 }
  0x26   : > { %v1419_v26 = vshll.u32 %v1350_v14, 16  ;;  %v492_v28 = vrot.slane %v6170_v6, 4  ;;  %2332 = vrot.lane.b32.xlu0 %v5955_v19, %s6032_s27  ;;  %v1400_v30 = vshrl.u32 %v1348_v24, 16  ;;  %v1403_v31 = vshll.u32 %v1348_v24, 16  ;;  %782 = vst.msk [vmem:[#allocation2 + $0x28] sm:$0xf] %vm286_vm0, %v491_v27 }
  0x27   : > { %v2001_v29 = vsel %vm6165_vm13, %v1999_v51, %v2000_v23  ;;  %v2942_v32 = vld [vmem:[#allocation2 + $0xc] sm:$0xe]  ;;  %v2943_v33 = vld [vmem:[#allocation2 + $0x10] sm:$0xf]  ;;  %v494_v36 = vshrl.u32 %v6185_v18, 16  ;;  %s6033_s28 = smov 8  }
  0x28   : > { %v5532_v34 = vcombine.low %v1998_v22, %v2001_v29  ;;  %v3040_v35 = vrot.slane %v2943_v33, 5  ;;  %v5956_v37 = vld [vmem:[#allocation2 + $0x18] sm:$0xff]   ;;  %v1402_v38 = vrot.slane %v1400_v30, 4  ;;  %v1405_v41 = vrot.slane %v1403_v31, 5  ;;  %s6034_s29 = smov 24   ;;  %s6035_s30 = smov 4  }
  0x29   : > { %v5957_v39 = vld [vmem:[#allocation2 + $0x18] sm:$0xff]   ;;  %v1417_v42 = vrot.slane %v1416_v25, 4  ;;  %v1421_v43 = vrot.slane %v1419_v26, 5  ;;  %v769_v44 = vld [vmem:[#allocation2 + $0x14] sm:$0x1]  ;;  %v5580_v51 = vrot.slane %v2942_v32, 9 }
  0x2a   : > { %2155 = vrot.lane.b32.xlu1 %v5532_v34, %s6033_s28  ;;  %3376 = vrot.lane.b32.xlu0 %v5956_v37, %s6034_s29  ;;  %v770_v45 = vsel %vm6085_vm3, %v458_v46, %v769_v44  ;;  %v1899_v47 = vld [vmem:[#allocation2 + $0xc] sm:$0xe]  ;;  %v1900_v48 = vld [vmem:[#allocation2 + $0x10] sm:$0xf]  ;;  %v776_v49 = vld [vmem:[#allocation2 + $0x20] sm:$0x1]  ;;  %v1406_v50 = vor.u32 %v1405_v41, %v1402_v38 }
  0x2b   : > { %771 = vst [vmem:[#allocation2 + $0x14] sm:$0x1] %v770_v45  ;;  %v2004_v52 = vrot.slane %v1900_v48, 5  ;;  %v777_v53 = vsel %vm6085_vm3, %v475_v8, %v776_v49  ;;  %v3986_v54 = vld [vmem:[#allocation2 + $0x18] sm:$0xe]  ;;  %v3042_v55 = vrot.slane %v3040_v35, 4  ;;  %v1422_v46 = vsel %vm6201_vm14, %v1417_v42, %v1421_v43 }
  0x2c   : > { %v5517_v56 = vrot.slane %v1899_v47, 9  ;;  %778 = vst [vmem:[#allocation2 + $0x20] sm:$0x1] %v777_v53  ;;  %v3987_v57 = vld [vmem:[#allocation2 + $0x1c] sm:$0xf]  ;;  %v1407_v20 = vrot.slane %v1406_v50, 4  ;;  %v3041_v6 = vsel %vm6165_vm13, %v5580_v51, %v3040_v35 }
  0x2d   : > { %v2945_v58 = vld [vmem:[#allocation2 + $0x18] sm:$0xe]  ;;  %v5958_v59 = vld [vmem:[#allocation2 + $0x24] sm:$0xff]   ;;  %v5644_v60 = vrot.slane %v3986_v54, 9  ;;  %v4084_v61 = vrot.slane %v3987_v57, 5  ;;  %v2006_v63 = vrot.slane %v2004_v52, 4 }
  0x2e   : > { %2334 = vrot.lane.b32.xlu1 %v5957_v39, %s6032_s27  ;;  %v2946_v1 = vld [vmem:[#allocation2 + $0x1c] sm:$0xf]  ;;  %v783_v2 = vld [vmem:[#allocation2 + $0x2c] sm:$0x1]  ;;  %v6215_v4 = vrot.slane %v494_v36, 7  ;;  %v1412_v5 = vsel %vm6201_vm14, %v1407_v20, %v6161_v62  ;;  %v5581_v7 = vrot.slane %v2945_v58, 9  ;;  %v2005_v27 = vsel %vm6165_vm13, %v5517_v56, %v2004_v52 }
  0x2f   : > { %v3047_v8 = vrot.slane %v2946_v1, 5  ;;  %v3989_v9 = vld [vmem:[#allocation2 + $0x24] sm:$0xe]  ;;  %v3990_v11 = vld [vmem:[#allocation2 + $0x28] sm:$0xf]  ;;  %v5500_v12 = vcombine.low %v1412_v5, %v1422_v46  ;;  %v784_v13 = vsel %vm6085_vm3, %v492_v28, %v783_v2  ;;  %v4086_v22 = vrot.slane %v4084_v61, 4 }
  0x30   : > { %v5645_v14 = vrot.slane %v3989_v9, 9  ;;  %v4091_v15 = vrot.slane %v3990_v11, 5  ;;  %v2400_v17 = vld [vmem:[#allocation2 + $0x18] sm:$0xf]  ;;  %v2401_v19 = vld [vmem:[#allocation2 + $0x1c] sm:$0xf]  ;;  %v4085_v28 = vsel %vm6165_vm13, %v5644_v60, %v4084_v61 }
  0x31   : > { %v3049_v23 = vrot.slane %v3047_v8, 4  ;;  %785 = vst [vmem:[#allocation2 + $0x2c] sm:$0x1] %v784_v13  ;;  %v2470_v62 = vshrl.u32 %v2400_v17, 16  ;;  %v2473_v24 = vshll.u32 %v2400_v17, 16  ;;  %1831 = vrot.lane.b32.xlu0 %v5500_v12, %s6035_s30  ;;  %v2479_v30 = vshll.u32 %v2401_v19, 16 }
  0x32   : > { %3378 = vrot.lane.b32.xlu1 %v5958_v59, %s6034_s29  ;;  %v2944_v25 = vld [vmem:[#allocation2 + $0x14] sm:$0x1]  ;;  %v4093_v29 = vrot.slane %v4091_v15, 4  ;;  %v3048_v35 = vsel %vm6165_vm13, %v5581_v7, %v3047_v8  ;;  %v6234_v36 = vsel %vm6165_vm13, %v5645_v14, %v4091_v15  ;;  %v1351_v42 = vld [vmem:[#allocation2 + $0xc] sm:$0xf]  ;;  %v2483_v48 = vshrl.u32 %v2401_v19, 16 }
  0x33   : > { %v1901_v26 = vld [vmem:[#allocation2 + $0x14] sm:$0x1]  ;;  %v3043_v31 = vrot.slane %v2944_v25, 5  ;;  %v3988_v33 = vld [vmem:[#allocation2 + $0x20] sm:$0x1]  ;;  %v2472_v39 = vrot.slane %v2470_v62, 4 }
  0x34   : > { %v2007_v32 = vrot.slane %v1901_v26, 5  ;;  %v2947_v34 = vld [vmem:[#allocation2 + $0x20] sm:$0x1]  ;;  %v4087_v37 = vrot.slane %v3988_v33, 5  ;;  %v2475_v41 = vrot.slane %v2473_v24, 5  ;;  %v2481_v47 = vrot.slane %v2479_v30, 5 }
  0x35   : > { %v3050_v38 = vrot.slane %v2947_v34, 5  ;;  %v3044_v43 = vsel %vm6165_vm13, %v3042_v55, %v3043_v31  ;;  %v2402_v45 = vld [vmem:[#allocation2 + $0x20] sm:$0x1]  ;;  %v1352_v49 = vld [vmem:[#allocation2 + $0x10] sm:$0xf]  ;;  %v2485_v58 = vrot.slane %v2483_v48, 4 }
  0x36   : > { %v2008_v44 = vsel %vm6165_vm13, %v2006_v63, %v2007_v32  ;;  %v5596_v50 = vcombine.low %v3041_v6, %v3044_v43  ;;  %v4088_v52 = vsel %vm6165_vm13, %v4086_v22, %v4087_v37  ;;  %v2476_v57 = vor.u32 %v2475_v41, %v2472_v39  ;;  %v1353_v55 = vld [vmem:[#allocation2 + $0x14] sm:$0x1]  ;;  %s6036_s7 = smov 20   ;;  %v3444_v6 = vld [vmem:[#allocation2 + $0x24] sm:$0xf]  ;;  %s6037_s8 = smov 32  }
  0x37   : > { %v5533_v51 = vcombine.low %v2005_v27, %v2008_v44  ;;  %v3051_v53 = vsel %vm6165_vm13, %v3049_v23, %v3050_v38  ;;  %v5660_v54 = vcombine.low %v4085_v28, %v4088_v52  ;;  %v2489_v46 = vshll.u32 %v2402_v45, 16  ;;  %v3445_v12 = vld [vmem:[#allocation2 + $0x28] sm:$0xf]  ;;  %v2398_v34 = vld [vmem:[#allocation2 + $0x10] sm:$0xf]  ;;  %s6038_s9 = smov 16  }
  0x38   : > { %v5597_v56 = vcombine.low %v3048_v35, %v3051_v53  ;;  %3198 = vrot.lane.b32.xlu0 %v5596_v50, %s6036_s7  ;;  %v3991_v20 = vld [vmem:[#allocation2 + $0x2c] sm:$0x1]  ;;  %v1424_v59 = vshrl.u32 %v1351_v42, 16  ;;  %v1427_v60 = vshll.u32 %v1351_v42, 16  ;;  %v1433_v61 = vshll.u32 %v1352_v49, 16  ;;  %s6039_s10 = smov 28  }
  0x39   : > { %2157 = vrot.lane.b32.xlu1 %v5533_v51, %s6033_s28  ;;  %v4094_v63 = vrot.slane %v3991_v20, 5  ;;  %v2477_v1 = vrot.slane %v2476_v57, 4  ;;  %v2486_v2 = vor.u32 %v2485_v58, %v2481_v47  ;;  %v1437_v5 = vshrl.u32 %v1352_v49, 16  ;;  %v3446_v26 = vld [vmem:[#allocation2 + $0x2c] sm:$0x1] }
  0x3a   : > { %v2491_v7 = vrot.slane %v2489_v46, 5  ;;  %v1426_v8 = vrot.slane %v1424_v59, 4  ;;  %v1429_v9 = vrot.slane %v1427_v60, 5  ;;  %v1435_v11 = vrot.slane %v1433_v61, 5  ;;  %v2399_v48 = vld [vmem:[#allocation2 + $0x14] sm:$0x1] }
  0x3b   : > { %v4095_v13 = vsel %vm6165_vm13, %v4093_v29, %v4094_v63  ;;  %v2482_v14 = vsel %vm6201_vm14, %v2477_v1, %v2481_v47  ;;  %v2487_v15 = vrot.slane %v2486_v2, 4  ;;  %v1439_v17 = vrot.slane %v1437_v5, 4  ;;  %v2397_v29 = vld [vmem:[#allocation2 + $0xc] sm:$0xf]  ;;  %v1354_v50 = vld [vmem:[#allocation2 + $0x18] sm:$0xf] }
  0x3c   : > { %4242 = vrot.lane.b32.xlu0 %v5660_v54, %s6037_s8  ;;  %v5661_v19 = vcombine.low %v6234_v36, %v4095_v13  ;;  %v1430_v22 = vor.u32 %v1429_v9, %v1426_v8  ;;  %v1443_v23 = vshll.u32 %v1353_v55, 16  ;;  %v3514_v62 = vshrl.u32 %v3444_v6, 16  ;;  %v1356_v46 = vld [vmem:[#allocation2 + $0x20] sm:$0x1]  ;;  %v3441_v1 = vld [vmem:[#allocation2 + $0x18] sm:$0xf] }
  0x3d   : > { %3200 = vrot.lane.b32.xlu1 %v5597_v56, %s6036_s7  ;;  %v2492_v24 = vsel %vm6201_vm14, %v2487_v15, %v2491_v7  ;;  %v1440_v25 = vor.u32 %v1439_v17, %v1435_v11  ;;  %v3517_v27 = vshll.u32 %v3444_v6, 16  ;;  %v3523_v28 = vshll.u32 %v3445_v12, 16  ;;  %v1355_v56 = vld [vmem:[#allocation2 + $0x1c] sm:$0xf] }
  0x3e   : > { %v5565_v30 = vcombine.low %v2482_v14, %v2492_v24  ;;  %v1431_v31 = vrot.slane %v1430_v22, 4  ;;  %v1445_v32 = vrot.slane %v1443_v23, 5  ;;  %v3516_v33 = vrot.slane %v3514_v62, 4 }
  0x3f   : > { %v1441_v35 = vrot.slane %v1440_v25, 4  ;;  %v3519_v37 = vrot.slane %v3517_v27, 5  ;;  %v3525_v38 = vrot.slane %v3523_v28, 5  ;;  %v3527_v36 = vshrl.u32 %v3445_v12, 16  ;;  %v3443_v27 = vld [vmem:[#allocation2 + $0x20] sm:$0x1] }
  0x40   : > { %4244 = vrot.lane.b32.xlu0 %v5661_v19, %s6037_s8  ;;  %v1436_v39 = vsel %vm6201_vm14, %v1431_v31, %v1435_v11  ;;  %v3533_v41 = vshll.u32 %v3446_v26, 16  ;;  %v2446_v42 = vshrl.u32 %v2397_v29, 16  ;;  %v2449_v43 = vshll.u32 %v2397_v29, 16  ;;  %v3442_v19 = vld [vmem:[#allocation2 + $0x1c] sm:$0xf] }
  0x41   : > { %2879 = vrot.lane.b32.xlu1 %v5565_v30, %s6038_s9  ;;  %v1446_v44 = vsel %vm6201_vm14, %v1441_v35, %v1445_v32  ;;  %v3520_v45 = vor.u32 %v3519_v37, %v3516_v33  ;;  %v3529_v47 = vrot.slane %v3527_v36, 4  ;;  %v2455_v49 = vshll.u32 %v2398_v34, 16 }
  0x42   : > { %v5501_v51 = vcombine.low %v1436_v39, %v1446_v44  ;;  %v3535_v52 = vrot.slane %v3533_v41, 5  ;;  %v2448_v53 = vrot.slane %v2446_v42, 4  ;;  %v2451_v54 = vrot.slane %v2449_v43, 5  ;;  %v1358_v39 = vld [vmem:[#allocation2 + $0x28] sm:$0xf] }
  0x43   : > { %v3521_v57 = vrot.slane %v3520_v45, 4  ;;  %v3530_v58 = vor.u32 %v3529_v47, %v3525_v38  ;;  %v2457_v55 = vrot.slane %v2455_v49, 5  ;;  %v2459_v20 = vshrl.u32 %v2398_v34, 16  ;;  %v1357_v34 = vld [vmem:[#allocation2 + $0x24] sm:$0xf] }
  0x44   : > { %1833 = vrot.lane.b32.xlu0 %v5501_v51, %s6035_s30  ;;  %v2452_v59 = vor.u32 %v2451_v54, %v2448_v53  ;;  %v2465_v60 = vshll.u32 %v2399_v48, 16  ;;  %v1448_v61 = vshrl.u32 %v1354_v50, 16  ;;  %v1451_v63 = vshll.u32 %v1354_v50, 16  ;;  %v1359_v45 = vld [vmem:[#allocation2 + $0x2c] sm:$0x1] }
  0x45   : > { %v3526_v2 = vsel %vm6201_vm14, %v3521_v57, %v3525_v38  ;;  %v3531_v5 = vrot.slane %v3530_v58, 4  ;;  %v2461_v6 = vrot.slane %v2459_v20, 4  ;;  %v1457_v7 = vshll.u32 %v1355_v56, 16  ;;  %v1902_v51 = vld [vmem:[#allocation2 + $0x18] sm:$0xe] }
  0x46   : > { %v2453_v8 = vrot.slane %v2452_v59, 4  ;;  %v2467_v9 = vrot.slane %v2465_v60, 5  ;;  %v1450_v11 = vrot.slane %v1448_v61, 4  ;;  %v1453_v12 = vrot.slane %v1451_v63, 5  ;;  %v1903_v57 = vld [vmem:[#allocation2 + $0x1c] sm:$0xf] }
  0x47   : > { %v3536_v13 = vsel %vm6201_vm14, %v3531_v5, %v3535_v52  ;;  %v2462_v14 = vor.u32 %v2461_v6, %v2457_v55  ;;  %v1459_v15 = vrot.slane %v1457_v7, 5  ;;  %v1461_v17 = vshrl.u32 %v1355_v56, 16  ;;  %v1904_v59 = vld [vmem:[#allocation2 + $0x20] sm:$0x1] }
  0x48   : > { %v5629_v22 = vcombine.low %v3526_v2, %v3536_v13  ;;  %v2458_v23 = vsel %vm6201_vm14, %v2453_v8, %v2457_v55  ;;  %v1454_v62 = vor.u32 %v1453_v12, %v1450_v11  ;;  %v1467_v24 = vshll.u32 %v1356_v46, 16  ;;  %v1905_v2 = vld [vmem:[#allocation2 + $0x24] sm:$0xe] }
  0x49   : > { %v2463_v25 = vrot.slane %v2462_v14, 4  ;;  %v1463_v26 = vrot.slane %v1461_v17, 4  ;;  %v3490_v28 = vshrl.u32 %v3441_v1, 16  ;;  %v3493_v29 = vshll.u32 %v3441_v1, 16 }
  0x4a   : > { %3923 = vrot.lane.b32.xlu1 %v5629_v22, %s6039_s10  ;;  %v1455_v30 = vrot.slane %v1454_v62, 4  ;;  %v1469_v31 = vrot.slane %v1467_v24, 5  ;;  %v3499_v32 = vshll.u32 %v3442_v19, 16  ;;  %v3503_v33 = vshrl.u32 %v3442_v19, 16 }
  0x4b   : > { %v2468_v35 = vsel %vm6201_vm14, %v2463_v25, %v2467_v9  ;;  %v1464_v37 = vor.u32 %v1463_v26, %v1459_v15  ;;  %v3492_v38 = vrot.slane %v3490_v28, 4  ;;  %v3495_v36 = vrot.slane %v3493_v29, 5  ;;  %v1906_v9 = vld [vmem:[#allocation2 + $0x28] sm:$0xf] }
  0x4c   : > { %v5564_v41 = vcombine.low %v2458_v23, %v2468_v35  ;;  %v1460_v42 = vsel %vm6201_vm14, %v1455_v30, %v1459_v15  ;;  %v3501_v43 = vrot.slane %v3499_v32, 5  ;;  %v3505_v44 = vrot.slane %v3503_v33, 4  ;;  %v1907_v15 = vld [vmem:[#allocation2 + $0x2c] sm:$0x1]  ;;  %v2403_v32 = vld [vmem:[#allocation2 + $0x24] sm:$0xf] }
  0x4d   : > { %v1465_v47 = vrot.slane %v1464_v37, 4  ;;  %v3496_v48 = vor.u32 %v3495_v36, %v3492_v38  ;;  %v3509_v49 = vshll.u32 %v3443_v27, 16  ;;  %v1472_v50 = vshrl.u32 %v1357_v34, 16  ;;  %v415_v27 = vld [vmem:[%s6108_s26 + $0x1c] sm:$0xf] }
  0x4e   : > { %2877 = vrot.lane.b32.xlu0 %v5564_v41, %s6038_s9  ;;  %v3506_v52 = vor.u32 %v3505_v44, %v3501_v43  ;;  %v1475_v53 = vshll.u32 %v1357_v34, 16  ;;  %v1481_v54 = vshll.u32 %v1358_v39, 16  ;;  %v1485_v56 = vshrl.u32 %v1358_v39, 16  ;;  %v786_v38 = vld [vmem:[#allocation2 + $0x30] sm:$0xf] }
  0x4f   : > { %v1470_v58 = vsel %vm6201_vm14, %v1465_v47, %v1469_v31  ;;  %v3497_v55 = vrot.slane %v3496_v48, 4  ;;  %v3511_v20 = vrot.slane %v3509_v49, 5  ;;  %v1474_v46 = vrot.slane %v1472_v50, 4  ;;  %v366_v36 = vld [vmem:[#allocation2 + $0x38] sm:$0x1] }
  0x50   : > { %v5502_v60 = vcombine.low %v1460_v42, %v1470_v58  ;;  %v3507_v61 = vrot.slane %v3506_v52, 4  ;;  %v1477_v63 = vrot.slane %v1475_v53, 5  ;;  %v1483_v1 = vrot.slane %v1481_v54, 5  ;;  %v2404_v44 = vld [vmem:[#allocation2 + $0x28] sm:$0xf] }
  0x51   : > { %v3502_v5 = vsel %vm6201_vm14, %v3497_v55, %v3501_v43  ;;  %v1487_v6 = vrot.slane %v1485_v56, 4  ;;  %v1491_v7 = vshll.u32 %v1359_v45, 16  ;;  %v5518_v8 = vrot.slane %v1902_v51, 9  ;;  %v2405_v45 = vld [vmem:[#allocation2 + $0x2c] sm:$0x1] }
  0x52   : > { %1835 = vrot.lane.b32.xlu1 %v5502_v60, %s6035_s30  ;;  %v3512_v11 = vsel %vm6201_vm14, %v3507_v61, %v3511_v20  ;;  %v1478_v12 = vor.u32 %v1477_v63, %v1474_v46  ;;  %v2011_v13 = vrot.slane %v1903_v57, 5  ;;  %v2014_v14 = vrot.slane %v1904_v59, 5  ;;  %v2948_v51 = vld [vmem:[#allocation2 + $0x24] sm:$0xe]  ;;  %v2949_v52 = vld [vmem:[#allocation2 + $0x28] sm:$0xf] }
  0x53   : > { %v5628_v17 = vcombine.low %v3502_v5, %v3512_v11  ;;  %v1488_v19 = vor.u32 %v1487_v6, %v1483_v1  ;;  %v1493_v22 = vrot.slane %v1491_v7, 5  ;;  %v5519_v23 = vrot.slane %v1905_v2, 9  ;;  %v2950_v57 = vld [vmem:[#allocation2 + $0x2c] sm:$0x1]  ;;  %v313_v58 = vld [vmem:[#allocation2 + $0x3c] sm:$0x1] }
  0x54   : > { %v1479_v62 = vrot.slane %v1478_v12, 4  ;;  %v2012_v24 = vsel %vm6165_vm13, %v5518_v8, %v2011_v13  ;;  %v2013_v25 = vrot.slane %v2011_v13, 4  ;;  %v2018_v26 = vrot.slane %v1906_v9, 5  ;;  %v416_v55 = vld [vmem:[%s6108_s26 + $0x20] sm:$0xf] }
  0x55   : > { %3921 = vrot.lane.b32.xlu0 %v5628_v17, %s6039_s10  ;;  %v1489_v28 = vrot.slane %v1488_v19, 4  ;;  %v2021_v29 = vrot.slane %v1907_v15, 5  ;;  %v497_v30 = vshll.u32 %v6185_v18, 16  ;;  %v500_v31 = vrot.slane %v6215_v4, 4  ;;  %v5959_v18 = vld [vmem:[#allocation2 + $0x24] sm:$0xff]  }
  0x56   : > { %v1484_v33 = vsel %vm6201_vm14, %v1479_v62, %v1483_v1  ;;  %v2015_v34 = vsel %vm6165_vm13, %v2013_v25, %v2014_v14  ;;  %v2019_v35 = vsel %vm6165_vm13, %v5519_v23, %v2018_v26  ;;  %v2020_v37 = vrot.slane %v2018_v26, 4  ;;  %v417_v61 = vld [vmem:[%s6108_s26 + $0x24] sm:$0xf] }
  0x57   : > { %v1494_v39 = vsel %vm6201_vm14, %v1489_v28, %v1493_v22  ;;  %v5534_v41 = vcombine.low %v2012_v24, %v2015_v34  ;;  %v499_v42 = vor.u32 %v497_v30, %v6215_v4  ;;  %v502_v43 = vshrl.u32 %v415_v27, 16  ;;  %v369_v5 = vld [vmem:[#allocation2 + $0x44] sm:$0x1] }
  0x58   : > { %v5503_v47 = vcombine.low %v1484_v33, %v1494_v39  ;;  %v2022_v48 = vsel %vm6165_vm13, %v2020_v37, %v2021_v29  ;;  %v505_v49 = vshll.u32 %v415_v27, 16  ;;  %v2494_v50 = vshrl.u32 %v2403_v32, 16 }
  0x59   : > { %2159 = vrot.lane.b32.xlu0 %v5534_v41, %s6033_s28  ;;  %v5535_v53 = vcombine.low %v2019_v35, %v2022_v48  ;;  %v504_v54 = vrot.slane %v502_v43, 7  ;;  %v787_v4 = vsel %vm6129_vm10, %v499_v42, %v786_v38  ;;  %v2497_v56 = vshll.u32 %v2403_v32, 16 }
  0x5a   : > { %1837 = vrot.lane.b32.xlu1 %v5503_v47, %s6035_s30  ;;  %788 = vst [vmem:[#allocation2 + $0x30] sm:$0xf] %v787_v4  ;;  %v2496_v20 = vrot.slane %v2494_v50, 4  ;;  %v2503_v46 = vshll.u32 %v2404_v44, 16  ;;  %v2507_v59 = vshrl.u32 %v2404_v44, 16  ;;  %v2513_v60 = vshll.u32 %v2405_v45, 16 }
  0x5b   : > { %v507_v63 = vor.u32 %v505_v49, %v504_v54  ;;  %v2499_v1 = vrot.slane %v2497_v56, 5  ;;  %v367_v2 = vsel %vm6115_vm6, 0, %v366_v36  ;;  %v509_v6 = vrot.slane %v504_v54, 4 }
  0x5c   : > { %v2505_v7 = vrot.slane %v2503_v46, 5  ;;  %v2509_v8 = vrot.slane %v2507_v59, 4  ;;  %v2515_v9 = vrot.slane %v2513_v60, 5  ;;  %368 = vst [vmem:[#allocation2 + $0x38] sm:$0x1] %v367_v2  ;;  %v5582_v13 = vrot.slane %v2948_v51, 9 }
  0x5d   : > { %2336 = vrot.lane.b32.xlu0 %v5959_v18, %s6032_s27  ;;  %v508_v11 = vsel %vm6121_vm7, %v500_v31, %v507_v63  ;;  %v2500_v12 = vor.u32 %v2499_v1, %v2496_v20  ;;  %v3054_v14 = vrot.slane %v2949_v52, 5  ;;  %v3057_v17 = vrot.slane %v2950_v57, 5 }
  0x5e   : > { %2161 = vrot.lane.b32.xlu1 %v5535_v53, %s6033_s28  ;;  %789 = vst.msk [vmem:[#allocation2 + $0x34] sm:$0xf] %vm286_vm0, %v508_v11  ;;  %v2510_v15 = vor.u32 %v2509_v8, %v2505_v7  ;;  %v314_v19 = vsel %vm6085_vm3, 0, %v313_v58  ;;  %v511_v22 = vshrl.u32 %v416_v55, 16  ;;  %v514_v24 = vshll.u32 %v416_v55, 16 }
  0x5f   : > { %v2501_v23 = vrot.slane %v2500_v12, 4  ;;  %v3056_v62 = vrot.slane %v3054_v14, 4  ;;  %315 = vst [vmem:[#allocation2 + $0x3c] sm:$0x1] %v314_v19  ;;  %v519_v25 = vshrl.u32 %v417_v61, 16  ;;  %v522_v28 = vshll.u32 %v417_v61, 16 }
  0x60   : > { %v2511_v26 = vrot.slane %v2510_v15, 4  ;;  %v513_v27 = vrot.slane %v511_v22, 7  ;;  %v370_v29 = vsel %vm6115_vm6, 0, %v369_v5  ;;  %v3055_v32 = vsel %vm6165_vm13, %v5582_v13, %v3054_v14 }
  0x61   : > { %v2506_v30 = vsel %vm6201_vm14, %v2501_v23, %v2505_v7  ;;  %v2406_v31 = vld [vmem:[#allocation2 + $0x30] sm:$0xf]  ;;  %371 = vst [vmem:[#allocation2 + $0x44] sm:$0x1] %v370_v29  ;;  %v3058_v38 = vsel %vm6165_vm13, %v3056_v62, %v3057_v17  ;;  %v521_v47 = vrot.slane %v519_v25, 7  ;;  %vm990_vm15 = vcmask 31744  }
  0x62   : > { %v6319_v33 = vld [vmem:[#allocation2 + $0x30] sm:$0xe]  ;;  %v2516_v34 = vsel %vm6201_vm14, %v2511_v26, %v2515_v9  ;;  %v2518_v35 = vshrl.u32 %v2406_v31, 16  ;;  %v2521_v37 = vshll.u32 %v2406_v31, 16  ;;  %v517_v42 = vrot.slane %v513_v27, 4 }
  0x63   : > { %v3447_v36 = vld [vmem:[#allocation2 + $0x30] sm:$0xf]  ;;  %v5566_v39 = vcombine.low %v2506_v30, %v2516_v34  ;;  %v790_v41 = vld [vmem:[#allocation2 + $0x38] sm:$0x1]  ;;  %v5583_v18 = vrot.slane %v6319_v33, 9  ;;  %v5598_v50 = vcombine.low %v3055_v32, %v3058_v38  ;;  %v516_v51 = vor.u32 %v514_v24, %v513_v27 }
  0x64   : > { %v791_v43 = vsel %vm6085_vm3, %v509_v6, %v790_v41  ;;  %v2520_v44 = vrot.slane %v2518_v35, 4  ;;  %v2523_v45 = vrot.slane %v2521_v37, 5  ;;  %v3538_v52 = vshrl.u32 %v3447_v36, 16  ;;  %v3992_v46 = vld [vmem:[#allocation2 + $0x30] sm:$0xe] }
  0x65   : > { %v5960_v48 = vld [vmem:[#allocation2 + $0x30] sm:$0xff]   ;;  %2881 = vrot.lane.b32.xlu0 %v5566_v39, %s6038_s9  ;;  %792 = vst [vmem:[#allocation2 + $0x38] sm:$0x1] %v791_v43  ;;  %v524_v57 = vor.u32 %v522_v28, %v521_v47  ;;  %v526_v55 = vrot.slane %v521_v47, 4  ;;  %v3541_v7 = vshll.u32 %v3447_v36, 16  ;;  %v5646_v19 = vrot.slane %v3992_v46, 9 }
  0x66   : > { %v2407_v49 = vld [vmem:[#allocation2 + $0x34] sm:$0xf]  ;;  %v2524_v53 = vor.u32 %v2523_v45, %v2520_v44  ;;  %2338 = vrot.lane.b32.xlu1 %v5960_v48, %s6032_s27  ;;  %v793_v20 = vld [vmem:[#allocation2 + $0x3c] sm:$0xf]  ;;  %v3540_v2 = vrot.slane %v3538_v52, 4  ;;  %vm1879_vm1 = vcmask 64544  }
  0x67   : > { %v2527_v54 = vshll.u32 %v2407_v49, 16  ;;  %v2531_v4 = vshrl.u32 %v2407_v49, 16  ;;  %v2952_v56 = vld [vmem:[#allocation2 + $0x34] sm:$0xf]  ;;  %v525_v63 = vsel %vm6121_vm7, %v517_v42, %v524_v57  ;;  %v794_v6 = vsel %vm6129_vm10, %v516_v51, %v793_v20  ;;  %v1360_v41 = vld [vmem:[#allocation2 + $0x30] sm:$0xf] }
  0x68   : > { %v3061_v58 = vrot.slane %v2952_v56, 5  ;;  %v5961_v61 = vld [vmem:[#allocation2 + $0x30] sm:$0xff]   ;;  %v2525_v5 = vrot.slane %v2524_v53, 4  ;;  %796 = vst.msk [vmem:[#allocation2 + $0x40] sm:$0xf] %vm286_vm0, %v525_v63  ;;  %v3543_v15 = vrot.slane %v3541_v7, 5 }
  0x69   : > { %v2529_v59 = vrot.slane %v2527_v54, 5  ;;  %v2533_v60 = vrot.slane %v2531_v4, 4  ;;  %v3448_v1 = vld [vmem:[#allocation2 + $0x34] sm:$0xf]  ;;  %3202 = vrot.lane.b32.xlu0 %v5598_v50, %s6036_s7  ;;  %v797_v8 = vld [vmem:[#allocation2 + $0x44] sm:$0x1] }
  0x6a   : > { %v3993_v9 = vld [vmem:[#allocation2 + $0x34] sm:$0xf]  ;;  %v3063_v12 = vrot.slane %v3061_v58, 4  ;;  %795 = vst [vmem:[#allocation2 + $0x3c] sm:$0xf] %v794_v6  ;;  %v3547_v13 = vshll.u32 %v3448_v1, 16  ;;  %v798_v17 = vsel %vm6085_vm3, %v526_v55, %v797_v8  ;;  %v3544_v29 = vor.u32 %v3543_v15, %v3540_v2 }
  0x6b   : > { %v2534_v11 = vor.u32 %v2533_v60, %v2529_v59  ;;  %v3551_v14 = vshrl.u32 %v3448_v1, 16  ;;  %v4098_v22 = vrot.slane %v3993_v9, 5  ;;  %799 = vst [vmem:[#allocation2 + $0x44] sm:$0x1] %v798_v17  ;;  %v2530_v31 = vsel %vm6201_vm14, %v2525_v5, %v2529_v59  ;;  %v1361_v4 = vld [vmem:[#allocation2 + $0x34] sm:$0xf] }
  0x6c   : > { %v2408_v23 = vld [vmem:[#allocation2 + $0x38] sm:$0x1]  ;;  %v3549_v25 = vrot.slane %v3547_v13, 5  ;;  %v3062_v32 = vsel %vm6165_vm13, %v5583_v18, %v3061_v58  ;;  %v3545_v36 = vrot.slane %v3544_v29, 4  ;;  %v1496_v46 = vshrl.u32 %v1360_v41, 16 }
  0x6d   : > { %v2535_v62 = vrot.slane %v2534_v11, 4  ;;  %v2953_v24 = vld [vmem:[#allocation2 + $0x38] sm:$0x1]  ;;  %v2537_v26 = vshll.u32 %v2408_v23, 16  ;;  %3380 = vrot.lane.b32.xlu0 %v5961_v61, %s6034_s29  ;;  %v3553_v30 = vrot.slane %v3551_v14, 4  ;;  %v4100_v35 = vrot.slane %v4098_v22, 4 }
  0x6e   : > { %v3064_v27 = vrot.slane %v2953_v24, 5  ;;  %v3449_v28 = vld [vmem:[#allocation2 + $0x38] sm:$0x1]  ;;  %v4099_v44 = vsel %vm6165_vm13, %v5646_v19, %v4098_v22  ;;  %v3550_v48 = vsel %vm6201_vm14, %v3545_v36, %v3549_v25  ;;  %v1498_v7 = vrot.slane %v1496_v46, 4 }
  0x6f   : > { %v3557_v33 = vshll.u32 %v3449_v28, 16  ;;  %v3994_v34 = vld [vmem:[#allocation2 + $0x38] sm:$0x1]  ;;  %v2539_v37 = vrot.slane %v2537_v26, 5  ;;  %v3554_v39 = vor.u32 %v3553_v30, %v3549_v25  ;;  %v3451_v43 = vld [vmem:[#allocation2 + $0x40] sm:$0xf] }
  0x70   : > { %v3065_v38 = vsel %vm6165_vm13, %v3063_v12, %v3064_v27  ;;  %v4101_v45 = vrot.slane %v3994_v34, 5  ;;  %v3571_v54 = vshll.u32 %v3451_v43, 16  ;;  %v3575_v58 = vshrl.u32 %v3451_v43, 16  ;;  %v1362_v20 = vld [vmem:[#allocation2 + $0x38] sm:$0x1] }
  0x71   : > { %v3559_v42 = vrot.slane %v3557_v33, 5  ;;  %v2540_v47 = vsel %vm6201_vm14, %v2535_v62, %v2539_v37  ;;  %v5599_v18 = vcombine.low %v3062_v32, %v3065_v38  ;;  %v3555_v49 = vrot.slane %v3554_v39, 4  ;;  %v3450_v50 = vld [vmem:[#allocation2 + $0x3c] sm:$0xf]  ;;  %v3996_v8 = vld [vmem:[#allocation2 + $0x40] sm:$0xf] }
  0x72   : > { %v5567_v51 = vcombine.low %v2530_v31, %v2540_v47  ;;  %v3562_v52 = vshrl.u32 %v3450_v50, 16  ;;  %v3565_v53 = vshll.u32 %v3450_v50, 16  ;;  %v3452_v57 = vld [vmem:[#allocation2 + $0x44] sm:$0x1]  ;;  %v4102_v55 = vsel %vm6165_vm13, %v4100_v35, %v4101_v45  ;;  %v3995_v1 = vld [vmem:[#allocation2 + $0x3c] sm:$0xe] }
  0x73   : > { %v3560_v56 = vsel %vm6201_vm14, %v3555_v49, %v3559_v42  ;;  %v3573_v63 = vrot.slane %v3571_v54, 5  ;;  %v3577_v2 = vrot.slane %v3575_v58, 4  ;;  %v3581_v5 = vshll.u32 %v3452_v57, 16  ;;  %v3997_v14 = vld [vmem:[#allocation2 + $0x44] sm:$0x1]  ;;  %v5962_v62 = vld [vmem:[#allocation2 + $0x3c] sm:$0xff]  }
  0x74   : > { %2883 = vrot.lane.b32.xlu1 %v5567_v51, %s6038_s9  ;;  %v5630_v59 = vcombine.low %v3550_v48, %v3560_v56  ;;  %v3564_v60 = vrot.slane %v3562_v52, 4  ;;  %v3567_v61 = vrot.slane %v3565_v53, 5  ;;  %v5662_v6 = vcombine.low %v4099_v44, %v4102_v55  ;;  %v1363_v23 = vld [vmem:[#allocation2 + $0x3c] sm:$0xf]  ;;  %v1364_v35 = vld [vmem:[#allocation2 + $0x40] sm:$0xf] }
  0x75   : > { %v1499_v11 = vshll.u32 %v1360_v41, 16  ;;  %v1505_v12 = vshll.u32 %v1361_v4, 16  ;;  %v1509_v13 = vshrl.u32 %v1361_v4, 16  ;;  %v3578_v15 = vor.u32 %v3577_v2, %v3573_v63  ;;  %v1365_v41 = vld [vmem:[#allocation2 + $0x44] sm:$0x1] }
  0x76   : > { %3925 = vrot.lane.b32.xlu0 %v5630_v59, %s6039_s10  ;;  %v3568_v9 = vor.u32 %v3567_v61, %v3564_v60  ;;  %v3583_v17 = vrot.slane %v3581_v5, 5  ;;  %v1515_v19 = vshll.u32 %v1362_v20, 16  ;;  %v5647_v22 = vrot.slane %v3995_v1, 9  ;;  %v1908_v43 = vld [vmem:[#allocation2 + $0x30] sm:$0xe] }
  0x77   : > { %v1501_v25 = vrot.slane %v1499_v11, 5  ;;  %v1507_v26 = vrot.slane %v1505_v12, 5  ;;  %v1511_v27 = vrot.slane %v1509_v13, 4  ;;  %v3579_v28 = vrot.slane %v3578_v15, 4  ;;  %v1909_v48 = vld [vmem:[#allocation2 + $0x34] sm:$0xf] }
  0x78   : > { %3204 = vrot.lane.b32.xlu1 %v5599_v18, %s6036_s7  ;;  %v3569_v24 = vrot.slane %v3568_v9, 4  ;;  %v1517_v29 = vrot.slane %v1515_v19, 5  ;;  %v4105_v30 = vrot.slane %v3996_v8, 5  ;;  %v4108_v31 = vrot.slane %v3997_v14, 5  ;;  %v1910_v53 = vld [vmem:[#allocation2 + $0x38] sm:$0x1] }
  0x79   : > { %v1502_v33 = vor.u32 %v1501_v25, %v1498_v7  ;;  %v1512_v34 = vor.u32 %v1511_v27, %v1507_v26  ;;  %v1520_v37 = vshrl.u32 %v1363_v23, 16  ;;  %v3584_v38 = vsel %vm6201_vm14, %v3579_v28, %v3583_v17  ;;  %v316_v54 = vld [vmem:[#allocation2 + $0x48] sm:$0x1]  ;;  %v1911_v55 = vld [vmem:[#allocation2 + $0x3c] sm:$0xe]  ;;  %v5976_v27 = vld [vmem:[%s8160_s1] sm:$0xff]  }
  0x7a   : > { %v3574_v32 = vsel %vm6201_vm14, %v3569_v24, %v3573_v63  ;;  %4246 = vrot.lane.b32.xlu0 %v5662_v6, %s6037_s8  ;;  %v4106_v36 = vsel %vm6165_vm13, %v5647_v22, %v4105_v30  ;;  %v4107_v39 = vrot.slane %v4105_v30, 4  ;;  %v1523_v42 = vshll.u32 %v1363_v23, 16  ;;  %v1912_v20 = vld [vmem:[#allocation2 + $0x40] sm:$0xf]  ;;  %v1913_v63 = vld [vmem:[#allocation2 + $0x44] sm:$0x1]  ;;  %5898 = vmatprep.subr.bf16.mxu1 %v5976_v27 }
  0x7b   : > { %v5631_v44 = vcombine.low %v3574_v32, %v3584_v38  ;;  %v1503_v45 = vrot.slane %v1502_v33, 4  ;;  %v1513_v47 = vrot.slane %v1512_v34, 4  ;;  %v1522_v18 = vrot.slane %v1520_v37, 4  ;;  %v418_v1 = vld [vmem:[%s6108_s26 + $0x28] sm:$0xf]  ;;  %5899 = vmatpush3.bf16.msra.mxu1 %v5976_v27 }
  0x7c   : > { %3382 = vrot.lane.b32.xlu1 %v5962_v62, %s6034_s29  ;;  %v4109_v49 = vsel %vm6165_vm13, %v4107_v39, %v4108_v31  ;;  %v1525_v50 = vrot.slane %v1523_v42, 5  ;;  %v1529_v51 = vshll.u32 %v1364_v35, 16  ;;  %v1533_v52 = vshrl.u32 %v1364_v35, 16  ;;  %v419_v8 = vld [vmem:[%s6108_s26 + $0x2c] sm:$0xf] }
  0x7d   : > { %v1508_v4 = vsel %vm6201_vm14, %v1503_v45, %v1507_v26  ;;  %v1518_v56 = vsel %vm6201_vm14, %v1513_v47, %v1517_v29  ;;  %v5663_v57 = vcombine.low %v4106_v36, %v4109_v49  ;;  %v1539_v58 = vshll.u32 %v1365_v41, 16  ;;  %v2409_v22 = vld [vmem:[#allocation2 + $0x3c] sm:$0xf]  ;;  %v2410_v23 = vld [vmem:[#allocation2 + $0x40] sm:$0xf] }
  0x7e   : > { %v5504_v46 = vcombine.low %v1508_v4, %v1518_v56  ;;  %v1526_v59 = vor.u32 %v1525_v50, %v1522_v18  ;;  %v1531_v60 = vrot.slane %v1529_v51, 5  ;;  %v1535_v61 = vrot.slane %v1533_v52, 4  ;;  %v2411_v37 = vld [vmem:[#allocation2 + $0x44] sm:$0x1]  ;;  %v372_v38 = vld [vmem:[#allocation2 + $0x50] sm:$0x1] }
  0x7f   : > { %4248 = vrot.lane.b32.xlu0 %v5663_v57, %s6037_s8  ;;  %v1541_v2 = vrot.slane %v1539_v58, 5  ;;  %v5520_v5 = vrot.slane %v1908_v43, 9  ;;  %v2025_v6 = vrot.slane %v1909_v48, 5  ;;  %v2028_v7 = vrot.slane %v1910_v53, 5  ;;  %v2954_v42 = vld [vmem:[#allocation2 + $0x3c] sm:$0xe] }
  0x80   : > { %3927 = vrot.lane.b32.xlu1 %v5631_v44, %s6039_s10  ;;  %v1527_v9 = vrot.slane %v1526_v59, 4  ;;  %v1536_v11 = vor.u32 %v1535_v61, %v1531_v60  ;;  %v5521_v12 = vrot.slane %v1911_v55, 9  ;;  %v2032_v13 = vrot.slane %v1912_v20, 5  ;;  %v5963_v43 = vld [vmem:[#allocation2 + $0x3c] sm:$0xff]   ;;  %v319_v48 = vld [vmem:[#allocation2 + $0x54] sm:$0x1] }
  0x81   : > { %v2026_v14 = vsel %vm6165_vm13, %v5520_v5, %v2025_v6  ;;  %v2027_v15 = vrot.slane %v2025_v6, 4  ;;  %v2035_v17 = vrot.slane %v1913_v63, 5  ;;  %v317_v19 = vsel %vm6085_vm3, 0, %v316_v54  ;;  %v6398_v49 = vld [vmem:[%s6108_s26 + $0x30] sm:$0xf]  ;;  %v5979_v50 = vld [vmem:[%s8160_s1 + $0x8] sm:$0xff]  }
  0x82   : > { %v1532_v62 = vsel %vm6201_vm14, %v1527_v9, %v1531_v60  ;;  %v1537_v24 = vrot.slane %v1536_v11, 4  ;;  %v2033_v25 = vsel %vm6165_vm13, %v5521_v12, %v2032_v13  ;;  %v2034_v26 = vrot.slane %v2032_v13, 4  ;;  %318 = vst [vmem:[#allocation2 + $0x48] sm:$0x1] %v317_v19  ;;  %v2955_v4 = vld [vmem:[#allocation2 + $0x40] sm:$0xf]  ;;  %5900 = vmatprep.subr.bf16.mxu1 %v5979_v50 }
  0x83   : > { %v2029_v28 = vsel %vm6165_vm13, %v2027_v15, %v2028_v7  ;;  %v528_v29 = vshrl.u32 %v418_v1, 16  ;;  %v531_v30 = vshll.u32 %v418_v1, 16  ;;  %v536_v31 = vshrl.u32 %v419_v8, 16  ;;  %v2956_v56 = vld [vmem:[#allocation2 + $0x44] sm:$0x1]  ;;  %5901 = vmatpush3.bf16.msra.mxu1 %v5979_v50 }
  0x84   : > { %1839 = vrot.lane.b32.xlu1 %v5504_v46, %s6035_s30  ;;  %v1542_v32 = vsel %vm6201_vm14, %v1537_v24, %v1541_v2  ;;  %v5536_v33 = vcombine.low %v2026_v14, %v2029_v28  ;;  %v2036_v34 = vsel %vm6165_vm13, %v2034_v26, %v2035_v17  ;;  %v539_v35 = vshll.u32 %v419_v8, 16  ;;  %v421_v46 = vld [vmem:[%s6108_s26 + $0x34] sm:$0xf]  ;;  %v375_v8 = vld [vmem:[#allocation2 + $0x5c] sm:$0x1] }
  0x85   : > { %v5505_v36 = vcombine.low %v1532_v62, %v1542_v32  ;;  %v530_v39 = vrot.slane %v528_v29, 7  ;;  %v6394_v41 = vrot.slane %v536_v31, 7  ;;  %v2542_v44 = vshrl.u32 %v2409_v22, 16  ;;  %v322_v14 = vld [vmem:[#allocation2 + $0x60] sm:$0x1] }
  0x86   : > { %2163 = vrot.lane.b32.xlu0 %v5536_v33, %s6033_s28  ;;  %v2545_v45 = vshll.u32 %v2409_v22, 16  ;;  %v2551_v47 = vshll.u32 %v2410_v23, 16  ;;  %v2555_v18 = vshrl.u32 %v2410_v23, 16  ;;  %v5537_v51 = vcombine.low %v2033_v25, %v2036_v34  ;;  %v6419_v15 = vld [vmem:[%s6108_s26 + $0x38] sm:$0xf] }
  0x87   : > { %v533_v52 = vor.u32 %v531_v30, %v530_v39  ;;  %v534_v53 = vrot.slane %v530_v39, 4  ;;  %v541_v54 = vor.u32 %v539_v35, %v6394_v41  ;;  %v2544_v57 = vrot.slane %v2542_v44, 4 }
  0x88   : > { %1841 = vrot.lane.b32.xlu1 %v5505_v36, %s6035_s30  ;;  %v2547_v58 = vrot.slane %v2545_v45, 5  ;;  %v2553_v55 = vrot.slane %v2551_v47, 5  ;;  %v2557_v20 = vrot.slane %v2555_v18, 4  ;;  %v2561_v61 = vshll.u32 %v2411_v37, 16 }
  0x89   : > { %v542_v59 = vsel %vm6121_vm7, %v534_v53, %v541_v54  ;;  %v800_v60 = vld [vmem:[#allocation2 + $0x48] sm:$0xf]  ;;  %v373_v63 = vsel %vm6115_vm6, 0, %v372_v38  ;;  %v5584_v1 = vrot.slane %v2954_v42, 9  ;;  %v3068_v7 = vrot.slane %v2955_v4, 5 }
  0x8a   : > { %2340 = vrot.lane.b32.xlu0 %v5963_v43, %s6032_s27  ;;  %v801_v2 = vsel %vm6129_vm10, %v533_v52, %v800_v60  ;;  %803 = vst.msk [vmem:[#allocation2 + $0x4c] sm:$0xf] %vm286_vm0, %v542_v59  ;;  %v2548_v5 = vor.u32 %v2547_v58, %v2544_v57  ;;  %v2558_v6 = vor.u32 %v2557_v20, %v2553_v55  ;;  %374 = vst [vmem:[#allocation2 + $0x50] sm:$0x1] %v373_v63  ;;  %vm8167_vm2 = vcmask 97344  }
  0x8b   : > { %802 = vst [vmem:[#allocation2 + $0x48] sm:$0xf] %v801_v2  ;;  %v2563_v9 = vrot.slane %v2561_v61, 5  ;;  %v3071_v11 = vrot.slane %v2956_v56, 5  ;;  %v320_v12 = vsel %vm6085_vm3, 0, %v319_v48  ;;  %v545_v13 = vshrl.u32 %v6398_v49, 16 }
  0x8c   : > { %2165 = vrot.lane.b32.xlu1 %v5537_v51, %s6033_s28  ;;  %v543_v17 = vrot.slane %v6394_v41, 4  ;;  %v2549_v19 = vrot.slane %v2548_v5, 4  ;;  %v2559_v22 = vrot.slane %v2558_v6, 4  ;;  %v3070_v23 = vrot.slane %v3068_v7, 4  ;;  %321 = vst [vmem:[#allocation2 + $0x54] sm:$0x1] %v320_v12 }
  0x8d   : > { %v3069_v62 = vsel %vm6165_vm13, %v5584_v1, %v3068_v7  ;;  %v547_v24 = vrot.slane %v545_v13, 7  ;;  %v553_v25 = vshrl.u32 %v421_v46, 16  ;;  %v556_v26 = vshll.u32 %v421_v46, 16 }
  0x8e   : > { %v2554_v27 = vsel %vm6201_vm14, %v2549_v19, %v2553_v55  ;;  %v2564_v28 = vsel %vm6201_vm14, %v2559_v22, %v2563_v9  ;;  %v3072_v29 = vsel %vm6165_vm13, %v3070_v23, %v3071_v11  ;;  %v376_v30 = vsel %vm6115_vm6, 0, %v375_v8 }
  0x8f   : > { %v5568_v31 = vcombine.low %v2554_v27, %v2564_v28  ;;  %v548_v32 = vshll.u32 %v6398_v49, 16  ;;  %377 = vst [vmem:[#allocation2 + $0x5c] sm:$0x1] %v376_v30  ;;  %v551_v33 = vrot.slane %v547_v24, 4  ;;  %v555_v34 = vrot.slane %v553_v25, 7 }
  0x90   : > { %v323_v35 = vsel %vm6085_vm3, 0, %v322_v14  ;;  %v562_v37 = vshrl.u32 %v6419_v15, 16  ;;  %v5600_v39 = vcombine.low %v3069_v62, %v3072_v29  ;;  %v565_v50 = vshll.u32 %v6419_v15, 16 }
  0x91   : > { %2885 = vrot.lane.b32.xlu0 %v5568_v31, %s6038_s9  ;;  %v804_v38 = vld [vmem:[#allocation2 + $0x50] sm:$0x1]  ;;  %v2413_v36 = vld [vmem:[#allocation2 + $0x4c] sm:$0xf]  ;;  %324 = vst [vmem:[#allocation2 + $0x60] sm:$0x1] %v323_v35  ;;  %v558_v45 = vor.u32 %v556_v26, %v555_v34  ;;  %v550_v54 = vor.u32 %v548_v32, %v547_v24 }
  0x92   : > { %v5964_v41 = vld [vmem:[#allocation2 + $0x48] sm:$0xff]   ;;  %v805_v42 = vsel %vm6085_vm3, %v543_v17, %v804_v38  ;;  %v2575_v44 = vshll.u32 %v2413_v36, 16  ;;  %v2579_v48 = vshrl.u32 %v2413_v36, 16  ;;  %v560_v46 = vrot.slane %v555_v34, 4 }
  0x93   : > { %v2412_v43 = vld [vmem:[#allocation2 + $0x48] sm:$0xf]  ;;  %806 = vst [vmem:[#allocation2 + $0x50] sm:$0x1] %v805_v42  ;;  %2342 = vrot.lane.b32.xlu1 %v5964_v41, %s6032_s27  ;;  %v2958_v52 = vld [vmem:[#allocation2 + $0x4c] sm:$0xf]  ;;  %v559_v4 = vsel %vm6121_vm7, %v551_v33, %v558_v45 }
  0x94   : > { %v2566_v47 = vshrl.u32 %v2412_v43, 16  ;;  %v2569_v18 = vshll.u32 %v2412_v43, 16  ;;  %v2957_v49 = vld [vmem:[#allocation2 + $0x48] sm:$0xe]  ;;  %v6441_v51 = vrot.slane %v2575_v44, 5  ;;  %v2581_v58 = vrot.slane %v2579_v48, 4 }
  0x95   : > { %v5965_v53 = vld [vmem:[#allocation2 + $0x48] sm:$0xff]   ;;  %3206 = vrot.lane.b32.xlu0 %v5600_v39, %s6036_s7  ;;  %v3075_v55 = vrot.slane %v2958_v52, 5  ;;  %810 = vst.msk [vmem:[#allocation2 + $0x58] sm:$0xf] %vm286_vm0, %v559_v4  ;;  %v5585_v20 = vrot.slane %v2957_v49, 9  ;;  %v6448_v6 = vrot.slane %v562_v37, 7 }
  0x96   : > { %v2568_v56 = vrot.slane %v2566_v47, 4  ;;  %v2571_v57 = vrot.slane %v2569_v18, 5  ;;  %v807_v59 = vld [vmem:[#allocation2 + $0x54] sm:$0xf]  ;;  %v3453_v60 = vld [vmem:[#allocation2 + $0x48] sm:$0xf]  ;;  %v2582_v63 = vor.u32 %v2581_v58, %v6441_v51 }
  0x97   : > { %v3077_v1 = vrot.slane %v3075_v55, 4  ;;  %v3454_v2 = vld [vmem:[#allocation2 + $0x4c] sm:$0xf]  ;;  %v811_v5 = vld [vmem:[#allocation2 + $0x5c] sm:$0x1]  ;;  %v808_v8 = vsel %vm6129_vm10, %v550_v54, %v807_v59  ;;  %v3586_v9 = vshrl.u32 %v3453_v60, 16  ;;  %v6459_v24 = vsel %vm6165_vm13, %v5585_v20, %v3075_v55 }
  0x98   : > { %v2572_v61 = vor.u32 %v2571_v57, %v2568_v56  ;;  %v6450_v7 = vpop.permute.xlu0 %2332  ;;  %v3589_v11 = vshll.u32 %v3453_v60, 16  ;;  %v3595_v12 = vshll.u32 %v3454_v2, 16  ;;  %809 = vst [vmem:[#allocation2 + $0x54] sm:$0xf] %v808_v8  ;;  %v3599_v14 = vshrl.u32 %v3454_v2, 16 }
  0x99   : > { %3384 = vrot.lane.b32.xlu0 %v5965_v53, %s6034_s29  ;;  %v812_v17 = vsel %vm6085_vm3, %v560_v46, %v811_v5  ;;  %v3998_v19 = vld [vmem:[#allocation2 + $0x48] sm:$0xe]  ;;  %v3999_v22 = vld [vmem:[#allocation2 + $0x4c] sm:$0xf]  ;;  %v2583_v26 = vrot.slane %v2582_v63, 4  ;;  %v3588_v29 = vrot.slane %v3586_v9, 4 }
  0x9a   : > { %v2573_v13 = vrot.slane %v2572_v61, 4  ;;  %v2414_v23 = vld [vmem:[#allocation2 + $0x50] sm:$0x1]  ;;  %813 = vst [vmem:[#allocation2 + $0x5c] sm:$0x1] %v812_v17  ;;  %v3591_v31 = vrot.slane %v3589_v11, 5 }
  0x9b   : > { %v2959_v62 = vld [vmem:[#allocation2 + $0x50] sm:$0x1]  ;;  %v2585_v27 = vshll.u32 %v2414_v23, 16  ;;  %v3597_v32 = vrot.slane %v3595_v12, 5  ;;  %v3601_v33 = vrot.slane %v3599_v14, 4  ;;  %v5648_v36 = vrot.slane %v3998_v19, 9 }
  0x9c   : > { %v3455_v25 = vld [vmem:[#allocation2 + $0x50] sm:$0x1]  ;;  %v3078_v28 = vrot.slane %v2959_v62, 5  ;;  %v6461_v30 = vpop.permute.xlu1 %2155  ;;  %v2578_v35 = vsel %vm6201_vm14, %v2573_v13, %v6441_v51  ;;  %v3457_v38 = vld [vmem:[#allocation2 + $0x58] sm:$0xf]  ;;  %v4112_v39 = vrot.slane %v3999_v22, 5  ;;  %v6466_v41 = vpop.permute.xlu0 %3376  ;;  %v3592_v43 = vor.u32 %v3591_v31, %v3588_v29 }
  0x9d   : > { %v3605_v34 = vshll.u32 %v3455_v25, 16  ;;  %v2587_v37 = vrot.slane %v2585_v27, 5  ;;  %v3602_v44 = vor.u32 %v3601_v33, %v3597_v32  ;;  %v3619_v18 = vshll.u32 %v3457_v38, 16  ;;  %v4000_v49 = vld [vmem:[#allocation2 + $0x50] sm:$0x1] }
  0x9e   : > { %v3079_v42 = vsel %vm6165_vm13, %v3077_v1, %v3078_v28  ;;  %v3623_v48 = vshrl.u32 %v3457_v38, 16  ;;  %v1366_v52 = vld [vmem:[#allocation2 + $0x48] sm:$0xf]  ;;  %v6475_v51 = vor.u32 %v565_v50, %v6448_v6  ;;  %v3593_v54 = vrot.slane %v3592_v43, 4  ;;  %v1367_v1 = vld [vmem:[#allocation2 + $0x4c] sm:$0xf] }
  0x9f   : > { %v3607_v45 = vrot.slane %v3605_v34, 5  ;;  %v2588_v47 = vsel %vm6201_vm14, %v2583_v26, %v2587_v37  ;;  %v3603_v4 = vrot.slane %v3602_v44, 4  ;;  %v4114_v56 = vrot.slane %v4112_v39, 4  ;;  %v3456_v58 = vld [vmem:[#allocation2 + $0x54] sm:$0xf] }
  0xa0   : > { %v5569_v53 = vcombine.low %v2578_v35, %v2588_v47  ;;  %v5601_v57 = vcombine.low %v6459_v24, %v3079_v42  ;;  %v3621_v20 = vrot.slane %v3619_v18, 5  ;;  %v3625_v46 = vrot.slane %v3623_v48, 4  ;;  %v6480_v60 = vpop.permute.xlu1 %2334  ;;  %v1368_v11 = vld [vmem:[#allocation2 + $0x50] sm:$0x1]  ;;  %v4002_v22 = vld [vmem:[#allocation2 + $0x58] sm:$0xf] }
  0xa1   : > { %v3458_v55 = vld [vmem:[#allocation2 + $0x5c] sm:$0x1]  ;;  %v4113_v59 = vsel %vm6165_vm13, %v5648_v36, %v4112_v39  ;;  %v3598_v15 = vsel %vm6201_vm14, %v3593_v54, %v3597_v32  ;;  %v3608_v50 = vsel %vm6201_vm14, %v3603_v4, %v3607_v45  ;;  %v3610_v61 = vshrl.u32 %v3456_v58, 16  ;;  %v5966_v23 = vld [vmem:[#allocation2 + $0x54] sm:$0xff]  }
  0xa2   : > { %2887 = vrot.lane.b32.xlu1 %v5569_v53, %s6038_s9  ;;  %v3613_v63 = vshll.u32 %v3456_v58, 16  ;;  %v5632_v2 = vcombine.low %v3598_v15, %v3608_v50  ;;  %v3626_v5 = vor.u32 %v3625_v46, %v3621_v20  ;;  %v3629_v8 = vshll.u32 %v3458_v55, 16  ;;  %v4001_v27 = vld [vmem:[#allocation2 + $0x54] sm:$0xe]  ;;  %v4003_v33 = vld [vmem:[#allocation2 + $0x5c] sm:$0x1] }
  0xa3   : > { %v4115_v9 = vrot.slane %v4000_v49, 5  ;;  %v6487_v12 = vpop.permute.xlu0 %1831  ;;  %v3612_v13 = vrot.slane %v3610_v61, 4  ;;  %v1544_v17 = vshrl.u32 %v1366_v52, 16  ;;  %v1547_v19 = vshll.u32 %v1366_v52, 16  ;;  %v1369_v34 = vld [vmem:[#allocation2 + $0x54] sm:$0xf] }
  0xa4   : > { %v3615_v14 = vrot.slane %v3613_v63, 5  ;;  %3929 = vrot.lane.b32.xlu0 %v5632_v2, %s6039_s10  ;;  %v3627_v62 = vrot.slane %v3626_v5, 4  ;;  %v3631_v24 = vrot.slane %v3629_v8, 5  ;;  %v1553_v26 = vshll.u32 %v1367_v1, 16  ;;  %v6495_v39 = vpop.permute.xlu1 %3378  ;;  %v1370_v47 = vld [vmem:[#allocation2 + $0x58] sm:$0xf] }
  0xa5   : > { %v4116_v25 = vsel %vm6165_vm13, %v4114_v56, %v4115_v9  ;;  %v1546_v31 = vrot.slane %v1544_v17, 4  ;;  %v1549_v32 = vrot.slane %v1547_v19, 5  ;;  %v1557_v38 = vshrl.u32 %v1367_v1, 16  ;;  %v1371_v52 = vld [vmem:[#allocation2 + $0x5c] sm:$0x1] }
  0xa6   : > { %3208 = vrot.lane.b32.xlu1 %v5601_v57, %s6036_s7  ;;  %v3616_v28 = vor.u32 %v3615_v14, %v3612_v13  ;;  %v5664_v29 = vcombine.low %v4113_v59, %v4116_v25  ;;  %v3632_v35 = vsel %vm6201_vm14, %v3627_v62, %v3631_v24  ;;  %v1555_v37 = vrot.slane %v1553_v26, 5  ;;  %v1914_v50 = vld [vmem:[#allocation2 + $0x48] sm:$0xe]  ;;  %v1915_v61 = vld [vmem:[#allocation2 + $0x4c] sm:$0xf] }
  0xa7   : > { %v1563_v36 = vshll.u32 %v1368_v11, 16  ;;  %v1550_v43 = vor.u32 %v1549_v32, %v1546_v31  ;;  %v5649_v44 = vrot.slane %v4001_v27, 9  ;;  %v4119_v45 = vrot.slane %v4002_v22, 5  ;;  %v1917_v8 = vld [vmem:[#allocation2 + $0x54] sm:$0xe] }
  0xa8   : > { %v3617_v42 = vrot.slane %v3616_v28, 4  ;;  %4250 = vrot.lane.b32.xlu0 %v5664_v29, %s6037_s8  ;;  %v1559_v18 = vrot.slane %v1557_v38, 4  ;;  %v4122_v49 = vrot.slane %v4003_v33, 5  ;;  %v1568_v53 = vshrl.u32 %v1369_v34, 16  ;;  %v1918_v17 = vld [vmem:[#allocation2 + $0x58] sm:$0xf] }
  0xa9   : > { %v1565_v48 = vrot.slane %v1563_v36, 5  ;;  %v1551_v56 = vrot.slane %v1550_v43, 4  ;;  %v4120_v57 = vsel %vm6165_vm13, %v5649_v44, %v4119_v45  ;;  %v4121_v58 = vrot.slane %v4119_v45, 4  ;;  %v1919_v25 = vld [vmem:[#allocation2 + $0x5c] sm:$0x1] }
  0xaa   : > { %v6498_v54 = vpop.permute.xlu0 %3198  ;;  %3386 = vrot.lane.b32.xlu1 %v5966_v23, %s6034_s29  ;;  %v3622_v4 = vsel %vm6201_vm14, %v3617_v42, %v3621_v20  ;;  %v1560_v46 = vor.u32 %v1559_v18, %v1555_v37  ;;  %v1570_v59 = vrot.slane %v1568_v53, 4  ;;  %v1571_v15 = vshll.u32 %v1369_v34, 16  ;;  %v1916_v20 = vld [vmem:[#allocation2 + $0x50] sm:$0x1]  ;;  %v423_v32 = vld [vmem:[%s6108_s26 + $0x3c] sm:$0xf] }
  0xab   : > { %v5633_v55 = vcombine.low %v3622_v4, %v3632_v35  ;;  %v1556_v63 = vsel %vm6201_vm14, %v1551_v56, %v1555_v37  ;;  %v4123_v1 = vsel %vm6165_vm13, %v4121_v58, %v4122_v49  ;;  %v1577_v2 = vshll.u32 %v1370_v47, 16  ;;  %v6509_v19 = vpop.permute.xlu1 %2157  ;;  %v814_v44 = vld [vmem:[#allocation2 + $0x60] sm:$0xf]  ;;  %v2415_v49 = vld [vmem:[#allocation2 + $0x54] sm:$0xf] }
  0xac   : > { %v1581_v5 = vshrl.u32 %v1370_v47, 16  ;;  %v1561_v9 = vrot.slane %v1560_v46, 4  ;;  %v5665_v11 = vcombine.low %v4120_v57, %v4123_v1  ;;  %v1573_v13 = vrot.slane %v1571_v15, 5  ;;  %v5967_v57 = vld [vmem:[#allocation2 + $0x54] sm:$0xff]   ;;  %v378_v46 = vld [vmem:[#allocation2 + $0x68] sm:$0x1] }
  0xad   : > { %v1587_v14 = vshll.u32 %v1371_v52, 16  ;;  %v1579_v22 = vrot.slane %v1577_v2, 5  ;;  %v5522_v62 = vrot.slane %v1914_v50, 9  ;;  %v2039_v24 = vrot.slane %v1915_v61, 5  ;;  %v2416_v58 = vld [vmem:[#allocation2 + $0x58] sm:$0xf] }
  0xae   : > { %3931 = vrot.lane.b32.xlu1 %v5633_v55, %s6039_s10  ;;  %v1583_v23 = vrot.slane %v1581_v5, 4  ;;  %v6512_v26 = vpop.permute.xlu0 %4242  ;;  %v1566_v27 = vsel %vm6201_vm14, %v1561_v9, %v1565_v48  ;;  %4252 = vrot.lane.b32.xlu0 %v5665_v11, %s6037_s8  ;;  %v1574_v28 = vor.u32 %v1573_v13, %v1570_v59  ;;  %v2042_v31 = vrot.slane %v1916_v20, 5  ;;  %v2417_v55 = vld [vmem:[#allocation2 + $0x5c] sm:$0x1]  ;;  %v2961_v9 = vld [vmem:[#allocation2 + $0x58] sm:$0xf] }
  0xaf   : > { %v1589_v29 = vrot.slane %v1587_v14, 5  ;;  %v5506_v33 = vcombine.low %v1556_v63, %v1566_v27  ;;  %v2040_v35 = vsel %vm6165_vm13, %v5522_v62, %v2039_v24  ;;  %v2041_v37 = vrot.slane %v2039_v24, 4  ;;  %v6528_v59 = vpop.permute.xlu1 %3200  ;;  %v2960_v63 = vld [vmem:[#allocation2 + $0x54] sm:$0xe]  ;;  %v325_v11 = vld [vmem:[#allocation2 + $0x6c] sm:$0x1] }
  0xb0   : > { %v1584_v34 = vor.u32 %v1583_v23, %v1579_v22  ;;  %v1575_v38 = vrot.slane %v1574_v28, 4  ;;  %v5523_v36 = vrot.slane %v1917_v8, 9  ;;  %v2046_v42 = vrot.slane %v1918_v17, 5  ;;  %v424_v13 = vld [vmem:[%s6108_s26 + $0x40] sm:$0xf] }
  0xb1   : > { %v2049_v43 = vrot.slane %v1919_v25, 5  ;;  %v2043_v47 = vsel %vm6165_vm13, %v2041_v37, %v2042_v31  ;;  %v568_v18 = vrot.slane %v6448_v6, 4  ;;  %v570_v48 = vshrl.u32 %v423_v32, 16 }
  0xb2   : > { %1843 = vrot.lane.b32.xlu1 %v5506_v33, %s6035_s30  ;;  %v1585_v45 = vrot.slane %v1584_v34, 4  ;;  %v1580_v52 = vsel %vm6201_vm14, %v1575_v38, %v1579_v22  ;;  %v5538_v53 = vcombine.low %v2040_v35, %v2043_v47  ;;  %v2047_v4 = vsel %vm6165_vm13, %v5523_v36, %v2046_v42  ;;  %v6537_v1 = vpop.permute.xlu0 %4244  ;;  %v425_v35 = vld [vmem:[%s6108_s26 + $0x44] sm:$0xf] }
  0xb3   : > { %v2048_v56 = vrot.slane %v2046_v42, 4  ;;  %v6532_v15 = vrot.slane %v570_v48, 7  ;;  %v573_v50 = vshll.u32 %v423_v32, 16  ;;  %v815_v61 = vsel %vm6129_vm10, %v6475_v51, %v814_v44  ;;  %v2962_v51 = vld [vmem:[#allocation2 + $0x5c] sm:$0x1]  ;;  %v6552_v37 = vpop.permute.xlu1 %2879 }
  0xb4   : > { %v1590_v6 = vsel %vm6201_vm14, %v1585_v45, %v1589_v29  ;;  %2167 = vrot.lane.b32.xlu0 %v5538_v53, %s6033_s28  ;;  %816 = vst [vmem:[#allocation2 + $0x60] sm:$0xf] %v815_v61  ;;  %v2590_v20 = vshrl.u32 %v2415_v49, 16  ;;  %v2593_v8 = vshll.u32 %v2415_v49, 16  ;;  %v2599_v22 = vshll.u32 %v2416_v58, 16 }
  0xb5   : > { %v5507_v2 = vcombine.low %v1580_v52, %v1590_v6  ;;  %v2050_v5 = vsel %vm6165_vm13, %v2048_v56, %v2049_v43  ;;  %v575_v17 = vor.u32 %v573_v50, %v6532_v15  ;;  %v2603_v24 = vshrl.u32 %v2416_v58, 16 }
  0xb6   : > { %v5539_v14 = vcombine.low %v2047_v4, %v2050_v5  ;;  %v2592_v23 = vrot.slane %v2590_v20, 4  ;;  %v2595_v62 = vrot.slane %v2593_v8, 5  ;;  %v2609_v25 = vshll.u32 %v2417_v55, 16  ;;  %v6556_v44 = vpop.permute.xlu0 %1833 }
  0xb7   : > { %1845 = vrot.lane.b32.xlu1 %v5507_v2, %s6035_s30  ;;  %v576_v27 = vsel %vm6121_vm7, %v568_v18, %v575_v17  ;;  %v2601_v28 = vrot.slane %v2599_v22, 5  ;;  %v379_v29 = vsel %vm6115_vm6, 0, %v378_v46  ;;  %v2605_v32 = vrot.slane %v2603_v24, 4 }
  0xb8   : > { %2344 = vrot.lane.b32.xlu0 %v5967_v57, %s6032_s27  ;;  %817 = vst.msk [vmem:[#allocation2 + $0x64] sm:$0xf] %vm286_vm0, %v576_v27  ;;  %v2596_v31 = vor.u32 %v2595_v62, %v2592_v23  ;;  %380 = vst [vmem:[#allocation2 + $0x68] sm:$0x1] %v379_v29  ;;  %v5586_v33 = vrot.slane %v2960_v63, 9  ;;  %v3082_v34 = vrot.slane %v2961_v9, 5 }
  0xb9   : > { %v2611_v38 = vrot.slane %v2609_v25, 5  ;;  %v3085_v36 = vrot.slane %v2962_v51, 5  ;;  %v326_v42 = vsel %vm6085_vm3, 0, %v325_v11  ;;  %v579_v43 = vshrl.u32 %v424_v13, 16 }
  0xba   : > { %v2597_v45 = vrot.slane %v2596_v31, 4  ;;  %v2606_v47 = vor.u32 %v2605_v32, %v2601_v28  ;;  %v3084_v18 = vrot.slane %v3082_v34, 4  ;;  %327 = vst [vmem:[#allocation2 + $0x6c] sm:$0x1] %v326_v42  ;;  %v577_v48 = vrot.slane %v6532_v15, 4 }
  0xbb   : > { %2169 = vrot.lane.b32.xlu1 %v5539_v14, %s6033_s28  ;;  %v2418_v49 = vld [vmem:[#allocation2 + $0x60] sm:$0xf]  ;;  %v582_v52 = vshll.u32 %v424_v13, 16  ;;  %v3083_v58 = vsel %vm6165_vm13, %v5586_v33, %v3082_v34  ;;  %v581_v46 = vrot.slane %v579_v43, 7  ;;  %v587_v6 = vshrl.u32 %v425_v35, 16 }
  0xbc   : > { %v2602_v53 = vsel %vm6201_vm14, %v2597_v45, %v2601_v28  ;;  %v2607_v4 = vrot.slane %v2606_v47, 4  ;;  %v2614_v56 = vshrl.u32 %v2418_v49, 16  ;;  %v2617_v57 = vshll.u32 %v2418_v49, 16  ;;  %v6568_v63 = vld [vmem:[#allocation2 + $0x60] sm:$0xe]  ;;  %v6570_v2 = vpop.permute.xlu1 %3923  ;;  %v5974_v45 = vld [vmem:[#allocation2 + $0xc] sm:$0xff]  }
  0xbd   : > { %v3086_v55 = vsel %vm6165_vm13, %v3084_v18, %v3085_v36  ;;  %v584_v51 = vor.u32 %v582_v52, %v581_v46  ;;  %v6578_v25 = vrot.slane %v587_v6, 7  ;;  %v3459_v27 = vld [vmem:[#allocation2 + $0x60] sm:$0xf]  ;;  %v381_v28 = vld [vmem:[#allocation2 + $0x74] sm:$0x1]  ;;  %v585_v29 = vrot.slane %v581_v46, 4 }
  0xbe   : > { %v2612_v50 = vsel %vm6201_vm14, %v2607_v4, %v2611_v38  ;;  %v2616_v15 = vrot.slane %v2614_v56, 4  ;;  %v2619_v61 = vrot.slane %v2617_v57, 5  ;;  %v5602_v17 = vcombine.low %v3083_v58, %v3086_v55  ;;  %v5971_v34 = vld [vmem:[#allocation2] sm:$0xff]   ;;  %v5975_v47 = vld [vmem:[#allocation2 + $0x18] sm:$0xff]   ;;  %v5984_v4 = vld [vmem:[#allocation2 + $0x30] sm:$0xff]   ;;  %1333 = vst.msk [vmem:[#allocation3 + $0x8] sm:$0xff] %vm990_vm15, %v5974_v45 }
  0xbf   : > { %v5968_v5 = vld [vmem:[#allocation2 + $0x60] sm:$0xff]   ;;  %v5570_v20 = vcombine.low %v2602_v53, %v2612_v50  ;;  %v818_v8 = vld [vmem:[#allocation2 + $0x68] sm:$0x1]  ;;  %v590_v31 = vshll.u32 %v425_v35, 16  ;;  %v5587_v43 = vrot.slane %v6568_v63, 9  ;;  %v3634_v52 = vshrl.u32 %v3459_v27, 16 }
  0xc0   : > { %v6572_v9 = vpop.permute.xlu0 %2877  ;;  %v819_v11 = vsel %vm6085_vm3, %v577_v48, %v818_v8  ;;  %v2419_v13 = vld [vmem:[#allocation2 + $0x64] sm:$0xf]  ;;  %v2620_v14 = vor.u32 %v2619_v61, %v2616_v15  ;;  %2346 = vrot.lane.b32.xlu1 %v5968_v5, %s6032_s27  ;;  %v5985_v56 = vld [vmem:[#allocation2 + $0x3c] sm:$0xff]   ;;  %v594_v55 = vrot.slane %v6578_v25, 4  ;;  %v3637_v46 = vshll.u32 %v3459_v27, 16  ;;  %1332 = vst.msk [vmem:[#allocation3] sm:$0xff] %vm990_vm15, %v5971_v34 }
  0xc1   : > { %v2964_v22 = vld [vmem:[#allocation2 + $0x64] sm:$0xf]  ;;  %2889 = vrot.lane.b32.xlu0 %v5570_v20, %s6038_s9  ;;  %820 = vst [vmem:[#allocation2 + $0x68] sm:$0x1] %v819_v11  ;;  %v2623_v23 = vshll.u32 %v2419_v13, 16  ;;  %v2627_v62 = vshrl.u32 %v2419_v13, 16  ;;  %v592_v48 = vor.u32 %v590_v31, %v6578_v25 }
  0xc2   : > { %v3089_v24 = vrot.slane %v2964_v22, 5  ;;  %v821_v32 = vld [vmem:[#allocation2 + $0x6c] sm:$0xf]  ;;  %v3460_v33 = vld [vmem:[#allocation2 + $0x64] sm:$0xf]  ;;  %v6580_v38 = vrot.slane %v2620_v14, 4 }
  0xc3   : > { %v6582_v36 = vrot.slane %v2623_v23, 5  ;;  %v2629_v42 = vrot.slane %v2627_v62, 4  ;;  %v822_v49 = vsel %vm6129_vm10, %v584_v51, %v821_v32  ;;  %v5977_v53 = vld [vmem:[#allocation2 + $0x24] sm:$0xff]   ;;  %v3643_v6 = vshll.u32 %v3460_v33, 16  ;;  %v4004_v50 = vld [vmem:[#allocation2 + $0x60] sm:$0xe] }
  0xc4   : > { %v3091_v18 = vrot.slane %v3089_v24, 4  ;;  %v1836_v35 = vpop.permute.xlu1 %1835  ;;  %v5969_v58 = vld [vmem:[#allocation2 + $0x60] sm:$0xff]   ;;  %823 = vst [vmem:[#allocation2 + $0x6c] sm:$0xf] %v822_v49  ;;  %v593_v61 = vsel %vm6121_vm7, %v585_v29, %v592_v48  ;;  %v3636_v63 = vrot.slane %v3634_v52, 4  ;;  %v3647_v5 = vshrl.u32 %v3460_v33, 16 }
  0xc5   : > { %v2630_v57 = vor.u32 %v2629_v42, %v6582_v36  ;;  %3210 = vrot.lane.b32.xlu0 %v5602_v17, %s6036_s7  ;;  %v382_v20 = vsel %vm6115_vm6, 0, %v381_v28  ;;  %824 = vst.msk [vmem:[#allocation2 + $0x70] sm:$0xf] %vm286_vm0, %v593_v61  ;;  %v3639_v11 = vrot.slane %v3637_v46, 5  ;;  %v3645_v13 = vrot.slane %v3643_v6, 5 }
  0xc6   : > { %383 = vst [vmem:[#allocation2 + $0x74] sm:$0x1] %v382_v20  ;;  %v2626_v17 = vsel %vm6201_vm14, %v6580_v38, %v6582_v36  ;;  %v6604_v51 = vsel %vm6165_vm13, %v5587_v43, %v3089_v24  ;;  %1334 = vst.msk [vmem:[#allocation3 + $0x10] sm:$0xff] %vm990_vm15, %v5975_v47  ;;  %v3649_v24 = vrot.slane %v3647_v5, 4  ;;  %v4005_v29 = vld [vmem:[#allocation2 + $0x64] sm:$0xf] }
  0xc7   : > { %v6591_v15 = vpop.permute.xlu0 %3921  ;;  %v2631_v8 = vrot.slane %v2630_v57, 4  ;;  %1335 = vst.msk [vmem:[#allocation3 + $0x18] sm:$0xff] %vm990_vm15, %v5977_v53  ;;  %1336 = vst.msk [vmem:[#allocation3 + $0x20] sm:$0xff] %vm990_vm15, %v5984_v4  ;;  %v3640_v28 = vor.u32 %v3639_v11, %v3636_v63  ;;  %v5650_v33 = vrot.slane %v4004_v50, 9  ;;  %v4126_v48 = vrot.slane %v4005_v29, 5 }
  0xc8   : > { %v2420_v14 = vld [vmem:[#allocation2 + $0x68] sm:$0x1]  ;;  %1337 = vst.msk [vmem:[#allocation3 + $0x28] sm:$0xff] %vm990_vm15, %v5985_v56  ;;  %v3650_v43 = vor.u32 %v3649_v24, %v3645_v13  ;;  %v1372_v49 = vld [vmem:[#allocation2 + $0x60] sm:$0xf]  ;;  %vm2380_vm4 = vcmask 130144  }
  0xc9   : > { %v2965_v22 = vld [vmem:[#allocation2 + $0x68] sm:$0x1]  ;;  %v2633_v62 = vshll.u32 %v2420_v14, 16  ;;  %3388 = vrot.lane.b32.xlu0 %v5969_v58, %s6034_s29  ;;  %v3641_v42 = vrot.slane %v3640_v28, 4  ;;  %1880 = vst.msk [vmem:[#allocation3] sm:$0xff] %vm1879_vm1, %v6487_v12  ;;  %1881 = vst.msk [vmem:[#allocation3 + $0x8] sm:$0xff] %vm1879_vm1, %v6556_v44 }
  0xca   : > { %v3461_v23 = vld [vmem:[#allocation2 + $0x68] sm:$0x1]  ;;  %v3092_v27 = vrot.slane %v2965_v22, 5  ;;  %1882 = vst.msk [vmem:[#allocation3 + $0x10] sm:$0xff] %vm1879_vm1, %v1836_v35  ;;  %v1373_v53 = vld [vmem:[#allocation2 + $0x64] sm:$0xf] }
  0xcb   : > { %v2160_v31 = vpop.permute.xlu0 %2159  ;;  %v3653_v32 = vshll.u32 %v3461_v23, 16  ;;  %v2635_v38 = vrot.slane %v2633_v62, 5  ;;  %v3462_v47 = vld [vmem:[#allocation2 + $0x6c] sm:$0xf]  ;;  %2204 = vst.msk [vmem:[#allocation3] sm:$0xff] %vm8167_vm2, %v6461_v30  ;;  %2205 = vst.msk [vmem:[#allocation3 + $0x8] sm:$0xff] %vm8167_vm2, %v6509_v19  ;;  %v3646_v44 = vsel %vm6201_vm14, %v3641_v42, %v3645_v13  ;;  %v4127_v19 = vsel %vm6165_vm13, %v5650_v33, %v4126_v48 }
  0xcc   : > { %v1838_v34 = vpop.permute.xlu1 %1837  ;;  %v3093_v36 = vsel %vm6165_vm13, %v3091_v18, %v3092_v27  ;;  %2206 = vst.msk [vmem:[#allocation3 + $0x10] sm:$0xff] %vm8167_vm2, %v2160_v31  ;;  %v3651_v18 = vrot.slane %v3650_v43, 4  ;;  %v3658_v52 = vshrl.u32 %v3462_v47, 16  ;;  %v4006_v35 = vld [vmem:[#allocation2 + $0x68] sm:$0x1]  ;;  %v3661_v57 = vshll.u32 %v3462_v47, 16 }
  0xcd   : > { %1883 = vst.msk [vmem:[#allocation3 + $0x18] sm:$0xff] %vm1879_vm1, %v1838_v34  ;;  %v3655_v45 = vrot.slane %v3653_v32, 5  ;;  %v2636_v12 = vsel %vm6201_vm14, %v2631_v8, %v2635_v38  ;;  %v5603_v30 = vcombine.low %v6604_v51, %v3093_v36  ;;  %v825_v56 = vld [vmem:[#allocation2 + $0x74] sm:$0x1]  ;;  %v3463_v50 = vld [vmem:[#allocation2 + $0x70] sm:$0xf] }
  0xce   : > { %v5571_v4 = vcombine.low %v2626_v17, %v2636_v12  ;;  %v826_v6 = vsel %vm6085_vm3, %v594_v55, %v825_v56  ;;  %v3660_v61 = vrot.slane %v3658_v52, 4  ;;  %v4128_v63 = vrot.slane %v4126_v48, 4  ;;  %v1374_v14 = vld [vmem:[#allocation2 + $0x68] sm:$0x1]  ;;  %v4007_v17 = vld [vmem:[#allocation2 + $0x6c] sm:$0xe] }
  0xcf   : > { %v3656_v46 = vsel %vm6201_vm14, %v3651_v18, %v3655_v45  ;;  %v6640_v5 = vpop.permute.xlu0 %2336  ;;  %827 = vst [vmem:[#allocation2 + $0x74] sm:$0x1] %v826_v6  ;;  %v3663_v8 = vrot.slane %v3661_v57, 5  ;;  %v3667_v11 = vshll.u32 %v3463_v50, 16  ;;  %v3671_v13 = vshrl.u32 %v3463_v50, 16  ;;  %v5970_v38 = vld [vmem:[#allocation2 + $0x6c] sm:$0xff]  }
  0xd0   : > { %v2162_v58 = vpop.permute.xlu1 %2161  ;;  %2891 = vrot.lane.b32.xlu1 %v5571_v4, %s6038_s9  ;;  %v5634_v20 = vcombine.low %v3646_v44, %v3656_v46  ;;  %v4129_v25 = vrot.slane %v4006_v35, 5  ;;  %v1592_v22 = vshrl.u32 %v1372_v49, 16  ;;  %v1595_v51 = vshll.u32 %v1372_v49, 16  ;;  %v1375_v23 = vld [vmem:[#allocation2 + $0x6c] sm:$0xf]  ;;  %2382 = vst.msk [vmem:[#allocation3 + $0x8] sm:$0xff] %vm2380_vm4, %v6480_v60 }
  0xd1   : > { %2207 = vst.msk [vmem:[#allocation3 + $0x18] sm:$0xff] %vm8167_vm2, %v2162_v58  ;;  %v1601_v55 = vshll.u32 %v1373_v53, 16  ;;  %v3664_v62 = vor.u32 %v3663_v8, %v3660_v61  ;;  %v3669_v27 = vrot.slane %v3667_v11, 5  ;;  %v3673_v28 = vrot.slane %v3671_v13, 4  ;;  %v4008_v29 = vld [vmem:[#allocation2 + $0x70] sm:$0xf] }
  0xd2   : > { %3933 = vrot.lane.b32.xlu0 %v5634_v20, %s6039_s10  ;;  %v1605_v24 = vshrl.u32 %v1373_v53, 16  ;;  %v4130_v31 = vsel %vm6165_vm13, %v4128_v63, %v4129_v25  ;;  %v1594_v32 = vrot.slane %v1592_v22, 4  ;;  %v1597_v33 = vrot.slane %v1595_v51, 5  ;;  %v1376_v35 = vld [vmem:[#allocation2 + $0x70] sm:$0xf]  ;;  %2381 = vst.msk [vmem:[#allocation3] sm:$0xff] %vm2380_vm4, %v6450_v7 }
  0xd3   : > { %v1603_v34 = vrot.slane %v1601_v55, 5  ;;  %v3665_v36 = vrot.slane %v3664_v62, 4  ;;  %v3674_v42 = vor.u32 %v3673_v28, %v3669_v27  ;;  %v5666_v43 = vcombine.low %v4127_v19, %v4130_v31  ;;  %v1920_v63 = vld [vmem:[#allocation2 + $0x60] sm:$0xe]  ;;  %v1921_v55 = vld [vmem:[#allocation2 + $0x64] sm:$0xf] }
  0xd4   : > { %3212 = vrot.lane.b32.xlu1 %v5603_v30, %s6036_s7  ;;  %v1607_v45 = vrot.slane %v1605_v24, 4  ;;  %v1598_v47 = vor.u32 %v1597_v33, %v1594_v32  ;;  %v1611_v48 = vshll.u32 %v1374_v14, 16  ;;  %v5651_v49 = vrot.slane %v4007_v17, 9  ;;  %v1922_v62 = vld [vmem:[#allocation2 + $0x68] sm:$0x1]  ;;  %2383 = vst.msk [vmem:[#allocation3 + $0x10] sm:$0xff] %vm2380_vm4, %v6640_v5 }
  0xd5   : > { %v4133_v12 = vrot.slane %v4008_v29, 5  ;;  %v3675_v18 = vrot.slane %v3674_v42, 4  ;;  %v1616_v53 = vshrl.u32 %v1375_v23, 16  ;;  %v3670_v30 = vsel %vm6201_vm14, %v3665_v36, %v3669_v27  ;;  %v1924_v32 = vld [vmem:[#allocation2 + $0x70] sm:$0xf] }
  0xd6   : > { %4254 = vrot.lane.b32.xlu0 %v5666_v43, %s6037_s8  ;;  %v1608_v52 = vor.u32 %v1607_v45, %v1603_v34  ;;  %v3464_v4 = vld [vmem:[#allocation2 + $0x74] sm:$0x1]  ;;  %v1599_v56 = vrot.slane %v1598_v47, 4  ;;  %v1613_v57 = vrot.slane %v1611_v48, 5  ;;  %v1619_v13 = vshll.u32 %v1375_v23, 16 }
  0xd7   : > { %v6647_v44 = vpop.permute.xlu0 %2881  ;;  %v4009_v19 = vld [vmem:[#allocation2 + $0x74] sm:$0x1]  ;;  %v4134_v58 = vsel %vm6165_vm13, %v5651_v49, %v4133_v12  ;;  %v3677_v46 = vshll.u32 %v3464_v4, 16  ;;  %v4135_v50 = vrot.slane %v4133_v12, 4  ;;  %v1618_v11 = vrot.slane %v1616_v53, 4 }
  0xd8   : > { %3390 = vrot.lane.b32.xlu1 %v5970_v38, %s6034_s29  ;;  %v1609_v6 = vrot.slane %v1608_v52, 4  ;;  %v4136_v61 = vrot.slane %v4009_v19, 5  ;;  %v1604_v20 = vsel %vm6201_vm14, %v1599_v56, %v1603_v34  ;;  %v1377_v8 = vld [vmem:[#allocation2 + $0x74] sm:$0x1]  ;;  %v1625_v14 = vshll.u32 %v1376_v35, 16 }
  0xd9   : > { %v3679_v17 = vrot.slane %v3677_v46, 5  ;;  %v1629_v51 = vshrl.u32 %v1376_v35, 16  ;;  %v1621_v29 = vrot.slane %v1619_v13, 5  ;;  %v1923_v23 = vld [vmem:[#allocation2 + $0x6c] sm:$0xe]  ;;  %v1635_v36 = vshll.u32 %v1377_v8, 16 }
  0xda   : > { %v1614_v25 = vsel %vm6201_vm14, %v1609_v6, %v1613_v57  ;;  %v4137_v22 = vsel %vm6165_vm13, %v4135_v50, %v4136_v61  ;;  %v1627_v31 = vrot.slane %v1625_v14, 5  ;;  %v328_v33 = vld [vmem:[#allocation2 + $0x78] sm:$0x1]  ;;  %v5524_v42 = vrot.slane %v1920_v63, 9  ;;  %v1925_v43 = vld [vmem:[#allocation2 + $0x74] sm:$0x1]  ;;  %v2339_v57 = vpop.permute.xlu1 %2338 }
  0xdb   : > { %v6661_v27 = vpop.permute.xlu0 %3202  ;;  %v5508_v28 = vcombine.low %v1604_v20, %v1614_v25  ;;  %v5667_v24 = vcombine.low %v4134_v58, %v4137_v22  ;;  %v3680_v34 = vsel %vm6201_vm14, %v3675_v18, %v3679_v17  ;;  %v1631_v38 = vrot.slane %v1629_v51, 4  ;;  %v426_v45 = vld [vmem:[%s6108_s26 + $0x48] sm:$0xf]  ;;  %v427_v52 = vld [vmem:[%s6108_s26 + $0x4c] sm:$0xf]  ;;  %2384 = vst.msk [vmem:[#allocation3 + $0x18] sm:$0xff] %vm2380_vm4, %v2339_v57 }
  0xdc   : > { %v5635_v47 = vcombine.low %v3670_v30, %v3680_v34  ;;  %v1622_v48 = vor.u32 %v1621_v29, %v1618_v11  ;;  %v2053_v49 = vrot.slane %v1921_v55, 5  ;;  %v2056_v12 = vrot.slane %v1922_v62, 5  ;;  %v5990_v20 = vld [vmem:[#allocation2 + $0x48] sm:$0xff]   ;;  %v6691_v62 = vld [vmem:[#allocation2 + $0x70] sm:$0xf] }
  0xdd   : > { %4256 = vrot.lane.b32.xlu0 %v5667_v24, %s6037_s8  ;;  %v1632_v35 = vor.u32 %v1631_v38, %v1627_v31  ;;  %v1637_v53 = vrot.slane %v1635_v36, 5  ;;  %v5525_v4 = vrot.slane %v1923_v23, 9  ;;  %v2060_v56 = vrot.slane %v1924_v32, 5  ;;  %v6683_v17 = vld [vmem:[#allocation2 + $0x6c] sm:$0xf]  ;;  %1338 = vst.msk [vmem:[#allocation3 + $0x30] sm:$0xff] %vm990_vm15, %v5990_v20 }
  0xde   : > { %3935 = vrot.lane.b32.xlu1 %v5635_v47, %s6039_s10  ;;  %v1623_v18 = vrot.slane %v1622_v48, 4  ;;  %v2054_v19 = vsel %vm6165_vm13, %v5524_v42, %v2053_v49  ;;  %v2055_v58 = vrot.slane %v2053_v49, 4  ;;  %v2063_v46 = vrot.slane %v1925_v43, 5  ;;  %v6693_v24 = vld [vmem:[#allocation2 + $0x74] sm:$0x1] }
  0xdf   : > { %v1633_v30 = vrot.slane %v1632_v35, 4  ;;  %v6673_v6 = vsel %vm6165_vm13, %v5525_v4, %v2060_v56  ;;  %v2062_v50 = vrot.slane %v2060_v56, 4  ;;  %v329_v61 = vsel %vm6085_vm3, 0, %v328_v33  ;;  %v6677_v63 = vpop.permute.xlu0 %3380  ;;  %v384_v32 = vld [vmem:[#allocation2 + $0x80] sm:$0x1]  ;;  %v5972_v33 = vld [vmem:[#allocation2 + $0x6c] sm:$0xff]  }
  0xe0   : > { %v1628_v8 = vsel %vm6201_vm14, %v1623_v18, %v1627_v31  ;;  %v2057_v11 = vsel %vm6165_vm13, %v2055_v58, %v2056_v12  ;;  %330 = vst [vmem:[#allocation2 + $0x78] sm:$0x1] %v329_v61  ;;  %v596_v13 = vshrl.u32 %v426_v45, 16  ;;  %v599_v14 = vshll.u32 %v426_v45, 16  ;;  %v5991_v36 = vld [vmem:[#allocation2 + $0x54] sm:$0xff]  }
  0xe1   : > { %v1638_v25 = vsel %vm6201_vm14, %v1633_v30, %v1637_v53  ;;  %v5540_v22 = vcombine.low %v2054_v19, %v2057_v11  ;;  %v6689_v51 = vsel %vm6165_vm13, %v2062_v50, %v2063_v46  ;;  %v604_v55 = vshrl.u32 %v427_v52, 16  ;;  %v6706_v45 = vld [vmem:[#allocation2 + $0x6c] sm:$0xe]  ;;  %v6708_v47 = vld [vmem:[#allocation2 + $0x70] sm:$0xf]  ;;  %1339 = vst.msk [vmem:[#allocation3 + $0x38] sm:$0xff] %vm990_vm15, %v5991_v36 }
  0xe2   : > { %1847 = vrot.lane.b32.xlu1 %v5508_v28, %s6035_s30  ;;  %v5509_v29 = vcombine.low %v1628_v8, %v1638_v25  ;;  %v598_v31 = vrot.slane %v596_v13, 7  ;;  %v607_v23 = vshll.u32 %v427_v52, 16  ;;  %vm2925_vm5 = vcmask 162944   ;;  %v331_v48 = vld [vmem:[#allocation2 + $0x84] sm:$0x1] }
  0xe3   : > { %2171 = vrot.lane.b32.xlu0 %v5540_v22, %s6033_s28  ;;  %v6698_v34 = vrot.slane %v604_v55, 7  ;;  %vm8166_vm8 = vcmask 195744   ;;  %v5541_v42 = vcombine.low %v6673_v6, %v6689_v51  ;;  %vm3424_vm9 = vcmask 228544   ;;  %2927 = vst.msk [vmem:[#allocation3 + $0x8] sm:$0xff] %vm2925_vm5, %v6552_v37  ;;  %2926 = vst.msk [vmem:[#allocation3] sm:$0xff] %vm2925_vm5, %v6572_v9 }
  0xe4   : > { %v601_v43 = vor.u32 %v599_v14, %v598_v31  ;;  %v602_v28 = vrot.slane %v598_v31, 4  ;;  %vm3969_vm11 = vcmask 261344   ;;  %vm4290_vm12 = vcmask 294144   ;;  %v6720_v60 = vld [vmem:[%s6108_s26 + $0x50] sm:$0xf]  ;;  %2928 = vst.msk [vmem:[#allocation3 + $0x10] sm:$0xff] %vm2925_vm5, %v6647_v44 }
  0xe5   : > { %v609_v49 = vor.u32 %v607_v23, %v6698_v34  ;;  %v2638_v7 = vshrl.u32 %v6683_v17, 16  ;;  %3248 = vst.msk [vmem:[#allocation3 + $0x8] sm:$0xff] %vm8166_vm8, %v6528_v59  ;;  %v2641_v37 = vshll.u32 %v6683_v17, 16  ;;  %v2647_v12 = vshll.u32 %v6691_v62, 16  ;;  %3247 = vst.msk [vmem:[#allocation3] sm:$0xff] %vm8166_vm8, %v6498_v54 }
  0xe6   : > { %v2884_v38 = vpop.permute.xlu1 %2883  ;;  %1849 = vrot.lane.b32.xlu1 %v5509_v29, %s6035_s30  ;;  %v2651_v9 = vshrl.u32 %v6691_v62, 16  ;;  %v2657_v52 = vshll.u32 %v6693_v24, 16  ;;  %v6736_v44 = vld [vmem:[%s6108_s26 + $0x54] sm:$0xf]  ;;  %3249 = vst.msk [vmem:[#allocation3 + $0x10] sm:$0xff] %vm8166_vm8, %v6661_v27  ;;  %v385_v4 = vsel %vm6115_vm6, 0, %v384_v32 }
  0xe7   : > { %2929 = vst.msk [vmem:[#allocation3 + $0x18] sm:$0xff] %vm2925_vm5, %v2884_v38  ;;  %2348 = vrot.lane.b32.xlu0 %v5972_v33, %s6032_s27  ;;  %v610_v59 = vsel %vm6121_vm7, %v602_v28, %v609_v49  ;;  %v828_v35 = vld [vmem:[#allocation2 + $0x78] sm:$0xf]  ;;  %v2640_v53 = vrot.slane %v2638_v7, 4  ;;  %v2968_v54 = vld [vmem:[#allocation2 + $0x74] sm:$0x1] }
  0xe8   : > { %v3926_v5 = vpop.permute.xlu0 %3925  ;;  %3426 = vst.msk [vmem:[#allocation3 + $0x8] sm:$0xff] %vm3424_vm9, %v6495_v39  ;;  %3425 = vst.msk [vmem:[#allocation3] sm:$0xff] %vm3424_vm9, %v6466_v41  ;;  %v5981_v27 = vld [vmem:[%s8160_s1 + $0x10] ss:$0 sps:$4 sm:$0x33]   ;;  %v829_v57 = vsel %vm6129_vm10, %v601_v43, %v828_v35  ;;  %v2643_v39 = vrot.slane %v2641_v37, 5 }
  0xe9   : > { %3427 = vst.msk [vmem:[#allocation3 + $0x10] sm:$0xff] %vm3424_vm9, %v6677_v63  ;;  %v2649_v18 = vrot.slane %v2647_v12, 5  ;;  %v2653_v41 = vrot.slane %v2651_v9, 4  ;;  %386 = vst [vmem:[#allocation2 + $0x80] sm:$0x1] %v385_v4  ;;  %v2659_v58 = vrot.slane %v2657_v52, 5 }
  0xea   : > { %v3205_v56 = vpop.permute.xlu1 %3204  ;;  %831 = vst.msk [vmem:[#allocation2 + $0x7c] sm:$0xf] %vm286_vm0, %v610_v59  ;;  %v387_v19 = vld [vmem:[#allocation2 + $0x8c] sm:$0x1]  ;;  %830 = vst [vmem:[#allocation2 + $0x78] sm:$0xf] %v829_v57  ;;  %2173 = vrot.lane.b32.xlu1 %v5541_v42, %s6033_s28  ;;  %v2644_v6 = vor.u32 %v2643_v39, %v2640_v53 }
  0xeb   : > { %3971 = vst.msk [vmem:[#allocation3 + $0x8] sm:$0xff] %vm3969_vm11, %v6570_v2  ;;  %3970 = vst.msk [vmem:[#allocation3] sm:$0xff] %vm3969_vm11, %v6591_v15  ;;  %v5588_v46 = vrot.slane %v6706_v45, 9  ;;  %v3096_v2 = vrot.slane %v6708_v47, 5  ;;  %v332_v15 = vsel %vm6085_vm3, 0, %v331_v48  ;;  %v2654_v50 = vor.u32 %v2653_v41, %v2649_v18 }
  0xec   : > { %3250 = vst.msk [vmem:[#allocation3 + $0x18] sm:$0xff] %vm8166_vm8, %v3205_v56  ;;  %v4247_v30 = vpop.permute.xlu0 %4246  ;;  %v3099_v61 = vrot.slane %v2968_v54, 5  ;;  %333 = vst [vmem:[#allocation2 + $0x84] sm:$0x1] %v332_v15  ;;  %v611_v63 = vrot.slane %v6698_v34, 4  ;;  %v616_v8 = vshll.u32 %v6720_v60, 16 }
  0xed   : > { %3972 = vst.msk [vmem:[#allocation3 + $0x10] sm:$0xff] %vm3969_vm11, %v3926_v5  ;;  %v3098_v20 = vrot.slane %v3096_v2, 4  ;;  %v2645_v13 = vrot.slane %v2644_v6, 4  ;;  %v2655_v14 = vrot.slane %v2654_v50, 4  ;;  %v624_v17 = vshll.u32 %v6736_v44, 16 }
  0xee   : > { %4292 = vst.msk [vmem:[#allocation3 + $0x8] sm:$0xff] %vm4290_vm12, %v6537_v1  ;;  %4291 = vst.msk [vmem:[#allocation3] sm:$0xff] %vm4290_vm12, %v6512_v26  ;;  %v613_v1 = vshrl.u32 %v6720_v60, 16  ;;  %v621_v26 = vshrl.u32 %v6736_v44, 16  ;;  %v3383_v11 = vpop.permute.xlu1 %3382  ;;  %vm8168_vm8 = vcmask 1041408   ;;  %v388_v51 = vsel %vm6115_vm6, 0, %v387_v19 }
  0xef   : > { %4293 = vst.msk [vmem:[#allocation3 + $0x10] sm:$0xff] %vm4290_vm12, %v4247_v30  ;;  %5937 = vmatprep.subr.msk.bf16.mxu1 %vm8168_vm8, %v5981_v27  ;;  %v4393_v55 = vsel %vm8168_vm8, %v5981_v27, 0  ;;  %v2650_v62 = vsel %vm6201_vm14, %v2645_v13, %v2649_v18  ;;  %v2660_v24 = vsel %vm6201_vm14, %v2655_v14, %v2659_v58  ;;  %v3097_v29 = vsel %vm6165_vm13, %v5588_v46, %v3096_v2 }
  0xf0   : > { %3428 = vst.msk [vmem:[#allocation3 + $0x18] sm:$0xff] %vm3424_vm9, %v3383_v11  ;;  %v615_v25 = vrot.slane %v613_v1, 7  ;;  %v6779_v22 = vrot.slane %v621_v26, 7  ;;  %v3100_v31 = vsel %vm6165_vm13, %v3098_v20, %v3099_v61  ;;  %389 = vst [vmem:[#allocation2 + $0x8c] sm:$0x1] %v388_v51  ;;  %5903 = vmatpush3.bf16.msra.mxu1 %v4393_v55  ;;  %v5572_v23 = vcombine.low %v2650_v62, %v2660_v24 }
  0xf1   : > { %v832_v32 = vld [vmem:[#allocation2 + $0x80] sm:$0x1]  ;;  %v2425_v33 = vld [vmem:[#allocation2 + $0x7c] sm:$0xf]  ;;  %v4249_v38 = vpop.permute.xlu0 %4248  ;;  %v2424_v43 = vld [vmem:[#allocation2 + $0x78] sm:$0xf]  ;;  %v5604_v49 = vcombine.low %v3097_v29, %v3100_v31 }
  0xf2   : > { %v3928_v34 = vpop.permute.xlu1 %3927  ;;  %v5973_v36 = vld [vmem:[#allocation2 + $0x78] sm:$0xff]   ;;  %v833_v42 = vsel %vm6085_vm3, %v611_v63, %v832_v32  ;;  %v2671_v28 = vshll.u32 %v2425_v33, 16  ;;  %2893 = vrot.lane.b32.xlu0 %v5572_v23, %s6038_s9  ;;  %v2662_v45 = vshrl.u32 %v2424_v43, 16  ;;  %v2665_v47 = vshll.u32 %v2424_v43, 16 }
  0xf3   : > { %3973 = vst.msk [vmem:[#allocation3 + $0x18] sm:$0xff] %vm3969_vm11, %v3928_v34  ;;  %834 = vst [vmem:[#allocation2 + $0x80] sm:$0x1] %v833_v42  ;;  %v2675_v48 = vshrl.u32 %v2425_v33, 16  ;;  %v6797_v7 = vld [vmem:[#allocation2 + $0x78] sm:$0xe]  ;;  %2350 = vrot.lane.b32.xlu1 %v5973_v36, %s6032_s27  ;;  %v618_v37 = vor.u32 %v616_v8, %v615_v25  ;;  %v626_v12 = vor.u32 %v624_v17, %v6779_v22 }
  0xf4   : > { %4294 = vst.msk [vmem:[#allocation3 + $0x18] sm:$0xff] %vm4290_vm12, %v4249_v38  ;;  %v6801_v60 = vrot.slane %v2671_v28, 5  ;;  %v2970_v5 = vld [vmem:[#allocation2 + $0x7c] sm:$0xf]  ;;  %v2664_v9 = vrot.slane %v2662_v45, 4  ;;  %v2667_v52 = vrot.slane %v2665_v47, 5 }
  0xf5   : > { %v2677_v44 = vrot.slane %v2675_v48, 4  ;;  %v3103_v59 = vrot.slane %v2970_v5, 5  ;;  %v619_v53 = vrot.slane %v615_v25, 4  ;;  %v628_v4 = vrot.slane %v6779_v22, 4  ;;  %v835_v54 = vld [vmem:[#allocation2 + $0x84] sm:$0xf] }
  0xf6   : > { %v1840_v35 = vpop.permute.xlu1 %1839  ;;  %v3465_v27 = vld [vmem:[#allocation2 + $0x78] sm:$0xf]  ;;  %v2668_v56 = vor.u32 %v2667_v52, %v2664_v9  ;;  %3214 = vrot.lane.b32.xlu0 %v5604_v49, %s6036_s7  ;;  %v5589_v39 = vrot.slane %v6797_v7, 9  ;;  %v3466_v41 = vld [vmem:[#allocation2 + $0x7c] sm:$0xf]  ;;  %v836_v46 = vsel %vm6129_vm10, %v618_v37, %v835_v54 }
  0xf7   : > { %1884 = vst.msk [vmem:[#allocation3 + $0x20] sm:$0xff] %vm1879_vm1, %v1840_v35  ;;  %v2678_v57 = vor.u32 %v2677_v44, %v6801_v60  ;;  %v5978_v18 = vld [vmem:[#allocation2 + $0x78] sm:$0xff]   ;;  %v839_v19 = vld [vmem:[#allocation2 + $0x8c] sm:$0x1]  ;;  %v627_v58 = vsel %vm6121_vm7, %v619_v53, %v626_v12  ;;  %v3682_v2 = vshrl.u32 %v3465_v27, 16  ;;  %v3685_v15 = vshll.u32 %v3465_v27, 16 }
  0xf8   : > { %v4010_v30 = vld [vmem:[#allocation2 + $0x78] sm:$0xe]  ;;  %v2164_v6 = vpop.permute.xlu0 %2163  ;;  %v2669_v50 = vrot.slane %v2668_v56, 4  ;;  %v3105_v61 = vrot.slane %v3103_v59, 4  ;;  %837 = vst [vmem:[#allocation2 + $0x84] sm:$0xf] %v836_v46  ;;  %v840_v14 = vsel %vm6085_vm3, %v628_v4, %v839_v19  ;;  %v3104_v42 = vsel %vm6165_vm13, %v5589_v39, %v3103_v59 }
  0xf9   : > { %838 = vst.msk [vmem:[#allocation2 + $0x88] sm:$0xf] %vm286_vm0, %v627_v58  ;;  %v3691_v1 = vshll.u32 %v3466_v41, 16  ;;  %v3695_v63 = vshrl.u32 %v3466_v41, 16  ;;  %v4011_v20 = vld [vmem:[#allocation2 + $0x7c] sm:$0xf] }
  0xfa   : > { %v1842_v8 = vpop.permute.xlu1 %1841  ;;  %2208 = vst.msk [vmem:[#allocation3 + $0x20] sm:$0xff] %vm8167_vm2, %v2164_v6  ;;  %v2426_v26 = vld [vmem:[#allocation2 + $0x80] sm:$0x1]  ;;  %v2679_v17 = vrot.slane %v2678_v57, 4  ;;  %3392 = vrot.lane.b32.xlu0 %v5978_v18, %s6034_s29  ;;  %v3684_v51 = vrot.slane %v3682_v2, 4  ;;  %v3687_v55 = vrot.slane %v3685_v15, 5  ;;  %v2674_v32 = vsel %vm6201_vm14, %v2669_v50, %v6801_v60 }
  0xfb   : > { %v2971_v11 = vld [vmem:[#allocation2 + $0x80] sm:$0x1]  ;;  %1885 = vst.msk [vmem:[#allocation3 + $0x28] sm:$0xff] %vm1879_vm1, %v1842_v8  ;;  %v2681_v25 = vshll.u32 %v2426_v26, 16  ;;  %841 = vst [vmem:[#allocation2 + $0x8c] sm:$0x1] %v840_v14 }
  0xfc   : > { %v3467_v13 = vld [vmem:[#allocation2 + $0x80] sm:$0x1]  ;;  %v3106_v22 = vrot.slane %v2971_v11, 5  ;;  %v3693_v62 = vrot.slane %v3691_v1, 5  ;;  %v3697_v24 = vrot.slane %v3695_v63, 4  ;;  %v2341_v23 = vpop.permute.xlu0 %2340  ;;  %v5652_v34 = vrot.slane %v4010_v30, 9 }
  0xfd   : > { %v3701_v29 = vshll.u32 %v3467_v13, 16  ;;  %v4012_v31 = vld [vmem:[#allocation2 + $0x80] sm:$0x1]  ;;  %v2683_v33 = vrot.slane %v2681_v25, 5  ;;  %v4140_v38 = vrot.slane %v4011_v20, 5  ;;  %2385 = vst.msk [vmem:[#allocation3 + $0x20] sm:$0xff] %vm2380_vm4, %v2341_v23  ;;  %v3688_v28 = vor.u32 %v3687_v55, %v3684_v51 }
  0xfe   : > { %v2166_v36 = vpop.permute.xlu1 %2165  ;;  %v3107_v43 = vsel %vm6165_vm13, %v3105_v61, %v3106_v22  ;;  %v3698_v45 = vor.u32 %v3697_v24, %v3693_v62  ;;  %v4143_v7 = vrot.slane %v4012_v31, 5  ;;  %v4307_v60 = vld [vmem:[#allocation3] sm:$0xff]  ;;  %v909_v5 = vld [vmem:[%s8161_s2] sm:$0x3]  ;;  %v4309_v44 = vld [vmem:[#allocation3 + $0x10] sm:$0xff] }
  0xff   : > { %2209 = vst.msk [vmem:[#allocation3 + $0x28] sm:$0xff] %vm8167_vm2, %v2166_v36  ;;  %v2684_v47 = vsel %vm6201_vm14, %v2679_v17, %v2683_v33  ;;  %v3703_v48 = vrot.slane %v3701_v29, 5  ;;  %v4142_v49 = vrot.slane %v4140_v38, 4  ;;  %v3689_v12 = vrot.slane %v3688_v28, 4  ;;  %v1378_v52 = vld [vmem:[#allocation2 + $0x78] sm:$0xf]  ;;  %5936 = vmatprep.subr.msk.bf16.mxu0 %vm8168_vm8, %v909_v5 }
 0x100   : > { %v5573_v37 = vcombine.low %v2674_v32, %v2684_v47  ;;  %v6835_v9 = vsel %vm6165_vm13, %v5652_v34, %v4140_v38  ;;  %v5605_v59 = vcombine.low %v3104_v42, %v3107_v43  ;;  %v3699_v35 = vrot.slane %v3698_v45, 4  ;;  %v3468_v53 = vld [vmem:[#allocation2 + $0x84] sm:$0xf]  ;;  %v3469_v4 = vld [vmem:[#allocation2 + $0x88] sm:$0xf]  ;;  %v4310_v45 = vld [vmem:[#allocation3 + $0x18] sm:$0xff] }
 0x101   : > { %v4144_v54 = vsel %vm6165_vm13, %v4142_v49, %v4143_v7  ;;  %vm4343_vm2 = vcmask 293888   ;;  %v3694_v27 = vsel %vm6201_vm14, %v3689_v12, %v3693_v62  ;;  %v3706_v57 = vshrl.u32 %v3468_v53, 16  ;;  %v4308_v41 = vld [vmem:[#allocation3 + $0x8] sm:$0xff]  ;;  %v1379_v15 = vld [vmem:[#allocation2 + $0x7c] sm:$0xf] }
 0x102   : > { %2895 = vrot.lane.b32.xlu1 %v5573_v37, %s6038_s9  ;;  %v3470_v56 = vld [vmem:[#allocation2 + $0x8c] sm:$0x1]  ;;  %v3709_v39 = vshll.u32 %v3468_v53, 16  ;;  %v3715_v18 = vshll.u32 %v3469_v4, 16  ;;  %5904 = vmatprep.mubr.msk.bf16.mxu1 %vm4343_vm2, %v4307_v60  ;;  %v3704_v19 = vsel %vm6201_vm14, %v3699_v35, %v3703_v48  ;;  %v3719_v58 = vshrl.u32 %v3469_v4, 16  ;;  %v5994_v8 = vld [vmem:[%s6108_s26] sm:$0xff]  }
 0x103   : > { %v3725_v46 = vshll.u32 %v3470_v56, 16  ;;  %v5668_v2 = vcombine.low %v6835_v9, %v4144_v54  ;;  %v1380_v30 = vld [vmem:[#allocation2 + $0x80] sm:$0x1]  ;;  %5905 = vmatmul.mubr.msk.bf16.vlgmr.msra.gmra.mrb[0].mxu1 %vm4343_vm2, %v4308_v41  ;;  %v2886_v6 = vpop.permute.xlu0 %2885  ;;  %v5636_v50 = vcombine.low %v3694_v27, %v3704_v19  ;;  %v3708_v61 = vrot.slane %v3706_v57, 4  ;;  %v4013_v20 = vld [vmem:[#allocation2 + $0x84] sm:$0xe]  ;;  %5866 = vmatprep.mubr.msk.bf16.mxu0 %vm990_vm15, %v5994_v8 }
 0x104   : > { %v3711_v1 = vrot.slane %v3709_v39, 5  ;;  %v3717_v63 = vrot.slane %v3715_v18, 5  ;;  %5908 = vmatprep.mubr.msk.bf16.mxu1 %vm4343_vm2, %v4309_v44  ;;  %2930 = vst.msk [vmem:[#allocation3 + $0x20] sm:$0xff] %vm2925_vm5, %v2886_v6  ;;  %v3721_v26 = vrot.slane %v3719_v58, 4  ;;  %v1640_v13 = vshrl.u32 %v1378_v52, 16  ;;  %v5980_v25 = vld [vmem:[#allocation2 + $0x84] sm:$0xff]  }
 0x105   : > { %v3727_v11 = vrot.slane %v3725_v46, 5  ;;  %v1643_v14 = vshll.u32 %v1378_v52, 16  ;;  %v4014_v17 = vld [vmem:[#allocation2 + $0x88] sm:$0xf]  ;;  %3937 = vrot.lane.b32.xlu0 %v5636_v50, %s6039_s10  ;;  %v1649_v51 = vshll.u32 %v1379_v15, 16  ;;  %v1653_v55 = vshrl.u32 %v1379_v15, 16  ;;  %v2343_v29 = vpop.permute.xlu1 %2342 }
 0x106   : > { %3216 = vrot.lane.b32.xlu1 %v5605_v59, %s6036_s7  ;;  %v3712_v22 = vor.u32 %v3711_v1, %v3708_v61  ;;  %v1659_v62 = vshll.u32 %v1380_v30, 16  ;;  %v4015_v24 = vld [vmem:[#allocation2 + $0x8c] sm:$0x1]  ;;  %v3722_v31 = vor.u32 %v3721_v26, %v3717_v63  ;;  %v1642_v23 = vrot.slane %v1640_v13, 4  ;;  %v1381_v34 = vld [vmem:[#allocation2 + $0x84] sm:$0xf] }
 0x107   : > { %v1645_v32 = vrot.slane %v1643_v14, 5  ;;  %v5653_v33 = vrot.slane %v4013_v20, 9  ;;  %2386 = vst.msk [vmem:[#allocation3 + $0x28] sm:$0xff] %vm2380_vm4, %v2343_v29  ;;  %v3207_v38 = vpop.permute.xlu0 %3206  ;;  %v1651_v42 = vrot.slane %v1649_v51, 5  ;;  %v1655_v43 = vrot.slane %v1653_v55, 4 }
 0x108   : > { %v3713_v36 = vrot.slane %v3712_v22, 4  ;;  %v1661_v28 = vrot.slane %v1659_v62, 5  ;;  %vm8189_vm8 = vcmask 195744   ;;  %v3723_v47 = vrot.slane %v3722_v31, 4  ;;  %v1382_v37 = vld [vmem:[#allocation2 + $0x88] sm:$0xf] }
 0x109   : > { %3251 = vst.msk [vmem:[#allocation3 + $0x20] sm:$0xff] %vm8189_vm8, %v3207_v38  ;;  %v1646_v48 = vor.u32 %v1645_v32, %v1642_v23  ;;  %v4147_v49 = vrot.slane %v4014_v17, 5  ;;  %v4150_v7 = vrot.slane %v4015_v24, 5  ;;  %4258 = vrot.lane.b32.xlu0 %v5668_v2, %s6037_s8  ;;  %v1656_v5 = vor.u32 %v1655_v43, %v1651_v42  ;;  %v1926_v52 = vld [vmem:[#allocation2 + $0x78] sm:$0xe]  ;;  %v6000_v23 = vld [vmem:[#allocation2 + $0x60] sm:$0xff]  }
 0x10a   : > { %3394 = vrot.lane.b32.xlu1 %v5980_v25, %s6034_s29  ;;  %v3718_v60 = vsel %vm6201_vm14, %v3713_v36, %v3717_v63  ;;  %v1664_v12 = vshrl.u32 %v1381_v34, 16  ;;  %v1667_v9 = vshll.u32 %v1381_v34, 16  ;;  %v3728_v44 = vsel %vm6201_vm14, %v3723_v47, %v3727_v11  ;;  %v1383_v4 = vld [vmem:[#allocation2 + $0x8c] sm:$0x1]  ;;  %v1927_v18 = vld [vmem:[#allocation2 + $0x7c] sm:$0xf] }
 0x10b   : > { %v1647_v59 = vrot.slane %v1646_v48, 4  ;;  %v4148_v35 = vsel %vm6165_vm13, %v5653_v33, %v4147_v49  ;;  %v4149_v53 = vrot.slane %v4147_v49, 4  ;;  %5909 = vmatmul.mubr.msk.bf16.gmra.mrb[4].mxu1 %vm4343_vm2, %v4310_v45  ;;  %v3385_v54 = vpop.permute.xlu0 %3384  ;;  %v5637_v27 = vcombine.low %v3718_v60, %v3728_v44  ;;  %v1928_v2 = vld [vmem:[#allocation2 + $0x80] sm:$0x1]  ;;  %v1929_v15 = vld [vmem:[#allocation2 + $0x84] sm:$0xe] }
 0x10c   : > { %v1657_v56 = vrot.slane %v1656_v5, 4  ;;  %v1666_v57 = vrot.slane %v1664_v12, 4  ;;  %v1669_v39 = vrot.slane %v1667_v9, 5  ;;  %3429 = vst.msk [vmem:[#allocation3 + $0x20] sm:$0xff] %vm3424_vm9, %v3385_v54  ;;  %v1673_v58 = vshll.u32 %v1382_v37, 16  ;;  %v6001_v9 = vld [vmem:[#allocation2 + $0x6c] sm:$0xff]  }
 0x10d   : > { %v1652_v41 = vsel %vm6201_vm14, %v1647_v59, %v1651_v42  ;;  %v4151_v19 = vsel %vm6165_vm13, %v4149_v53, %v4150_v7  ;;  %v1677_v46 = vshrl.u32 %v1382_v37, 16  ;;  %v1683_v61 = vshll.u32 %v1383_v4, 16  ;;  %v1930_v1 = vld [vmem:[#allocation2 + $0x88] sm:$0xf]  ;;  %v1931_v63 = vld [vmem:[#allocation2 + $0x8c] sm:$0x1] }
 0x10e   : > { %3939 = vrot.lane.b32.xlu1 %v5637_v27, %s6039_s10  ;;  %v1662_v30 = vsel %vm6201_vm14, %v1657_v56, %v1661_v28  ;;  %v5669_v6 = vcombine.low %v4148_v35, %v4151_v19  ;;  %v1670_v50 = vor.u32 %v1669_v39, %v1666_v57  ;;  %v1675_v8 = vrot.slane %v1673_v58, 5  ;;  %v334_v13 = vld [vmem:[#allocation2 + $0x90] sm:$0x1]  ;;  %v430_v51 = vld [vmem:[%s6108_s26 + $0x58] sm:$0xf]  ;;  %1340 = vst.msk [vmem:[#allocation3 + $0x40] sm:$0xff] %vm990_vm15, %v6000_v23 }
 0x10f   : > { %v5510_v20 = vcombine.low %v1652_v41, %v1662_v30  ;;  %v1679_v26 = vrot.slane %v1677_v46, 4  ;;  %v5526_v11 = vrot.slane %v1926_v52, 9  ;;  %v1685_v17 = vrot.slane %v1683_v61, 5  ;;  %v431_v31 = vld [vmem:[%s6108_s26 + $0x5c] sm:$0xf]  ;;  %1341 = vst.msk [vmem:[#allocation3 + $0x48] sm:$0xff] %vm990_vm15, %v6001_v9 }
 0x110   : > { %4260 = vrot.lane.b32.xlu0 %v5669_v6, %s6037_s8  ;;  %v1671_v14 = vrot.slane %v1670_v50, 4  ;;  %v2067_v25 = vrot.slane %v1927_v18, 5  ;;  %v2070_v22 = vrot.slane %v1928_v2, 5  ;;  %v5527_v62 = vrot.slane %v1929_v15, 9  ;;  %v2427_v36 = vld [vmem:[#allocation2 + $0x84] sm:$0xf] }
 0x111   : > { %v1680_v55 = vor.u32 %v1679_v26, %v1675_v8  ;;  %v2074_v24 = vrot.slane %v1930_v1, 5  ;;  %v2077_v29 = vrot.slane %v1931_v63, 5  ;;  %v335_v38 = vsel %vm6085_vm3, 0, %v334_v13  ;;  %v2428_v47 = vld [vmem:[#allocation2 + $0x88] sm:$0xf] }
 0x112   : > { %1851 = vrot.lane.b32.xlu1 %v5510_v20, %s6035_s30  ;;  %v1676_v32 = vsel %vm6201_vm14, %v1671_v14, %v1675_v8  ;;  %v2068_v33 = vsel %vm6165_vm13, %v5526_v11, %v2067_v25  ;;  %v2069_v34 = vrot.slane %v2067_v25, 4  ;;  %336 = vst [vmem:[#allocation2 + $0x90] sm:$0x1] %v335_v38  ;;  %v630_v45 = vshrl.u32 %v430_v51, 16  ;;  %v2429_v5 = vld [vmem:[#allocation2 + $0x8c] sm:$0x1] }
 0x113   : > { %v1681_v42 = vrot.slane %v1680_v55, 4  ;;  %v2075_v43 = vsel %vm6165_vm13, %v5527_v62, %v2074_v24  ;;  %v2076_v28 = vrot.slane %v2074_v24, 4  ;;  %v633_v49 = vshll.u32 %v430_v51, 16  ;;  %v390_v37 = vld [vmem:[#allocation2 + $0x98] sm:$0x1]  ;;  %v5982_v57 = vld [vmem:[#allocation2 + $0x84] sm:$0xff]  }
 0x114   : > { %v2071_v48 = vsel %vm6165_vm13, %v2069_v34, %v2070_v22  ;;  %v638_v7 = vshrl.u32 %v431_v31, 16  ;;  %v641_v60 = vshll.u32 %v431_v31, 16  ;;  %v2888_v12 = vpop.permute.xlu1 %2887  ;;  %v632_v35 = vrot.slane %v630_v45, 7  ;;  %v2972_v53 = vld [vmem:[#allocation2 + $0x84] sm:$0xe] }
 0x115   : > { %v1686_v52 = vsel %vm6201_vm14, %v1681_v42, %v1685_v17  ;;  %v5542_v44 = vcombine.low %v2068_v33, %v2071_v48  ;;  %v2078_v59 = vsel %vm6165_vm13, %v2076_v28, %v2077_v29  ;;  %v2973_v4 = vld [vmem:[#allocation2 + $0x88] sm:$0xf]  ;;  %2931 = vst.msk [vmem:[#allocation3 + $0x28] sm:$0xff] %vm2925_vm5, %v2888_v12  ;;  %v2686_v56 = vshrl.u32 %v2427_v36, 16  ;;  %v337_v58 = vld [vmem:[#allocation2 + $0x9c] sm:$0x1] }
 0x116   : > { %v5511_v54 = vcombine.low %v1676_v32, %v1686_v52  ;;  %v6893_v27 = vrot.slane %v638_v7, 7  ;;  %v635_v39 = vor.u32 %v633_v49, %v632_v35  ;;  %v636_v18 = vrot.slane %v632_v35, 4  ;;  %v3930_v46 = vpop.permute.xlu0 %3929  ;;  %v2974_v50 = vld [vmem:[#allocation2 + $0x8c] sm:$0x1]  ;;  %v6900_v61 = vld [vmem:[%s6108_s26 + $0x60] sm:$0xf] }
 0x117   : > { %2175 = vrot.lane.b32.xlu0 %v5542_v44, %s6033_s28  ;;  %v2689_v41 = vshll.u32 %v2427_v36, 16  ;;  %v2695_v19 = vshll.u32 %v2428_v47, 16  ;;  %v5543_v2 = vcombine.low %v2075_v43, %v2078_v59  ;;  %v2688_v30 = vrot.slane %v2686_v56, 4  ;;  %v433_v1 = vld [vmem:[%s6108_s26 + $0x64] sm:$0xf]  ;;  %3974 = vst.msk [vmem:[#allocation3 + $0x20] sm:$0xff] %vm3969_vm11, %v3930_v46 }
 0x118   : > { %1853 = vrot.lane.b32.xlu1 %v5511_v54, %s6035_s30  ;;  %v643_v15 = vor.u32 %v641_v60, %v6893_v27  ;;  %v2699_v6 = vshrl.u32 %v2428_v47, 16  ;;  %v3209_v63 = vpop.permute.xlu1 %3208  ;;  %v2705_v26 = vshll.u32 %v2429_v5, 16  ;;  %v391_v11 = vsel %vm6115_vm6, 0, %v390_v37  ;;  %v393_v24 = vld [vmem:[#allocation2 + $0xa4] sm:$0x1] }
 0x119   : > { %v2691_v20 = vrot.slane %v2689_v41, 5  ;;  %v2697_v8 = vrot.slane %v2695_v19, 5  ;;  %3252 = vst.msk [vmem:[#allocation3 + $0x28] sm:$0xff] %vm8189_vm8, %v3209_v63  ;;  %v842_v14 = vld [vmem:[#allocation2 + $0x90] sm:$0xf]  ;;  %v5590_v25 = vrot.slane %v2972_v53, 9 }
 0x11a   : > { %v644_v13 = vsel %vm6121_vm7, %v636_v18, %v643_v15  ;;  %v2701_v17 = vrot.slane %v2699_v6, 4  ;;  %392 = vst [vmem:[#allocation2 + $0x98] sm:$0x1] %v391_v11  ;;  %v3110_v22 = vrot.slane %v2973_v4, 5  ;;  %v843_v51 = vsel %vm6129_vm10, %v635_v39, %v842_v14  ;;  %v4251_v29 = vpop.permute.xlu0 %4250  ;;  %v340_v38 = vld [vmem:[#allocation2 + $0xa8] sm:$0x1] }
 0x11b   : > { %2352 = vrot.lane.b32.xlu0 %v5982_v57, %s6032_s27  ;;  %845 = vst.msk [vmem:[#allocation2 + $0x94] sm:$0xf] %vm286_vm0, %v644_v13  ;;  %v2692_v55 = vor.u32 %v2691_v20, %v2688_v30  ;;  %v2707_v62 = vrot.slane %v2705_v26, 5  ;;  %844 = vst [vmem:[#allocation2 + $0x90] sm:$0xf] %v843_v51  ;;  %v3113_v32 = vrot.slane %v2974_v50, 5 }
 0x11c   : > { %2177 = vrot.lane.b32.xlu1 %v5543_v2, %s6033_s28  ;;  %v2702_v31 = vor.u32 %v2701_v17, %v2697_v8  ;;  %v3112_v23 = vrot.slane %v3110_v22, 4  ;;  %v338_v33 = vsel %vm6085_vm3, 0, %v337_v58  ;;  %v3387_v34 = vpop.permute.xlu1 %3386  ;;  %4295 = vst.msk [vmem:[#allocation3 + $0x20] sm:$0xff] %vm4290_vm12, %v4251_v29  ;;  %v645_v36 = vrot.slane %v6893_v27, 4  ;;  %v6921_v45 = vld [vmem:[%s6108_s26 + $0x68] sm:$0xf] }
 0x11d   : > { %v2693_v42 = vrot.slane %v2692_v55, 4  ;;  %339 = vst [vmem:[#allocation2 + $0x9c] sm:$0x1] %v338_v33  ;;  %v647_v43 = vshrl.u32 %v6900_v61, 16  ;;  %v655_v28 = vshrl.u32 %v433_v1, 16  ;;  %3430 = vst.msk [vmem:[#allocation3 + $0x28] sm:$0xff] %vm3424_vm9, %v3387_v34  ;;  %v3111_v48 = vsel %vm6165_vm13, %v5590_v25, %v3110_v22 }
 0x11e   : > { %v2703_v47 = vrot.slane %v2702_v31, 4  ;;  %v658_v49 = vshll.u32 %v433_v1, 16  ;;  %v394_v7 = vsel %vm6115_vm6, 0, %v393_v24  ;;  %v650_v37 = vshll.u32 %v6900_v61, 16  ;;  %v6012_v39 = vld [vmem:[#allocation2 + $0x78] sm:$0xff]  }
 0x11f   : > { %v2698_v60 = vsel %vm6201_vm14, %v2693_v42, %v2697_v8  ;;  %v649_v5 = vrot.slane %v647_v43, 7  ;;  %v6930_v12 = vrot.slane %v655_v28, 7  ;;  %395 = vst [vmem:[#allocation2 + $0xa4] sm:$0x1] %v394_v7  ;;  %v3114_v52 = vsel %vm6165_vm13, %v3112_v23, %v3113_v32  ;;  %1342 = vst.msk [vmem:[#allocation3 + $0x50] sm:$0xff] %vm990_vm15, %v6012_v39  ;;  %v6013_v42 = vld [vmem:[#allocation2 + $0x84] sm:$0xff]  }
 0x120   : > { %v2708_v9 = vsel %vm6201_vm14, %v2703_v47, %v2707_v62  ;;  %v341_v44 = vsel %vm6085_vm3, 0, %v340_v38  ;;  %v664_v59 = vshrl.u32 %v6921_v45, 16  ;;  %v3932_v35 = vpop.permute.xlu1 %3931  ;;  %v667_v56 = vshll.u32 %v6921_v45, 16  ;;  %v4253_v57 = vpop.permute.xlu0 %4252  ;;  %1343 = vst.msk [vmem:[#allocation3 + $0x58] sm:$0xff] %vm990_vm15, %v6013_v42 }
 0x121   : > { %v5574_v53 = vcombine.low %v2698_v60, %v2708_v9  ;;  %v846_v4 = vld [vmem:[#allocation2 + $0x98] sm:$0x1]  ;;  %v653_v54 = vrot.slane %v649_v5, 4  ;;  %v660_v27 = vor.u32 %v658_v49, %v6930_v12  ;;  %342 = vst [vmem:[#allocation2 + $0xa8] sm:$0x1] %v341_v44  ;;  %3975 = vst.msk [vmem:[#allocation3 + $0x28] sm:$0xff] %vm3969_vm11, %v3932_v35  ;;  %v5606_v15 = vcombine.low %v3111_v48, %v3114_v52 }
 0x122   : > { %v847_v18 = vsel %vm6085_vm3, %v645_v36, %v846_v4  ;;  %v2431_v41 = vld [vmem:[#allocation2 + $0x94] sm:$0xf]  ;;  %4296 = vst.msk [vmem:[#allocation3 + $0x28] sm:$0xff] %vm4290_vm12, %v4253_v57  ;;  %v2430_v46 = vld [vmem:[#allocation2 + $0x90] sm:$0xf]  ;;  %v652_v30 = vor.u32 %v650_v37, %v649_v5  ;;  %v662_v55 = vrot.slane %v6930_v12, 4 }
 0x123   : > { %v2976_v19 = vld [vmem:[#allocation2 + $0x94] sm:$0xf]  ;;  %2897 = vrot.lane.b32.xlu0 %v5574_v53, %s6038_s9  ;;  %848 = vst [vmem:[#allocation2 + $0x98] sm:$0x1] %v847_v18  ;;  %v2719_v2 = vshll.u32 %v2431_v41, 16  ;;  %v661_v6 = vsel %vm6121_vm7, %v653_v54, %v660_v27  ;;  %v2710_v50 = vshrl.u32 %v2430_v46, 16 }
 0x124   : > { %v5983_v58 = vld [vmem:[#allocation2 + $0x90] sm:$0xff]   ;;  %v2713_v61 = vshll.u32 %v2430_v46, 16  ;;  %v2723_v1 = vshrl.u32 %v2431_v41, 16  ;;  %v3117_v20 = vrot.slane %v2976_v19, 5  ;;  %852 = vst.msk [vmem:[#allocation2 + $0xa0] sm:$0xf] %vm286_vm0, %v661_v6  ;;  %v1844_v8 = vpop.permute.xlu1 %1843 }
 0x125   : > { %v2975_v63 = vld [vmem:[#allocation2 + $0x90] sm:$0xe]  ;;  %2354 = vrot.lane.b32.xlu1 %v5983_v58, %s6032_s27  ;;  %v6951_v26 = vrot.slane %v2719_v2, 5  ;;  %1886 = vst.msk [vmem:[#allocation3 + $0x30] sm:$0xff] %vm1879_vm1, %v1844_v8  ;;  %v2712_v13 = vrot.slane %v2710_v50, 4  ;;  %v4311_v51 = vld [vmem:[#allocation3 + $0x20] sm:$0xff] }
 0x126   : > { %v5591_v11 = vrot.slane %v2975_v63, 9  ;;  %v2715_v14 = vrot.slane %v2713_v61, 5  ;;  %v2725_v17 = vrot.slane %v2723_v1, 4  ;;  %v3119_v25 = vrot.slane %v3117_v20, 4  ;;  %v5986_v22 = vld [vmem:[#allocation2 + $0x90] sm:$0xff]   ;;  %v2168_v31 = vpop.permute.xlu0 %2167  ;;  %5912 = vmatprep.mubr.msk.bf16.mxu1 %vm4343_vm2, %v4311_v51 }
 0x127   : > { %3218 = vrot.lane.b32.xlu0 %v5606_v15, %s6036_s7  ;;  %v849_v62 = vld [vmem:[#allocation2 + $0x9c] sm:$0xf]  ;;  %v3471_v24 = vld [vmem:[#allocation2 + $0x90] sm:$0xf]  ;;  %v6956_v29 = vrot.slane %v664_v59, 7  ;;  %vm8190_vm8 = vcmask 97344  }
 0x128   : > { %v2716_v23 = vor.u32 %v2715_v14, %v2712_v13  ;;  %v2726_v32 = vor.u32 %v2725_v17, %v6951_v26  ;;  %v850_v33 = vsel %vm6129_vm10, %v652_v30, %v849_v62  ;;  %v3472_v34 = vld [vmem:[#allocation2 + $0x94] sm:$0xf]  ;;  %v3730_v38 = vshrl.u32 %v3471_v24, 16  ;;  %v853_v36 = vld [vmem:[#allocation2 + $0xa4] sm:$0x1]  ;;  %2210 = vst.msk [vmem:[#allocation3 + $0x30] sm:$0xff] %vm8190_vm8, %v2168_v31 }
 0x129   : > { %851 = vst [vmem:[#allocation2 + $0x9c] sm:$0xf] %v850_v33  ;;  %v3733_v43 = vshll.u32 %v3471_v24, 16  ;;  %v3739_v28 = vshll.u32 %v3472_v34, 16  ;;  %v3743_v47 = vshrl.u32 %v3472_v34, 16  ;;  %v854_v48 = vsel %vm6085_vm3, %v662_v55, %v853_v36  ;;  %v1846_v49 = vpop.permute.xlu1 %1845  ;;  %v4312_v7 = vld [vmem:[#allocation3 + $0x28] sm:$0xff] }
 0x12a   : > { %v2432_v60 = vld [vmem:[#allocation2 + $0x98] sm:$0x1]  ;;  %v2717_v5 = vrot.slane %v2716_v23, 4  ;;  %v2727_v37 = vrot.slane %v2726_v32, 4  ;;  %855 = vst [vmem:[#allocation2 + $0xa4] sm:$0x1] %v854_v48  ;;  %5913 = vmatmul.mubr.msk.bf16.gmra.mrb[8].mxu1 %vm4343_vm2, %v4312_v7  ;;  %v6970_v52 = vsel %vm6165_vm13, %v5591_v11, %v3117_v20  ;;  %v2345_v35 = vpop.permute.xlu0 %2344  ;;  %v6985_v20 = vor.u32 %v667_v56, %v6956_v29 }
 0x12b   : > { %v2977_v12 = vld [vmem:[#allocation2 + $0x98] sm:$0x1]  ;;  %1887 = vst.msk [vmem:[#allocation3 + $0x38] sm:$0xff] %vm1879_vm1, %v1846_v49  ;;  %v2729_v9 = vshll.u32 %v2432_v60, 16  ;;  %3396 = vrot.lane.b32.xlu0 %v5986_v22, %s6034_s29  ;;  %v3732_v4 = vrot.slane %v3730_v38, 4  ;;  %v3735_v54 = vrot.slane %v3733_v43, 5 }
 0x12c   : > { %v3120_v44 = vrot.slane %v2977_v12, 5  ;;  %v3473_v59 = vld [vmem:[#allocation2 + $0x98] sm:$0x1]  ;;  %v2722_v53 = vsel %vm6201_vm14, %v2717_v5, %v6951_v26  ;;  %v3741_v27 = vrot.slane %v3739_v28, 5  ;;  %v3475_v57 = vld [vmem:[#allocation2 + $0xa0] sm:$0xf] }
 0x12d   : > { %2387 = vst.msk [vmem:[#allocation3 + $0x30] sm:$0xff] %vm2380_vm4, %v2345_v35  ;;  %v2731_v39 = vrot.slane %v2729_v9, 5  ;;  %v3745_v41 = vrot.slane %v3743_v47, 4  ;;  %v3749_v19 = vshll.u32 %v3473_v59, 16  ;;  %v4016_v58 = vld [vmem:[#allocation2 + $0x90] sm:$0xe]  ;;  %v2170_v46 = vpop.permute.xlu1 %2169  ;;  %v3736_v2 = vor.u32 %v3735_v54, %v3732_v4 }
 0x12e   : > { %v3121_v18 = vsel %vm6165_vm13, %v3119_v25, %v3120_v44  ;;  %v3763_v15 = vshll.u32 %v3475_v57, 16  ;;  %v3767_v30 = vshrl.u32 %v3475_v57, 16  ;;  %2211 = vst.msk [vmem:[#allocation3 + $0x38] sm:$0xff] %vm8190_vm8, %v2170_v46  ;;  %v4017_v1 = vld [vmem:[#allocation2 + $0x94] sm:$0xf]  ;;  %v5654_v14 = vrot.slane %v4016_v58, 9 }
 0x12f   : > { %v2732_v6 = vsel %vm6201_vm14, %v2727_v37, %v2731_v39  ;;  %v3746_v50 = vor.u32 %v3745_v41, %v3741_v27  ;;  %v3751_v61 = vrot.slane %v3749_v19, 5  ;;  %v4018_v63 = vld [vmem:[#allocation2 + $0x98] sm:$0x1]  ;;  %v5607_v26 = vcombine.low %v6970_v52, %v3121_v18  ;;  %v1384_v17 = vld [vmem:[#allocation2 + $0x90] sm:$0xf] }
 0x130   : > { %v5575_v8 = vcombine.low %v2722_v53, %v2732_v6  ;;  %v3737_v11 = vrot.slane %v3736_v2, 4  ;;  %v3474_v13 = vld [vmem:[#allocation2 + $0x9c] sm:$0xf]  ;;  %v3765_v62 = vrot.slane %v3763_v15, 5  ;;  %v3769_v45 = vrot.slane %v3767_v30, 4  ;;  %v6018_v52 = vld [vmem:[#allocation2 + $0x90] sm:$0xff]  }
 0x131   : > { %v3747_v25 = vrot.slane %v3746_v50, 4  ;;  %v3476_v22 = vld [vmem:[#allocation2 + $0xa4] sm:$0x1]  ;;  %v3754_v51 = vshrl.u32 %v3474_v13, 16  ;;  %v3757_v55 = vshll.u32 %v3474_v13, 16  ;;  %v4154_v31 = vrot.slane %v4017_v1, 5 }
 0x132   : > { %2899 = vrot.lane.b32.xlu1 %v5575_v8, %s6038_s9  ;;  %v3742_v24 = vsel %vm6201_vm14, %v3737_v11, %v3741_v27  ;;  %v3773_v56 = vshll.u32 %v3476_v22, 16  ;;  %v1385_v23 = vld [vmem:[#allocation2 + $0x94] sm:$0xf]  ;;  %v4157_v38 = vrot.slane %v4018_v63, 5  ;;  %v1386_v36 = vld [vmem:[#allocation2 + $0x98] sm:$0x1]  ;;  %v3770_v28 = vor.u32 %v3769_v45, %v3765_v62  ;;  %v2347_v49 = vpop.permute.xlu1 %2346 }
 0x133   : > { %v3752_v32 = vsel %vm6201_vm14, %v3747_v25, %v3751_v61  ;;  %v3756_v33 = vrot.slane %v3754_v51, 4  ;;  %v3759_v34 = vrot.slane %v3757_v55, 5  ;;  %v5987_v42 = vld [vmem:[#allocation2 + $0x9c] sm:$0xff]   ;;  %v4155_v48 = vsel %vm6165_vm13, %v5654_v14, %v4154_v31  ;;  %v2890_v7 = vpop.permute.xlu0 %2889  ;;  %2388 = vst.msk [vmem:[#allocation3 + $0x38] sm:$0xff] %vm2380_vm4, %v2347_v49  ;;  %v4021_v18 = vld [vmem:[#allocation2 + $0xa4] sm:$0x1] }
 0x134   : > { %v5638_v43 = vcombine.low %v3742_v24, %v3752_v32  ;;  %v3775_v47 = vrot.slane %v3773_v56, 5  ;;  %v4156_v5 = vrot.slane %v4154_v31, 4  ;;  %v1688_v37 = vshrl.u32 %v1384_v17, 16  ;;  %v4019_v9 = vld [vmem:[#allocation2 + $0x9c] sm:$0xe]  ;;  %2932 = vst.msk [vmem:[#allocation3 + $0x30] sm:$0xff] %vm2925_vm5, %v2890_v7 }
 0x135   : > { %v3760_v60 = vor.u32 %v3759_v34, %v3756_v33  ;;  %v1691_v12 = vshll.u32 %v1384_v17, 16  ;;  %v3771_v44 = vrot.slane %v3770_v28, 4  ;;  %v1697_v59 = vshll.u32 %v1385_v23, 16  ;;  %v4020_v4 = vld [vmem:[#allocation2 + $0xa0] sm:$0xf]  ;;  %1344 = vst.msk [vmem:[#allocation3 + $0x60] sm:$0xff] %vm990_vm15, %v6018_v52 }
 0x136   : > { %3220 = vrot.lane.b32.xlu1 %v5607_v26, %s6036_s7  ;;  %3941 = vrot.lane.b32.xlu0 %v5638_v43, %s6039_s10  ;;  %v1701_v35 = vshrl.u32 %v1385_v23, 16  ;;  %v1707_v53 = vshll.u32 %v1386_v36, 16  ;;  %v4158_v27 = vsel %vm6165_vm13, %v4156_v5, %v4157_v38  ;;  %v1690_v57 = vrot.slane %v1688_v37, 4  ;;  %v6019_v41 = vld [vmem:[#allocation2 + $0x9c] sm:$0xff]   ;;  %v1389_v8 = vld [vmem:[#allocation2 + $0xa4] sm:$0x1] }
 0x137   : > { %v3761_v54 = vrot.slane %v3760_v60, 4  ;;  %v1693_v39 = vrot.slane %v1691_v12, 5  ;;  %v3776_v19 = vsel %vm6201_vm14, %v3771_v44, %v3775_v47  ;;  %v5670_v58 = vcombine.low %v4155_v48, %v4158_v27  ;;  %v1387_v15 = vld [vmem:[#allocation2 + $0x9c] sm:$0xf]  ;;  %v1388_v30 = vld [vmem:[#allocation2 + $0xa0] sm:$0xf]  ;;  %v3211_v6 = vpop.permute.xlu0 %3210 }
 0x138   : > { %v1699_v46 = vrot.slane %v1697_v59, 5  ;;  %v1703_v2 = vrot.slane %v1701_v35, 4  ;;  %v1709_v1 = vrot.slane %v1707_v53, 5  ;;  %v5655_v63 = vrot.slane %v4019_v9, 9  ;;  %1345 = vst.msk [vmem:[#allocation3 + $0x68] sm:$0xff] %vm990_vm15, %v6019_v41 }
 0x139   : > { %v3766_v50 = vsel %vm6201_vm14, %v3761_v54, %v3765_v62  ;;  %v1694_v61 = vor.u32 %v1693_v39, %v1690_v57  ;;  %vm8191_vm8 = vcmask 195744   ;;  %v4161_v13 = vrot.slane %v4020_v4, 5  ;;  %v1932_v17 = vld [vmem:[#allocation2 + $0x90] sm:$0xe]  ;;  %v1933_v62 = vld [vmem:[#allocation2 + $0x94] sm:$0xf] }
 0x13a   : > { %3253 = vst.msk [vmem:[#allocation3 + $0x30] sm:$0xff] %vm8191_vm8, %v3211_v6  ;;  %3398 = vrot.lane.b32.xlu1 %v5987_v42, %s6034_s29  ;;  %v5639_v26 = vcombine.low %v3766_v50, %v3776_v19  ;;  %4262 = vrot.lane.b32.xlu0 %v5670_v58, %s6037_s8  ;;  %v1704_v11 = vor.u32 %v1703_v2, %v1699_v46  ;;  %v4164_v14 = vrot.slane %v4021_v18, 5  ;;  %v1712_v22 = vshrl.u32 %v1387_v15, 16  ;;  %v1934_v23 = vld [vmem:[#allocation2 + $0x98] sm:$0x1] }
 0x13b   : > { %v1695_v25 = vrot.slane %v1694_v61, 4  ;;  %v1715_v51 = vshll.u32 %v1387_v15, 16  ;;  %v1721_v55 = vshll.u32 %v1388_v30, 16  ;;  %v4162_v45 = vsel %vm6165_vm13, %v5655_v63, %v4161_v13  ;;  %v3389_v32 = vpop.permute.xlu0 %3388  ;;  %v1935_v42 = vld [vmem:[#allocation2 + $0x9c] sm:$0xe] }
 0x13c   : > { %v1705_v24 = vrot.slane %v1704_v11, 4  ;;  %v4163_v56 = vrot.slane %v4161_v13, 4  ;;  %v1725_v31 = vshrl.u32 %v1388_v30, 16  ;;  %v1714_v34 = vrot.slane %v1712_v22, 4  ;;  %3431 = vst.msk [vmem:[#allocation3 + $0x30] sm:$0xff] %vm3424_vm9, %v3389_v32 }
 0x13d   : > { %v1700_v33 = vsel %vm6201_vm14, %v1695_v25, %v1699_v46  ;;  %v1717_v38 = vrot.slane %v1715_v51, 5  ;;  %v1723_v36 = vrot.slane %v1721_v55, 5  ;;  %v1731_v48 = vshll.u32 %v1389_v8, 16  ;;  %v1936_v49 = vld [vmem:[#allocation2 + $0xa0] sm:$0xf] }
 0x13e   : > { %3943 = vrot.lane.b32.xlu1 %v5639_v26, %s6039_s10  ;;  %v1710_v43 = vsel %vm6201_vm14, %v1705_v24, %v1709_v1  ;;  %v4165_v28 = vsel %vm6165_vm13, %v4163_v56, %v4164_v14  ;;  %v1727_v47 = vrot.slane %v1725_v31, 4  ;;  %v1937_v7 = vld [vmem:[#allocation2 + $0xa4] sm:$0x1]  ;;  %v5528_v12 = vrot.slane %v1932_v17, 9  ;;  %v435_v9 = vld [vmem:[%s6108_s26 + $0x6c] sm:$0xf] }
 0x13f   : > { %v5512_v60 = vcombine.low %v1700_v33, %v1710_v43  ;;  %v5671_v5 = vcombine.low %v4162_v45, %v4165_v28  ;;  %v1718_v37 = vor.u32 %v1717_v38, %v1714_v34  ;;  %v1733_v44 = vrot.slane %v1731_v48, 5  ;;  %v856_v53 = vld [vmem:[#allocation2 + $0xa8] sm:$0xf]  ;;  %v2433_v39 = vld [vmem:[#allocation2 + $0x9c] sm:$0xf] }
 0x140   : > { %v1728_v52 = vor.u32 %v1727_v47, %v1723_v36  ;;  %v2081_v59 = vrot.slane %v1933_v62, 5  ;;  %v2084_v35 = vrot.slane %v1934_v23, 5  ;;  %v5529_v54 = vrot.slane %v1935_v42, 9  ;;  %v2434_v18 = vld [vmem:[#allocation2 + $0xa0] sm:$0xf] }
 0x141   : > { %4264 = vrot.lane.b32.xlu0 %v5671_v5, %s6037_s8  ;;  %v1719_v4 = vrot.slane %v1718_v37, 4  ;;  %v2088_v27 = vrot.slane %v1936_v49, 5  ;;  %v2091_v57 = vrot.slane %v1937_v7, 5  ;;  %v670_v46 = vrot.slane %v6956_v29, 4  ;;  %v2435_v8 = vld [vmem:[#allocation2 + $0xa4] sm:$0x1] }
 0x142   : > { %1855 = vrot.lane.b32.xlu1 %v5512_v60, %s6035_s30  ;;  %v1729_v41 = vrot.slane %v1728_v52, 4  ;;  %v2082_v19 = vsel %vm6165_vm13, %v5528_v12, %v2081_v59  ;;  %v2083_v58 = vrot.slane %v2081_v59, 4  ;;  %v672_v6 = vshrl.u32 %v435_v9, 16  ;;  %v2892_v50 = vpop.permute.xlu1 %2891  ;;  %v396_v26 = vld [vmem:[#allocation2 + $0xb0] sm:$0x1]  ;;  %v5988_v31 = vld [vmem:[#allocation2 + $0x9c] sm:$0xff]  }
 0x143   : > { %v1724_v2 = vsel %vm6201_vm14, %v1719_v4, %v1723_v36  ;;  %v2089_v15 = vsel %vm6165_vm13, %v5529_v54, %v2088_v27  ;;  %v2090_v30 = vrot.slane %v2088_v27, 4  ;;  %v675_v63 = vshll.u32 %v435_v9, 16  ;;  %2933 = vst.msk [vmem:[#allocation3 + $0x38] sm:$0xff] %vm2925_vm5, %v2892_v50  ;;  %v2978_v25 = vld [vmem:[#allocation2 + $0x9c] sm:$0xe] }
 0x144   : > { %v1734_v61 = vsel %vm6201_vm14, %v1729_v41, %v1733_v44  ;;  %v2085_v1 = vsel %vm6165_vm13, %v2083_v58, %v2084_v35  ;;  %v857_v29 = vsel %vm6129_vm10, %v6985_v20, %v856_v53  ;;  %v7040_v17 = vrot.slane %v672_v6, 7  ;;  %v343_v22 = vld [vmem:[#allocation2 + $0xb4] sm:$0x1]  ;;  %v3934_v51 = vpop.permute.xlu0 %3933  ;;  %v2979_v45 = vld [vmem:[#allocation2 + $0xa0] sm:$0xf] }
 0x145   : > { %v5513_v11 = vcombine.low %v1724_v2, %v1734_v61  ;;  %v5544_v13 = vcombine.low %v2082_v19, %v2085_v1  ;;  %v2092_v14 = vsel %vm6165_vm13, %v2090_v30, %v2091_v57  ;;  %858 = vst [vmem:[#allocation2 + $0xa8] sm:$0xf] %v857_v29  ;;  %v2734_v62 = vshrl.u32 %v2433_v39, 16  ;;  %v436_v56 = vld [vmem:[%s6108_s26 + $0x70] sm:$0xf]  ;;  %3976 = vst.msk [vmem:[#allocation3 + $0x30] sm:$0xff] %vm3969_vm11, %v3934_v51 }
 0x146   : > { %v5545_v55 = vcombine.low %v2089_v15, %v2092_v14  ;;  %v2737_v24 = vshll.u32 %v2433_v39, 16  ;;  %v2743_v20 = vshll.u32 %v2434_v18, 16  ;;  %v677_v23 = vor.u32 %v675_v63, %v7040_v17  ;;  %v2980_v38 = vld [vmem:[#allocation2 + $0xa4] sm:$0x1]  ;;  %v3213_v36 = vpop.permute.xlu1 %3212  ;;  %v437_v48 = vld [vmem:[%s6108_s26 + $0x74] sm:$0xf] }
 0x147   : > { %1857 = vrot.lane.b32.xlu1 %v5513_v11, %s6035_s30  ;;  %2179 = vrot.lane.b32.xlu0 %v5544_v13, %s6033_s28  ;;  %v679_v32 = vrot.slane %v7040_v17, 4  ;;  %v2747_v33 = vshrl.u32 %v2434_v18, 16  ;;  %v2753_v34 = vshll.u32 %v2435_v8, 16  ;;  %v2736_v42 = vrot.slane %v2734_v62, 4  ;;  %3254 = vst.msk [vmem:[#allocation3 + $0x38] sm:$0xff] %vm8191_vm8, %v3213_v36 }
 0x148   : > { %v2739_v43 = vrot.slane %v2737_v24, 5  ;;  %v2745_v28 = vrot.slane %v2743_v20, 5  ;;  %v397_v47 = vsel %vm6115_vm6, 0, %v396_v26  ;;  %v678_v49 = vsel %vm6121_vm7, %v670_v46, %v677_v23  ;;  %v4255_v37 = vpop.permute.xlu0 %4254 }
 0x149   : > { %v2749_v7 = vrot.slane %v2747_v33, 4  ;;  %v2755_v60 = vrot.slane %v2753_v34, 5  ;;  %398 = vst [vmem:[#allocation2 + $0xb0] sm:$0x1] %v397_v47  ;;  %v5592_v5 = vrot.slane %v2978_v25, 9  ;;  %v3124_v9 = vrot.slane %v2979_v45, 5 }
 0x14a   : > { %859 = vst.msk [vmem:[#allocation2 + $0xac] sm:$0xf] %vm286_vm0, %v678_v49  ;;  %v2740_v12 = vor.u32 %v2739_v43, %v2736_v42  ;;  %v3127_v52 = vrot.slane %v2980_v38, 5  ;;  %v344_v44 = vsel %vm6085_vm3, 0, %v343_v22  ;;  %v681_v35 = vshrl.u32 %v436_v56, 16  ;;  %v3391_v54 = vpop.permute.xlu1 %3390 }
 0x14b   : > { %4297 = vst.msk [vmem:[#allocation3 + $0x30] sm:$0xff] %vm4290_vm12, %v4255_v37  ;;  %2181 = vrot.lane.b32.xlu1 %v5545_v55, %s6033_s28  ;;  %2356 = vrot.lane.b32.xlu0 %v5988_v31, %s6032_s27  ;;  %v2750_v59 = vor.u32 %v2749_v7, %v2745_v28  ;;  %345 = vst [vmem:[#allocation2 + $0xb4] sm:$0x1] %v344_v44  ;;  %v684_v53 = vshll.u32 %v436_v56, 16  ;;  %v689_v4 = vshrl.u32 %v437_v48, 16  ;;  %v3126_v39 = vrot.slane %v3124_v9, 4 }
 0x14c   : > { %v2741_v27 = vrot.slane %v2740_v12, 4  ;;  %v2436_v57 = vld [vmem:[#allocation2 + $0xa8] sm:$0xf]  ;;  %3432 = vst.msk [vmem:[#allocation3 + $0x38] sm:$0xff] %vm3424_vm9, %v3391_v54  ;;  %v683_v58 = vrot.slane %v681_v35, 7  ;;  %v3125_v2 = vsel %vm6165_vm13, %v5592_v5, %v3124_v9  ;;  %v692_v11 = vshll.u32 %v437_v48, 16 }
 0x14d   : > { %v2751_v18 = vrot.slane %v2750_v59, 4  ;;  %v2758_v41 = vshrl.u32 %v2436_v57, 16  ;;  %v2761_v19 = vshll.u32 %v2436_v57, 16  ;;  %v7065_v15 = vld [vmem:[#allocation2 + $0xa8] sm:$0xe]  ;;  %v7067_v30 = vrot.slane %v689_v4, 7 }
 0x14e   : > { %v2746_v46 = vsel %vm6201_vm14, %v2741_v27, %v2745_v28  ;;  %v3128_v1 = vsel %vm6165_vm13, %v3126_v39, %v3127_v52  ;;  %v686_v8 = vor.u32 %v684_v53, %v683_v58  ;;  %v687_v26 = vrot.slane %v683_v58, 4  ;;  %v3477_v13 = vld [vmem:[#allocation2 + $0xa8] sm:$0xf]  ;;  %v399_v31 = vld [vmem:[#allocation2 + $0xbc] sm:$0x1] }
 0x14f   : > { %v2756_v6 = vsel %vm6201_vm14, %v2751_v18, %v2755_v60  ;;  %v2760_v50 = vrot.slane %v2758_v41, 4  ;;  %v2763_v61 = vrot.slane %v2761_v19, 5  ;;  %v5593_v51 = vrot.slane %v7065_v15, 9  ;;  %v4257_v55 = vpop.permute.xlu0 %4256  ;;  %v7078_v23 = vld [vmem:[#allocation2 + $0xa8] sm:$0xe] }
 0x150   : > { %v5576_v63 = vcombine.low %v2746_v46, %v2756_v6  ;;  %v860_v29 = vld [vmem:[#allocation2 + $0xb0] sm:$0x1]  ;;  %v5608_v20 = vcombine.low %v3125_v2, %v3128_v1  ;;  %v694_v56 = vor.u32 %v692_v11, %v7067_v30  ;;  %v3936_v33 = vpop.permute.xlu1 %3935  ;;  %v3778_v38 = vshrl.u32 %v3477_v13, 16  ;;  %v7081_v36 = vld [vmem:[#allocation2 + $0xa8] sm:$0xf] }
 0x151   : > { %v5989_v14 = vld [vmem:[#allocation2 + $0xa8] sm:$0xff]   ;;  %v861_v17 = vsel %vm6085_vm3, %v679_v32, %v860_v29  ;;  %v2764_v22 = vor.u32 %v2763_v61, %v2760_v50  ;;  %3977 = vst.msk [vmem:[#allocation3 + $0x38] sm:$0xff] %vm3969_vm11, %v3936_v33  ;;  %v696_v60 = vrot.slane %v7067_v30, 4  ;;  %v3781_v37 = vshll.u32 %v3477_v13, 16 }
 0x152   : > { %v2437_v25 = vld [vmem:[#allocation2 + $0xac] sm:$0xf]  ;;  %2901 = vrot.lane.b32.xlu0 %v5576_v63, %s6038_s9  ;;  %862 = vst [vmem:[#allocation2 + $0xb0] sm:$0x1] %v861_v17  ;;  %2358 = vrot.lane.b32.xlu1 %v5989_v14, %s6032_s27  ;;  %v863_v34 = vld [vmem:[#allocation2 + $0xb4] sm:$0xf]  ;;  %v695_v28 = vsel %vm6121_vm7, %v687_v26, %v694_v56 }
 0x153   : > { %v2767_v62 = vshll.u32 %v2437_v25, 16  ;;  %v2771_v24 = vshrl.u32 %v2437_v25, 16  ;;  %v2982_v45 = vld [vmem:[#allocation2 + $0xac] sm:$0xf]  ;;  %v864_v47 = vsel %vm6129_vm10, %v686_v8, %v863_v34  ;;  %4298 = vst.msk [vmem:[#allocation3 + $0x38] sm:$0xff] %vm4290_vm12, %v4257_v55  ;;  %v7091_v7 = vrot.slane %v2764_v22, 4 }
 0x154   : > { %v3131_v32 = vrot.slane %v2982_v45, 5  ;;  %v3478_v48 = vld [vmem:[#allocation2 + $0xac] sm:$0xf]  ;;  %865 = vst [vmem:[#allocation2 + $0xb4] sm:$0xf] %v864_v47  ;;  %v3780_v5 = vrot.slane %v3778_v38, 4  ;;  %v1848_v53 = vpop.permute.xlu1 %1847 }
 0x155   : > { %v7084_v42 = vrot.slane %v2767_v62, 5  ;;  %v2773_v43 = vrot.slane %v2771_v24, 4  ;;  %v4023_v49 = vld [vmem:[#allocation2 + $0xac] sm:$0xf]  ;;  %866 = vst.msk [vmem:[#allocation2 + $0xb8] sm:$0xf] %vm286_vm0, %v695_v28  ;;  %v2172_v39 = vpop.permute.xlu0 %2171 }
 0x156   : > { %v4313_v12 = vld [vmem:[#allocation3 + $0x30] sm:$0xff]  ;;  %3222 = vrot.lane.b32.xlu0 %v5608_v20, %s6036_s7  ;;  %v3133_v52 = vrot.slane %v3131_v32, 4  ;;  %v3787_v59 = vshll.u32 %v3478_v48, 16  ;;  %v3791_v35 = vshrl.u32 %v3478_v48, 16  ;;  %v3783_v4 = vrot.slane %v3781_v37, 5  ;;  %1888 = vst.msk [vmem:[#allocation3 + $0x40] sm:$0xff] %vm1879_vm1, %v1848_v53 }
 0x157   : > { %v2774_v9 = vor.u32 %v2773_v43, %v7084_v42  ;;  %v5992_v44 = vld [vmem:[#allocation2 + $0xa8] sm:$0xff]   ;;  %5916 = vmatprep.mubr.msk.bf16.mxu1 %vm4343_vm2, %v4313_v12  ;;  %v400_v54 = vsel %vm6115_vm6, 0, %v399_v31  ;;  %v5656_v27 = vrot.slane %v7078_v23, 9  ;;  %v4168_v57 = vrot.slane %v4023_v49, 5 }
 0x158   : > { %v3789_v41 = vrot.slane %v3787_v59, 5  ;;  %v3793_v19 = vrot.slane %v3791_v35, 4  ;;  %401 = vst [vmem:[#allocation2 + $0xbc] sm:$0x1] %v400_v54  ;;  %v1736_v58 = vshrl.u32 %v7081_v36, 16  ;;  %vm8192_vm8 = vcmask 97344   ;;  %v1850_v26 = vpop.permute.xlu1 %1849 }
 0x159   : > { %v2775_v18 = vrot.slane %v2774_v9, 4  ;;  %2212 = vst.msk [vmem:[#allocation3 + $0x40] sm:$0xff] %vm8192_vm8, %v2172_v39  ;;  %v2438_v46 = vld [vmem:[#allocation2 + $0xb0] sm:$0x1]  ;;  %v7106_v15 = vsel %vm6165_vm13, %v5593_v51, %v3131_v32  ;;  %v3784_v50 = vor.u32 %v3783_v4, %v3780_v5  ;;  %v2770_v11 = vsel %vm6201_vm14, %v7091_v7, %v7084_v42  ;;  %v2349_v25 = vpop.permute.xlu0 %2348  ;;  %v1391_v42 = vld [vmem:[#allocation2 + $0xac] sm:$0xf] }
 0x15a   : > { %v2983_v2 = vld [vmem:[#allocation2 + $0xb0] sm:$0x1]  ;;  %v2777_v61 = vshll.u32 %v2438_v46, 16  ;;  %3400 = vrot.lane.b32.xlu0 %v5992_v44, %s6034_s29  ;;  %v3794_v63 = vor.u32 %v3793_v19, %v3789_v41  ;;  %v4170_v14 = vrot.slane %v4168_v57, 4  ;;  %1889 = vst.msk [vmem:[#allocation3 + $0x48] sm:$0xff] %vm1879_vm1, %v1850_v26  ;;  %v4169_v55 = vsel %vm6165_vm13, %v5656_v27, %v4168_v57 }
 0x15b   : > { %v3479_v6 = vld [vmem:[#allocation2 + $0xb0] sm:$0x1]  ;;  %v3134_v1 = vrot.slane %v2983_v2, 5  ;;  %v3785_v13 = vrot.slane %v3784_v50, 4  ;;  %v7118_v62 = vrot.slane %v1736_v58, 4  ;;  %2389 = vst.msk [vmem:[#allocation3 + $0x40] sm:$0xff] %vm2380_vm4, %v2349_v25 }
 0x15c   : > { %v3797_v29 = vshll.u32 %v3479_v6, 16  ;;  %v4024_v8 = vld [vmem:[#allocation2 + $0xb0] sm:$0x1]  ;;  %v2779_v22 = vrot.slane %v2777_v61, 5  ;;  %v3795_v45 = vrot.slane %v3794_v63, 4  ;;  %v2174_v43 = vpop.permute.xlu1 %2173  ;;  %v1739_v54 = vshll.u32 %v7081_v36, 16 }
 0x15d   : > { %v4171_v17 = vrot.slane %v4024_v8, 5  ;;  %v3135_v51 = vsel %vm6165_vm13, %v3133_v52, %v3134_v1  ;;  %v3790_v20 = vsel %vm6201_vm14, %v3785_v13, %v3789_v41  ;;  %v3480_v31 = vld [vmem:[#allocation2 + $0xb4] sm:$0xf]  ;;  %v3481_v23 = vld [vmem:[#allocation2 + $0xb8] sm:$0xf]  ;;  %2213 = vst.msk [vmem:[#allocation3 + $0x48] sm:$0xff] %vm8192_vm8, %v2174_v43 }
 0x15e   : > { %v5609_v24 = vcombine.low %v7106_v15, %v3135_v51  ;;  %v3799_v56 = vrot.slane %v3797_v29, 5  ;;  %v2780_v33 = vsel %vm6201_vm14, %v2775_v18, %v2779_v22  ;;  %v3802_v32 = vshrl.u32 %v3480_v31, 16  ;;  %v1392_v5 = vld [vmem:[#allocation2 + $0xb0] sm:$0x1]  ;;  %v4026_v59 = vld [vmem:[#allocation2 + $0xb8] sm:$0xf] }
 0x15f   : > { %v3805_v34 = vshll.u32 %v3480_v31, 16  ;;  %v3811_v38 = vshll.u32 %v3481_v23, 16  ;;  %v5577_v28 = vcombine.low %v2770_v11, %v2780_v33  ;;  %v867_v48 = vld [vmem:[#allocation2 + $0xbc] sm:$0x1]  ;;  %v3815_v49 = vshrl.u32 %v3481_v23, 16  ;;  %v4314_v37 = vld [vmem:[#allocation3 + $0x38] sm:$0xff] }
 0x160   : > { %v3800_v47 = vsel %vm6201_vm14, %v3795_v45, %v3799_v56  ;;  %v4172_v7 = vsel %vm6165_vm13, %v4170_v14, %v4171_v17  ;;  %v868_v9 = vsel %vm6085_vm3, %v696_v60, %v867_v48  ;;  %v3804_v52 = vrot.slane %v3802_v32, 4  ;;  %5917 = vmatmul.mubr.msk.bf16.gmra.mrb[12].mxu1 %vm4343_vm2, %v4314_v37  ;;  %v4025_v27 = vld [vmem:[#allocation2 + $0xb4] sm:$0xe]  ;;  %v1394_v46 = vld [vmem:[#allocation2 + $0xb8] sm:$0xf]  ;;  %v6020_v2 = vld [vmem:[#allocation2 + $0xa8] sm:$0xff]  }
 0x161   : > { %v5640_v12 = vcombine.low %v3790_v20, %v3800_v47  ;;  %v3807_v44 = vrot.slane %v3805_v34, 5  ;;  %2903 = vrot.lane.b32.xlu1 %v5577_v28, %s6038_s9  ;;  %869 = vst [vmem:[#allocation2 + $0xbc] sm:$0x1] %v868_v9  ;;  %v7137_v35 = vrot.slane %v3811_v38, 5  ;;  %v3817_v53 = vrot.slane %v3815_v49, 4  ;;  %v5993_v50 = vld [vmem:[#allocation2 + $0xb4] sm:$0xff]  }
 0x162   : > { %v5672_v4 = vcombine.low %v4169_v55, %v4172_v7  ;;  %v1745_v57 = vshll.u32 %v1391_v42, 16  ;;  %v1749_v60 = vshrl.u32 %v1391_v42, 16  ;;  %v1755_v39 = vshll.u32 %v1392_v5, 16  ;;  %v1393_v18 = vld [vmem:[#allocation2 + $0xb4] sm:$0xf]  ;;  %1346 = vst.msk [vmem:[#allocation3 + $0x70] sm:$0xff] %vm990_vm15, %v6020_v2 }
 0x163   : > { %3945 = vrot.lane.b32.xlu0 %v5640_v12, %s6039_s10  ;;  %v3808_v30 = vor.u32 %v3807_v44, %v3804_v52  ;;  %v3818_v41 = vor.u32 %v3817_v53, %v7137_v35  ;;  %v1741_v19 = vrot.slane %v1739_v54, 5  ;;  %v4175_v58 = vrot.slane %v4026_v59, 5  ;;  %v5995_v17 = vld [vmem:[%s6108_s26 + $0x8] sm:$0xff]   ;;  %v5998_v25 = vld [vmem:[%s6108_s26 + $0x10] sm:$0xff]  }
 0x164   : > { %v7142_v15 = vrot.slane %v1745_v57, 5  ;;  %v1751_v6 = vrot.slane %v1749_v60, 4  ;;  %v5657_v36 = vrot.slane %v4025_v27, 9  ;;  %v7150_v29 = vrot.slane %v1755_v39, 5  ;;  %v2894_v8 = vpop.permute.xlu0 %2893  ;;  %v1938_v45 = vld [vmem:[#allocation2 + $0xa8] sm:$0xe] }
 0x165   : > { %3224 = vrot.lane.b32.xlu1 %v5609_v24, %s6036_s7  ;;  %v7145_v61 = vrot.slane %v3808_v30, 4  ;;  %v7147_v1 = vrot.slane %v3818_v41, 4  ;;  %v1742_v63 = vor.u32 %v1741_v19, %v7118_v62  ;;  %v4177_v11 = vrot.slane %v4175_v58, 4  ;;  %v2351_v22 = vpop.permute.xlu1 %2350  ;;  %2934 = vst.msk [vmem:[#allocation3 + $0x40] sm:$0xff] %vm2925_vm5, %v2894_v8  ;;  %v6022_v24 = vld [vmem:[%s8161_s2] sm:$0x3] }
 0x166   : > { %v1752_v26 = vor.u32 %v1751_v6, %v7142_v15  ;;  %v1760_v13 = vshrl.u32 %v1393_v18, 16  ;;  %v1763_v14 = vshll.u32 %v1393_v18, 16  ;;  %v1769_v55 = vshll.u32 %v1394_v46, 16  ;;  %2390 = vst.msk [vmem:[#allocation3 + $0x48] sm:$0xff] %vm2380_vm4, %v2351_v22  ;;  %v1939_v34 = vld [vmem:[#allocation2 + $0xac] sm:$0xf] }
 0x167   : > { %4266 = vrot.lane.b32.xlu0 %v5672_v4, %s6037_s8  ;;  %v7158_v51 = vrot.slane %v1742_v63, 4  ;;  %v1773_v62 = vshrl.u32 %v1394_v46, 16  ;;  %vm8193_vm8 = vcmask 1041408   ;;  %v4176_v33 = vsel %vm6165_vm13, %v5657_v36, %v4175_v58  ;;  %v1940_v38 = vld [vmem:[#allocation2 + $0xb0] sm:$0x1]  ;;  %v6021_v7 = vld [vmem:[#allocation2 + $0xb4] sm:$0xff]  }
 0x168   : > { %v1041_v20 = vsel %vm8193_vm8, %v6022_v24, 0  ;;  %v3482_v56 = vld [vmem:[#allocation2 + $0xbc] sm:$0x1]  ;;  %v1753_v31 = vrot.slane %v1752_v26, 4  ;;  %v1762_v32 = vrot.slane %v1760_v13, 4  ;;  %v3814_v42 = vsel %vm6201_vm14, %v7145_v61, %v7137_v35  ;;  %v3215_v49 = vpop.permute.xlu0 %3214  ;;  %1347 = vst.msk [vmem:[#allocation3 + $0x78] sm:$0xff] %vm990_vm15, %v6021_v7 }
 0x169   : > { %v4027_v23 = vld [vmem:[#allocation2 + $0xbc] sm:$0x1]  ;;  %5865 = vmatpush3.bf16.msra.mxu0 %v1041_v20  ;;  %3402 = vrot.lane.b32.xlu1 %v5993_v50, %s6034_s29  ;;  %v3821_v43 = vshll.u32 %v3482_v56, 16  ;;  %v1765_v48 = vrot.slane %v1763_v14, 5  ;;  %v1748_v5 = vsel %vm6201_vm14, %v7158_v51, %v7142_v15  ;;  %v1771_v37 = vrot.slane %v1769_v55, 5  ;;  %v6003_v22 = vld [vmem:[%s6108_s26 + $0x20] sm:$0xff]  }
 0x16a   : > { %v4178_v28 = vrot.slane %v4027_v23, 5  ;;  %v1395_v47 = vld [vmem:[#allocation2 + $0xbc] sm:$0x1]  ;;  %v1775_v12 = vrot.slane %v1773_v62, 4  ;;  %v1941_v52 = vld [vmem:[#allocation2 + $0xb4] sm:$0xe]  ;;  %v1758_v59 = vsel %vm6201_vm14, %v1753_v31, %v7150_v29 }
 0x16b   : > { %v1779_v9 = vshll.u32 %v1395_v47, 16  ;;  %vm8194_vm8 = vcmask 195744   ;;  %v3823_v44 = vrot.slane %v3821_v43, 5  ;;  %v1766_v53 = vor.u32 %v1765_v48, %v1762_v32  ;;  %v1942_v4 = vld [vmem:[#allocation2 + $0xb8] sm:$0xf] }
 0x16c   : > { %3255 = vst.msk [vmem:[#allocation3 + $0x40] sm:$0xff] %vm8194_vm8, %v3215_v49  ;;  %v4179_v35 = vsel %vm6165_vm13, %v4177_v11, %v4178_v28  ;;  %v1943_v54 = vld [vmem:[#allocation2 + $0xbc] sm:$0x1]  ;;  %5867 = vmatmul.mubr.msk.bf16.vlgmr.msra.gmra.mrb[0].mxu0 %vm990_vm15, %v5995_v17  ;;  %v1776_v30 = vor.u32 %v1775_v12, %v1771_v37  ;;  %v5530_v60 = vrot.slane %v1938_v45, 9  ;;  %v2095_v41 = vrot.slane %v1939_v34, 5  ;;  %v3393_v46 = vpop.permute.xlu0 %3392 }
 0x16d   : > { %v5673_v27 = vcombine.low %v4176_v33, %v4179_v35  ;;  %v1781_v57 = vrot.slane %v1779_v9, 5  ;;  %5870 = vmatprep.mubr.msk.bf16.mxu0 %vm990_vm15, %v5998_v25  ;;  %v3824_v39 = vsel %vm6201_vm14, %v7147_v1, %v3823_v44  ;;  %v1767_v18 = vrot.slane %v1766_v53, 4  ;;  %v346_v58 = vld [vmem:[#allocation2 + $0xc0] sm:$0x1]  ;;  %v438_v50 = vld [vmem:[%s6108_s26 + $0x78] sm:$0xf] }
 0x16e   : > { %v2098_v19 = vrot.slane %v1940_v38, 5  ;;  %v5641_v2 = vcombine.low %v3814_v42, %v3824_v39  ;;  %v1777_v15 = vrot.slane %v1776_v30, 4  ;;  %v5531_v6 = vrot.slane %v1941_v52, 9  ;;  %3433 = vst.msk [vmem:[#allocation3 + $0x40] sm:$0xff] %vm3424_vm9, %v3393_v46  ;;  %v439_v8 = vld [vmem:[%s6108_s26 + $0x7c] sm:$0xf] }
 0x16f   : > { %4268 = vrot.lane.b32.xlu0 %v5673_v27, %s6037_s8  ;;  %v2102_v36 = vrot.slane %v1942_v4, 5  ;;  %v1772_v61 = vsel %vm6201_vm14, %v1767_v18, %v1771_v37  ;;  %v2096_v1 = vsel %vm6165_vm13, %v5530_v60, %v2095_v41  ;;  %v2097_v63 = vrot.slane %v2095_v41, 4  ;;  %v5999_v26 = vld [vmem:[%s6108_s26 + $0x18] sm:$0xff]   ;;  %v2439_v25 = vld [vmem:[#allocation2 + $0xb4] sm:$0xf] }
 0x170   : > { %v2105_v29 = vrot.slane %v1943_v54, 5  ;;  %3947 = vrot.lane.b32.xlu1 %v5641_v2, %s6039_s10  ;;  %v5514_v11 = vcombine.low %v1748_v5, %v1758_v59  ;;  %v1782_v13 = vsel %vm6201_vm14, %v1777_v15, %v1781_v57  ;;  %v347_v17 = vsel %vm6085_vm3, 0, %v346_v58  ;;  %v2440_v20 = vld [vmem:[#allocation2 + $0xb8] sm:$0xf]  ;;  %v2441_v45 = vld [vmem:[#allocation2 + $0xbc] sm:$0x1] }
 0x171   : > { %v2104_v14 = vrot.slane %v2102_v36, 4  ;;  %v2099_v51 = vsel %vm6165_vm13, %v2097_v63, %v2098_v19  ;;  %v7207_v55 = vsel %vm6165_vm13, %v5531_v6, %v2102_v36  ;;  %348 = vst [vmem:[#allocation2 + $0xc0] sm:$0x1] %v347_v17  ;;  %v698_v62 = vshrl.u32 %v438_v50, 16  ;;  %v402_v32 = vld [vmem:[#allocation2 + $0xc8] sm:$0x1] }
 0x172   : > { %v701_v24 = vshll.u32 %v438_v50, 16  ;;  %v5515_v56 = vcombine.low %v1772_v61, %v1782_v13  ;;  %v5546_v31 = vcombine.low %v2096_v1, %v2099_v51  ;;  %v706_v23 = vshrl.u32 %v439_v8, 16  ;;  %v5996_v38 = vld [vmem:[#allocation2 + $0xb4] sm:$0xff]   ;;  %v2986_v35 = vld [vmem:[#allocation2 + $0xbc] sm:$0x1]  ;;  %v6005_v19 = vld [vmem:[%s6108_s26 + $0x28] sm:$0xff]  }
 0x173   : > { %v709_v33 = vshll.u32 %v439_v8, 16  ;;  %v2106_v34 = vsel %vm6165_vm13, %v2104_v14, %v2105_v29  ;;  %v700_v42 = vrot.slane %v698_v62, 7  ;;  %v2782_v43 = vshrl.u32 %v2439_v25, 16  ;;  %v2984_v47 = vld [vmem:[#allocation2 + $0xb4] sm:$0xe] }
 0x174   : > { %v2785_v28 = vshll.u32 %v2439_v25, 16  ;;  %5871 = vmatmul.mubr.msk.bf16.gmra.mrb[4].mxu0 %vm990_vm15, %v5999_v26  ;;  %1859 = vrot.lane.b32.xlu1 %v5514_v11, %s6035_s30  ;;  %v7214_v48 = vrot.slane %v706_v23, 7  ;;  %v2791_v49 = vshll.u32 %v2440_v20, 16  ;;  %v2795_v7 = vshrl.u32 %v2440_v20, 16  ;;  %v2985_v37 = vld [vmem:[#allocation2 + $0xb8] sm:$0xf]  ;;  %v2896_v12 = vpop.permute.xlu1 %2895 }
 0x175   : > { %2183 = vrot.lane.b32.xlu0 %v5546_v31, %s6033_s28  ;;  %v2801_v5 = vshll.u32 %v2441_v45, 16  ;;  %v703_v9 = vor.u32 %v701_v24, %v700_v42  ;;  %v704_v52 = vrot.slane %v700_v42, 4  ;;  %v2784_v44 = vrot.slane %v2782_v43, 4  ;;  %5874 = vmatprep.mubr.msk.bf16.mxu0 %vm990_vm15, %v6003_v22  ;;  %2935 = vst.msk [vmem:[#allocation3 + $0x48] sm:$0xff] %vm2925_vm5, %v2896_v12  ;;  %v349_v30 = vld [vmem:[#allocation2 + $0xcc] sm:$0x1] }
 0x176   : > { %v2787_v59 = vrot.slane %v2785_v28, 5  ;;  %v5547_v53 = vcombine.low %v7207_v55, %v2106_v34  ;;  %v711_v4 = vor.u32 %v709_v33, %v7214_v48  ;;  %v2793_v54 = vrot.slane %v2791_v49, 5  ;;  %v405_v57 = vld [vmem:[#allocation2 + $0xd4] sm:$0x1]  ;;  %v3487_v58 = vld [vmem:[#allocation2 + $0xd0] sm:$0xf] }
 0x177   : > { %v2797_v27 = vrot.slane %v2795_v7, 4  ;;  %v2803_v39 = vrot.slane %v2801_v5, 5  ;;  %v403_v18 = vsel %vm6115_vm6, 0, %v402_v32  ;;  %v5594_v41 = vrot.slane %v2984_v47, 9  ;;  %v6006_v50 = vld [vmem:[%s6108_s26 + $0x30] sm:$0xff]   ;;  %v3938_v1 = vpop.permute.xlu0 %3937  ;;  %v6007_v31 = vld [vmem:[%s6108_s26 + $0x38] sm:$0xff]  }
 0x178   : > { %v2788_v60 = vor.u32 %v2787_v59, %v2784_v44  ;;  %1861 = vrot.lane.b32.xlu1 %v5515_v56, %s6035_s30  ;;  %v712_v46 = vsel %vm6121_vm7, %v704_v52, %v711_v4  ;;  %v870_v2 = vld [vmem:[#allocation2 + $0xc0] sm:$0xf]  ;;  %404 = vst [vmem:[#allocation2 + $0xc8] sm:$0x1] %v403_v18  ;;  %v3138_v6 = vrot.slane %v2985_v37, 5  ;;  %v3141_v36 = vrot.slane %v2986_v35, 5  ;;  %v3217_v61 = vpop.permute.xlu1 %3216  ;;  %vm8195_vm7 = vmmov %vm8194_vm8 }
 0x179   : > { %2360 = vrot.lane.b32.xlu0 %v5996_v38, %s6032_s27  ;;  %v2798_v15 = vor.u32 %v2797_v27, %v2793_v54  ;;  %v871_v63 = vsel %vm6129_vm10, %v703_v9, %v870_v2  ;;  %873 = vst.msk [vmem:[#allocation2 + $0xc4] sm:$0xf] %vm286_vm0, %v712_v46  ;;  %v350_v8 = vsel %vm6085_vm3, 0, %v349_v30  ;;  %v406_v16 = vsel %vm6115_vm6, 0, %v405_v57  ;;  %v6008_v23 = vld [vmem:[%s6108_s26 + $0x40] sm:$0xff]   ;;  %v6009_v46 = vld [vmem:[%s6108_s26 + $0x48] sm:$0xff]   ;;  %vm8198_vm6 = vmmov %vm8195_vm7 }
 0x17a   : > { %v2789_v29 = vrot.slane %v2788_v60, 4  ;;  %3256 = vst.msk [vmem:[#allocation3 + $0x48] sm:$0xff] %vm8195_vm7, %v3217_v61  ;;  %872 = vst [vmem:[#allocation2 + $0xc0] sm:$0xf] %v871_v63  ;;  %v3140_v11 = vrot.slane %v3138_v6, 4  ;;  %v3859_v13 = vshll.u32 %v3487_v58, 16  ;;  %v3139_v25 = vsel %vm6165_vm13, %v5594_v41, %v3138_v6 }
 0x17b   : > { %3978 = vst.msk [vmem:[#allocation3 + $0x40] sm:$0xff] %vm3969_vm11, %v3938_v1  ;;  %v2799_v26 = vrot.slane %v2798_v15, 4  ;;  %351 = vst [vmem:[#allocation2 + $0xcc] sm:$0x1] %v350_v8  ;;  %v3863_v14 = vshrl.u32 %v3487_v58, 16  ;;  %v713_v10 = vrot.slane %v7214_v48, 4  ;;  %v4259_v55 = vpop.permute.xlu0 %4258 }
 0x17c   : > { %407 = vst [vmem:[#allocation2 + $0xd4] sm:$0x1] %v406_v16  ;;  %v2794_v21 = vsel %vm6201_vm14, %v2789_v29, %v2793_v54  ;;  %5875 = vmatmul.mubr.msk.bf16.gmra.mrb[8].mxu0 %vm990_vm15, %v6005_v19  ;;  %2185 = vrot.lane.b32.xlu1 %v5547_v53, %s6033_s28  ;;  %v3142_v22 = vsel %vm6165_vm13, %v3140_v11, %v3141_v36  ;;  %v3395_v51 = vpop.permute.xlu1 %3394  ;;  %4299 = vst.msk [vmem:[#allocation3 + $0x40] sm:$0xff] %vm4290_vm12, %v4259_v55  ;;  %v7252_v45 = vrot.slane %v3859_v13, 5  ;;  %v6010_v2 = vld [vmem:[%s6108_s26 + $0x50] sm:$0xff]   ;;  %vm8196_vm0 = vcmask 97344  }
 0x17d   : > { %v2804_v17 = vsel %vm6201_vm14, %v2799_v26, %v2803_v39  ;;  %5878 = vmatprep.mubr.msk.bf16.mxu0 %vm990_vm15, %v6006_v50  ;;  %3434 = vst.msk [vmem:[#allocation3 + $0x48] sm:$0xff] %vm3424_vm9, %v3395_v51  ;;  %v5610_v20 = vcombine.low %v3139_v25, %v3142_v22  ;;  %v7254_v56 = vrot.slane %v3863_v14, 4  ;;  %vm8199_vm10 = vmmov %vm8198_vm6  ;;  %vm4684_vm8 = vcmask 257024  }
 0x17e   : > { %v5578_v62 = vcombine.low %v2794_v21, %v2804_v17  ;;  %vm4877_vm7 = vcmask 261120  }
 0x17f   : > { %v874_v24 = vld [vmem:[#allocation2 + $0xc8] sm:$0x1]  ;;  %v3866_v14 = vor.u32 %v7254_v56, %v7252_v45 }
 0x180   : > { %2905 = vrot.lane.b32.xlu0 %v5578_v62, %s6038_s9  ;;  %v875_v33 = vsel %vm6085_vm3, %v713_v10, %v874_v24  ;;  %v2443_v32 = vld [vmem:[#allocation2 + $0xc4] sm:$0xf]  ;;  %v3940_v38 = vpop.permute.xlu1 %3939  ;;  %v7278_v10 = vld [vmem:[#allocation2 + $0xd0] sm:$0xf]  ;;  %vm8197_vm3 = vmmov %vm8196_vm0 }
 0x181   : > { %v7260_v34 = vld [vmem:[#allocation2 + $0xc4] sm:$0xf]  ;;  %876 = vst [vmem:[#allocation2 + $0xc8] sm:$0x1] %v875_v33  ;;  %v2442_v43 = vld [vmem:[#allocation2 + $0xc0] sm:$0xf] }
 0x182   : > { %v5997_v42 = vld [vmem:[#allocation2 + $0xc0] sm:$0xff]   ;;  %v2815_v28 = vshll.u32 %v2443_v32, 16  ;;  %3979 = vst.msk [vmem:[#allocation3 + $0x48] sm:$0xff] %vm3969_vm11, %v3940_v38  ;;  %v2806_v47 = vshrl.u32 %v2442_v43, 16  ;;  %v2809_v48 = vshll.u32 %v2442_v43, 16  ;;  %v2819_v49 = vshrl.u32 %v2443_v32, 16  ;;  %v4261_v37 = vpop.permute.xlu0 %4260 }
 0x183   : > { %v2987_v7 = vld [vmem:[#allocation2 + $0xc0] sm:$0xe]  ;;  %v3145_v5 = vrot.slane %v7260_v34, 5  ;;  %2362 = vrot.lane.b32.xlu1 %v5997_v42, %s6032_s27  ;;  %4300 = vst.msk [vmem:[#allocation3 + $0x48] sm:$0xff] %vm4290_vm12, %v4261_v37  ;;  %v3484_v54 = vld [vmem:[#allocation2 + $0xc4] sm:$0xf] }
 0x184   : > { %v7265_v0 = vrot.slane %v2815_v28, 5  ;;  %3226 = vrot.lane.b32.xlu0 %v5610_v20, %s6036_s7  ;;  %v5595_v12 = vrot.slane %v2987_v7, 9  ;;  %v2808_v9 = vrot.slane %v2806_v47, 4  ;;  %v2811_v52 = vrot.slane %v2809_v48, 5  ;;  %v6002_v35 = vld [vmem:[#allocation2 + $0xc0] sm:$0xff]   ;;  %5879 = vmatmul.mubr.msk.bf16.gmra.mrb[12].mxu0 %vm990_vm15, %v6007_v31  ;;  %v1852_v53 = vpop.permute.xlu1 %1851  ;;  %v4315_v25 = vld [vmem:[#allocation3 + $0x40] sm:$0xff] }
 0x185   : > { %v2821_v44 = vrot.slane %v2819_v49, 4  ;;  %v3147_v59 = vrot.slane %v3145_v5, 4  ;;  %v3483_v4 = vld [vmem:[#allocation2 + $0xc0] sm:$0xf]  ;;  %5882 = vmatprep.mubr.msk.bf16.mxu0 %vm990_vm15, %v6008_v23  ;;  %1890 = vst.msk [vmem:[#allocation3 + $0x50] sm:$0xff] %vm1879_vm1, %v1852_v53  ;;  %v3835_v18 = vshll.u32 %v3484_v54, 16  ;;  %5920 = vmatprep.mubr.msk.bf16.mxu1 %vm4343_vm2, %v4315_v25 }
 0x186   : > { %v2812_v27 = vor.u32 %v2811_v52, %v2808_v9  ;;  %v3826_v57 = vshrl.u32 %v3483_v4, 16  ;;  %v3829_v60 = vshll.u32 %v3483_v4, 16  ;;  %v3486_v39 = vld [vmem:[#allocation2 + $0xcc] sm:$0xf]  ;;  %v3839_v41 = vshrl.u32 %v3484_v54, 16  ;;  %v6011_v4 = vld [vmem:[%s6108_s26 + $0x58] sm:$0xff]  }
 0x187   : > { %v2822_v30 = vor.u32 %v2821_v44, %v7265_v0  ;;  %v3850_v19 = vshrl.u32 %v3486_v39, 16  ;;  %v3853_v58 = vshll.u32 %v3486_v39, 16  ;;  %v3837_v26 = vrot.slane %v3835_v18, 5  ;;  %v3488_v13 = vld [vmem:[#allocation2 + $0xd4] sm:$0x1]  ;;  %v6014_v39 = vld [vmem:[%s6108_s26 + $0x60] sm:$0xff]  }
 0x188   : > { %3404 = vrot.lane.b32.xlu0 %v6002_v35, %s6034_s29  ;;  %v2444_v15 = vld [vmem:[#allocation2 + $0xc8] sm:$0x1]  ;;  %v2813_v6 = vrot.slane %v2812_v27, 4  ;;  %v3828_v29 = vrot.slane %v3826_v57, 4  ;;  %v3831_v8 = vrot.slane %v3829_v60, 5  ;;  %v3841_v11 = vrot.slane %v3839_v41, 4 }
 0x189   : > { %v2823_v36 = vrot.slane %v2822_v30, 4  ;;  %v2989_v50 = vld [vmem:[#allocation2 + $0xc8] sm:$0x1]  ;;  %v2825_v61 = vshll.u32 %v2444_v15, 16  ;;  %v2176_v16 = vpop.permute.xlu0 %2175  ;;  %v3852_v62 = vrot.slane %v3850_v19, 4  ;;  %v3146_v56 = vsel %vm6165_vm13, %v5595_v12, %v3145_v5  ;;  %v6004_v19 = vld [vmem:[#allocation2 + $0xcc] sm:$0xff]  }
 0x18a   : > { %v3148_v1 = vrot.slane %v2989_v50, 5  ;;  %v3485_v63 = vld [vmem:[#allocation2 + $0xc8] sm:$0x1]  ;;  %v1854_v17 = vpop.permute.xlu1 %1853  ;;  %2214 = vst.msk [vmem:[#allocation3 + $0x50] sm:$0xff] %vm8196_vm0, %v2176_v16  ;;  %v2818_v22 = vsel %vm6201_vm14, %v2813_v6, %v7265_v0  ;;  %v3832_v55 = vor.u32 %v3831_v8, %v3828_v29  ;;  %v4028_v24 = vld [vmem:[#allocation2 + $0xc0] sm:$0xe]  ;;  %v3842_v31 = vor.u32 %v3841_v11, %v3837_v26 }
 0x18b   : > { %v3845_v21 = vshll.u32 %v3485_v63, 16  ;;  %v2827_v51 = vrot.slane %v2825_v61, 5  ;;  %v4029_v20 = vld [vmem:[#allocation2 + $0xc4] sm:$0xf]  ;;  %1891 = vst.msk [vmem:[#allocation3 + $0x58] sm:$0xff] %vm1879_vm1, %v1854_v17  ;;  %v3855_v33 = vrot.slane %v3853_v58, 5 }
 0x18c   : > { %v4030_v32 = vld [vmem:[#allocation2 + $0xc8] sm:$0x1]  ;;  %5883 = vmatmul.mubr.msk.bf16.gmra.mrb[16].mxu0 %vm990_vm15, %v6009_v46  ;;  %v4316_v34 = vld [vmem:[#allocation3 + $0x48] sm:$0xff]  ;;  %v3149_v42 = vsel %vm6165_vm13, %v3147_v59, %v3148_v1  ;;  %v3833_v43 = vrot.slane %v3832_v55, 4  ;;  %v3869_v28 = vshll.u32 %v3488_v13, 16  ;;  %v3843_v49 = vrot.slane %v3842_v31, 4 }
 0x18d   : > { %v3847_v23 = vrot.slane %v3845_v21, 5  ;;  %v2828_v38 = vsel %vm6201_vm14, %v2823_v36, %v2827_v51  ;;  %5886 = vmatprep.mubr.msk.bf16.mxu0 %vm990_vm15, %v6010_v2  ;;  %v2353_v47 = vpop.permute.xlu0 %2352  ;;  %5921 = vmatmul.mubr.msk.bf16.gmra.mrb[16].mxu1 %vm4343_vm2, %v4316_v34  ;;  %v3856_v7 = vor.u32 %v3855_v33, %v3852_v62  ;;  %v5658_v5 = vrot.slane %v4028_v24, 9  ;;  %v4031_v60 = vld [vmem:[#allocation2 + $0xcc] sm:$0xe]  ;;  %v4033_v18 = vld [vmem:[#allocation2 + $0xd4] sm:$0x1] }
 0x18e   : > { %v5579_v48 = vcombine.low %v2818_v22, %v2828_v38  ;;  %v2178_v37 = vpop.permute.xlu1 %2177  ;;  %2391 = vst.msk [vmem:[#allocation3 + $0x50] sm:$0xff] %vm2380_vm4, %v2353_v47  ;;  %v3838_v0 = vsel %vm6201_vm14, %v3833_v43, %v3837_v26  ;;  %v4182_v12 = vrot.slane %v4029_v20, 5  ;;  %v4185_v9 = vrot.slane %v4030_v32, 5  ;;  %v6015_v63 = vld [vmem:[%s6108_s26 + $0x68] sm:$0xff]   ;;  %v6016_v29 = vld [vmem:[%s6108_s26 + $0x70] sm:$0xff]   ;;  %v6017_v11 = vld [vmem:[%s6108_s26 + $0x78] sm:$0xff]   ;;  %s7360_s26 = scalar_lea.vmem %s8162_s3, %s6100_s23 }
 0x18f   : > { %v4189_v52 = vrot.slane %v7278_v10, 5  ;;  %2215 = vst.msk [vmem:[#allocation3 + $0x58] sm:$0xff] %vm8197_vm3, %v2178_v37  ;;  %v5611_v44 = vcombine.low %v3146_v56, %v3149_v42  ;;  %v3848_v59 = vsel %vm6201_vm14, %v3843_v49, %v3847_v23  ;;  %v3867_v35 = vrot.slane %v3866_v14, 4 }
 0x190   : > { %2907 = vrot.lane.b32.xlu1 %v5579_v48, %s6038_s9  ;;  %v3871_v53 = vrot.slane %v3869_v28, 5  ;;  %v5642_v54 = vcombine.low %v3838_v0, %v3848_v59  ;;  %v3857_v27 = vrot.slane %v3856_v7, 4  ;;  %v4183_v30 = vsel %vm6165_vm13, %v5658_v5, %v4182_v12 }
 0x191   : > { %v4184_v57 = vrot.slane %v4182_v12, 4  ;;  %v5659_v46 = vrot.slane %v4031_v60, 9  ;;  %v4191_v6 = vrot.slane %v4189_v52, 4  ;;  %v4192_v36 = vrot.slane %v4033_v18, 5 }
 0x192   : > { %3949 = vrot.lane.b32.xlu0 %v5642_v54, %s6039_s10  ;;  %v3862_v2 = vsel %vm6201_vm14, %v3857_v27, %v7252_v45  ;;  %v3872_v15 = vsel %vm6201_vm14, %v3867_v35, %v3871_v53  ;;  %vm8201_vm14 = vmmov %vm8196_vm0 }
 0x193   : > { %v4186_v41 = vsel %vm6165_vm13, %v4184_v57, %v4185_v9  ;;  %v5643_v1 = vcombine.low %v3862_v2, %v3872_v15  ;;  %v4190_v40 = vsel %vm6165_vm13, %v5659_v46, %v4189_v52  ;;  %v4193_v45 = vsel %vm6165_vm13, %v4191_v6, %v4192_v36  ;;  %vm8200_vm13 = vmmov %vm8196_vm0 }
 0x194   : > { %3228 = vrot.lane.b32.xlu1 %v5611_v44, %s6036_s7  ;;  %v5674_v58 = vcombine.low %v4183_v30, %v4186_v41  ;;  %5887 = vmatmul.mubr.msk.bf16.gmra.mrb[20].mxu0 %vm990_vm15, %v6011_v4  ;;  %v5675_v16 = vcombine.low %v4190_v40, %v4193_v45  ;;  %vm8203_vm0 = vmmov %vm8198_vm6 }
 0x195   : > { %5890 = vmatprep.mubr.msk.bf16.mxu0 %vm990_vm15, %v6014_v39  ;;  %v2898_v50 = vpop.permute.xlu0 %2897 }
 0x196   : > { %2936 = vst.msk [vmem:[#allocation3 + $0x50] sm:$0xff] %vm2925_vm5, %v2898_v50  ;;  %4270 = vrot.lane.b32.xlu0 %v5674_v58, %s6037_s8 }
 0x197   : > { %v2355_v61 = vpop.permute.xlu1 %2354 }
 0x198   : > { %3406 = vrot.lane.b32.xlu1 %v6004_v19, %s6034_s29  ;;  %2392 = vst.msk [vmem:[#allocation3 + $0x58] sm:$0xff] %vm2380_vm4, %v2355_v61  ;;  %s7521_s29 = scalar_lea.vmem %s8163_s4, %s6100_s23  ;;  %s5450_s23 = sshll.u32 %s8224_s22, 1 }
 0x199   : > { %v3219_v8 = vpop.permute.xlu0 %3218  ;;  %s8034_s11 = scalar_lea.vmem %s8164_s5, %s5450_s23 }
 0x19a   : > { %3257 = vst.msk [vmem:[#allocation3 + $0x50] sm:$0xff] %vm8198_vm6, %v3219_v8 }
 0x19c   : > { %3951 = vrot.lane.b32.xlu1 %v5643_v1, %s6039_s10  ;;  %5891 = vmatmul.mubr.msk.bf16.gmra.mrb[24].mxu0 %vm990_vm15, %v6015_v63 }
 0x19d   : > { %5894 = vmatprep.mubr.msk.bf16.mxu0 %vm990_vm15, %v6016_v29  ;;  %v3397_v26 = vpop.permute.xlu0 %3396 }
 0x19e   : > { %3435 = vst.msk [vmem:[#allocation3 + $0x50] sm:$0xff] %vm3424_vm9, %v3397_v26 }
 0x1a0   : > { %4272 = vrot.lane.b32.xlu1 %v5675_v16, %s6037_s8  ;;  %s7805_s8 = scalar_lea.vmem %s8165_s6, %s5450_s23 }
 0x1a4   : > { %5895 = vmatmul.mubr.msk.bf16.gmra.mrb[28].mxu0 %vm990_vm15, %v6017_v11  ;;  %v2900_v3 = vpop.permute.xlu1 %2899  ;;  %vm8202_vm15 = vmmov %vm8198_vm6 }
 0x1a5   : > { %2937 = vst.msk [vmem:[#allocation3 + $0x58] sm:$0xff] %vm2925_vm5, %v2900_v3  ;;  %vm8204_vm6 = vmmov %vm8197_vm3 }
 0x1a8   : > { %v3221_v21 = vpop.permute.xlu1 %3220  ;;  %v3942_v13 = vpop.permute.xlu0 %3941 }
 0x1a9   : > { %3258 = vst.msk [vmem:[#allocation3 + $0x58] sm:$0xff] %vm8199_vm10, %v3221_v21  ;;  %vm8205_vm10 = vmmov %vm8203_vm0 }
 0x1aa   : > { %3980 = vst.msk [vmem:[#allocation3 + $0x50] sm:$0xff] %vm3969_vm11, %v3942_v13 }
 0x1ac   : > { %v3399_v14 = vpop.permute.xlu1 %3398  ;;  %v4263_v10 = vpop.permute.xlu0 %4262 }
 0x1ad   : > { %3436 = vst.msk [vmem:[#allocation3 + $0x58] sm:$0xff] %vm3424_vm9, %v3399_v14 }
 0x1ae   : > { %4301 = vst.msk [vmem:[#allocation3 + $0x50] sm:$0xff] %vm4290_vm12, %v4263_v10 }
 0x1b0   : > { %v3944_v17 = vpop.permute.xlu1 %3943 }
 0x1b1   : > { %3981 = vst.msk [vmem:[#allocation3 + $0x58] sm:$0xff] %vm3969_vm11, %v3944_v17 }
 0x1b3   : > { %v4265_v25 = vpop.permute.xlu0 %4264 }
 0x1b4   : > { %v1856_v22 = vpop.permute.xlu1 %1855  ;;  %4302 = vst.msk [vmem:[#allocation3 + $0x58] sm:$0xff] %vm4290_vm12, %v4265_v25 }
 0x1b5   : > { %v4317_v51 = vld [vmem:[#allocation3 + $0x50] sm:$0xff]  ;;  %1892 = vst.msk [vmem:[#allocation3 + $0x60] sm:$0xff] %vm1879_vm1, %v1856_v22 }
 0x1b6   : > { %5924 = vmatprep.mubr.msk.bf16.mxu1 %vm4343_vm2, %v4317_v51 }
 0x1b9   : > { %v1858_v55 = vpop.permute.xlu1 %1857  ;;  %v2180_v62 = vpop.permute.xlu0 %2179 }
 0x1ba   : > { %1893 = vst.msk [vmem:[#allocation3 + $0x68] sm:$0xff] %vm1879_vm1, %v1858_v55 }
 0x1bb   : > { %2216 = vst.msk [vmem:[#allocation3 + $0x60] sm:$0xff] %vm8200_vm13, %v2180_v62  ;;  %v4318_v24 = vld [vmem:[#allocation3 + $0x58] sm:$0xff] }
 0x1bc   : > { %5925 = vmatmul.mubr.msk.bf16.gmra.mrb[20].mxu1 %vm4343_vm2, %v4318_v24 }
 0x1bd   : > { %v2182_v20 = vpop.permute.xlu1 %2181  ;;  %v2357_v56 = vpop.permute.xlu0 %2356 }
 0x1be   : > { %2217 = vst.msk [vmem:[#allocation3 + $0x68] sm:$0xff] %vm8201_vm14, %v2182_v20 }
 0x1bf   : > { %2393 = vst.msk [vmem:[#allocation3 + $0x60] sm:$0xff] %vm2380_vm4, %v2357_v56 }
 0x1c4   : > { %v2902_v31 = vpop.permute.xlu0 %2901  ;;  %v2359_v23 = vpop.permute.xlu1 %2358 }
 0x1c5   : > { %2938 = vst.msk [vmem:[#allocation3 + $0x60] sm:$0xff] %vm2925_vm5, %v2902_v31 }
 0x1c6   : > { %2394 = vst.msk [vmem:[#allocation3 + $0x68] sm:$0xff] %vm2380_vm4, %v2359_v23 }
 0x1c8   : > { %v3223_v33 = vpop.permute.xlu0 %3222 }
 0x1c9   : > { %3259 = vst.msk [vmem:[#allocation3 + $0x60] sm:$0xff] %vm8202_vm15, %v3223_v33 }
 0x1cc   : > { %v3401_v32 = vpop.permute.xlu0 %3400 }
 0x1cd   : > { %3437 = vst.msk [vmem:[#allocation3 + $0x60] sm:$0xff] %vm3424_vm9, %v3401_v32 }
 0x1d3   : > { %v2904_v34 = vpop.permute.xlu1 %2903 }
 0x1d4   : > { %2939 = vst.msk [vmem:[#allocation3 + $0x68] sm:$0xff] %vm2925_vm5, %v2904_v34 }
 0x1d5   : > { %v3946_v38 = vpop.permute.xlu0 %3945 }
 0x1d6   : > { %3982 = vst.msk [vmem:[#allocation3 + $0x60] sm:$0xff] %vm3969_vm11, %v3946_v38  ;;  %v7362_v42 = vpop.f32.mrb[0].mxu1 }
 0x1d7   : > { %v3225_v43 = vpop.permute.xlu1 %3224  ;;  %v5766_v28 = vpack.c.bf16 %v7362_v42, %v7362_v42  ;;  %v7366_v47 = vpop.f32.mrb[1].mxu1  ;;  %v4881_v59 = vsel %vm4877_vm7, %v7362_v42, 0.0 }
 0x1d8   : > { %3260 = vst.msk [vmem:[#allocation3 + $0x68] sm:$0xff] %vm8203_vm0, %v3225_v43  ;;  %v5764_v49 = vpack.c.bf16 %v7366_v47, %v7366_v47  ;;  %v7371_v7 = vpop.f32.mrb[2].mxu1  ;;  %v4878_v0 = vsel %vm4877_vm7, %v7366_v47, 0.0 }
 0x1d9   : > { %v4267_v48 = vpop.permute.xlu0 %4266  ;;  %4687 = vst.msk [vmem:[%s7360_s26 + $0x8] sm:$0xf] %vm4684_vm8, %v5766_v28  ;;  %v5767_v5 = vpack.c.bf16 %v7371_v7, %v7371_v7  ;;  %v7378_v37 = vpop.f32.mrb[3].mxu1  ;;  %v4883_v53 = vsel %vm4877_vm7, %v7371_v7, 0.0 }
 0x1da   : > { %4303 = vst.msk [vmem:[#allocation3 + $0x60] sm:$0xff] %vm4290_vm12, %v4267_v48  ;;  %v5765_v12 = vpack.c.bf16 %v7378_v37, %v7378_v37  ;;  %v4879_v9 = vsel %vm4877_vm7, %v7378_v37, 0.0 }
 0x1db   : > { %4685 = vst.msk [vmem:[%s7360_s26] sm:$0xf] %vm4684_vm8, %v5764_v49  ;;  %v3403_v52 = vpop.permute.xlu1 %3402  ;;  %4688 = vst.msk [vmem:[%s7360_s26 + $0xc] sm:$0xf] %vm4684_vm8, %v5767_v5  ;;  %v4880_v44 = vadd.f32 %v4879_v9, %v4878_v0 }
 0x1dc   : > { %3438 = vst.msk [vmem:[#allocation3 + $0x68] sm:$0xff] %vm3424_vm9, %v3403_v52 }
 0x1dd   : > { %4686 = vst.msk [vmem:[%s7360_s26 + $0x4] sm:$0xf] %vm4684_vm8, %v5765_v12  ;;  %v4882_v35 = vadd.f32 %v4881_v59, %v4880_v44 }
 0x1de   : > { %v7397_v4 = vpop.f32.mrb[4].mxu1 }
 0x1df   : > { %v5770_v54 = vpack.c.bf16 %v7397_v4, %v7397_v4  ;;  %v7401_v27 = vpop.f32.mrb[5].mxu1  ;;  %v4884_v30 = vadd.f32 %v4883_v53, %v4882_v35  ;;  %v4889_v50 = vsel %vm4877_vm7, %v7397_v4, 0.0 }
 0x1e0   : > { %v5768_v39 = vpack.c.bf16 %v7401_v27, %v7401_v27  ;;  %v4885_v18 = vsel %vm4877_vm7, %v7401_v27, 0.0  ;;  %v7407_v41 = vpop.f32.mrb[6].mxu1 }
 0x1e1   : > { %v4269_v57 = vpop.permute.xlu0 %4268  ;;  %v4319_v60 = vld [vmem:[#allocation3 + $0x60] sm:$0xff]  ;;  %4691 = vst.msk [vmem:[%s7360_s26 + $0x18] sm:$0xf] %vm4684_vm8, %v5770_v54  ;;  %v4886_v19 = vadd.f32 %v4885_v18, %v4884_v30  ;;  %v5771_v58 = vpack.c.bf16 %v7407_v41, %v7407_v41  ;;  %v7414_v46 = vpop.f32.mrb[7].mxu1  ;;  %v4891_v40 = vsel %vm4877_vm7, %v7407_v41, 0.0 }
 0x1e2   : > { %5928 = vmatprep.mubr.msk.bf16.mxu1 %vm4343_vm2, %v4319_v60  ;;  %v3948_v2 = vpop.permute.xlu1 %3947  ;;  %4689 = vst.msk [vmem:[%s7360_s26 + $0x10] sm:$0xf] %vm4684_vm8, %v5768_v39  ;;  %v5769_v15 = vpack.c.bf16 %v7414_v46, %v7414_v46  ;;  %v4887_v6 = vsel %vm4877_vm7, %v7414_v46, 0.0 }
 0x1e3   : > { %3983 = vst.msk [vmem:[#allocation3 + $0x68] sm:$0xff] %vm3969_vm11, %v3948_v2  ;;  %v4888_v36 = vadd.f32 %v4887_v6, %v4886_v19 }
 0x1e4   : > { %4692 = vst.msk [vmem:[%s7360_s26 + $0x1c] sm:$0xf] %vm4684_vm8, %v5771_v58  ;;  %4690 = vst.msk [vmem:[%s7360_s26 + $0x14] sm:$0xf] %vm4684_vm8, %v5769_v15 }
 0x1e5   : > { %4304 = vst.msk [vmem:[#allocation3 + $0x68] sm:$0xff] %vm4290_vm12, %v4269_v57  ;;  %v4890_v61 = vadd.f32 %v4889_v50, %v4888_v36 }
 0x1e6   : > { %v1860_v1 = vpop.permute.xlu1 %1859 }
 0x1e7   : > { %v2184_v63 = vpop.permute.xlu0 %2183  ;;  %1894 = vst.msk [vmem:[#allocation3 + $0x70] sm:$0xff] %vm1879_vm1, %v1860_v1  ;;  %v4892_v45 = vadd.f32 %v4891_v40, %v4890_v61 }
 0x1e8   : > { %2218 = vst.msk [vmem:[#allocation3 + $0x70] sm:$0xff] %vm8197_vm3, %v2184_v63 }
 0x1ea   : > { %v1862_v29 = vpop.permute.xlu1 %1861 }
 0x1eb   : > { %v2361_v8 = vpop.permute.xlu0 %2360  ;;  %1895 = vst.msk [vmem:[#allocation3 + $0x78] sm:$0xff] %vm1879_vm1, %v1862_v29  ;;  %vm8206_vm1 = vmmov %vm8203_vm0 }
 0x1ec   : > { %2395 = vst.msk [vmem:[#allocation3 + $0x70] sm:$0xff] %vm2380_vm4, %v2361_v8  ;;  %v4320_v16 = vld [vmem:[#allocation3 + $0x68] sm:$0xff] }
 0x1ed   : > { %5929 = vmatmul.mubr.msk.bf16.gmra.mrb[24].mxu1 %vm4343_vm2, %v4320_v16 }
 0x1ee   : > { %v2186_v26 = vpop.permute.xlu1 %2185 }
 0x1ef   : > { %2219 = vst.msk [vmem:[#allocation3 + $0x78] sm:$0xff] %vm8204_vm6, %v2186_v26 }
 0x1f2   : > { %v2906_v11 = vpop.permute.xlu0 %2905 }
 0x1f3   : > { %2940 = vst.msk [vmem:[#allocation3 + $0x70] sm:$0xff] %vm2925_vm5, %v2906_v11 }
 0x1f5   : > { %v2363_v3 = vpop.permute.xlu1 %2362 }
 0x1f6   : > { %v3227_v21 = vpop.permute.xlu0 %3226  ;;  %2396 = vst.msk [vmem:[#allocation3 + $0x78] sm:$0xff] %vm2380_vm4, %v2363_v3 }
 0x1f7   : > { %3261 = vst.msk [vmem:[#allocation3 + $0x70] sm:$0xff] %vm8205_vm10, %v3227_v21 }
 0x1fa   : > { %v3405_v13 = vpop.permute.xlu0 %3404 }
 0x1fb   : > { %3439 = vst.msk [vmem:[#allocation3 + $0x70] sm:$0xff] %vm3424_vm9, %v3405_v13 }
 0x1fd   : > { %v7442_v14 = vpop.f32.mrb[8].mxu1 }
 0x1fe   : > { %v5774_v10 = vpack.c.bf16 %v7442_v14, %v7442_v14  ;;  %v7446_v17 = vpop.f32.mrb[9].mxu1  ;;  %v4897_v33 = vsel %vm4877_vm7, %v7442_v14, 0.0 }
 0x1ff   : > { %v5772_v25 = vpack.c.bf16 %v7446_v17, %v7446_v17  ;;  %v4893_v22 = vsel %vm4877_vm7, %v7446_v17, 0.0  ;;  %v7452_v51 = vpop.f32.mrb[10].mxu1 }
 0x200   : > { %4695 = vst.msk [vmem:[%s7360_s26 + $0x28] sm:$0xf] %vm4684_vm8, %v5774_v10  ;;  %v4894_v55 = vadd.f32 %v4893_v22, %v4892_v45  ;;  %v5775_v62 = vpack.c.bf16 %v7452_v51, %v7452_v51  ;;  %v7458_v24 = vpop.f32.mrb[11].mxu1  ;;  %v4899_v38 = vsel %vm4877_vm7, %v7452_v51, 0.0 }
 0x201   : > { %4693 = vst.msk [vmem:[%s7360_s26 + $0x20] sm:$0xf] %vm4684_vm8, %v5772_v25  ;;  %v5773_v20 = vpack.c.bf16 %v7458_v24, %v7458_v24  ;;  %v4895_v56 = vsel %vm4877_vm7, %v7458_v24, 0.0 }
 0x202   : > { %v2908_v31 = vpop.permute.xlu1 %2907  ;;  %4696 = vst.msk [vmem:[%s7360_s26 + $0x2c] sm:$0xf] %vm4684_vm8, %v5775_v62  ;;  %v4896_v23 = vadd.f32 %v4895_v56, %v4894_v55 }
 0x203   : > { %2941 = vst.msk [vmem:[#allocation3 + $0x78] sm:$0xff] %vm2925_vm5, %v2908_v31 }
 0x204   : > { %4694 = vst.msk [vmem:[%s7360_s26 + $0x24] sm:$0xf] %vm4684_vm8, %v5773_v20  ;;  %v4898_v32 = vadd.f32 %v4897_v33, %v4896_v23  ;;  %v3950_v34 = vpop.permute.xlu0 %3949 }
 0x205   : > { %3984 = vst.msk [vmem:[#allocation3 + $0x70] sm:$0xff] %vm3969_vm11, %v3950_v34 }
 0x206   : > { %v3229_v43 = vpop.permute.xlu1 %3228  ;;  %v4900_v28 = vadd.f32 %v4899_v38, %v4898_v32 }
 0x207   : > { %3262 = vst.msk [vmem:[#allocation3 + $0x78] sm:$0xff] %vm8206_vm1, %v3229_v43 }
 0x208   : > { %v4271_v48 = vpop.permute.xlu0 %4270 }
 0x209   : > { %4305 = vst.msk [vmem:[#allocation3 + $0x70] sm:$0xff] %vm4290_vm12, %v4271_v48 }
 0x20a   : > { %v3407_v49 = vpop.permute.xlu1 %3406 }
 0x20b   : > { %3440 = vst.msk [vmem:[#allocation3 + $0x78] sm:$0xff] %vm3424_vm9, %v3407_v49 }
 0x20e   : > { %v3952_v5 = vpop.permute.xlu1 %3951 }
 0x20f   : > { %3985 = vst.msk [vmem:[#allocation3 + $0x78] sm:$0xff] %vm3969_vm11, %v3952_v5 }
 0x210   : > { %v4321_v0 = vld [vmem:[#allocation3 + $0x70] sm:$0xff] }
 0x211   : > { %5932 = vmatprep.mubr.msk.bf16.mxu1 %vm4343_vm2, %v4321_v0 }
 0x212   : > { %v4273_v12 = vpop.permute.xlu1 %4272 }
 0x213   : > { %4306 = vst.msk [vmem:[#allocation3 + $0x78] sm:$0xff] %vm4290_vm12, %v4273_v12 }
 0x21a   : > { %v4322_v9 = vld [vmem:[#allocation3 + $0x78] sm:$0xff] }
 0x21b   : > { %5933 = vmatmul.mubr.msk.bf16.gmra.mrb[28].mxu1 %vm4343_vm2, %v4322_v9  ;;  %vm4980_vm2 = vcmask 253952  }
 0x233   : > { %v7483_v52 = vpop.f32.mrb[12].mxu1 }
 0x234   : > { %8207 = vst [vmem:[#allocation4_spill] sm:$0xff] %v7483_v52  ;;  %v5778_v44 = vpack.c.bf16 %v7483_v52, %v7483_v52  ;;  %v7487_v59 = vpop.f32.mrb[13].mxu1  ;;  %v4905_v58 = vsel %vm4877_vm7, %v7483_v52, 0.0 }
 0x235   : > { %8208 = vst [vmem:[#allocation5_spill] sm:$0xff] %v7487_v59  ;;  %v5776_v35 = vpack.c.bf16 %v7487_v59, %v7487_v59  ;;  %v4901_v53 = vsel %vm4877_vm7, %v7487_v59, 0.0  ;;  %v7493_v54 = vpop.f32.mrb[14].mxu1 }
 0x236   : > { %8209 = vst [vmem:[#allocation6_spill] sm:$0xff] %v7493_v54  ;;  %4699 = vst.msk [vmem:[%s7360_s26 + $0x38] sm:$0xf] %vm4684_vm8, %v5778_v44  ;;  %v4902_v30 = vadd.f32 %v4901_v53, %v4900_v28  ;;  %v5779_v57 = vpack.c.bf16 %v7493_v54, %v7493_v54  ;;  %v7499_v60 = vpop.f32.mrb[15].mxu1  ;;  %v4907_v15 = vsel %vm4877_vm7, %v7493_v54, 0.0 }
 0x237   : > { %8210 = vst [vmem:[#allocation7_spill] sm:$0xff] %v7499_v60  ;;  %4697 = vst.msk [vmem:[%s7360_s26 + $0x30] sm:$0xf] %vm4684_vm8, %v5776_v35  ;;  %v5777_v39 = vpack.c.bf16 %v7499_v60, %v7499_v60  ;;  %v4903_v18 = vsel %vm4877_vm7, %v7499_v60, 0.0 }
 0x238   : > { %4700 = vst.msk [vmem:[%s7360_s26 + $0x3c] sm:$0xf] %vm4684_vm8, %v5779_v57  ;;  %v4904_v19 = vadd.f32 %v4903_v18, %v4902_v30 }
 0x239   : > { %4698 = vst.msk [vmem:[%s7360_s26 + $0x34] sm:$0xf] %vm4684_vm8, %v5777_v39 }
 0x23a   : > { %v4906_v2 = vadd.f32 %v4905_v58, %v4904_v19 }
 0x23c   : > { %v7515_v6 = vadd.f32 %v4907_v15, %v4906_v2 }
 0x23f   : > { %v7523_v36 = vpop.f32.mrb[0].mxu0 }
 0x240   : > { %v5798_v50 = vpack.c.bf16 %v7523_v36, %v7523_v36  ;;  %v7527_v61 = vpop.f32.mrb[1].mxu0  ;;  %v5087_v8 = vsel %vm4877_vm7, %v7523_v36, 0.0 }
 0x241   : > { %v5796_v1 = vpack.c.bf16 %v7527_v61, %v7527_v61  ;;  %v5084_v63 = vsel %vm4877_vm7, %v7527_v61, 0.0  ;;  %v7533_v40 = vpop.f32.mrb[2].mxu0 }
 0x242   : > { %4847 = vst.msk [vmem:[%s7521_s29 + $0x8] sm:$0xf] %vm4684_vm8, %v5798_v50  ;;  %v5799_v45 = vpack.c.bf16 %v7533_v40, %v7533_v40  ;;  %v7539_v29 = vpop.f32.mrb[3].mxu0  ;;  %v5089_v3 = vsel %vm4877_vm7, %v7533_v40, 0.0 }
 0x243   : > { %4845 = vst.msk [vmem:[%s7521_s29] sm:$0xf] %vm4684_vm8, %v5796_v1  ;;  %v5797_v16 = vpack.c.bf16 %v7539_v29, %v7539_v29  ;;  %v5085_v26 = vsel %vm4877_vm7, %v7539_v29, 0.0 }
 0x244   : > { %4848 = vst.msk [vmem:[%s7521_s29 + $0xc] sm:$0xf] %vm4684_vm8, %v5799_v45  ;;  %v5086_v11 = vadd.f32 %v5085_v26, %v5084_v63 }
 0x245   : > { %4846 = vst.msk [vmem:[%s7521_s29 + $0x4] sm:$0xf] %vm4684_vm8, %v5797_v16 }
 0x246   : > { %v5088_v21 = vadd.f32 %v5087_v8, %v5086_v11 }
 0x247   : > { %v7555_v13 = vpop.f32.mrb[4].mxu0 }
 0x248   : > { %v5802_v10 = vpack.c.bf16 %v7555_v13, %v7555_v13  ;;  %v7559_v25 = vpop.f32.mrb[5].mxu0  ;;  %v5090_v22 = vadd.f32 %v5089_v3, %v5088_v21  ;;  %v5095_v33 = vsel %vm4877_vm7, %v7555_v13, 0.0 }
 0x249   : > { %v5800_v55 = vpack.c.bf16 %v7559_v25, %v7559_v25  ;;  %v5091_v62 = vsel %vm4877_vm7, %v7559_v25, 0.0  ;;  %v7565_v20 = vpop.f32.mrb[6].mxu0 }
 0x24a   : > { %4851 = vst.msk [vmem:[%s7521_s29 + $0x18] sm:$0xf] %vm4684_vm8, %v5802_v10  ;;  %v5092_v56 = vadd.f32 %v5091_v62, %v5090_v22  ;;  %v5803_v31 = vpack.c.bf16 %v7565_v20, %v7565_v20  ;;  %v7571_v23 = vpop.f32.mrb[7].mxu0  ;;  %v5097_v43 = vsel %vm4877_vm7, %v7565_v20, 0.0 }
 0x24b   : > { %4849 = vst.msk [vmem:[%s7521_s29 + $0x10] sm:$0xf] %vm4684_vm8, %v5800_v55  ;;  %v5801_v32 = vpack.c.bf16 %v7571_v23, %v7571_v23  ;;  %v5093_v34 = vsel %vm4877_vm7, %v7571_v23, 0.0 }
 0x24c   : > { %4852 = vst.msk [vmem:[%s7521_s29 + $0x1c] sm:$0xf] %vm4684_vm8, %v5803_v31  ;;  %v5094_v38 = vadd.f32 %v5093_v34, %v5092_v56 }
 0x24d   : > { %4850 = vst.msk [vmem:[%s7521_s29 + $0x14] sm:$0xf] %vm4684_vm8, %v5801_v32 }
 0x24e   : > { %v5096_v28 = vadd.f32 %v5095_v33, %v5094_v38 }
 0x24f   : > { %v7587_v48 = vpop.f32.mrb[8].mxu0 }
 0x250   : > { %v5806_v49 = vpack.c.bf16 %v7587_v48, %v7587_v48  ;;  %v7591_v5 = vpop.f32.mrb[9].mxu0  ;;  %v5098_v0 = vadd.f32 %v5097_v43, %v5096_v28  ;;  %v5103_v57 = vsel %vm4877_vm7, %v7587_v48, 0.0 }
 0x251   : > { %v5804_v12 = vpack.c.bf16 %v7591_v5, %v7591_v5  ;;  %v5099_v9 = vsel %vm4877_vm7, %v7591_v5, 0.0  ;;  %v7597_v44 = vpop.f32.mrb[10].mxu0 }
 0x252   : > { %4855 = vst.msk [vmem:[%s7521_s29 + $0x28] sm:$0xf] %vm4684_vm8, %v5806_v49  ;;  %v5100_v35 = vadd.f32 %v5099_v9, %v5098_v0  ;;  %v5807_v53 = vpack.c.bf16 %v7597_v44, %v7597_v44  ;;  %v7603_v30 = vpop.f32.mrb[11].mxu0  ;;  %v5105_v58 = vsel %vm4877_vm7, %v7597_v44, 0.0 }
 0x253   : > { %4853 = vst.msk [vmem:[%s7521_s29 + $0x20] sm:$0xf] %vm4684_vm8, %v5804_v12  ;;  %v5805_v39 = vpack.c.bf16 %v7603_v30, %v7603_v30  ;;  %v5101_v18 = vsel %vm4877_vm7, %v7603_v30, 0.0 }
 0x254   : > { %4856 = vst.msk [vmem:[%s7521_s29 + $0x2c] sm:$0xf] %vm4684_vm8, %v5807_v53  ;;  %v5102_v19 = vadd.f32 %v5101_v18, %v5100_v35 }
 0x255   : > { %4854 = vst.msk [vmem:[%s7521_s29 + $0x24] sm:$0xf] %vm4684_vm8, %v5805_v39 }
 0x256   : > { %v5104_v2 = vadd.f32 %v5103_v57, %v5102_v19 }
 0x257   : > { %v7619_v15 = vpop.f32.mrb[12].mxu0 }
 0x258   : > { %v5106_v50 = vadd.f32 %v5105_v58, %v5104_v2  ;;  %v5810_v1 = vpack.c.bf16 %v7619_v15, %v7619_v15  ;;  %v7623_v63 = vpop.f32.mrb[13].mxu0  ;;  %v5111_v21 = vsel %vm4877_vm7, %v7619_v15, 0.0 }
 0x259   : > { %v5808_v45 = vpack.c.bf16 %v7623_v63, %v7623_v63  ;;  %v5107_v8 = vsel %vm4877_vm7, %v7623_v63, 0.0  ;;  %v7629_v16 = vpop.f32.mrb[14].mxu0 }
 0x25a   : > { %4859 = vst.msk [vmem:[%s7521_s29 + $0x38] sm:$0xf] %vm4684_vm8, %v5810_v1  ;;  %v5108_v26 = vadd.f32 %v5107_v8, %v5106_v50  ;;  %v5811_v11 = vpack.c.bf16 %v7629_v16, %v7629_v16  ;;  %v7635_v3 = vpop.f32.mrb[15].mxu0  ;;  %v5113_v62 = vsel %vm4877_vm7, %v7629_v16, 0.0 }
 0x25b   : > { %4857 = vst.msk [vmem:[%s7521_s29 + $0x30] sm:$0xf] %vm4684_vm8, %v5808_v45  ;;  %v5809_v10 = vpack.c.bf16 %v7635_v3, %v7635_v3  ;;  %v5109_v22 = vsel %vm4877_vm7, %v7635_v3, 0.0 }
 0x25c   : > { %4860 = vst.msk [vmem:[%s7521_s29 + $0x3c] sm:$0xf] %vm4684_vm8, %v5811_v11  ;;  %v5110_v55 = vadd.f32 %v5109_v22, %v5108_v26 }
 0x25d   : > { %4858 = vst.msk [vmem:[%s7521_s29 + $0x34] sm:$0xf] %vm4684_vm8, %v5809_v10 }
 0x25e   : > { %v5112_v56 = vadd.f32 %v5111_v21, %v5110_v55 }
 0x25f   : > { %v7651_v31 = vpop.f32.mrb[16].mxu0 }
 0x260   : > { %v5814_v33 = vpack.c.bf16 %v7651_v31, %v7651_v31  ;;  %v7655_v32 = vpop.f32.mrb[17].mxu0  ;;  %v5114_v34 = vadd.f32 %v5113_v62, %v5112_v56  ;;  %v7657_v38 = vpop.f32.mrb[16].mxu1  ;;  %v5119_v9 = vsel %vm4877_vm7, %v7651_v31, 0.0 }
 0x261   : > { %8211 = vst [vmem:[#allocation8_spill] sm:$0xff] %v7657_v38  ;;  %v5812_v43 = vpack.c.bf16 %v7655_v32, %v7655_v32  ;;  %v5115_v28 = vsel %vm4877_vm7, %v7655_v32, 0.0  ;;  %v7663_v49 = vpop.f32.mrb[18].mxu0  ;;  %v5782_v0 = vpack.c.bf16 %v7657_v38, %v7657_v38  ;;  %v7667_v12 = vpop.f32.mrb[17].mxu1 }
 0x262   : > { %8212 = vst [vmem:[#allocation9_spill] sm:$0xff] %v7667_v12  ;;  %4863 = vst.msk [vmem:[%s7521_s29 + $0x48] sm:$0xf] %vm4684_vm8, %v5814_v33  ;;  %v5116_v35 = vadd.f32 %v5115_v28, %v5114_v34  ;;  %v5815_v53 = vpack.c.bf16 %v7663_v49, %v7663_v49  ;;  %v7675_v57 = vpop.f32.mrb[19].mxu0  ;;  %v5780_v39 = vpack.c.bf16 %v7667_v12, %v7667_v12  ;;  %v7679_v18 = vpop.f32.mrb[18].mxu1  ;;  %v4909_v2 = vsel %vm4877_vm7, %v7667_v12, 0.0 }
 0x263   : > { %8213 = vst [vmem:[#allocation10_spill] sm:$0xff] %v7679_v18  ;;  %4861 = vst.msk [vmem:[%s7521_s29 + $0x40] sm:$0xf] %vm4684_vm8, %v5812_v43  ;;  %v5813_v19 = vpack.c.bf16 %v7675_v57, %v7675_v57  ;;  %v5117_v58 = vsel %vm4877_vm7, %v7675_v57, 0.0  ;;  %v5783_v50 = vpack.c.bf16 %v7679_v18, %v7679_v18  ;;  %v7693_v1 = vpop.f32.mrb[19].mxu1  ;;  %v4910_v8 = vadd.f32 %v4909_v2, %v7515_v6 }
 0x264   : > { %4703 = vst.msk [vmem:[%s7360_s26 + $0x48] sm:$0xf] %vm4684_vm8, %v5782_v0  ;;  %8214 = vst [vmem:[#allocation11_spill] sm:$0xff] %v7693_v1  ;;  %v5118_v45 = vadd.f32 %v5117_v58, %v5116_v35  ;;  %v5781_v26 = vpack.c.bf16 %v7693_v1, %v7693_v1  ;;  %v5121_v11 = vsel %vm4877_vm7, %v7663_v49, 0.0  ;;  %v4911_v21 = vsel %vm4877_vm7, %v7693_v1, 0.0 }
 0x265   : > { %4864 = vst.msk [vmem:[%s7521_s29 + $0x4c] sm:$0xf] %vm4684_vm8, %v5815_v53  ;;  %4701 = vst.msk [vmem:[%s7360_s26 + $0x40] sm:$0xf] %vm4684_vm8, %v5780_v39  ;;  %v4912_v22 = vadd.f32 %v4911_v21, %v4910_v8  ;;  %v4913_v6 = vsel %vm4877_vm7, %v7657_v38, 0.0 }
 0x266   : > { %4862 = vst.msk [vmem:[%s7521_s29 + $0x44] sm:$0xf] %vm4684_vm8, %v5813_v19  ;;  %4704 = vst.msk [vmem:[%s7360_s26 + $0x4c] sm:$0xf] %vm4684_vm8, %v5783_v50  ;;  %v5120_v10 = vadd.f32 %v5119_v9, %v5118_v45  ;;  %v4915_v9 = vsel %vm4877_vm7, %v7679_v18, 0.0 }
 0x267   : > { %4702 = vst.msk [vmem:[%s7360_s26 + $0x44] sm:$0xf] %vm4684_vm8, %v5781_v26  ;;  %v7712_v55 = vpop.f32.mrb[20].mxu0  ;;  %v4914_v34 = vadd.f32 %v4913_v6, %v4912_v22 }
 0x268   : > { %v5818_v62 = vpack.c.bf16 %v7712_v55, %v7712_v55  ;;  %v7718_v56 = vpop.f32.mrb[21].mxu0  ;;  %v5122_v33 = vadd.f32 %v5121_v11, %v5120_v10  ;;  %v5127_v58 = vsel %vm4877_vm7, %v7712_v55, 0.0 }
 0x269   : > { %v5816_v43 = vpack.c.bf16 %v7718_v56, %v7718_v56  ;;  %v5123_v28 = vsel %vm4877_vm7, %v7718_v56, 0.0  ;;  %v7724_v0 = vpop.f32.mrb[22].mxu0  ;;  %v7734_v19 = vadd.f32 %v4915_v9, %v4914_v34 }
 0x26a   : > { %4867 = vst.msk [vmem:[%s7521_s29 + $0x58] sm:$0xf] %vm4684_vm8, %v5818_v62  ;;  %v5124_v35 = vadd.f32 %v5123_v28, %v5122_v33  ;;  %v5819_v53 = vpack.c.bf16 %v7724_v0, %v7724_v0  ;;  %v7732_v39 = vpop.f32.mrb[23].mxu0  ;;  %v5129_v8 = vsel %vm4877_vm7, %v7724_v0, 0.0 }
 0x26b   : > { %4865 = vst.msk [vmem:[%s7521_s29 + $0x50] sm:$0xf] %vm4684_vm8, %v5816_v43  ;;  %v5817_v2 = vpack.c.bf16 %v7732_v39, %v7732_v39  ;;  %v5125_v50 = vsel %vm4877_vm7, %v7732_v39, 0.0 }
 0x26c   : > { %4868 = vst.msk [vmem:[%s7521_s29 + $0x5c] sm:$0xf] %vm4684_vm8, %v5819_v53  ;;  %v5126_v45 = vadd.f32 %v5125_v50, %v5124_v35 }
 0x26d   : > { %4866 = vst.msk [vmem:[%s7521_s29 + $0x54] sm:$0xf] %vm4684_vm8, %v5817_v2 }
 0x26e   : > { %v5128_v26 = vadd.f32 %v5127_v58, %v5126_v45 }
 0x26f   : > { %v7750_v11 = vpop.f32.mrb[24].mxu0 }
 0x270   : > { %v5822_v21 = vpack.c.bf16 %v7750_v11, %v7750_v11  ;;  %v7754_v10 = vpop.f32.mrb[25].mxu0  ;;  %v5130_v22 = vadd.f32 %v5129_v8, %v5128_v26  ;;  %v5135_v9 = vsel %vm4877_vm7, %v7750_v11, 0.0 }
 0x271   : > { %v5820_v6 = vpack.c.bf16 %v7754_v10, %v7754_v10  ;;  %v5131_v62 = vsel %vm4877_vm7, %v7754_v10, 0.0  ;;  %v7760_v33 = vpop.f32.mrb[26].mxu0 }
 0x272   : > { %4871 = vst.msk [vmem:[%s7521_s29 + $0x68] sm:$0xf] %vm4684_vm8, %v5822_v21  ;;  %v5132_v34 = vadd.f32 %v5131_v62, %v5130_v22  ;;  %v5823_v43 = vpack.c.bf16 %v7760_v33, %v7760_v33  ;;  %v7766_v28 = vpop.f32.mrb[27].mxu0  ;;  %v5137_v2 = vsel %vm4877_vm7, %v7760_v33, 0.0 }
 0x273   : > { %4869 = vst.msk [vmem:[%s7521_s29 + $0x60] sm:$0xf] %vm4684_vm8, %v5820_v6  ;;  %v5821_v35 = vpack.c.bf16 %v7766_v28, %v7766_v28  ;;  %v5133_v53 = vsel %vm4877_vm7, %v7766_v28, 0.0 }
 0x274   : > { %4872 = vst.msk [vmem:[%s7521_s29 + $0x6c] sm:$0xf] %vm4684_vm8, %v5823_v43  ;;  %v5134_v58 = vadd.f32 %v5133_v53, %v5132_v34 }
 0x275   : > { %4870 = vst.msk [vmem:[%s7521_s29 + $0x64] sm:$0xf] %vm4684_vm8, %v5821_v35 }
 0x276   : > { %v5136_v50 = vadd.f32 %v5135_v9, %v5134_v58 }
 0x277   : > { %v7782_v45 = vpop.f32.mrb[28].mxu0 }
 0x278   : > { %v5826_v8 = vpack.c.bf16 %v7782_v45, %v7782_v45  ;;  %v1189_v26 = vpop.f32.mrb[29].mxu0  ;;  %v5138_v21 = vadd.f32 %v5137_v2, %v5136_v50  ;;  %v5143_v9 = vsel %vm4877_vm7, %v7782_v45, 0.0 }
 0x279   : > { %v5824_v22 = vpack.c.bf16 %v1189_v26, %v1189_v26  ;;  %v5139_v6 = vsel %vm4877_vm7, %v1189_v26, 0.0  ;;  %v5897_v62 = vpop.f32.mrb[30].mxu0 }
 0x27a   : > { %4875 = vst.msk [vmem:[%s7521_s29 + $0x78] sm:$0xf] %vm4684_vm8, %v5826_v8  ;;  %v5140_v34 = vadd.f32 %v5139_v6, %v5138_v21  ;;  %v5827_v43 = vpack.c.bf16 %v5897_v62, %v5897_v62  ;;  %v1192_v35 = vpop.f32.mrb[31].mxu0  ;;  %v5145_v50 = vsel %vm4877_vm7, %v5897_v62, 0.0 }
 0x27b   : > { %4873 = vst.msk [vmem:[%s7521_s29 + $0x70] sm:$0xf] %vm4684_vm8, %v5824_v22  ;;  %v5825_v53 = vpack.c.bf16 %v1192_v35, %v1192_v35  ;;  %v5141_v58 = vsel %vm4877_vm7, %v1192_v35, 0.0 }
 0x27c   : > { %4876 = vst.msk [vmem:[%s7521_s29 + $0x7c] sm:$0xf] %vm4684_vm8, %v5827_v43  ;;  %v5142_v2 = vadd.f32 %v5141_v58, %v5140_v34 }
 0x27d   : > { %4874 = vst.msk [vmem:[%s7521_s29 + $0x74] sm:$0xf] %vm4684_vm8, %v5825_v53 }
 0x27e   : > { %v5144_v8 = vadd.f32 %v5143_v9, %v5142_v2 }
 0x280   : > { %v5146_v21 = vadd.f32 %v5145_v50, %v5144_v8 }
 0x282   : > { %v5147_v6 = vrot.slane %v5146_v21, 4 }
 0x284   : > { %v5148_v18 = vadd.f32 %v5147_v6, %v5146_v21 }
 0x286   : > { %v5149_v38 = vrot.slane %v5148_v18, 2 }
 0x288   : > { %v5150_v1 = vadd.f32 %v5149_v38, %v5148_v18 }
 0x28a   : > { %v5151_v12 = vrot.slane %v5150_v1, 1 }
 0x28c   : > { %v5152_v22 = vadd.f32 %v5151_v12, %v5150_v1 }
 0x28e   : > { %v5153_v34 = vmul.f32 0.00390625, %v5152_v22  ;;  %5186 = vst.msk [vmem:[%s7805_s8] sm:$0x1] %vm4980_vm2, %v5152_v22 }
 0x28f   : > { %v7809_v43 = vpop.f32.mrb[20].mxu1 }
 0x290   : > { %v5154_v9 = vsub.f32 %v7527_v61, %v5153_v34  ;;  %v5155_v53 = vsub.f32 %v7539_v29, %v5153_v34  ;;  %v5156_v38 = vsub.f32 %v7523_v36, %v5153_v34  ;;  %v5157_v18 = vsub.f32 %v7533_v40, %v5153_v34  ;;  %v7815_v58 = vpop.f32.mrb[21].mxu1 }
 0x291   : > { %v5158_v2 = vsub.f32 %v7559_v25, %v5153_v34  ;;  %v5159_v50 = vsub.f32 %v7571_v23, %v5153_v34  ;;  %v5160_v12 = vsub.f32 %v7555_v13, %v5153_v34  ;;  %v5161_v1 = vsub.f32 %v7565_v20, %v5153_v34  ;;  %v7821_v8 = vpop.f32.mrb[22].mxu1 }
 0x292   : > { %v5162_v61 = vsub.f32 %v7591_v5, %v5153_v34  ;;  %v5163_v29 = vsub.f32 %v7603_v30, %v5153_v34  ;;  %v5164_v36 = vsub.f32 %v7587_v48, %v5153_v34  ;;  %v5165_v40 = vsub.f32 %v7597_v44, %v5153_v34  ;;  %v7827_v21 = vpop.f32.mrb[23].mxu1 }
 0x293   : > { %v7830_v25 = vsub.f32 %v7623_v63, %v5153_v34  ;;  %v7833_v23 = vsub.f32 %v7635_v3, %v5153_v34  ;;  %v7836_v13 = vsub.f32 %v7619_v15, %v5153_v34  ;;  %v7839_v20 = vsub.f32 %v7629_v16, %v5153_v34 }
 0x294   : > { %v7842_v5 = vsub.f32 %v7655_v32, %v5153_v34  ;;  %v7845_v48 = vsub.f32 %v7675_v57, %v5153_v34  ;;  %v7848_v44 = vsub.f32 %v7651_v31, %v5153_v34  ;;  %v7851_v30 = vsub.f32 %v7663_v49, %v5153_v34 }
 0x295   : > { %v7854_v63 = vsub.f32 %v7718_v56, %v5153_v34  ;;  %v7857_v15 = vsub.f32 %v7732_v39, %v5153_v34  ;;  %v7860_v16 = vsub.f32 %v7712_v55, %v5153_v34  ;;  %v7863_v3 = vsub.f32 %v7724_v0, %v5153_v34 }
 0x296   : > { %v7866_v32 = vsub.f32 %v7754_v10, %v5153_v34  ;;  %v7869_v31 = vsub.f32 %v7766_v28, %v5153_v34  ;;  %v7872_v49 = vsub.f32 %v7750_v11, %v5153_v34  ;;  %v7875_v57 = vsub.f32 %v7760_v33, %v5153_v34 }
 0x297   : > { %v7877_v56 = vsub.f32 %v1189_v26, %v5153_v34  ;;  %v7879_v39 = vsub.f32 %v1192_v35, %v5153_v34  ;;  %v7882_v55 = vsub.f32 %v7782_v45, %v5153_v34  ;;  %v7884_v0 = vsub.f32 %v5897_v62, %v5153_v34 }
 0x298   : > { %v5187_v10 = vmul.f32 %v5154_v9, %v5154_v9  ;;  %v5188_v6 = vmul.f32 %v5155_v53, %v5155_v53  ;;  %v5189_v22 = vmul.f32 %v5156_v38, %v5156_v38  ;;  %v5190_v28 = vmul.f32 %v5157_v18, %v5157_v18 }
 0x299   : > { %v5191_v54 = vmul.f32 %v5158_v2, %v5158_v2  ;;  %v5192_v60 = vmul.f32 %v5159_v50, %v5159_v50  ;;  %v5193_v45 = vmul.f32 %v5160_v12, %v5160_v12  ;;  %v5194_v9 = vmul.f32 %v5161_v1, %v5161_v1 }
 0x29a   : > { %v5219_v11 = vsel %vm4877_vm7, %v5187_v10, 0.0  ;;  %v5220_v52 = vsel %vm4877_vm7, %v5188_v6, 0.0  ;;  %v5222_v33 = vsel %vm4877_vm7, %v5189_v22, 0.0  ;;  %v5224_v35 = vsel %vm4877_vm7, %v5190_v28, 0.0 }
 0x29b   : > { %v5221_v26 = vadd.f32 %v5220_v52, %v5219_v11  ;;  %v5226_v62 = vsel %vm4877_vm7, %v5191_v54, 0.0  ;;  %v5228_v53 = vsel %vm4877_vm7, %v5192_v60, 0.0  ;;  %v5195_v18 = vmul.f32 %v5162_v61, %v5162_v61 }
 0x29c   : > { %v5230_v2 = vsel %vm4877_vm7, %v5193_v45, 0.0  ;;  %v5196_v10 = vmul.f32 %v5163_v29, %v5163_v29  ;;  %v5786_v50 = vpack.c.bf16 %v7809_v43, %v7809_v43  ;;  %v5784_v54 = vpack.c.bf16 %v7815_v58, %v7815_v58 }
 0x29d   : > { %v5223_v59 = vadd.f32 %v5222_v33, %v5221_v26  ;;  %v4917_v12 = vsel %vm4877_vm7, %v7815_v58, 0.0  ;;  %v5787_v60 = vpack.c.bf16 %v7821_v8, %v7821_v8  ;;  %v5785_v1 = vpack.c.bf16 %v7827_v21, %v7827_v21 }
 0x29e   : > { %4707 = vst.msk [vmem:[%s7360_s26 + $0x58] sm:$0xf] %vm4684_vm8, %v5786_v50  ;;  %4705 = vst.msk [vmem:[%s7360_s26 + $0x50] sm:$0xf] %vm4684_vm8, %v5784_v54  ;;  %v4918_v29 = vadd.f32 %v4917_v12, %v7734_v19  ;;  %v4919_v6 = vsel %vm4877_vm7, %v7827_v21, 0.0  ;;  %v5197_v22 = vmul.f32 %v5164_v36, %v5164_v36  ;;  %v5234_v28 = vsel %vm4877_vm7, %v5195_v18, 0.0 }
 0x29f   : > { %v5225_v34 = vadd.f32 %v5224_v35, %v5223_v59  ;;  %v5232_v59 = vsel %vm4877_vm7, %v5194_v9, 0.0  ;;  %4708 = vst.msk [vmem:[%s7360_s26 + $0x5c] sm:$0xf] %vm4684_vm8, %v5787_v60  ;;  %4706 = vst.msk [vmem:[%s7360_s26 + $0x54] sm:$0xf] %vm4684_vm8, %v5785_v1  ;;  %v5198_v26 = vmul.f32 %v5165_v40, %v5165_v40  ;;  %v5236_v35 = vsel %vm4877_vm7, %v5196_v10, 0.0 }
 0x2a0   : > { %v4920_v33 = vadd.f32 %v4919_v6, %v4918_v29  ;;  %v4921_v45 = vsel %vm4877_vm7, %v7809_v43, 0.0  ;;  %v5238_v36 = vsel %vm4877_vm7, %v5197_v22, 0.0  ;;  %v4923_v9 = vsel %vm4877_vm7, %v7821_v8, 0.0 }
 0x2a1   : > { %v5227_v38 = vadd.f32 %v5226_v62, %v5225_v34  ;;  %v5199_v34 = vmul.f32 %v7830_v25, %v7830_v25  ;;  %v5200_v40 = vmul.f32 %v7833_v23, %v7833_v23  ;;  %v5240_v18 = vsel %vm4877_vm7, %v5198_v26, 0.0 }
 0x2a2   : > { %v4922_v19 = vadd.f32 %v4921_v45, %v4920_v33  ;;  %v5201_v10 = vmul.f32 %v7836_v13, %v7836_v13  ;;  %v5202_v25 = vmul.f32 %v7839_v20, %v7839_v20  ;;  %v5203_v12 = vmul.f32 %v7842_v5, %v7842_v5 }
 0x2a3   : > { %v5229_v52 = vadd.f32 %v5228_v53, %v5227_v38  ;;  %v5244_v54 = vsel %vm4877_vm7, %v5200_v40, 0.0  ;;  %v5204_v1 = vmul.f32 %v7845_v48, %v7845_v48  ;;  %v5205_v29 = vmul.f32 %v7848_v44, %v7848_v44 }
 0x2a4   : > { %v4924_v38 = vadd.f32 %v4923_v9, %v4922_v19  ;;  %v5246_v23 = vsel %vm4877_vm7, %v5201_v10, 0.0  ;;  %v5248_v13 = vsel %vm4877_vm7, %v5202_v25, 0.0  ;;  %v5250_v20 = vsel %vm4877_vm7, %v5203_v12, 0.0 }
 0x2a5   : > { %v5231_v61 = vadd.f32 %v5230_v2, %v5229_v52  ;;  %v5242_v52 = vsel %vm4877_vm7, %v5199_v34, 0.0  ;;  %v5206_v22 = vmul.f32 %v7851_v30, %v7851_v30  ;;  %v5252_v5 = vsel %vm4877_vm7, %v5204_v1, 0.0 }
 0x2a6   : > { %v5207_v48 = vmul.f32 %v7854_v63, %v7854_v63  ;;  %v5254_v33 = vsel %vm4877_vm7, %v5205_v29, 0.0  ;;  %v5208_v63 = vmul.f32 %v7857_v15, %v7857_v15  ;;  %v5211_v12 = vmul.f32 %v7866_v32, %v7866_v32 }
 0x2a7   : > { %v5233_v11 = vadd.f32 %v5232_v59, %v5231_v61  ;;  %v5256_v19 = vsel %vm4877_vm7, %v5206_v22, 0.0  ;;  %v5213_v29 = vmul.f32 %v7872_v49, %v7872_v49  ;;  %v5214_v22 = vmul.f32 %v7875_v57, %v7875_v57 }
 0x2a8   : > { %v5260_v25 = vsel %vm4877_vm7, %v5208_v63, 0.0 }
 0x2a9   : > { %v5235_v62 = vadd.f32 %v5234_v28, %v5233_v11  ;;  %v5272_v49 = vsel %vm4877_vm7, %v5214_v22, 0.0 }
 0x2ab   : > { %v5237_v53 = vadd.f32 %v5236_v35, %v5235_v62 }
 0x2ad   : > { %v5239_v2 = vadd.f32 %v5238_v36, %v5237_v53 }
 0x2af   : > { %v5241_v50 = vadd.f32 %v5240_v18, %v5239_v2  ;;  %v5209_v18 = vmul.f32 %v7860_v16, %v7860_v16  ;;  %v5258_v2 = vsel %vm4877_vm7, %v5207_v48, 0.0 }
 0x2b1   : > { %v5243_v59 = vadd.f32 %v5242_v52, %v5241_v50  ;;  %v5210_v50 = vmul.f32 %v7863_v3, %v7863_v3 }
 0x2b3   : > { %v5245_v60 = vadd.f32 %v5244_v54, %v5243_v59 }
 0x2b5   : > { %v5247_v61 = vadd.f32 %v5246_v23, %v5245_v60  ;;  %v5262_v23 = vsel %vm4877_vm7, %v5209_v18, 0.0 }
 0x2b7   : > { %v5249_v6 = vadd.f32 %v5248_v13, %v5247_v61  ;;  %v5212_v13 = vmul.f32 %v7869_v31, %v7869_v31  ;;  %v5264_v61 = vsel %vm4877_vm7, %v5210_v50, 0.0  ;;  %v5270_v31 = vsel %vm4877_vm7, %v5213_v29, 0.0 }
 0x2b9   : > { %v5251_v28 = vadd.f32 %v5250_v20, %v5249_v6  ;;  %v5266_v20 = vsel %vm4877_vm7, %v5211_v12, 0.0  ;;  %v5268_v32 = vsel %vm4877_vm7, %v5212_v13, 0.0 }
 0x2bb   : > { %v5253_v35 = vadd.f32 %v5252_v5, %v5251_v28  ;;  %v5215_v28 = vmul.f32 %v7877_v56, %v7877_v56 }
 0x2bd   : > { %v5255_v53 = vadd.f32 %v5254_v33, %v5253_v35  ;;  %v5216_v33 = vmul.f32 %v7879_v39, %v7879_v39  ;;  %v5217_v35 = vmul.f32 %v7882_v55, %v7882_v55  ;;  %v5274_v57 = vsel %vm4877_vm7, %v5215_v28, 0.0 }
 0x2bf   : > { %v5257_v10 = vadd.f32 %v5256_v19, %v5255_v53  ;;  %v5276_v56 = vsel %vm4877_vm7, %v5216_v33, 0.0  ;;  %v5278_v19 = vsel %vm4877_vm7, %v5217_v35, 0.0 }
 0x2c0   : > { %v7945_v11 = vpop.f32.mrb[24].mxu1 }
 0x2c1   : > { %v5790_v44 = vpack.c.bf16 %v7945_v11, %v7945_v11  ;;  %v7952_v26 = vpop.f32.mrb[25].mxu1  ;;  %v4929_v52 = vsel %vm4877_vm7, %v7945_v11, 0.0  ;;  %v5259_v59 = vadd.f32 %v5258_v2, %v5257_v10 }
 0x2c2   : > { %v5788_v30 = vpack.c.bf16 %v7952_v26, %v7952_v26  ;;  %v4925_v45 = vsel %vm4877_vm7, %v7952_v26, 0.0  ;;  %v7958_v62 = vpop.f32.mrb[26].mxu1 }
 0x2c3   : > { %4711 = vst.msk [vmem:[%s7360_s26 + $0x68] sm:$0xf] %vm4684_vm8, %v5790_v44  ;;  %v4926_v34 = vadd.f32 %v4925_v45, %v4924_v38  ;;  %v5791_v36 = vpack.c.bf16 %v7958_v62, %v7958_v62  ;;  %v7967_v9 = vpop.f32.mrb[27].mxu1  ;;  %v4931_v16 = vsel %vm4877_vm7, %v7958_v62, 0.0  ;;  %v5261_v1 = vadd.f32 %v5260_v25, %v5259_v59 }
 0x2c4   : > { %4709 = vst.msk [vmem:[%s7360_s26 + $0x60] sm:$0xf] %vm4684_vm8, %v5788_v30  ;;  %v5789_v40 = vpack.c.bf16 %v7967_v9, %v7967_v9  ;;  %v4927_v15 = vsel %vm4877_vm7, %v7967_v9, 0.0  ;;  %v5218_v45 = vmul.f32 %v7884_v0, %v7884_v0 }
 0x2c5   : > { %4712 = vst.msk [vmem:[%s7360_s26 + $0x6c] sm:$0xf] %vm4684_vm8, %v5791_v36  ;;  %v4928_v38 = vadd.f32 %v4927_v15, %v4926_v34  ;;  %v5263_v3 = vadd.f32 %v5262_v23, %v5261_v1 }
 0x2c6   : > { %4710 = vst.msk [vmem:[%s7360_s26 + $0x64] sm:$0xf] %vm4684_vm8, %v5789_v40  ;;  %v5280_v39 = vsel %vm4877_vm7, %v5218_v45, 0.0 }
 0x2c7   : > { %v4930_v54 = vadd.f32 %v4929_v52, %v4928_v38  ;;  %v5265_v6 = vadd.f32 %v5264_v61, %v5263_v3 }
 0x2c9   : > { %v4932_v60 = vadd.f32 %v4931_v16, %v4930_v54  ;;  %v5267_v5 = vadd.f32 %v5266_v20, %v5265_v6 }
 0x2cb   : > { %v5269_v48 = vadd.f32 %v5268_v32, %v5267_v5 }
 0x2cd   : > { %v5271_v44 = vadd.f32 %v5270_v31, %v5269_v48 }
 0x2cf   : > { %v5273_v30 = vadd.f32 %v5272_v49, %v5271_v44 }
 0x2d1   : > { %v5275_v63 = vadd.f32 %v5274_v57, %v5273_v30 }
 0x2d3   : > { %v5277_v34 = vadd.f32 %v5276_v56, %v5275_v63 }
 0x2d5   : > { %v5279_v36 = vadd.f32 %v5278_v19, %v5277_v34  ;;  %v8215_v19 = vld [vmem:[#allocation5_spill] sm:$0xff]  ;;  %v8216_v34 = vld [vmem:[#allocation7_spill] sm:$0xff] }
 0x2d7   : > { %v5281_v53 = vadd.f32 %v5280_v39, %v5279_v36  ;;  %v8217_v39 = vld [vmem:[#allocation4_spill] sm:$0xff]  ;;  %v8218_v36 = vld [vmem:[#allocation6_spill] sm:$0xff] }
 0x2d9   : > { %v5282_v40 = vrot.slane %v5281_v53, 4 }
 0x2db   : > { %v5283_v55 = vadd.f32 %v5282_v40, %v5281_v53  ;;  %v8219_v53 = vld [vmem:[#allocation9_spill] sm:$0xff]  ;;  %v8220_v40 = vld [vmem:[#allocation11_spill] sm:$0xff] }
 0x2dd   : > { %v5284_v15 = vrot.slane %v5283_v55, 2 }
 0x2df   : > { %v5285_v18 = vadd.f32 %v5284_v15, %v5283_v55  ;;  %v8221_v55 = vld [vmem:[#allocation8_spill] sm:$0xff] }
 0x2e1   : > { %v5286_v2 = vrot.slane %v5285_v18, 1 }
 0x2e3   : > { %v5287_v38 = vadd.f32 %v5286_v2, %v5285_v18 }
 0x2e5   : > { %5288 = vst.msk [vmem:[%s7805_s8 + $0x1] sm:$0x1] %vm4980_vm2, %v5287_v38 }
 0x2ee   : > { %v5934_v0 = vpop.f32.mrb[28].mxu1 }
 0x2ef   : > { %v5794_v10 = vpack.c.bf16 %v5934_v0, %v5934_v0  ;;  %v4541_v52 = vpop.f32.mrb[29].mxu1  ;;  %v4937_v61 = vsel %vm4877_vm7, %v5934_v0, 0.0 }
 0x2f0   : > { %v5792_v50 = vpack.c.bf16 %v4541_v52, %v4541_v52  ;;  %v4933_v25 = vsel %vm4877_vm7, %v4541_v52, 0.0  ;;  %v5935_v54 = vpop.f32.mrb[30].mxu1 }
 0x2f1   : > { %4715 = vst.msk [vmem:[%s7360_s26 + $0x78] sm:$0xf] %vm4684_vm8, %v5794_v10  ;;  %v4934_v59 = vadd.f32 %v4933_v25, %v4932_v60  ;;  %v5795_v16 = vpack.c.bf16 %v5935_v54, %v5935_v54  ;;  %v4544_v12 = vpop.f32.mrb[31].mxu1  ;;  %v4939_v29 = vsel %vm4877_vm7, %v5935_v54, 0.0 }
 0x2f2   : > { %4713 = vst.msk [vmem:[%s7360_s26 + $0x70] sm:$0xf] %vm4684_vm8, %v5792_v50  ;;  %v5793_v23 = vpack.c.bf16 %v4544_v12, %v4544_v12  ;;  %v4935_v1 = vsel %vm4877_vm7, %v4544_v12, 0.0 }
 0x2f3   : > { %4716 = vst.msk [vmem:[%s7360_s26 + $0x7c] sm:$0xf] %vm4684_vm8, %v5795_v16  ;;  %v4936_v13 = vadd.f32 %v4935_v1, %v4934_v59 }
 0x2f4   : > { %4714 = vst.msk [vmem:[%s7360_s26 + $0x74] sm:$0xf] %vm4684_vm8, %v5793_v23 }
 0x2f5   : > { %v4938_v3 = vadd.f32 %v4937_v61, %v4936_v13 }
 0x2f7   : > { %v4940_v20 = vadd.f32 %v4939_v29, %v4938_v3 }
 0x2f9   : > { %v4941_v60 = vrot.slane %v4940_v20, 4 }
 0x2fb   : > { %v4942_v6 = vadd.f32 %v4941_v60, %v4940_v20 }
 0x2fd   : > { %v4943_v22 = vrot.slane %v4942_v6, 2 }
 0x2ff   : > { %v4944_v32 = vadd.f32 %v4943_v22, %v4942_v6 }
 0x301   : > { %v4945_v5 = vrot.slane %v4944_v32, 1 }
 0x303   : > { %v4946_v28 = vadd.f32 %v4945_v5, %v4944_v32 }
 0x305   : > { %v4947_v31 = vmul.f32 0.00390625, %v4946_v28  ;;  %4981 = vst.msk [vmem:[%s8034_s11] sm:$0x1] %vm4980_vm2, %v4946_v28 }
 0x307   : > { %v4948_v48 = vsub.f32 %v7366_v47, %v4947_v31  ;;  %v4949_v33 = vsub.f32 %v7378_v37, %v4947_v31  ;;  %v4950_v49 = vsub.f32 %v7362_v42, %v4947_v31  ;;  %v4951_v44 = vsub.f32 %v7371_v7, %v4947_v31 }
 0x308   : > { %v4952_v35 = vsub.f32 %v7401_v27, %v4947_v31  ;;  %v4953_v57 = vsub.f32 %v7414_v46, %v4947_v31  ;;  %v4954_v30 = vsub.f32 %v7397_v4, %v4947_v31  ;;  %v4955_v45 = vsub.f32 %v7407_v41, %v4947_v31 }
 0x309   : > { %v4956_v56 = vsub.f32 %v7446_v17, %v4947_v31  ;;  %v4957_v63 = vsub.f32 %v7458_v24, %v4947_v31  ;;  %v4958_v47 = vsub.f32 %v7442_v14, %v4947_v31  ;;  %v4959_v37 = vsub.f32 %v7452_v51, %v4947_v31  ;;  %v8222_v24 = vld [vmem:[#allocation10_spill] sm:$0xff] }
 0x30a   : > { %v4960_v42 = vsub.f32 %v8215_v19, %v4947_v31  ;;  %v4961_v7 = vsub.f32 %v8216_v34, %v4947_v31  ;;  %v4962_v27 = vsub.f32 %v8217_v39, %v4947_v31  ;;  %v4963_v46 = vsub.f32 %v8218_v36, %v4947_v31 }
 0x30b   : > { %v4964_v4 = vsub.f32 %v8219_v53, %v4947_v31  ;;  %v4965_v41 = vsub.f32 %v8220_v40, %v4947_v31  ;;  %v8057_v17 = vsub.f32 %v8221_v55, %v4947_v31  ;;  %v8060_v15 = vsub.f32 %v8222_v24, %v4947_v31 }
 0x30c   : > { %v8063_v14 = vsub.f32 %v7815_v58, %v4947_v31  ;;  %v8066_v51 = vsub.f32 %v7827_v21, %v4947_v31  ;;  %v8069_v18 = vsub.f32 %v7809_v43, %v4947_v31  ;;  %v8072_v2 = vsub.f32 %v7821_v8, %v4947_v31 }
 0x30d   : > { %v8075_v38 = vsub.f32 %v7952_v26, %v4947_v31  ;;  %v8078_v10 = vsub.f32 %v7967_v9, %v4947_v31  ;;  %v8081_v50 = vsub.f32 %v7945_v11, %v4947_v31  ;;  %v8084_v58 = vsub.f32 %v7958_v62, %v4947_v31 }
 0x30e   : > { %v8086_v21 = vsub.f32 %v4541_v52, %v4947_v31  ;;  %v8088_v25 = vsub.f32 %v4544_v12, %v4947_v31  ;;  %v8090_v43 = vsub.f32 %v5934_v0, %v4947_v31  ;;  %v8092_v8 = vsub.f32 %v5935_v54, %v4947_v31 }
 0x30f   : > { %v4982_v59 = vmul.f32 %v4948_v48, %v4948_v48  ;;  %v4983_v26 = vmul.f32 %v4949_v33, %v4949_v33  ;;  %v4984_v16 = vmul.f32 %v4950_v49, %v4950_v49  ;;  %v4985_v23 = vmul.f32 %v4951_v44, %v4951_v44 }
 0x310   : > { %v4986_v13 = vmul.f32 %v4952_v35, %v4952_v35  ;;  %v4987_v61 = vmul.f32 %v4953_v57, %v4953_v57  ;;  %v4988_v3 = vmul.f32 %v4954_v30, %v4954_v30  ;;  %v4989_v20 = vmul.f32 %v4955_v45, %v4955_v45 }
 0x311   : > { %v5014_v9 = vsel %vm4877_vm7, %v4982_v59, 0.0  ;;  %v5015_v11 = vsel %vm4877_vm7, %v4983_v26, 0.0  ;;  %v5017_v62 = vsel %vm4877_vm7, %v4984_v16, 0.0  ;;  %v5019_v12 = vsel %vm4877_vm7, %v4985_v23, 0.0 }
 0x312   : > { %v5016_v1 = vadd.f32 %v5015_v11, %v5014_v9  ;;  %v5021_v54 = vsel %vm4877_vm7, %v4986_v13, 0.0  ;;  %v5023_v60 = vsel %vm4877_vm7, %v4987_v61, 0.0  ;;  %v4990_v22 = vmul.f32 %v4956_v56, %v4956_v56 }
 0x313   : > { %v5025_v32 = vsel %vm4877_vm7, %v4988_v3, 0.0  ;;  %v4991_v28 = vmul.f32 %v4957_v63, %v4957_v63  ;;  %v5027_v31 = vsel %vm4877_vm7, %v4989_v20, 0.0  ;;  %v4992_v33 = vmul.f32 %v4958_v47, %v4958_v47 }
 0x314   : > { %v5018_v52 = vadd.f32 %v5017_v62, %v5016_v1  ;;  %v5029_v49 = vsel %vm4877_vm7, %v4990_v22, 0.0  ;;  %v4993_v35 = vmul.f32 %v4959_v37, %v4959_v37  ;;  %v4994_v45 = vmul.f32 %v4960_v42, %v4960_v42 }
 0x315   : > { %v5031_v57 = vsel %vm4877_vm7, %v4991_v28, 0.0  ;;  %v5033_v19 = vsel %vm4877_vm7, %v4992_v33, 0.0  ;;  %v4995_v56 = vmul.f32 %v4961_v7, %v4961_v7  ;;  %v4996_v63 = vmul.f32 %v4962_v27, %v4962_v27 }
 0x316   : > { %v5020_v0 = vadd.f32 %v5019_v12, %v5018_v52  ;;  %v5035_v39 = vsel %vm4877_vm7, %v4993_v35, 0.0  ;;  %v5037_v53 = vsel %vm4877_vm7, %v4994_v45, 0.0  ;;  %v4997_v47 = vmul.f32 %v4963_v46, %v4963_v46 }
 0x317   : > { %v5039_v55 = vsel %vm4877_vm7, %v4995_v56, 0.0  ;;  %v4998_v37 = vmul.f32 %v4964_v4, %v4964_v4  ;;  %v5041_v59 = vsel %vm4877_vm7, %v4996_v63, 0.0  ;;  %v4999_v42 = vmul.f32 %v4965_v41, %v4965_v41 }
 0x318   : > { %v5022_v29 = vadd.f32 %v5021_v54, %v5020_v0  ;;  %v5043_v16 = vsel %vm4877_vm7, %v4997_v47, 0.0  ;;  %v5000_v7 = vmul.f32 %v8057_v17, %v8057_v17  ;;  %v5001_v46 = vmul.f32 %v8060_v15, %v8060_v15 }
 0x319   : > { %v5045_v27 = vsel %vm4877_vm7, %v4998_v37, 0.0  ;;  %v5047_v11 = vsel %vm4877_vm7, %v4999_v42, 0.0  ;;  %v5002_v4 = vmul.f32 %v8063_v14, %v8063_v14  ;;  %v5003_v62 = vmul.f32 %v8066_v51, %v8066_v51 }
 0x31a   : > { %v5024_v6 = vadd.f32 %v5023_v60, %v5022_v29  ;;  %v5049_v41 = vsel %vm4877_vm7, %v5000_v7, 0.0  ;;  %v5051_v17 = vsel %vm4877_vm7, %v5001_v46, 0.0  ;;  %v5004_v61 = vmul.f32 %v8069_v18, %v8069_v18 }
 0x31b   : > { %v5053_v15 = vsel %vm4877_vm7, %v5002_v4, 0.0  ;;  %v5005_v0 = vmul.f32 %v8072_v2, %v8072_v2  ;;  %v5055_v14 = vsel %vm4877_vm7, %v5003_v62, 0.0  ;;  %v5006_v54 = vmul.f32 %v8075_v38, %v8075_v38 }
 0x31c   : > { %v5026_v5 = vadd.f32 %v5025_v32, %v5024_v6  ;;  %v5057_v51 = vsel %vm4877_vm7, %v5004_v61, 0.0  ;;  %v5007_v20 = vmul.f32 %v8078_v10, %v8078_v10  ;;  %v5008_v6 = vmul.f32 %v8081_v50, %v8081_v50 }
 0x31d   : > { %v5059_v18 = vsel %vm4877_vm7, %v5005_v0, 0.0  ;;  %v5061_v2 = vsel %vm4877_vm7, %v5006_v54, 0.0  ;;  %v5009_v32 = vmul.f32 %v8084_v58, %v8084_v58  ;;  %v5010_v28 = vmul.f32 %v8086_v21, %v8086_v21 }
 0x31e   : > { %v5028_v48 = vadd.f32 %v5027_v31, %v5026_v5  ;;  %v5063_v38 = vsel %vm4877_vm7, %v5007_v20, 0.0  ;;  %v5065_v10 = vsel %vm4877_vm7, %v5008_v6, 0.0  ;;  %v5013_v35 = vmul.f32 %v8092_v8, %v8092_v8 }
 0x31f   : > { %v5067_v50 = vsel %vm4877_vm7, %v5009_v32, 0.0  ;;  %v5069_v58 = vsel %vm4877_vm7, %v5010_v28, 0.0 }
 0x320   : > { %v5030_v44 = vadd.f32 %v5029_v49, %v5028_v48  ;;  %v5011_v48 = vmul.f32 %v8088_v25, %v8088_v25  ;;  %v5012_v49 = vmul.f32 %v8090_v43, %v8090_v43  ;;  %v5075_v25 = vsel %vm4877_vm7, %v5013_v35, 0.0 }
 0x322   : > { %v5032_v30 = vadd.f32 %v5031_v57, %v5030_v44  ;;  %v5071_v21 = vsel %vm4877_vm7, %v5011_v48, 0.0 }
 0x324   : > { %v5034_v34 = vadd.f32 %v5033_v19, %v5032_v30  ;;  %v5073_v30 = vsel %vm4877_vm7, %v5012_v49, 0.0 }
 0x326   : > { %v5036_v36 = vadd.f32 %v5035_v39, %v5034_v34 }
 0x328   : > { %v5038_v40 = vadd.f32 %v5037_v53, %v5036_v36 }
 0x32a   : > { %v5040_v24 = vadd.f32 %v5039_v55, %v5038_v40 }
 0x32c   : > { %v5042_v26 = vadd.f32 %v5041_v59, %v5040_v24 }
 0x32e   : > { %v5044_v23 = vadd.f32 %v5043_v16, %v5042_v26 }
 0x330   : > { %v5046_v9 = vadd.f32 %v5045_v27, %v5044_v23 }
 0x332   : > { %v5048_v1 = vadd.f32 %v5047_v11, %v5046_v9 }
 0x334   : > { %v5050_v13 = vadd.f32 %v5049_v41, %v5048_v1 }
 0x336   : > { %v5052_v52 = vadd.f32 %v5051_v17, %v5050_v13 }
 0x338   : > { %v5054_v12 = vadd.f32 %v5053_v15, %v5052_v52 }
 0x33a   : > { %v5056_v3 = vadd.f32 %v5055_v14, %v5054_v12 }
 0x33c   : > { %v5058_v29 = vadd.f32 %v5057_v51, %v5056_v3 }
 0x33e   : > { %v5060_v60 = vadd.f32 %v5059_v18, %v5058_v29 }
 0x340   : > { %v5062_v22 = vadd.f32 %v5061_v2, %v5060_v60 }
 0x342   : > { %v5064_v5 = vadd.f32 %v5063_v38, %v5062_v22 }
 0x344   : > { %v5066_v31 = vadd.f32 %v5065_v10, %v5064_v5 }
 0x346   : > { %v5068_v33 = vadd.f32 %v5067_v50, %v5066_v31 }
 0x348   : > { %v5070_v44 = vadd.f32 %v5069_v58, %v5068_v33 }
 0x34a   : > { %v5072_v57 = vadd.f32 %v5071_v21, %v5070_v44 }
 0x34c   : > { %v5074_v45 = vadd.f32 %v5073_v30, %v5072_v57 }
 0x34e   : > { %v5076_v19 = vadd.f32 %v5075_v25, %v5074_v45 }
 0x350   : > { %v5077_v34 = vrot.slane %v5076_v19, 4 }
 0x352   : > { %v5078_v56 = vadd.f32 %v5077_v34, %v5076_v19 }
 0x354   : > { %v5079_v39 = vrot.slane %v5078_v56, 2 }
 0x356   : > { %v5080_v43 = vadd.f32 %v5079_v39, %v5078_v56 }
 0x358   : > { %v5081_v36 = vrot.slane %v5080_v43, 1 }
 0x35a   : > { %v5082_v63 = vadd.f32 %v5081_v36, %v5080_v43 }
 0x35c   : > { %5083 = vst.msk [vmem:[%s8034_s11 + $0x1] sm:$0x1] %vm4980_vm2, %v5082_v63 }
 0x35d PF: > { %s17_s21 = sadd.s32 1, %s6029_s21  }
 0x35e   : > { %p14_p4 = scmp.ge.s32.totalorder %s17_s21, 4  }
 0x360   :  { %16 = sbr.rel (!%p14_p4) target bundleno = 1 (0x1), region = 101 }

</bundles_post_ra>
